<compile_context>
chip_gen: v5e
topology: v5e:2x2
jax: 0.10.0
libtpu: 0.0.40
codegen_flags: <defaults>
</compile_context>

<pallas_src>
import functools

import jax
import jax.numpy as jnp
import numpy as np
from jax import lax
from jax.experimental import pallas as pl
from jax.experimental.pallas import tpu as pltpu


def _round_up(x, m):
    return (x + m - 1) // m * m


def _pick_time_chunk(seq_len, bt, hp, ep, in_bytes, budget_bytes=8 << 20):
    """Largest divisor of seq_len whose per-chunk staging (f32 xg scratch + double-buffered
    x chunk) fits in `budget_bytes` of VMEM.  Divisor => no padded time steps, recurrence
    semantics stay exact."""
    per_step = bt * 4 * hp * 4 + 2 * bt * ep * in_bytes
    cap = max(1, min(seq_len, budget_bytes // max(per_step, 1)))
    for c in range(cap, 0, -1):
        if seq_len % c == 0:
            return c
    return 1


def _pad_gate_cols(w, h, hp):
    """Pad each of the 4 PyTorch-ordered (i, f, g, o) gate blocks from h to hp columns."""
    lead = w.shape[:-1]
    w = w.reshape(*lead, 4, h)
    w = jnp.pad(w, [(0, 0)] * len(lead) + [(0, 0), (0, hp - h)])
    return w.reshape(*lead, 4 * hp)


def _lstm_cls_kernel(x_ref, wih_ref, whh_ref, b_ref, wout_ref, bout_ref,
                     out_ref, h_sc, c_sc, xg_sc, *, hp, t_chunk, unroll):
    """Grid = (batch_tiles, time_chunks). One grid step = t_chunk LSTM steps for one
    batch tile.  h/c live in f32 VMEM scratch across the (serial) time axis."""
    t = pl.program_id(1)

    @pl.when(t == 0)
    def _():
        h_sc[...] = jnp.zeros_like(h_sc)
        c_sc[...] = jnp.zeros_like(c_sc)

    tc, bt, ep = x_ref.shape

    # Input-side gate pre-activations for the whole chunk in ONE large MXU matmul,
    # fused bias added once, staged TIME-MAJOR so each step reads a contiguous slab.
    xg_sc[...] = (
        jnp.dot(x_ref[...].reshape(tc * bt, ep), wih_ref[...],
                preferred_element_type=jnp.float32)
        + b_ref[...]
    ).reshape(tc, bt, 4 * hp)

    w_dt = whh_ref.dtype

    def step(i, carry):
        h, c = carry
        # Only the h @ W_hh matmul sits on the serial critical path; xg_sc[i] is a clean
        # leading-axis load; gate slices are 128-lane aligned (hp % 128 == 0).
        gates = xg_sc[i] + jnp.dot(h.astype(w_dt), whh_ref[...],
                                   preferred_element_type=jnp.float32)
        i_g = jax.nn.sigmoid(gates[:, 0 * hp:1 * hp])
        f_g = jax.nn.sigmoid(gates[:, 1 * hp:2 * hp])
        g_g = jnp.tanh(gates[:, 2 * hp:3 * hp])
        o_g = jax.nn.sigmoid(gates[:, 3 * hp:4 * hp])
        c = f_g * c + i_g * g_g
        h = o_g * jnp.tanh(c)
        return h, c

    # Partial unroll keeps LLO scheduling visibility without blowing vreg pressure.
    h, c = lax.fori_loop(0, t_chunk, step, (h_sc[...], c_sc[...]), unroll=unroll)
    h_sc[...] = h
    c_sc[...] = c

    @pl.when(t == pl.num_programs(1) - 1)
    def _():
        out_ref[...] = (
            jnp.dot(h.astype(wout_ref.dtype), wout_ref[...],
                    preferred_element_type=jnp.float32)
            + bout_ref[...]
        ).astype(out_ref.dtype)


def lstm_classifier_forward(input_sentence, params, *, mxu_dtype=jnp.float32):
    """input_sentence: (B, S) int32 token ids. Returns (B, output_size) f32 logits."""
    emb = params["embedding"]            # (V, E)
    w_ih = params["w_ih"]                # (E, 4H)   gate order (i, f, g, o)
    w_hh = params["w_hh"]                # (H, 4H)
    b_ih = params["b_ih"]                # (1, 4H)
    b_hh = params["b_hh"]                # (1, 4H)
    w_out = params["w_out"]              # (H, O)
    b_out = params["b_out"]              # (1, O)

    B, S = input_sentence.shape
    E = emb.shape[1]
    H = w_hh.shape[0]
    O = w_out.shape[1]

    # Batch tiling: sublane-aligned tile, leading parallel grid axis (v7x megacore).
    if B <= 128:
        bt = _round_up(B, 8)
        Bp = bt
    else:
        bt = 128
        Bp = _round_up(B, bt)
    Ep = _round_up(E, 128)               # lane multiple
    Hp = _round_up(H, 128)               # lane multiple -> aligned gate slices
    Op = _round_up(O, 128)               # lane-dense output stores

    in_bytes = jnp.dtype(mxu_dtype).itemsize
    t_chunk = _pick_time_chunk(S, bt, Hp, Ep, in_bytes)
    n_chunks = S // t_chunk
    unroll = max(1, min(t_chunk, 8))

    # Embedding lookup + time-major layout (mirrors the module's permute(1, 0, 2)).
    x = jnp.take(emb, input_sentence, axis=0)                    # (B, S, E)
    x = jnp.transpose(x, (1, 0, 2))                              # (S, B, E)
    x = jnp.pad(x, ((0, 0), (0, Bp - B), (0, Ep - E))).astype(mxu_dtype)   # (S, Bp, Ep)

    # Zero-pad weights/biases.  Padded hidden columns get zero gate pre-activations ->
    # i*g = 0 and f = 0.5 decaying an all-zero state keep padded h/c identically zero;
    # padded W_out rows/cols contribute nothing, so the padded math is exact.
    w_ih_p = jnp.pad(_pad_gate_cols(w_ih, H, Hp), ((0, Ep - E), (0, 0))).astype(mxu_dtype)
    w_hh_p = jnp.pad(_pad_gate_cols(w_hh, H, Hp), ((0, Hp - H), (0, 0))).astype(mxu_dtype)
    b_p = _pad_gate_cols(b_ih + b_hh, H, Hp)                               # (1, 4Hp) f32
    w_out_p = jnp.pad(w_out, ((0, Hp - H), (0, Op - O))).astype(mxu_dtype) # (Hp, Op)
    b_out_p = jnp.pad(b_out, ((0, 0), (0, Op - O)))                        # (1, Op)  f32

    kernel = functools.partial(_lstm_cls_kernel, hp=Hp, t_chunk=t_chunk, unroll=unroll)

    # Rough VMEM footprint (worst-case double buffering) -> explicit scoped-VMEM limit.
    est = (2 * (t_chunk * bt * Ep * in_bytes                       # x chunk
                + (Ep * 4 * Hp + Hp * 4 * Hp + Hp * Op) * in_bytes # weights
                + (4 * Hp + Op) * 4                                # biases
                + bt * Op * 4)                                     # out block
           + (2 * bt * Hp + t_chunk * bt * 4 * Hp) * 4)            # h/c/xg scratch
    vmem_limit = int(min(96 * 2**20, max(32 * 2**20, 2 * est)))

    def run(weight_mode):
        wkw = {} if weight_mode is None else {"pipeline_mode": weight_mode}
        const = lambda b, t: (0, 0)
        grid_spec = pltpu.PrefetchScalarGridSpec(
            num_scalar_prefetch=0,
            grid=(Bp // bt, n_chunks),
            in_specs=[
                pl.BlockSpec((t_chunk, bt, Ep), lambda b, t: (t, b, 0)),   # x chunk
                pl.BlockSpec((Ep, 4 * Hp), const, **wkw),                  # W_ih
                pl.BlockSpec((Hp, 4 * Hp), const, **wkw),                  # W_hh
                pl.BlockSpec((1, 4 * Hp), const, **wkw),                   # b_ih + b_hh
                pl.BlockSpec((Hp, Op), const, **wkw),                      # W_out
                pl.BlockSpec((1, Op), const, **wkw),                       # b_out
            ],
            out_specs=pl.BlockSpec((bt, Op), lambda b, t: (b, 0)),
            scratch_shapes=[
                pltpu.VMEM((bt, Hp), jnp.float32),                         # h state
                pltpu.VMEM((bt, Hp), jnp.float32),                         # c state
                pltpu.VMEM((t_chunk, bt, 4 * Hp), jnp.float32),            # time-major xg
            ],
        )
        return pl.pallas_call(
            kernel,
            out_shape=jax.ShapeDtypeStruct((Bp, Op), jnp.float32),
            grid_spec=grid_spec,
            compiler_params=pltpu.CompilerParams(
                dimension_semantics=("parallel", "arbitrary"),  # batch ∥, time serial
                vmem_limit_bytes=vmem_limit,
            ),
        )(x, w_ih_p, w_hh_p, b_p, w_out_p, b_out_p)

    try:
        # Single-buffer the loop-invariant weight operands (constant index maps).
        out = run(pl.Buffered(1))
    except Exception:
        # Fallback for builds where pallas_call's pipeline rejects pipeline_mode.
        out = run(None)
    return out[:B, :O]


def reference_forward(input_sentence, params):
    """Pure-JAX f32 reference mirroring the PyTorch forward."""
    emb = params["embedding"]
    x = jnp.take(emb, input_sentence, axis=0)        # (B, S, E)
    x = jnp.transpose(x, (1, 0, 2))                  # (S, B, E)
    B = x.shape[1]
    H = params["w_hh"].shape[0]

    def step(carry, x_t):
        h, c = carry
        gates = (x_t @ params["w_ih"] + h @ params["w_hh"]
                 + params["b_ih"] + params["b_hh"])
        i_g = jax.nn.sigmoid(gates[:, 0 * H:1 * H])
        f_g = jax.nn.sigmoid(gates[:, 1 * H:2 * H])
        g_g = jnp.tanh(gates[:, 2 * H:3 * H])
        o_g = jax.nn.sigmoid(gates[:, 3 * H:4 * H])
        c = f_g * c + i_g * g_g
        h = o_g * jnp.tanh(c)
        return (h, c), None

    h0 = jnp.zeros((B, H), jnp.float32)
    c0 = jnp.zeros((B, H), jnp.float32)
    (h_final, _), _ = lax.scan(step, (h0, c0), x)
    return h_final @ params["w_out"] + params["b_out"]


def make_params(key, vocab_size, embedding_length, hidden_size, output_size):
    ks = jax.random.split(key, 7)
    scale = 0.1
    return {
        "embedding": scale * jax.random.normal(ks[0], (vocab_size, embedding_length), jnp.float32),
        "w_ih": scale * jax.random.normal(ks[1], (embedding_length, 4 * hidden_size), jnp.float32),
        "w_hh": scale * jax.random.normal(ks[2], (hidden_size, 4 * hidden_size), jnp.float32),
        "b_ih": scale * jax.random.normal(ks[3], (1, 4 * hidden_size), jnp.float32),
        "b_hh": scale * jax.random.normal(ks[4], (1, 4 * hidden_size), jnp.float32),
        "w_out": scale * jax.random.normal(ks[5], (hidden_size, output_size), jnp.float32),
        "b_out": scale * jax.random.normal(ks[6], (1, output_size), jnp.float32),
    }


if __name__ == "__main__":
    batch_size = 2
    seq_len = 8
    hidden_size = 32
    vocab_size = 50
    embedding_length = 16
    output_size = 2

    key = jax.random.PRNGKey(0)
    k_params, k_tokens = jax.random.split(key)
    params = make_params(k_params, vocab_size, embedding_length, hidden_size, output_size)
    input_sentence = jax.random.randint(
        k_tokens, (batch_size, seq_len), 0, vocab_size, dtype=jnp.int32)

    ref = jax.block_until_ready(reference_forward(input_sentence, params))

    # f32 MXU path: tight tolerance vs the f32 reference.
    out = jax.block_until_ready(lstm_classifier_forward(input_sentence, params))
    np.testing.assert_allclose(np.asarray(out), np.asarray(ref), atol=1e-4, rtol=1e-4)
    assert out.shape == (batch_size, output_size)

    # bf16 MXU path (production dtype plan on v6e/v7x): re-baselined tolerance.
    out_bf16 = jax.block_until_ready(
        lstm_classifier_forward(input_sentence, params, mxu_dtype=jnp.bfloat16))
    np.testing.assert_allclose(np.asarray(out_bf16), np.asarray(ref), atol=3e-2, rtol=3e-2)

    print("KERNEL_OK")
</pallas_src>

<mosaic_0001>
module attributes {stable_mosaic.version = 11 : i64} {
  func.func @_lstm_cls_kernel(%arg0: i32, %arg1: i32, %arg2: memref<8x8x128xf32, #tpu.memory_space<vmem>>, %arg3: memref<128x512xf32, #tpu.memory_space<vmem>>, %arg4: memref<128x512xf32, #tpu.memory_space<vmem>>, %arg5: memref<1x512xf32, #tpu.memory_space<vmem>>, %arg6: memref<128x128xf32, #tpu.memory_space<vmem>>, %arg7: memref<1x128xf32, #tpu.memory_space<vmem>>, %arg8: memref<8x128xf32, #tpu.memory_space<vmem>>, %arg9: memref<8x128xf32, #tpu.memory_space<vmem>>, %arg10: memref<8x128xf32, #tpu.memory_space<vmem>>, %arg11: memref<8x8x512xf32, #tpu.memory_space<vmem>>) attributes {dimension_semantics = [#tpu.dimension_semantics<parallel>, #tpu.dimension_semantics<arbitrary>], iteration_bounds = array<i64: 1, 1>, scalar_prefetch = 0 : i64, scratch_operands = 3 : i64, tpu.core_type = #tpu.core_type<tc>, window_params = [{transform_indices = @transform_0, window_bounds = array<i64: 8, 8, 128>}, {pipeline_mode = #tpu.pipeline_mode<synchronous>, transform_indices = @transform_1, window_bounds = array<i64: 128, 512>}, {pipeline_mode = #tpu.pipeline_mode<synchronous>, transform_indices = @transform_2, window_bounds = array<i64: 128, 512>}, {pipeline_mode = #tpu.pipeline_mode<synchronous>, transform_indices = @transform_3, window_bounds = array<i64: 1, 512>}, {pipeline_mode = #tpu.pipeline_mode<synchronous>, transform_indices = @transform_4, window_bounds = array<i64: 128, 128>}, {pipeline_mode = #tpu.pipeline_mode<synchronous>, transform_indices = @transform_5, window_bounds = array<i64: 1, 128>}, {transform_indices = @transform_6, window_bounds = array<i64: 8, 128>}]} {
    %c0_i32 = arith.constant 0 : i32
    %0 = arith.cmpi eq, %arg1, %c0_i32 : i32
    %1 = arith.extui %0 : i1 to i32
    %c0_i32_0 = arith.constant 0 : i32
    %2 = arith.cmpi ne, %1, %c0_i32_0 : i32
    scf.if %2 {
      %cst_85 = arith.constant 0.000000e+00 : f32
      %267 = vector.broadcast %cst_85 : f32 to vector<8x128xf32>
      %c0_86 = arith.constant 0 : index
      %c0_87 = arith.constant 0 : index
      %268 = vector.load %arg9[%c0_86, %c0_87] : memref<8x128xf32, #tpu.memory_space<vmem>>, vector<8x128xf32>
      tpu.vector_store %arg9[%c0_86, %c0_87], %267 {strides = array<i32>} : memref<8x128xf32, #tpu.memory_space<vmem>>, vector<8x128xf32>,
      %cst_88 = arith.constant 0.000000e+00 : f32
      %269 = vector.broadcast %cst_88 : f32 to vector<8x128xf32>
      %c0_89 = arith.constant 0 : index
      %c0_90 = arith.constant 0 : index
      %270 = vector.load %arg10[%c0_89, %c0_90] : memref<8x128xf32, #tpu.memory_space<vmem>>, vector<8x128xf32>
      tpu.vector_store %arg10[%c0_89, %c0_90], %269 {strides = array<i32>} : memref<8x128xf32, #tpu.memory_space<vmem>>, vector<8x128xf32>,
    } else {
    }
    %c0 = arith.constant 0 : index
    %c0_1 = arith.constant 0 : index
    %c0_2 = arith.constant 0 : index
    %3 = vector.load %arg2[%c0, %c0_1, %c0_2] : memref<8x8x128xf32, #tpu.memory_space<vmem>>, vector<8x8x128xf32>
    %4 = vector.shape_cast %3 : vector<8x8x128xf32> to vector<64x128xf32>
    %c0_3 = arith.constant 0 : index
    %c0_4 = arith.constant 0 : index
    %5 = vector.load %arg3[%c0_3, %c0_4] : memref<128x512xf32, #tpu.memory_space<vmem>>, vector<128x512xf32>
    %cst = arith.constant dense<0.000000e+00> : vector<64x512xf32>
    %6 = tpu.matmul %4, %5, %cst {dimension_numbers = #tpu.dot_dimension_numbers<[1], [0], [0], [1], [0, 0, 1, 1], [], []>} : vector<64x128xf32>, vector<128x512xf32>, vector<64x512xf32> -> vector<64x512xf32>
    %c0_5 = arith.constant 0 : index
    %c0_6 = arith.constant 0 : index
    %7 = vector.load %arg5[%c0_5, %c0_6] : memref<1x512xf32, #tpu.memory_space<vmem>>, vector<1x512xf32>
    %8 = vector.broadcast %7 : vector<1x512xf32> to vector<64x512xf32>
    %9 = arith.addf %6, %8 : vector<64x512xf32>
    %10 = vector.shape_cast %9 : vector<64x512xf32> to vector<8x8x512xf32>
    %c0_7 = arith.constant 0 : index
    %c0_8 = arith.constant 0 : index
    %c0_9 = arith.constant 0 : index
    %11 = vector.load %arg11[%c0_7, %c0_8, %c0_9] : memref<8x8x512xf32, #tpu.memory_space<vmem>>, vector<8x8x512xf32>
    tpu.vector_store %arg11[%c0_7, %c0_8, %c0_9], %10 {strides = array<i32>} : memref<8x8x512xf32, #tpu.memory_space<vmem>>, vector<8x8x512xf32>,
    %c0_10 = arith.constant 0 : index
    %c0_11 = arith.constant 0 : index
    %12 = vector.load %arg9[%c0_10, %c0_11] : memref<8x128xf32, #tpu.memory_space<vmem>>, vector<8x128xf32>
    %c0_12 = arith.constant 0 : index
    %c0_13 = arith.constant 0 : index
    %13 = vector.load %arg10[%c0_12, %c0_13] : memref<8x128xf32, #tpu.memory_space<vmem>>, vector<8x128xf32>
    %c0_i32_14 = arith.constant 0 : i32
    %14 = arith.index_cast %c0_i32_14 : i32 to index
    %c0_15 = arith.constant 0 : index
    %c0_16 = arith.constant 0 : index
    %15 = vector.load %arg11[%14, %c0_15, %c0_16] : memref<8x8x512xf32, #tpu.memory_space<vmem>>, vector<1x8x512xf32>
    %16 = vector.shape_cast %15 : vector<1x8x512xf32> to vector<8x512xf32>
    %c0_17 = arith.constant 0 : index
    %c0_18 = arith.constant 0 : index
    %17 = vector.load %arg4[%c0_17, %c0_18] : memref<128x512xf32, #tpu.memory_space<vmem>>, vector<128x512xf32>
    %cst_19 = arith.constant dense<0.000000e+00> : vector<8x512xf32>
    %18 = tpu.matmul %12, %17, %cst_19 {dimension_numbers = #tpu.dot_dimension_numbers<[1], [0], [0], [1], [0, 0, 1, 1], [], []>} : vector<8x128xf32>, vector<128x512xf32>, vector<8x512xf32> -> vector<8x512xf32>
    %19 = arith.addf %16, %18 : vector<8x512xf32>
    %20 = vector.extract_strided_slice %19 {offsets = [0, 0], sizes = [8, 128], strides = [1, 1]} : vector<8x512xf32> to vector<8x128xf32>
    %21 = arith.negf %20 : vector<8x128xf32>
    %22 = math.exp %21 : vector<8x128xf32>
    %cst_20 = arith.constant 1.000000e+00 : f32
    %23 = vector.broadcast %cst_20 : f32 to vector<8x128xf32>
    %24 = arith.addf %23, %22 : vector<8x128xf32>
    %25 = arith.divf %23, %24 : vector<8x128xf32>
    %26 = vector.extract_strided_slice %19 {offsets = [0, 128], sizes = [8, 128], strides = [1, 1]} : vector<8x512xf32> to vector<8x128xf32>
    %27 = arith.negf %26 : vector<8x128xf32>
    %28 = math.exp %27 : vector<8x128xf32>
    %cst_21 = arith.constant 1.000000e+00 : f32
    %29 = vector.broadcast %cst_21 : f32 to vector<8x128xf32>
    %30 = arith.addf %29, %28 : vector<8x128xf32>
    %31 = arith.divf %29, %30 : vector<8x128xf32>
    %32 = vector.extract_strided_slice %19 {offsets = [0, 256], sizes = [8, 128], strides = [1, 1]} : vector<8x512xf32> to vector<8x128xf32>
    %33 = math.tanh %32 : vector<8x128xf32>
    %34 = vector.extract_strided_slice %19 {offsets = [0, 384], sizes = [8, 128], strides = [1, 1]} : vector<8x512xf32> to vector<8x128xf32>
    %35 = arith.negf %34 : vector<8x128xf32>
    %36 = math.exp %35 : vector<8x128xf32>
    %cst_22 = arith.constant 1.000000e+00 : f32
    %37 = vector.broadcast %cst_22 : f32 to vector<8x128xf32>
    %38 = arith.addf %37, %36 : vector<8x128xf32>
    %39 = arith.divf %37, %38 : vector<8x128xf32>
    %40 = arith.mulf %31, %13 : vector<8x128xf32>
    %41 = arith.mulf %25, %33 : vector<8x128xf32>
    %42 = arith.addf %40, %41 : vector<8x128xf32>
    %43 = math.tanh %42 : vector<8x128xf32>
    %44 = arith.mulf %39, %43 : vector<8x128xf32>
    %c1_i32 = arith.constant 1 : i32
    %45 = arith.index_cast %c1_i32 : i32 to index
    %c0_23 = arith.constant 0 : index
    %c0_24 = arith.constant 0 : index
    %46 = vector.load %arg11[%45, %c0_23, %c0_24] : memref<8x8x512xf32, #tpu.memory_space<vmem>>, vector<1x8x512xf32>
    %47 = vector.shape_cast %46 : vector<1x8x512xf32> to vector<8x512xf32>
    %c0_25 = arith.constant 0 : index
    %c0_26 = arith.constant 0 : index
    %48 = vector.load %arg4[%c0_25, %c0_26] : memref<128x512xf32, #tpu.memory_space<vmem>>, vector<128x512xf32>
    %cst_27 = arith.constant dense<0.000000e+00> : vector<8x512xf32>
    %49 = tpu.matmul %44, %48, %cst_27 {dimension_numbers = #tpu.dot_dimension_numbers<[1], [0], [0], [1], [0, 0, 1, 1], [], []>} : vector<8x128xf32>, vector<128x512xf32>, vector<8x512xf32> -> vector<8x512xf32>
    %50 = arith.addf %47, %49 : vector<8x512xf32>
    %51 = vector.extract_strided_slice %50 {offsets = [0, 0], sizes = [8, 128], strides = [1, 1]} : vector<8x512xf32> to vector<8x128xf32>
    %52 = arith.negf %51 : vector<8x128xf32>
    %53 = math.exp %52 : vector<8x128xf32>
    %cst_28 = arith.constant 1.000000e+00 : f32
    %54 = vector.broadcast %cst_28 : f32 to vector<8x128xf32>
    %55 = arith.addf %54, %53 : vector<8x128xf32>
    %56 = arith.divf %54, %55 : vector<8x128xf32>
    %57 = vector.extract_strided_slice %50 {offsets = [0, 128], sizes = [8, 128], strides = [1, 1]} : vector<8x512xf32> to vector<8x128xf32>
    %58 = arith.negf %57 : vector<8x128xf32>
    %59 = math.exp %58 : vector<8x128xf32>
    %cst_29 = arith.constant 1.000000e+00 : f32
    %60 = vector.broadcast %cst_29 : f32 to vector<8x128xf32>
    %61 = arith.addf %60, %59 : vector<8x128xf32>
    %62 = arith.divf %60, %61 : vector<8x128xf32>
    %63 = vector.extract_strided_slice %50 {offsets = [0, 256], sizes = [8, 128], strides = [1, 1]} : vector<8x512xf32> to vector<8x128xf32>
    %64 = math.tanh %63 : vector<8x128xf32>
    %65 = vector.extract_strided_slice %50 {offsets = [0, 384], sizes = [8, 128], strides = [1, 1]} : vector<8x512xf32> to vector<8x128xf32>
    %66 = arith.negf %65 : vector<8x128xf32>
    %67 = math.exp %66 : vector<8x128xf32>
    %cst_30 = arith.constant 1.000000e+00 : f32
    %68 = vector.broadcast %cst_30 : f32 to vector<8x128xf32>
    %69 = arith.addf %68, %67 : vector<8x128xf32>
    %70 = arith.divf %68, %69 : vector<8x128xf32>
    %71 = arith.mulf %62, %42 : vector<8x128xf32>
    %72 = arith.mulf %56, %64 : vector<8x128xf32>
    %73 = arith.addf %71, %72 : vector<8x128xf32>
    %74 = math.tanh %73 : vector<8x128xf32>
    %75 = arith.mulf %70, %74 : vector<8x128xf32>
    %c2_i32 = arith.constant 2 : i32
    %76 = arith.index_cast %c2_i32 : i32 to index
    %c0_31 = arith.constant 0 : index
    %c0_32 = arith.constant 0 : index
    %77 = vector.load %arg11[%76, %c0_31, %c0_32] : memref<8x8x512xf32, #tpu.memory_space<vmem>>, vector<1x8x512xf32>
    %78 = vector.shape_cast %77 : vector<1x8x512xf32> to vector<8x512xf32>
    %c0_33 = arith.constant 0 : index
    %c0_34 = arith.constant 0 : index
    %79 = vector.load %arg4[%c0_33, %c0_34] : memref<128x512xf32, #tpu.memory_space<vmem>>, vector<128x512xf32>
    %cst_35 = arith.constant dense<0.000000e+00> : vector<8x512xf32>
    %80 = tpu.matmul %75, %79, %cst_35 {dimension_numbers = #tpu.dot_dimension_numbers<[1], [0], [0], [1], [0, 0, 1, 1], [], []>} : vector<8x128xf32>, vector<128x512xf32>, vector<8x512xf32> -> vector<8x512xf32>
    %81 = arith.addf %78, %80 : vector<8x512xf32>
    %82 = vector.extract_strided_slice %81 {offsets = [0, 0], sizes = [8, 128], strides = [1, 1]} : vector<8x512xf32> to vector<8x128xf32>
    %83 = arith.negf %82 : vector<8x128xf32>
    %84 = math.exp %83 : vector<8x128xf32>
    %cst_36 = arith.constant 1.000000e+00 : f32
    %85 = vector.broadcast %cst_36 : f32 to vector<8x128xf32>
    %86 = arith.addf %85, %84 : vector<8x128xf32>
    %87 = arith.divf %85, %86 : vector<8x128xf32>
    %88 = vector.extract_strided_slice %81 {offsets = [0, 128], sizes = [8, 128], strides = [1, 1]} : vector<8x512xf32> to vector<8x128xf32>
    %89 = arith.negf %88 : vector<8x128xf32>
    %90 = math.exp %89 : vector<8x128xf32>
    %cst_37 = arith.constant 1.000000e+00 : f32
    %91 = vector.broadcast %cst_37 : f32 to vector<8x128xf32>
    %92 = arith.addf %91, %90 : vector<8x128xf32>
    %93 = arith.divf %91, %92 : vector<8x128xf32>
    %94 = vector.extract_strided_slice %81 {offsets = [0, 256], sizes = [8, 128], strides = [1, 1]} : vector<8x512xf32> to vector<8x128xf32>
    %95 = math.tanh %94 : vector<8x128xf32>
    %96 = vector.extract_strided_slice %81 {offsets = [0, 384], sizes = [8, 128], strides = [1, 1]} : vector<8x512xf32> to vector<8x128xf32>
    %97 = arith.negf %96 : vector<8x128xf32>
    %98 = math.exp %97 : vector<8x128xf32>
    %cst_38 = arith.constant 1.000000e+00 : f32
    %99 = vector.broadcast %cst_38 : f32 to vector<8x128xf32>
    %100 = arith.addf %99, %98 : vector<8x128xf32>
    %101 = arith.divf %99, %100 : vector<8x128xf32>
    %102 = arith.mulf %93, %73 : vector<8x128xf32>
    %103 = arith.mulf %87, %95 : vector<8x128xf32>
    %104 = arith.addf %102, %103 : vector<8x128xf32>
    %105 = math.tanh %104 : vector<8x128xf32>
    %106 = arith.mulf %101, %105 : vector<8x128xf32>
    %c3_i32 = arith.constant 3 : i32
    %107 = arith.index_cast %c3_i32 : i32 to index
    %c0_39 = arith.constant 0 : index
    %c0_40 = arith.constant 0 : index
    %108 = vector.load %arg11[%107, %c0_39, %c0_40] : memref<8x8x512xf32, #tpu.memory_space<vmem>>, vector<1x8x512xf32>
    %109 = vector.shape_cast %108 : vector<1x8x512xf32> to vector<8x512xf32>
    %c0_41 = arith.constant 0 : index
    %c0_42 = arith.constant 0 : index
    %110 = vector.load %arg4[%c0_41, %c0_42] : memref<128x512xf32, #tpu.memory_space<vmem>>, vector<128x512xf32>
    %cst_43 = arith.constant dense<0.000000e+00> : vector<8x512xf32>
    %111 = tpu.matmul %106, %110, %cst_43 {dimension_numbers = #tpu.dot_dimension_numbers<[1], [0], [0], [1], [0, 0, 1, 1], [], []>} : vector<8x128xf32>, vector<128x512xf32>, vector<8x512xf32> -> vector<8x512xf32>
    %112 = arith.addf %109, %111 : vector<8x512xf32>
    %113 = vector.extract_strided_slice %112 {offsets = [0, 0], sizes = [8, 128], strides = [1, 1]} : vector<8x512xf32> to vector<8x128xf32>
    %114 = arith.negf %113 : vector<8x128xf32>
    %115 = math.exp %114 : vector<8x128xf32>
    %cst_44 = arith.constant 1.000000e+00 : f32
    %116 = vector.broadcast %cst_44 : f32 to vector<8x128xf32>
    %117 = arith.addf %116, %115 : vector<8x128xf32>
    %118 = arith.divf %116, %117 : vector<8x128xf32>
    %119 = vector.extract_strided_slice %112 {offsets = [0, 128], sizes = [8, 128], strides = [1, 1]} : vector<8x512xf32> to vector<8x128xf32>
    %120 = arith.negf %119 : vector<8x128xf32>
    %121 = math.exp %120 : vector<8x128xf32>
    %cst_45 = arith.constant 1.000000e+00 : f32
    %122 = vector.broadcast %cst_45 : f32 to vector<8x128xf32>
    %123 = arith.addf %122, %121 : vector<8x128xf32>
    %124 = arith.divf %122, %123 : vector<8x128xf32>
    %125 = vector.extract_strided_slice %112 {offsets = [0, 256], sizes = [8, 128], strides = [1, 1]} : vector<8x512xf32> to vector<8x128xf32>
    %126 = math.tanh %125 : vector<8x128xf32>
    %127 = vector.extract_strided_slice %112 {offsets = [0, 384], sizes = [8, 128], strides = [1, 1]} : vector<8x512xf32> to vector<8x128xf32>
    %128 = arith.negf %127 : vector<8x128xf32>
    %129 = math.exp %128 : vector<8x128xf32>
    %cst_46 = arith.constant 1.000000e+00 : f32
    %130 = vector.broadcast %cst_46 : f32 to vector<8x128xf32>
    %131 = arith.addf %130, %129 : vector<8x128xf32>
    %132 = arith.divf %130, %131 : vector<8x128xf32>
    %133 = arith.mulf %124, %104 : vector<8x128xf32>
    %134 = arith.mulf %118, %126 : vector<8x128xf32>
    %135 = arith.addf %133, %134 : vector<8x128xf32>
    %136 = math.tanh %135 : vector<8x128xf32>
    %137 = arith.mulf %132, %136 : vector<8x128xf32>
    %c4_i32 = arith.constant 4 : i32
    %138 = arith.index_cast %c4_i32 : i32 to index
    %c0_47 = arith.constant 0 : index
    %c0_48 = arith.constant 0 : index
    %139 = vector.load %arg11[%138, %c0_47, %c0_48] : memref<8x8x512xf32, #tpu.memory_space<vmem>>, vector<1x8x512xf32>
    %140 = vector.shape_cast %139 : vector<1x8x512xf32> to vector<8x512xf32>
    %c0_49 = arith.constant 0 : index
    %c0_50 = arith.constant 0 : index
    %141 = vector.load %arg4[%c0_49, %c0_50] : memref<128x512xf32, #tpu.memory_space<vmem>>, vector<128x512xf32>
    %cst_51 = arith.constant dense<0.000000e+00> : vector<8x512xf32>
    %142 = tpu.matmul %137, %141, %cst_51 {dimension_numbers = #tpu.dot_dimension_numbers<[1], [0], [0], [1], [0, 0, 1, 1], [], []>} : vector<8x128xf32>, vector<128x512xf32>, vector<8x512xf32> -> vector<8x512xf32>
    %143 = arith.addf %140, %142 : vector<8x512xf32>
    %144 = vector.extract_strided_slice %143 {offsets = [0, 0], sizes = [8, 128], strides = [1, 1]} : vector<8x512xf32> to vector<8x128xf32>
    %145 = arith.negf %144 : vector<8x128xf32>
    %146 = math.exp %145 : vector<8x128xf32>
    %cst_52 = arith.constant 1.000000e+00 : f32
    %147 = vector.broadcast %cst_52 : f32 to vector<8x128xf32>
    %148 = arith.addf %147, %146 : vector<8x128xf32>
    %149 = arith.divf %147, %148 : vector<8x128xf32>
    %150 = vector.extract_strided_slice %143 {offsets = [0, 128], sizes = [8, 128], strides = [1, 1]} : vector<8x512xf32> to vector<8x128xf32>
    %151 = arith.negf %150 : vector<8x128xf32>
    %152 = math.exp %151 : vector<8x128xf32>
    %cst_53 = arith.constant 1.000000e+00 : f32
    %153 = vector.broadcast %cst_53 : f32 to vector<8x128xf32>
    %154 = arith.addf %153, %152 : vector<8x128xf32>
    %155 = arith.divf %153, %154 : vector<8x128xf32>
    %156 = vector.extract_strided_slice %143 {offsets = [0, 256], sizes = [8, 128], strides = [1, 1]} : vector<8x512xf32> to vector<8x128xf32>
    %157 = math.tanh %156 : vector<8x128xf32>
    %158 = vector.extract_strided_slice %143 {offsets = [0, 384], sizes = [8, 128], strides = [1, 1]} : vector<8x512xf32> to vector<8x128xf32>
    %159 = arith.negf %158 : vector<8x128xf32>
    %160 = math.exp %159 : vector<8x128xf32>
    %cst_54 = arith.constant 1.000000e+00 : f32
    %161 = vector.broadcast %cst_54 : f32 to vector<8x128xf32>
    %162 = arith.addf %161, %160 : vector<8x128xf32>
    %163 = arith.divf %161, %162 : vector<8x128xf32>
    %164 = arith.mulf %155, %135 : vector<8x128xf32>
    %165 = arith.mulf %149, %157 : vector<8x128xf32>
    %166 = arith.addf %164, %165 : vector<8x128xf32>
    %167 = math.tanh %166 : vector<8x128xf32>
    %168 = arith.mulf %163, %167 : vector<8x128xf32>
    %c5_i32 = arith.constant 5 : i32
    %169 = arith.index_cast %c5_i32 : i32 to index
    %c0_55 = arith.constant 0 : index
    %c0_56 = arith.constant 0 : index
    %170 = vector.load %arg11[%169, %c0_55, %c0_56] : memref<8x8x512xf32, #tpu.memory_space<vmem>>, vector<1x8x512xf32>
    %171 = vector.shape_cast %170 : vector<1x8x512xf32> to vector<8x512xf32>
    %c0_57 = arith.constant 0 : index
    %c0_58 = arith.constant 0 : index
    %172 = vector.load %arg4[%c0_57, %c0_58] : memref<128x512xf32, #tpu.memory_space<vmem>>, vector<128x512xf32>
    %cst_59 = arith.constant dense<0.000000e+00> : vector<8x512xf32>
    %173 = tpu.matmul %168, %172, %cst_59 {dimension_numbers = #tpu.dot_dimension_numbers<[1], [0], [0], [1], [0, 0, 1, 1], [], []>} : vector<8x128xf32>, vector<128x512xf32>, vector<8x512xf32> -> vector<8x512xf32>
    %174 = arith.addf %171, %173 : vector<8x512xf32>
    %175 = vector.extract_strided_slice %174 {offsets = [0, 0], sizes = [8, 128], strides = [1, 1]} : vector<8x512xf32> to vector<8x128xf32>
    %176 = arith.negf %175 : vector<8x128xf32>
    %177 = math.exp %176 : vector<8x128xf32>
    %cst_60 = arith.constant 1.000000e+00 : f32
    %178 = vector.broadcast %cst_60 : f32 to vector<8x128xf32>
    %179 = arith.addf %178, %177 : vector<8x128xf32>
    %180 = arith.divf %178, %179 : vector<8x128xf32>
    %181 = vector.extract_strided_slice %174 {offsets = [0, 128], sizes = [8, 128], strides = [1, 1]} : vector<8x512xf32> to vector<8x128xf32>
    %182 = arith.negf %181 : vector<8x128xf32>
    %183 = math.exp %182 : vector<8x128xf32>
    %cst_61 = arith.constant 1.000000e+00 : f32
    %184 = vector.broadcast %cst_61 : f32 to vector<8x128xf32>
    %185 = arith.addf %184, %183 : vector<8x128xf32>
    %186 = arith.divf %184, %185 : vector<8x128xf32>
    %187 = vector.extract_strided_slice %174 {offsets = [0, 256], sizes = [8, 128], strides = [1, 1]} : vector<8x512xf32> to vector<8x128xf32>
    %188 = math.tanh %187 : vector<8x128xf32>
    %189 = vector.extract_strided_slice %174 {offsets = [0, 384], sizes = [8, 128], strides = [1, 1]} : vector<8x512xf32> to vector<8x128xf32>
    %190 = arith.negf %189 : vector<8x128xf32>
    %191 = math.exp %190 : vector<8x128xf32>
    %cst_62 = arith.constant 1.000000e+00 : f32
    %192 = vector.broadcast %cst_62 : f32 to vector<8x128xf32>
    %193 = arith.addf %192, %191 : vector<8x128xf32>
    %194 = arith.divf %192, %193 : vector<8x128xf32>
    %195 = arith.mulf %186, %166 : vector<8x128xf32>
    %196 = arith.mulf %180, %188 : vector<8x128xf32>
    %197 = arith.addf %195, %196 : vector<8x128xf32>
    %198 = math.tanh %197 : vector<8x128xf32>
    %199 = arith.mulf %194, %198 : vector<8x128xf32>
    %c6_i32 = arith.constant 6 : i32
    %200 = arith.index_cast %c6_i32 : i32 to index
    %c0_63 = arith.constant 0 : index
    %c0_64 = arith.constant 0 : index
    %201 = vector.load %arg11[%200, %c0_63, %c0_64] : memref<8x8x512xf32, #tpu.memory_space<vmem>>, vector<1x8x512xf32>
    %202 = vector.shape_cast %201 : vector<1x8x512xf32> to vector<8x512xf32>
    %c0_65 = arith.constant 0 : index
    %c0_66 = arith.constant 0 : index
    %203 = vector.load %arg4[%c0_65, %c0_66] : memref<128x512xf32, #tpu.memory_space<vmem>>, vector<128x512xf32>
    %cst_67 = arith.constant dense<0.000000e+00> : vector<8x512xf32>
    %204 = tpu.matmul %199, %203, %cst_67 {dimension_numbers = #tpu.dot_dimension_numbers<[1], [0], [0], [1], [0, 0, 1, 1], [], []>} : vector<8x128xf32>, vector<128x512xf32>, vector<8x512xf32> -> vector<8x512xf32>
    %205 = arith.addf %202, %204 : vector<8x512xf32>
    %206 = vector.extract_strided_slice %205 {offsets = [0, 0], sizes = [8, 128], strides = [1, 1]} : vector<8x512xf32> to vector<8x128xf32>
    %207 = arith.negf %206 : vector<8x128xf32>
    %208 = math.exp %207 : vector<8x128xf32>
    %cst_68 = arith.constant 1.000000e+00 : f32
    %209 = vector.broadcast %cst_68 : f32 to vector<8x128xf32>
    %210 = arith.addf %209, %208 : vector<8x128xf32>
    %211 = arith.divf %209, %210 : vector<8x128xf32>
    %212 = vector.extract_strided_slice %205 {offsets = [0, 128], sizes = [8, 128], strides = [1, 1]} : vector<8x512xf32> to vector<8x128xf32>
    %213 = arith.negf %212 : vector<8x128xf32>
    %214 = math.exp %213 : vector<8x128xf32>
    %cst_69 = arith.constant 1.000000e+00 : f32
    %215 = vector.broadcast %cst_69 : f32 to vector<8x128xf32>
    %216 = arith.addf %215, %214 : vector<8x128xf32>
    %217 = arith.divf %215, %216 : vector<8x128xf32>
    %218 = vector.extract_strided_slice %205 {offsets = [0, 256], sizes = [8, 128], strides = [1, 1]} : vector<8x512xf32> to vector<8x128xf32>
    %219 = math.tanh %218 : vector<8x128xf32>
    %220 = vector.extract_strided_slice %205 {offsets = [0, 384], sizes = [8, 128], strides = [1, 1]} : vector<8x512xf32> to vector<8x128xf32>
    %221 = arith.negf %220 : vector<8x128xf32>
    %222 = math.exp %221 : vector<8x128xf32>
    %cst_70 = arith.constant 1.000000e+00 : f32
    %223 = vector.broadcast %cst_70 : f32 to vector<8x128xf32>
    %224 = arith.addf %223, %222 : vector<8x128xf32>
    %225 = arith.divf %223, %224 : vector<8x128xf32>
    %226 = arith.mulf %217, %197 : vector<8x128xf32>
    %227 = arith.mulf %211, %219 : vector<8x128xf32>
    %228 = arith.addf %226, %227 : vector<8x128xf32>
    %229 = math.tanh %228 : vector<8x128xf32>
    %230 = arith.mulf %225, %229 : vector<8x128xf32>
    %c7_i32 = arith.constant 7 : i32
    %231 = arith.index_cast %c7_i32 : i32 to index
    %c0_71 = arith.constant 0 : index
    %c0_72 = arith.constant 0 : index
    %232 = vector.load %arg11[%231, %c0_71, %c0_72] : memref<8x8x512xf32, #tpu.memory_space<vmem>>, vector<1x8x512xf32>
    %233 = vector.shape_cast %232 : vector<1x8x512xf32> to vector<8x512xf32>
    %c0_73 = arith.constant 0 : index
    %c0_74 = arith.constant 0 : index
    %234 = vector.load %arg4[%c0_73, %c0_74] : memref<128x512xf32, #tpu.memory_space<vmem>>, vector<128x512xf32>
    %cst_75 = arith.constant dense<0.000000e+00> : vector<8x512xf32>
    %235 = tpu.matmul %230, %234, %cst_75 {dimension_numbers = #tpu.dot_dimension_numbers<[1], [0], [0], [1], [0, 0, 1, 1], [], []>} : vector<8x128xf32>, vector<128x512xf32>, vector<8x512xf32> -> vector<8x512xf32>
    %236 = arith.addf %233, %235 : vector<8x512xf32>
    %237 = vector.extract_strided_slice %236 {offsets = [0, 0], sizes = [8, 128], strides = [1, 1]} : vector<8x512xf32> to vector<8x128xf32>
    %238 = arith.negf %237 : vector<8x128xf32>
    %239 = math.exp %238 : vector<8x128xf32>
    %cst_76 = arith.constant 1.000000e+00 : f32
    %240 = vector.broadcast %cst_76 : f32 to vector<8x128xf32>
    %241 = arith.addf %240, %239 : vector<8x128xf32>
    %242 = arith.divf %240, %241 : vector<8x128xf32>
    %243 = vector.extract_strided_slice %236 {offsets = [0, 128], sizes = [8, 128], strides = [1, 1]} : vector<8x512xf32> to vector<8x128xf32>
    %244 = arith.negf %243 : vector<8x128xf32>
    %245 = math.exp %244 : vector<8x128xf32>
    %cst_77 = arith.constant 1.000000e+00 : f32
    %246 = vector.broadcast %cst_77 : f32 to vector<8x128xf32>
    %247 = arith.addf %246, %245 : vector<8x128xf32>
    %248 = arith.divf %246, %247 : vector<8x128xf32>
    %249 = vector.extract_strided_slice %236 {offsets = [0, 256], sizes = [8, 128], strides = [1, 1]} : vector<8x512xf32> to vector<8x128xf32>
    %250 = math.tanh %249 : vector<8x128xf32>
    %251 = vector.extract_strided_slice %236 {offsets = [0, 384], sizes = [8, 128], strides = [1, 1]} : vector<8x512xf32> to vector<8x128xf32>
    %252 = arith.negf %251 : vector<8x128xf32>
    %253 = math.exp %252 : vector<8x128xf32>
    %cst_78 = arith.constant 1.000000e+00 : f32
    %254 = vector.broadcast %cst_78 : f32 to vector<8x128xf32>
    %255 = arith.addf %254, %253 : vector<8x128xf32>
    %256 = arith.divf %254, %255 : vector<8x128xf32>
    %257 = arith.mulf %248, %228 : vector<8x128xf32>
    %258 = arith.mulf %242, %250 : vector<8x128xf32>
    %259 = arith.addf %257, %258 : vector<8x128xf32>
    %260 = math.tanh %259 : vector<8x128xf32>
    %261 = arith.mulf %256, %260 : vector<8x128xf32>
    %c8_i32 = arith.constant 8 : i32
    %c0_79 = arith.constant 0 : index
    %c0_80 = arith.constant 0 : index
    %262 = vector.load %arg9[%c0_79, %c0_80] : memref<8x128xf32, #tpu.memory_space<vmem>>, vector<8x128xf32>
    tpu.vector_store %arg9[%c0_79, %c0_80], %261 {strides = array<i32>} : memref<8x128xf32, #tpu.memory_space<vmem>>, vector<8x128xf32>,
    %c0_81 = arith.constant 0 : index
    %c0_82 = arith.constant 0 : index
    %263 = vector.load %arg10[%c0_81, %c0_82] : memref<8x128xf32, #tpu.memory_space<vmem>>, vector<8x128xf32>
    tpu.vector_store %arg10[%c0_81, %c0_82], %259 {strides = array<i32>} : memref<8x128xf32, #tpu.memory_space<vmem>>, vector<8x128xf32>,
    %c0_i32_83 = arith.constant 0 : i32
    %264 = arith.cmpi eq, %arg1, %c0_i32_83 : i32
    %265 = arith.extui %264 : i1 to i32
    %c0_i32_84 = arith.constant 0 : i32
    %266 = arith.cmpi ne, %265, %c0_i32_84 : i32
    scf.if %266 {
      %c0_85 = arith.constant 0 : index
      %c0_86 = arith.constant 0 : index
      %267 = vector.load %arg6[%c0_85, %c0_86] : memref<128x128xf32, #tpu.memory_space<vmem>>, vector<128x128xf32>
      %cst_87 = arith.constant dense<0.000000e+00> : vector<8x128xf32>
      %268 = tpu.matmul %261, %267, %cst_87 {dimension_numbers = #tpu.dot_dimension_numbers<[1], [0], [0], [1], [0, 0, 1, 1], [], []>} : vector<8x128xf32>, vector<128x128xf32>, vector<8x128xf32> -> vector<8x128xf32>
      %c0_88 = arith.constant 0 : index
      %c0_89 = arith.constant 0 : index
      %269 = vector.load %arg7[%c0_88, %c0_89] : memref<1x128xf32, #tpu.memory_space<vmem>>, vector<1x128xf32>
      %270 = vector.broadcast %269 : vector<1x128xf32> to vector<8x128xf32>
      %271 = arith.addf %268, %270 : vector<8x128xf32>
      %c0_90 = arith.constant 0 : index
      %c0_91 = arith.constant 0 : index
      %272 = vector.load %arg8[%c0_90, %c0_91] : memref<8x128xf32, #tpu.memory_space<vmem>>, vector<8x128xf32>
      tpu.vector_store %arg8[%c0_90, %c0_91], %271 {strides = array<i32>} : memref<8x128xf32, #tpu.memory_space<vmem>>, vector<8x128xf32>,
    } else {
    }
    return
  }
  func.func @transform_0(%arg0: i32, %arg1: i32) -> (i32, i32, i32) {
    %c0_i32 = arith.constant 0 : i32
    %c0_i32_0 = arith.constant 0 : i32
    return %arg1, %arg0, %c0_i32 : i32, i32, i32
  }
  func.func @transform_1(%arg0: i32, %arg1: i32) -> (i32, i32) {
    %c0_i32 = arith.constant 0 : i32
    %c0_i32_0 = arith.constant 0 : i32
    %c0_i32_1 = arith.constant 0 : i32
    return %c0_i32, %c0_i32_0 : i32, i32
  }
  func.func @transform_2(%arg0: i32, %arg1: i32) -> (i32, i32) {
    %c0_i32 = arith.constant 0 : i32
    %c0_i32_0 = arith.constant 0 : i32
    %c0_i32_1 = arith.constant 0 : i32
    return %c0_i32, %c0_i32_0 : i32, i32
  }
  func.func @transform_3(%arg0: i32, %arg1: i32) -> (i32, i32) {
    %c0_i32 = arith.constant 0 : i32
    %c0_i32_0 = arith.constant 0 : i32
    %c0_i32_1 = arith.constant 0 : i32
    return %c0_i32, %c0_i32_0 : i32, i32
  }
  func.func @transform_4(%arg0: i32, %arg1: i32) -> (i32, i32) {
    %c0_i32 = arith.constant 0 : i32
    %c0_i32_0 = arith.constant 0 : i32
    %c0_i32_1 = arith.constant 0 : i32
    return %c0_i32, %c0_i32_0 : i32, i32
  }
  func.func @transform_5(%arg0: i32, %arg1: i32) -> (i32, i32) {
    %c0_i32 = arith.constant 0 : i32
    %c0_i32_0 = arith.constant 0 : i32
    %c0_i32_1 = arith.constant 0 : i32
    return %c0_i32, %c0_i32_0 : i32, i32
  }
  func.func @transform_6(%arg0: i32, %arg1: i32) -> (i32, i32) {
    %c0_i32 = arith.constant 0 : i32
    %c0_i32_0 = arith.constant 0 : i32
    return %arg0, %c0_i32 : i32, i32
  }
}

module attributes {stable_mosaic.version = 11 : i64} {
  func.func @_lstm_cls_kernel(%arg0: i32, %arg1: i32, %arg2: memref<8x8x128xf32, #tpu.memory_space<vmem>>, %arg3: memref<128x512xf32, #tpu.memory_space<vmem>>, %arg4: memref<128x512xf32, #tpu.memory_space<vmem>>, %arg5: memref<1x512xf32, #tpu.memory_space<vmem>>, %arg6: memref<128x128xf32, #tpu.memory_space<vmem>>, %arg7: memref<1x128xf32, #tpu.memory_space<vmem>>, %arg8: memref<8x128xf32, #tpu.memory_space<vmem>>, %arg9: memref<8x128xf32, #tpu.memory_space<vmem>>, %arg10: memref<8x128xf32, #tpu.memory_space<vmem>>, %arg11: memref<8x8x512xf32, #tpu.memory_space<vmem>>) attributes {dimension_semantics = [#tpu.dimension_semantics<parallel>, #tpu.dimension_semantics<arbitrary>], iteration_bounds = array<i64: 1, 1>, scalar_prefetch = 0 : i64, scratch_operands = 3 : i64, tpu.core_type = #tpu.core_type<tc>, window_params = [{transform_indices = @transform_0, window_bounds = array<i64: 8, 8, 128>}, {pipeline_mode = #tpu.pipeline_mode<synchronous>, transform_indices = @transform_1, window_bounds = array<i64: 128, 512>}, {pipeline_mode = #tpu.pipeline_mode<synchronous>, transform_indices = @transform_2, window_bounds = array<i64: 128, 512>}, {pipeline_mode = #tpu.pipeline_mode<synchronous>, transform_indices = @transform_3, window_bounds = array<i64: 1, 512>}, {pipeline_mode = #tpu.pipeline_mode<synchronous>, transform_indices = @transform_4, window_bounds = array<i64: 128, 128>}, {pipeline_mode = #tpu.pipeline_mode<synchronous>, transform_indices = @transform_5, window_bounds = array<i64: 1, 128>}, {transform_indices = @transform_6, window_bounds = array<i64: 8, 128>}]} {
    %c0_i32 = arith.constant 0 : i32
    %0 = arith.cmpi eq, %arg1, %c0_i32 : i32
    %1 = arith.extui %0 : i1 to i32
    %c0_i32_0 = arith.constant 0 : i32
    %2 = arith.cmpi ne, %1, %c0_i32_0 : i32
    scf.if %2 {
      %cst_85 = arith.constant 0.000000e+00 : f32
      %267 = vector.broadcast %cst_85 : f32 to vector<8x128xf32>
      %c0_86 = arith.constant 0 : index
      %c0_87 = arith.constant 0 : index
      %268 = vector.load %arg9[%c0_86, %c0_87] : memref<8x128xf32, #tpu.memory_space<vmem>>, vector<8x128xf32>
      tpu.vector_store %arg9[%c0_86, %c0_87], %267 {strides = array<i32>} : memref<8x128xf32, #tpu.memory_space<vmem>>, vector<8x128xf32>,
      %cst_88 = arith.constant 0.000000e+00 : f32
      %269 = vector.broadcast %cst_88 : f32 to vector<8x128xf32>
      %c0_89 = arith.constant 0 : index
      %c0_90 = arith.constant 0 : index
      %270 = vector.load %arg10[%c0_89, %c0_90] : memref<8x128xf32, #tpu.memory_space<vmem>>, vector<8x128xf32>
      tpu.vector_store %arg10[%c0_89, %c0_90], %269 {strides = array<i32>} : memref<8x128xf32, #tpu.memory_space<vmem>>, vector<8x128xf32>,
    } else {
    }
    %c0 = arith.constant 0 : index
    %c0_1 = arith.constant 0 : index
    %c0_2 = arith.constant 0 : index
    %3 = vector.load %arg2[%c0, %c0_1, %c0_2] : memref<8x8x128xf32, #tpu.memory_space<vmem>>, vector<8x8x128xf32>
    %4 = vector.shape_cast %3 : vector<8x8x128xf32> to vector<64x128xf32>
    %c0_3 = arith.constant 0 : index
    %c0_4 = arith.constant 0 : index
    %5 = vector.load %arg3[%c0_3, %c0_4] : memref<128x512xf32, #tpu.memory_space<vmem>>, vector<128x512xf32>
    %cst = arith.constant dense<0.000000e+00> : vector<64x512xf32>
    %6 = tpu.matmul %4, %5, %cst {dimension_numbers = #tpu.dot_dimension_numbers<[1], [0], [0], [1], [0, 0, 1, 1], [], []>} : vector<64x128xf32>, vector<128x512xf32>, vector<64x512xf32> -> vector<64x512xf32>
    %c0_5 = arith.constant 0 : index
    %c0_6 = arith.constant 0 : index
    %7 = vector.load %arg5[%c0_5, %c0_6] : memref<1x512xf32, #tpu.memory_space<vmem>>, vector<1x512xf32>
    %8 = vector.broadcast %7 : vector<1x512xf32> to vector<64x512xf32>
    %9 = arith.addf %6, %8 : vector<64x512xf32>
    %10 = vector.shape_cast %9 : vector<64x512xf32> to vector<8x8x512xf32>
    %c0_7 = arith.constant 0 : index
    %c0_8 = arith.constant 0 : index
    %c0_9 = arith.constant 0 : index
    %11 = vector.load %arg11[%c0_7, %c0_8, %c0_9] : memref<8x8x512xf32, #tpu.memory_space<vmem>>, vector<8x8x512xf32>
    tpu.vector_store %arg11[%c0_7, %c0_8, %c0_9], %10 {strides = array<i32>} : memref<8x8x512xf32, #tpu.memory_space<vmem>>, vector<8x8x512xf32>,
    %c0_10 = arith.constant 0 : index
    %c0_11 = arith.constant 0 : index
    %12 = vector.load %arg9[%c0_10, %c0_11] : memref<8x128xf32, #tpu.memory_space<vmem>>, vector<8x128xf32>
    %c0_12 = arith.constant 0 : index
    %c0_13 = arith.constant 0 : index
    %13 = vector.load %arg10[%c0_12, %c0_13] : memref<8x128xf32, #tpu.memory_space<vmem>>, vector<8x128xf32>
    %c0_i32_14 = arith.constant 0 : i32
    %14 = arith.index_cast %c0_i32_14 : i32 to index
    %c0_15 = arith.constant 0 : index
    %c0_16 = arith.constant 0 : index
    %15 = vector.load %arg11[%14, %c0_15, %c0_16] : memref<8x8x512xf32, #tpu.memory_space<vmem>>, vector<1x8x512xf32>
    %16 = vector.shape_cast %15 : vector<1x8x512xf32> to vector<8x512xf32>
    %c0_17 = arith.constant 0 : index
    %c0_18 = arith.constant 0 : index
    %17 = vector.load %arg4[%c0_17, %c0_18] : memref<128x512xf32, #tpu.memory_space<vmem>>, vector<128x512xf32>
    %cst_19 = arith.constant dense<0.000000e+00> : vector<8x512xf32>
    %18 = tpu.matmul %12, %17, %cst_19 {dimension_numbers = #tpu.dot_dimension_numbers<[1], [0], [0], [1], [0, 0, 1, 1], [], []>} : vector<8x128xf32>, vector<128x512xf32>, vector<8x512xf32> -> vector<8x512xf32>
    %19 = arith.addf %16, %18 : vector<8x512xf32>
    %20 = vector.extract_strided_slice %19 {offsets = [0, 0], sizes = [8, 128], strides = [1, 1]} : vector<8x512xf32> to vector<8x128xf32>
    %21 = arith.negf %20 : vector<8x128xf32>
    %22 = math.exp %21 : vector<8x128xf32>
    %cst_20 = arith.constant 1.000000e+00 : f32
    %23 = vector.broadcast %cst_20 : f32 to vector<8x128xf32>
    %24 = arith.addf %23, %22 : vector<8x128xf32>
    %25 = arith.divf %23, %24 : vector<8x128xf32>
    %26 = vector.extract_strided_slice %19 {offsets = [0, 128], sizes = [8, 128], strides = [1, 1]} : vector<8x512xf32> to vector<8x128xf32>
    %27 = arith.negf %26 : vector<8x128xf32>
    %28 = math.exp %27 : vector<8x128xf32>
    %cst_21 = arith.constant 1.000000e+00 : f32
    %29 = vector.broadcast %cst_21 : f32 to vector<8x128xf32>
    %30 = arith.addf %29, %28 : vector<8x128xf32>
    %31 = arith.divf %29, %30 : vector<8x128xf32>
    %32 = vector.extract_strided_slice %19 {offsets = [0, 256], sizes = [8, 128], strides = [1, 1]} : vector<8x512xf32> to vector<8x128xf32>
    %33 = math.tanh %32 : vector<8x128xf32>
    %34 = vector.extract_strided_slice %19 {offsets = [0, 384], sizes = [8, 128], strides = [1, 1]} : vector<8x512xf32> to vector<8x128xf32>
    %35 = arith.negf %34 : vector<8x128xf32>
    %36 = math.exp %35 : vector<8x128xf32>
    %cst_22 = arith.constant 1.000000e+00 : f32
    %37 = vector.broadcast %cst_22 : f32 to vector<8x128xf32>
    %38 = arith.addf %37, %36 : vector<8x128xf32>
    %39 = arith.divf %37, %38 : vector<8x128xf32>
    %40 = arith.mulf %31, %13 : vector<8x128xf32>
    %41 = arith.mulf %25, %33 : vector<8x128xf32>
    %42 = arith.addf %40, %41 : vector<8x128xf32>
    %43 = math.tanh %42 : vector<8x128xf32>
    %44 = arith.mulf %39, %43 : vector<8x128xf32>
    %c1_i32 = arith.constant 1 : i32
    %45 = arith.index_cast %c1_i32 : i32 to index
    %c0_23 = arith.constant 0 : index
    %c0_24 = arith.constant 0 : index
    %46 = vector.load %arg11[%45, %c0_23, %c0_24] : memref<8x8x512xf32, #tpu.memory_space<vmem>>, vector<1x8x512xf32>
    %47 = vector.shape_cast %46 : vector<1x8x512xf32> to vector<8x512xf32>
    %c0_25 = arith.constant 0 : index
    %c0_26 = arith.constant 0 : index
    %48 = vector.load %arg4[%c0_25, %c0_26] : memref<128x512xf32, #tpu.memory_space<vmem>>, vector<128x512xf32>
    %cst_27 = arith.constant dense<0.000000e+00> : vector<8x512xf32>
    %49 = tpu.matmul %44, %48, %cst_27 {dimension_numbers = #tpu.dot_dimension_numbers<[1], [0], [0], [1], [0, 0, 1, 1], [], []>} : vector<8x128xf32>, vector<128x512xf32>, vector<8x512xf32> -> vector<8x512xf32>
    %50 = arith.addf %47, %49 : vector<8x512xf32>
    %51 = vector.extract_strided_slice %50 {offsets = [0, 0], sizes = [8, 128], strides = [1, 1]} : vector<8x512xf32> to vector<8x128xf32>
    %52 = arith.negf %51 : vector<8x128xf32>
    %53 = math.exp %52 : vector<8x128xf32>
    %cst_28 = arith.constant 1.000000e+00 : f32
    %54 = vector.broadcast %cst_28 : f32 to vector<8x128xf32>
    %55 = arith.addf %54, %53 : vector<8x128xf32>
    %56 = arith.divf %54, %55 : vector<8x128xf32>
    %57 = vector.extract_strided_slice %50 {offsets = [0, 128], sizes = [8, 128], strides = [1, 1]} : vector<8x512xf32> to vector<8x128xf32>
    %58 = arith.negf %57 : vector<8x128xf32>
    %59 = math.exp %58 : vector<8x128xf32>
    %cst_29 = arith.constant 1.000000e+00 : f32
    %60 = vector.broadcast %cst_29 : f32 to vector<8x128xf32>
    %61 = arith.addf %60, %59 : vector<8x128xf32>
    %62 = arith.divf %60, %61 : vector<8x128xf32>
    %63 = vector.extract_strided_slice %50 {offsets = [0, 256], sizes = [8, 128], strides = [1, 1]} : vector<8x512xf32> to vector<8x128xf32>
    %64 = math.tanh %63 : vector<8x128xf32>
    %65 = vector.extract_strided_slice %50 {offsets = [0, 384], sizes = [8, 128], strides = [1, 1]} : vector<8x512xf32> to vector<8x128xf32>
    %66 = arith.negf %65 : vector<8x128xf32>
    %67 = math.exp %66 : vector<8x128xf32>
    %cst_30 = arith.constant 1.000000e+00 : f32
    %68 = vector.broadcast %cst_30 : f32 to vector<8x128xf32>
    %69 = arith.addf %68, %67 : vector<8x128xf32>
    %70 = arith.divf %68, %69 : vector<8x128xf32>
    %71 = arith.mulf %62, %42 : vector<8x128xf32>
    %72 = arith.mulf %56, %64 : vector<8x128xf32>
    %73 = arith.addf %71, %72 : vector<8x128xf32>
    %74 = math.tanh %73 : vector<8x128xf32>
    %75 = arith.mulf %70, %74 : vector<8x128xf32>
    %c2_i32 = arith.constant 2 : i32
    %76 = arith.index_cast %c2_i32 : i32 to index
    %c0_31 = arith.constant 0 : index
    %c0_32 = arith.constant 0 : index
    %77 = vector.load %arg11[%76, %c0_31, %c0_32] : memref<8x8x512xf32, #tpu.memory_space<vmem>>, vector<1x8x512xf32>
    %78 = vector.shape_cast %77 : vector<1x8x512xf32> to vector<8x512xf32>
    %c0_33 = arith.constant 0 : index
    %c0_34 = arith.constant 0 : index
    %79 = vector.load %arg4[%c0_33, %c0_34] : memref<128x512xf32, #tpu.memory_space<vmem>>, vector<128x512xf32>
    %cst_35 = arith.constant dense<0.000000e+00> : vector<8x512xf32>
    %80 = tpu.matmul %75, %79, %cst_35 {dimension_numbers = #tpu.dot_dimension_numbers<[1], [0], [0], [1], [0, 0, 1, 1], [], []>} : vector<8x128xf32>, vector<128x512xf32>, vector<8x512xf32> -> vector<8x512xf32>
    %81 = arith.addf %78, %80 : vector<8x512xf32>
    %82 = vector.extract_strided_slice %81 {offsets = [0, 0], sizes = [8, 128], strides = [1, 1]} : vector<8x512xf32> to vector<8x128xf32>
    %83 = arith.negf %82 : vector<8x128xf32>
    %84 = math.exp %83 : vector<8x128xf32>
    %cst_36 = arith.constant 1.000000e+00 : f32
    %85 = vector.broadcast %cst_36 : f32 to vector<8x128xf32>
    %86 = arith.addf %85, %84 : vector<8x128xf32>
    %87 = arith.divf %85, %86 : vector<8x128xf32>
    %88 = vector.extract_strided_slice %81 {offsets = [0, 128], sizes = [8, 128], strides = [1, 1]} : vector<8x512xf32> to vector<8x128xf32>
    %89 = arith.negf %88 : vector<8x128xf32>
    %90 = math.exp %89 : vector<8x128xf32>
    %cst_37 = arith.constant 1.000000e+00 : f32
    %91 = vector.broadcast %cst_37 : f32 to vector<8x128xf32>
    %92 = arith.addf %91, %90 : vector<8x128xf32>
    %93 = arith.divf %91, %92 : vector<8x128xf32>
    %94 = vector.extract_strided_slice %81 {offsets = [0, 256], sizes = [8, 128], strides = [1, 1]} : vector<8x512xf32> to vector<8x128xf32>
    %95 = math.tanh %94 : vector<8x128xf32>
    %96 = vector.extract_strided_slice %81 {offsets = [0, 384], sizes = [8, 128], strides = [1, 1]} : vector<8x512xf32> to vector<8x128xf32>
    %97 = arith.negf %96 : vector<8x128xf32>
    %98 = math.exp %97 : vector<8x128xf32>
    %cst_38 = arith.constant 1.000000e+00 : f32
    %99 = vector.broadcast %cst_38 : f32 to vector<8x128xf32>
    %100 = arith.addf %99, %98 : vector<8x128xf32>
    %101 = arith.divf %99, %100 : vector<8x128xf32>
    %102 = arith.mulf %93, %73 : vector<8x128xf32>
    %103 = arith.mulf %87, %95 : vector<8x128xf32>
    %104 = arith.addf %102, %103 : vector<8x128xf32>
    %105 = math.tanh %104 : vector<8x128xf32>
    %106 = arith.mulf %101, %105 : vector<8x128xf32>
    %c3_i32 = arith.constant 3 : i32
    %107 = arith.index_cast %c3_i32 : i32 to index
    %c0_39 = arith.constant 0 : index
    %c0_40 = arith.constant 0 : index
    %108 = vector.load %arg11[%107, %c0_39, %c0_40] : memref<8x8x512xf32, #tpu.memory_space<vmem>>, vector<1x8x512xf32>
    %109 = vector.shape_cast %108 : vector<1x8x512xf32> to vector<8x512xf32>
    %c0_41 = arith.constant 0 : index
    %c0_42 = arith.constant 0 : index
    %110 = vector.load %arg4[%c0_41, %c0_42] : memref<128x512xf32, #tpu.memory_space<vmem>>, vector<128x512xf32>
    %cst_43 = arith.constant dense<0.000000e+00> : vector<8x512xf32>
    %111 = tpu.matmul %106, %110, %cst_43 {dimension_numbers = #tpu.dot_dimension_numbers<[1], [0], [0], [1], [0, 0, 1, 1], [], []>} : vector<8x128xf32>, vector<128x512xf32>, vector<8x512xf32> -> vector<8x512xf32>
    %112 = arith.addf %109, %111 : vector<8x512xf32>
    %113 = vector.extract_strided_slice %112 {offsets = [0, 0], sizes = [8, 128], strides = [1, 1]} : vector<8x512xf32> to vector<8x128xf32>
    %114 = arith.negf %113 : vector<8x128xf32>
    %115 = math.exp %114 : vector<8x128xf32>
    %cst_44 = arith.constant 1.000000e+00 : f32
    %116 = vector.broadcast %cst_44 : f32 to vector<8x128xf32>
    %117 = arith.addf %116, %115 : vector<8x128xf32>
    %118 = arith.divf %116, %117 : vector<8x128xf32>
    %119 = vector.extract_strided_slice %112 {offsets = [0, 128], sizes = [8, 128], strides = [1, 1]} : vector<8x512xf32> to vector<8x128xf32>
    %120 = arith.negf %119 : vector<8x128xf32>
    %121 = math.exp %120 : vector<8x128xf32>
    %cst_45 = arith.constant 1.000000e+00 : f32
    %122 = vector.broadcast %cst_45 : f32 to vector<8x128xf32>
    %123 = arith.addf %122, %121 : vector<8x128xf32>
    %124 = arith.divf %122, %123 : vector<8x128xf32>
    %125 = vector.extract_strided_slice %112 {offsets = [0, 256], sizes = [8, 128], strides = [1, 1]} : vector<8x512xf32> to vector<8x128xf32>
    %126 = math.tanh %125 : vector<8x128xf32>
    %127 = vector.extract_strided_slice %112 {offsets = [0, 384], sizes = [8, 128], strides = [1, 1]} : vector<8x512xf32> to vector<8x128xf32>
    %128 = arith.negf %127 : vector<8x128xf32>
    %129 = math.exp %128 : vector<8x128xf32>
    %cst_46 = arith.constant 1.000000e+00 : f32
    %130 = vector.broadcast %cst_46 : f32 to vector<8x128xf32>
    %131 = arith.addf %130, %129 : vector<8x128xf32>
    %132 = arith.divf %130, %131 : vector<8x128xf32>
    %133 = arith.mulf %124, %104 : vector<8x128xf32>
    %134 = arith.mulf %118, %126 : vector<8x128xf32>
    %135 = arith.addf %133, %134 : vector<8x128xf32>
    %136 = math.tanh %135 : vector<8x128xf32>
    %137 = arith.mulf %132, %136 : vector<8x128xf32>
    %c4_i32 = arith.constant 4 : i32
    %138 = arith.index_cast %c4_i32 : i32 to index
    %c0_47 = arith.constant 0 : index
    %c0_48 = arith.constant 0 : index
    %139 = vector.load %arg11[%138, %c0_47, %c0_48] : memref<8x8x512xf32, #tpu.memory_space<vmem>>, vector<1x8x512xf32>
    %140 = vector.shape_cast %139 : vector<1x8x512xf32> to vector<8x512xf32>
    %c0_49 = arith.constant 0 : index
    %c0_50 = arith.constant 0 : index
    %141 = vector.load %arg4[%c0_49, %c0_50] : memref<128x512xf32, #tpu.memory_space<vmem>>, vector<128x512xf32>
    %cst_51 = arith.constant dense<0.000000e+00> : vector<8x512xf32>
    %142 = tpu.matmul %137, %141, %cst_51 {dimension_numbers = #tpu.dot_dimension_numbers<[1], [0], [0], [1], [0, 0, 1, 1], [], []>} : vector<8x128xf32>, vector<128x512xf32>, vector<8x512xf32> -> vector<8x512xf32>
    %143 = arith.addf %140, %142 : vector<8x512xf32>
    %144 = vector.extract_strided_slice %143 {offsets = [0, 0], sizes = [8, 128], strides = [1, 1]} : vector<8x512xf32> to vector<8x128xf32>
    %145 = arith.negf %144 : vector<8x128xf32>
    %146 = math.exp %145 : vector<8x128xf32>
    %cst_52 = arith.constant 1.000000e+00 : f32
    %147 = vector.broadcast %cst_52 : f32 to vector<8x128xf32>
    %148 = arith.addf %147, %146 : vector<8x128xf32>
    %149 = arith.divf %147, %148 : vector<8x128xf32>
    %150 = vector.extract_strided_slice %143 {offsets = [0, 128], sizes = [8, 128], strides = [1, 1]} : vector<8x512xf32> to vector<8x128xf32>
    %151 = arith.negf %150 : vector<8x128xf32>
    %152 = math.exp %151 : vector<8x128xf32>
    %cst_53 = arith.constant 1.000000e+00 : f32
    %153 = vector.broadcast %cst_53 : f32 to vector<8x128xf32>
    %154 = arith.addf %153, %152 : vector<8x128xf32>
    %155 = arith.divf %153, %154 : vector<8x128xf32>
    %156 = vector.extract_strided_slice %143 {offsets = [0, 256], sizes = [8, 128], strides = [1, 1]} : vector<8x512xf32> to vector<8x128xf32>
    %157 = math.tanh %156 : vector<8x128xf32>
    %158 = vector.extract_strided_slice %143 {offsets = [0, 384], sizes = [8, 128], strides = [1, 1]} : vector<8x512xf32> to vector<8x128xf32>
    %159 = arith.negf %158 : vector<8x128xf32>
    %160 = math.exp %159 : vector<8x128xf32>
    %cst_54 = arith.constant 1.000000e+00 : f32
    %161 = vector.broadcast %cst_54 : f32 to vector<8x128xf32>
    %162 = arith.addf %161, %160 : vector<8x128xf32>
    %163 = arith.divf %161, %162 : vector<8x128xf32>
    %164 = arith.mulf %155, %135 : vector<8x128xf32>
    %165 = arith.mulf %149, %157 : vector<8x128xf32>
    %166 = arith.addf %164, %165 : vector<8x128xf32>
    %167 = math.tanh %166 : vector<8x128xf32>
    %168 = arith.mulf %163, %167 : vector<8x128xf32>
    %c5_i32 = arith.constant 5 : i32
    %169 = arith.index_cast %c5_i32 : i32 to index
    %c0_55 = arith.constant 0 : index
    %c0_56 = arith.constant 0 : index
    %170 = vector.load %arg11[%169, %c0_55, %c0_56] : memref<8x8x512xf32, #tpu.memory_space<vmem>>, vector<1x8x512xf32>
    %171 = vector.shape_cast %170 : vector<1x8x512xf32> to vector<8x512xf32>
    %c0_57 = arith.constant 0 : index
    %c0_58 = arith.constant 0 : index
    %172 = vector.load %arg4[%c0_57, %c0_58] : memref<128x512xf32, #tpu.memory_space<vmem>>, vector<128x512xf32>
    %cst_59 = arith.constant dense<0.000000e+00> : vector<8x512xf32>
    %173 = tpu.matmul %168, %172, %cst_59 {dimension_numbers = #tpu.dot_dimension_numbers<[1], [0], [0], [1], [0, 0, 1, 1], [], []>} : vector<8x128xf32>, vector<128x512xf32>, vector<8x512xf32> -> vector<8x512xf32>
    %174 = arith.addf %171, %173 : vector<8x512xf32>
    %175 = vector.extract_strided_slice %174 {offsets = [0, 0], sizes = [8, 128], strides = [1, 1]} : vector<8x512xf32> to vector<8x128xf32>
    %176 = arith.negf %175 : vector<8x128xf32>
    %177 = math.exp %176 : vector<8x128xf32>
    %cst_60 = arith.constant 1.000000e+00 : f32
    %178 = vector.broadcast %cst_60 : f32 to vector<8x128xf32>
    %179 = arith.addf %178, %177 : vector<8x128xf32>
    %180 = arith.divf %178, %179 : vector<8x128xf32>
    %181 = vector.extract_strided_slice %174 {offsets = [0, 128], sizes = [8, 128], strides = [1, 1]} : vector<8x512xf32> to vector<8x128xf32>
    %182 = arith.negf %181 : vector<8x128xf32>
    %183 = math.exp %182 : vector<8x128xf32>
    %cst_61 = arith.constant 1.000000e+00 : f32
    %184 = vector.broadcast %cst_61 : f32 to vector<8x128xf32>
    %185 = arith.addf %184, %183 : vector<8x128xf32>
    %186 = arith.divf %184, %185 : vector<8x128xf32>
    %187 = vector.extract_strided_slice %174 {offsets = [0, 256], sizes = [8, 128], strides = [1, 1]} : vector<8x512xf32> to vector<8x128xf32>
    %188 = math.tanh %187 : vector<8x128xf32>
    %189 = vector.extract_strided_slice %174 {offsets = [0, 384], sizes = [8, 128], strides = [1, 1]} : vector<8x512xf32> to vector<8x128xf32>
    %190 = arith.negf %189 : vector<8x128xf32>
    %191 = math.exp %190 : vector<8x128xf32>
    %cst_62 = arith.constant 1.000000e+00 : f32
    %192 = vector.broadcast %cst_62 : f32 to vector<8x128xf32>
    %193 = arith.addf %192, %191 : vector<8x128xf32>
    %194 = arith.divf %192, %193 : vector<8x128xf32>
    %195 = arith.mulf %186, %166 : vector<8x128xf32>
    %196 = arith.mulf %180, %188 : vector<8x128xf32>
    %197 = arith.addf %195, %196 : vector<8x128xf32>
    %198 = math.tanh %197 : vector<8x128xf32>
    %199 = arith.mulf %194, %198 : vector<8x128xf32>
    %c6_i32 = arith.constant 6 : i32
    %200 = arith.index_cast %c6_i32 : i32 to index
    %c0_63 = arith.constant 0 : index
    %c0_64 = arith.constant 0 : index
    %201 = vector.load %arg11[%200, %c0_63, %c0_64] : memref<8x8x512xf32, #tpu.memory_space<vmem>>, vector<1x8x512xf32>
    %202 = vector.shape_cast %201 : vector<1x8x512xf32> to vector<8x512xf32>
    %c0_65 = arith.constant 0 : index
    %c0_66 = arith.constant 0 : index
    %203 = vector.load %arg4[%c0_65, %c0_66] : memref<128x512xf32, #tpu.memory_space<vmem>>, vector<128x512xf32>
    %cst_67 = arith.constant dense<0.000000e+00> : vector<8x512xf32>
    %204 = tpu.matmul %199, %203, %cst_67 {dimension_numbers = #tpu.dot_dimension_numbers<[1], [0], [0], [1], [0, 0, 1, 1], [], []>} : vector<8x128xf32>, vector<128x512xf32>, vector<8x512xf32> -> vector<8x512xf32>
    %205 = arith.addf %202, %204 : vector<8x512xf32>
    %206 = vector.extract_strided_slice %205 {offsets = [0, 0], sizes = [8, 128], strides = [1, 1]} : vector<8x512xf32> to vector<8x128xf32>
    %207 = arith.negf %206 : vector<8x128xf32>
    %208 = math.exp %207 : vector<8x128xf32>
    %cst_68 = arith.constant 1.000000e+00 : f32
    %209 = vector.broadcast %cst_68 : f32 to vector<8x128xf32>
    %210 = arith.addf %209, %208 : vector<8x128xf32>
    %211 = arith.divf %209, %210 : vector<8x128xf32>
    %212 = vector.extract_strided_slice %205 {offsets = [0, 128], sizes = [8, 128], strides = [1, 1]} : vector<8x512xf32> to vector<8x128xf32>
    %213 = arith.negf %212 : vector<8x128xf32>
    %214 = math.exp %213 : vector<8x128xf32>
    %cst_69 = arith.constant 1.000000e+00 : f32
    %215 = vector.broadcast %cst_69 : f32 to vector<8x128xf32>
    %216 = arith.addf %215, %214 : vector<8x128xf32>
    %217 = arith.divf %215, %216 : vector<8x128xf32>
    %218 = vector.extract_strided_slice %205 {offsets = [0, 256], sizes = [8, 128], strides = [1, 1]} : vector<8x512xf32> to vector<8x128xf32>
    %219 = math.tanh %218 : vector<8x128xf32>
    %220 = vector.extract_strided_slice %205 {offsets = [0, 384], sizes = [8, 128], strides = [1, 1]} : vector<8x512xf32> to vector<8x128xf32>
    %221 = arith.negf %220 : vector<8x128xf32>
    %222 = math.exp %221 : vector<8x128xf32>
    %cst_70 = arith.constant 1.000000e+00 : f32
    %223 = vector.broadcast %cst_70 : f32 to vector<8x128xf32>
    %224 = arith.addf %223, %222 : vector<8x128xf32>
    %225 = arith.divf %223, %224 : vector<8x128xf32>
    %226 = arith.mulf %217, %197 : vector<8x128xf32>
    %227 = arith.mulf %211, %219 : vector<8x128xf32>
    %228 = arith.addf %226, %227 : vector<8x128xf32>
    %229 = math.tanh %228 : vector<8x128xf32>
    %230 = arith.mulf %225, %229 : vector<8x128xf32>
    %c7_i32 = arith.constant 7 : i32
    %231 = arith.index_cast %c7_i32 : i32 to index
    %c0_71 = arith.constant 0 : index
    %c0_72 = arith.constant 0 : index
    %232 = vector.load %arg11[%231, %c0_71, %c0_72] : memref<8x8x512xf32, #tpu.memory_space<vmem>>, vector<1x8x512xf32>
    %233 = vector.shape_cast %232 : vector<1x8x512xf32> to vector<8x512xf32>
    %c0_73 = arith.constant 0 : index
    %c0_74 = arith.constant 0 : index
    %234 = vector.load %arg4[%c0_73, %c0_74] : memref<128x512xf32, #tpu.memory_space<vmem>>, vector<128x512xf32>
    %cst_75 = arith.constant dense<0.000000e+00> : vector<8x512xf32>
    %235 = tpu.matmul %230, %234, %cst_75 {dimension_numbers = #tpu.dot_dimension_numbers<[1], [0], [0], [1], [0, 0, 1, 1], [], []>} : vector<8x128xf32>, vector<128x512xf32>, vector<8x512xf32> -> vector<8x512xf32>
    %236 = arith.addf %233, %235 : vector<8x512xf32>
    %237 = vector.extract_strided_slice %236 {offsets = [0, 0], sizes = [8, 128], strides = [1, 1]} : vector<8x512xf32> to vector<8x128xf32>
    %238 = arith.negf %237 : vector<8x128xf32>
    %239 = math.exp %238 : vector<8x128xf32>
    %cst_76 = arith.constant 1.000000e+00 : f32
    %240 = vector.broadcast %cst_76 : f32 to vector<8x128xf32>
    %241 = arith.addf %240, %239 : vector<8x128xf32>
    %242 = arith.divf %240, %241 : vector<8x128xf32>
    %243 = vector.extract_strided_slice %236 {offsets = [0, 128], sizes = [8, 128], strides = [1, 1]} : vector<8x512xf32> to vector<8x128xf32>
    %244 = arith.negf %243 : vector<8x128xf32>
    %245 = math.exp %244 : vector<8x128xf32>
    %cst_77 = arith.constant 1.000000e+00 : f32
    %246 = vector.broadcast %cst_77 : f32 to vector<8x128xf32>
    %247 = arith.addf %246, %245 : vector<8x128xf32>
    %248 = arith.divf %246, %247 : vector<8x128xf32>
    %249 = vector.extract_strided_slice %236 {offsets = [0, 256], sizes = [8, 128], strides = [1, 1]} : vector<8x512xf32> to vector<8x128xf32>
    %250 = math.tanh %249 : vector<8x128xf32>
    %251 = vector.extract_strided_slice %236 {offsets = [0, 384], sizes = [8, 128], strides = [1, 1]} : vector<8x512xf32> to vector<8x128xf32>
    %252 = arith.negf %251 : vector<8x128xf32>
    %253 = math.exp %252 : vector<8x128xf32>
    %cst_78 = arith.constant 1.000000e+00 : f32
    %254 = vector.broadcast %cst_78 : f32 to vector<8x128xf32>
    %255 = arith.addf %254, %253 : vector<8x128xf32>
    %256 = arith.divf %254, %255 : vector<8x128xf32>
    %257 = arith.mulf %248, %228 : vector<8x128xf32>
    %258 = arith.mulf %242, %250 : vector<8x128xf32>
    %259 = arith.addf %257, %258 : vector<8x128xf32>
    %260 = math.tanh %259 : vector<8x128xf32>
    %261 = arith.mulf %256, %260 : vector<8x128xf32>
    %c8_i32 = arith.constant 8 : i32
    %c0_79 = arith.constant 0 : index
    %c0_80 = arith.constant 0 : index
    %262 = vector.load %arg9[%c0_79, %c0_80] : memref<8x128xf32, #tpu.memory_space<vmem>>, vector<8x128xf32>
    tpu.vector_store %arg9[%c0_79, %c0_80], %261 {strides = array<i32>} : memref<8x128xf32, #tpu.memory_space<vmem>>, vector<8x128xf32>,
    %c0_81 = arith.constant 0 : index
    %c0_82 = arith.constant 0 : index
    %263 = vector.load %arg10[%c0_81, %c0_82] : memref<8x128xf32, #tpu.memory_space<vmem>>, vector<8x128xf32>
    tpu.vector_store %arg10[%c0_81, %c0_82], %259 {strides = array<i32>} : memref<8x128xf32, #tpu.memory_space<vmem>>, vector<8x128xf32>,
    %c0_i32_83 = arith.constant 0 : i32
    %264 = arith.cmpi eq, %arg1, %c0_i32_83 : i32
    %265 = arith.extui %264 : i1 to i32
    %c0_i32_84 = arith.constant 0 : i32
    %266 = arith.cmpi ne, %265, %c0_i32_84 : i32
    scf.if %266 {
      %c0_85 = arith.constant 0 : index
      %c0_86 = arith.constant 0 : index
      %267 = vector.load %arg6[%c0_85, %c0_86] : memref<128x128xf32, #tpu.memory_space<vmem>>, vector<128x128xf32>
      %cst_87 = arith.constant dense<0.000000e+00> : vector<8x128xf32>
      %268 = tpu.matmul %261, %267, %cst_87 {dimension_numbers = #tpu.dot_dimension_numbers<[1], [0], [0], [1], [0, 0, 1, 1], [], []>} : vector<8x128xf32>, vector<128x128xf32>, vector<8x128xf32> -> vector<8x128xf32>
      %c0_88 = arith.constant 0 : index
      %c0_89 = arith.constant 0 : index
      %269 = vector.load %arg7[%c0_88, %c0_89] : memref<1x128xf32, #tpu.memory_space<vmem>>, vector<1x128xf32>
      %270 = vector.broadcast %269 : vector<1x128xf32> to vector<8x128xf32>
      %271 = arith.addf %268, %270 : vector<8x128xf32>
      %c0_90 = arith.constant 0 : index
      %c0_91 = arith.constant 0 : index
      %272 = vector.load %arg8[%c0_90, %c0_91] : memref<8x128xf32, #tpu.memory_space<vmem>>, vector<8x128xf32>
      tpu.vector_store %arg8[%c0_90, %c0_91], %271 {strides = array<i32>} : memref<8x128xf32, #tpu.memory_space<vmem>>, vector<8x128xf32>,
    } else {
    }
    return
  }
  func.func @transform_0(%arg0: i32, %arg1: i32) -> (i32, i32, i32) {
    %c0_i32 = arith.constant 0 : i32
    %c0_i32_0 = arith.constant 0 : i32
    return %arg1, %arg0, %c0_i32 : i32, i32, i32
  }
  func.func @transform_1(%arg0: i32, %arg1: i32) -> (i32, i32) {
    %c0_i32 = arith.constant 0 : i32
    %c0_i32_0 = arith.constant 0 : i32
    %c0_i32_1 = arith.constant 0 : i32
    return %c0_i32, %c0_i32_0 : i32, i32
  }
  func.func @transform_2(%arg0: i32, %arg1: i32) -> (i32, i32) {
    %c0_i32 = arith.constant 0 : i32
    %c0_i32_0 = arith.constant 0 : i32
    %c0_i32_1 = arith.constant 0 : i32
    return %c0_i32, %c0_i32_0 : i32, i32
  }
  func.func @transform_3(%arg0: i32, %arg1: i32) -> (i32, i32) {
    %c0_i32 = arith.constant 0 : i32
    %c0_i32_0 = arith.constant 0 : i32
    %c0_i32_1 = arith.constant 0 : i32
    return %c0_i32, %c0_i32_0 : i32, i32
  }
  func.func @transform_4(%arg0: i32, %arg1: i32) -> (i32, i32) {
    %c0_i32 = arith.constant 0 : i32
    %c0_i32_0 = arith.constant 0 : i32
    %c0_i32_1 = arith.constant 0 : i32
    return %c0_i32, %c0_i32_0 : i32, i32
  }
  func.func @transform_5(%arg0: i32, %arg1: i32) -> (i32, i32) {
    %c0_i32 = arith.constant 0 : i32
    %c0_i32_0 = arith.constant 0 : i32
    %c0_i32_1 = arith.constant 0 : i32
    return %c0_i32, %c0_i32_0 : i32, i32
  }
  func.func @transform_6(%arg0: i32, %arg1: i32) -> (i32, i32) {
    %c0_i32 = arith.constant 0 : i32
    %c0_i32_0 = arith.constant 0 : i32
    return %arg0, %c0_i32 : i32, i32
  }
}

</mosaic_0001>

<bundles_post_ra>
// kernel: tpu_custom_call.1
= control target key start
LH: loop header
LB: loop body
LE: loop exit
PB: predicated region body
PF: predicated region fallthrough
CT: control target
= control target key end

     0   :  { %11 = vsyncpa [#allocation6], 0  ;;  %s3073_s0 = inlined_call_operand.hbm [shape: f32[8,8,128], index: 0, kind: input, shape index: {}]   ;;  %s3074_s1 = inlined_call_operand.hbm [shape: f32[128,512], index: 1, kind: input, shape index: {}]   ;;  %s3075_s2 = inlined_call_operand.hbm [shape: f32[128,512], index: 2, kind: input, shape index: {}]   ;;  %s3076_s3 = inlined_call_operand.hbm [shape: f32[1,512], index: 3, kind: input, shape index: {}]   ;;  %s3077_s4 = inlined_call_operand.hbm [shape: f32[128,128], index: 4, kind: input, shape index: {}]   ;;  %s3078_s5 = inlined_call_operand.vmem [shape: f32[1,128], index: 5, kind: input, shape index: {}]   ;;  %s3079_s6 = inlined_call_operand.hbm [shape: f32[8,128], index: 6, kind: output, shape index: {}]  }
   0x1   :  { %12 = vsyncpa [#allocation9], 0 }
   0x2   :  { %13 = vsyncpa [#allocation12], 0  ;;  %s32_s23 = sshll.u32 %s3074_s1, 4  ;;  %s33_s23 = int_to_ptr.hbm [resolvable:$true] %s32_s23 }
   0x3   :  { %14 = vsyncpa [#allocation7], 0  ;;  %s2110_s24 = smov [#allocation8]   ;;  %s59_s28 = sshll.u32 %s3076_s3, 4  ;;  %s60_s28 = int_to_ptr.hbm [resolvable:$true] %s59_s28 }
   0x4   :  { %s34_s25 = sshll.u32 %s2110_s24, 4  ;;  %s2111_s29 = smov 512   ;;  %s35_s25 = int_to_ptr.vmem [resolvable:$true] %s34_s25 }
   0x5   :  { %s2112_s30 = smov 32   ;;  %s2113_s7 = smov [#allocation11]  }
   0x6   :  { %40 = dma.hbm_to_vmem [thread:$0]  %s33_s23, 8192, %s35_s25, [#allocation9], %s2111_s29, %s2111_s29, %s2112_s30  }
   0x7   :  { %s61_s8 = sshll.u32 %s2113_s7, 4  ;;  %s19_s11 = sshll.u32 %s3073_s0, 4  ;;  %s62_s8 = int_to_ptr.vmem [resolvable:$true] %s61_s8  ;;  %s20_s11 = int_to_ptr.hbm [resolvable:$true] %s19_s11 }
   0x8   :  { %64 = dma.hbm_to_vmem [thread:$0]  %s60_s28, 64, %s62_s8, [#allocation12]  }
   0x9   :  { %s2114_s1 = smov [#allocation5]   ;;  %s45_s3 = sshll.u32 %s3075_s2, 4  ;;  %s46_s3 = int_to_ptr.hbm [resolvable:$true] %s45_s3 }
   0xa   :  { %s21_s12 = sshll.u32 %s2114_s1, 4  ;;  %s2115_s15 = smov 128   ;;  %s22_s12 = int_to_ptr.vmem [resolvable:$true] %s21_s12 }
   0xb   :  { %s2116_s16 = smov 8   ;;  %s2117_s17 = smov [#allocation10]  }
   0xc   :  { %27 = dma.hbm_to_vmem [thread:$0]  %s20_s11, 1024, %s22_s12, [#allocation6], %s2115_s15, %s2115_s15, %s2116_s16  }
   0xd   :  { %s47_s18 = sshll.u32 %s2117_s17, 4  ;;  %s69_s0 = sshll.u32 %s3077_s4, 4  ;;  %s48_s18 = int_to_ptr.vmem [resolvable:$true] %s47_s18  ;;  %s70_s0 = int_to_ptr.hbm [resolvable:$true] %s69_s0 }
   0xe   :  { %53 = dma.hbm_to_vmem [thread:$0]  %s46_s3, 8192, %s48_s18, [#allocation9], %s2111_s29, %s2111_s29, %s2112_s30  }
   0xf   :  { %s2118_s21 = smov [#allocation13]  }
  0x10   :  { %s71_s22 = sshll.u32 %s2118_s21, 4  ;;  %s72_s22 = int_to_ptr.vmem [resolvable:$true] %s71_s22 }
  0x11   :  { %77 = dma.hbm_to_vmem [thread:$0]  %s70_s0, 2048, %s72_s22, [#allocation12], %s2115_s15, %s2115_s15, %s2116_s16  }
  0x12   :  { %2102 = dma.done.wait [#allocation6], 1024  }
  0x13   :  { %2103 = vsyncadd [#allocation6], 4294966272 }
  0x14   :  { %2104 = dma.done.wait [#allocation9], 16384  }
  0x15   :  { %2105 = vsyncadd [#allocation9], 4294950912 }
  0x16   :  { %2106 = dma.done.wait [#allocation12], 2112  }
  0x17   :  { %2107 = vsyncadd [#allocation12], 4294965184  ;;  %v174_v0 = vld [vmem:[#allocation8 + $0x1e0] sm:$0xff]  ;;  %v175_v1 = vld [vmem:[#allocation8 + $0x1e8] sm:$0xff]  ;;  %s2120_s23 = smov [#allocation14]   ;;  %s1718_s27 = sshll.u32 %s3079_s6, 4  ;;  %s1719_s27 = int_to_ptr.hbm [resolvable:$true] %s1718_s27 }
  0x18   :  { %v176_v2 = vld [vmem:[#allocation8 + $0x1f0] sm:$0xff]  ;;  %188 = vmatpush.msra.mxu0 %v174_v0  ;;  %229 = vmatpush.msra.mxu1 %v175_v1  ;;  %v177_v3 = vld [vmem:[#allocation8 + $0x1f8] sm:$0xff]  ;;  %v170_v4 = vld [vmem:[#allocation8 + $0x1c0] sm:$0xff]  ;;  %s1716_s24 = sshll.u32 %s2120_s23, 4  ;;  %s1717_s24 = int_to_ptr.vmem [resolvable:$true] %s1716_s24 }
  0x19   :  { %v171_v5 = vld [vmem:[#allocation8 + $0x1c8] sm:$0xff]  ;;  %270 = vmatpush.msra.mxu2 %v176_v2  ;;  %311 = vmatpush.msra.mxu3 %v177_v3  ;;  %v172_v6 = vld [vmem:[#allocation8 + $0x1d0] sm:$0xff]  ;;  %v173_v7 = vld [vmem:[#allocation8 + $0x1d8] sm:$0xff] }
  0x1a   :  { %v166_v8 = vld [vmem:[#allocation8 + $0x1a0] sm:$0xff]  ;;  %189 = vmatpush.msra.mxu0 %v170_v4  ;;  %230 = vmatpush.msra.mxu1 %v171_v5  ;;  %v167_v9 = vld [vmem:[#allocation8 + $0x1a8] sm:$0xff]  ;;  %v168_v10 = vld [vmem:[#allocation8 + $0x1b0] sm:$0xff] }
  0x1b   :  { %v169_v11 = vld [vmem:[#allocation8 + $0x1b8] sm:$0xff]  ;;  %271 = vmatpush.msra.mxu2 %v172_v6  ;;  %312 = vmatpush.msra.mxu3 %v173_v7  ;;  %v162_v12 = vld [vmem:[#allocation8 + $0x180] sm:$0xff]  ;;  %v163_v13 = vld [vmem:[#allocation8 + $0x188] sm:$0xff] }
  0x1c   :  { %190 = vmatpush.msra.mxu0 %v166_v8  ;;  %231 = vmatpush.msra.mxu1 %v167_v9  ;;  %v164_v14 = vld [vmem:[#allocation8 + $0x190] sm:$0xff]  ;;  %v165_v15 = vld [vmem:[#allocation8 + $0x198] sm:$0xff]  ;;  %v158_v16 = vld [vmem:[#allocation8 + $0x160] sm:$0xff] }
  0x1d   :  { %272 = vmatpush.msra.mxu2 %v168_v10  ;;  %313 = vmatpush.msra.mxu3 %v169_v11  ;;  %v159_v17 = vld [vmem:[#allocation8 + $0x168] sm:$0xff]  ;;  %v160_v18 = vld [vmem:[#allocation8 + $0x170] sm:$0xff]  ;;  %v161_v19 = vld [vmem:[#allocation8 + $0x178] sm:$0xff] }
  0x1e   :  { %191 = vmatpush.msra.mxu0 %v162_v12  ;;  %232 = vmatpush.msra.mxu1 %v163_v13  ;;  %v154_v20 = vld [vmem:[#allocation8 + $0x140] sm:$0xff]  ;;  %v155_v21 = vld [vmem:[#allocation8 + $0x148] sm:$0xff]  ;;  %v156_v22 = vld [vmem:[#allocation8 + $0x150] sm:$0xff] }
  0x1f   :  { %273 = vmatpush.msra.mxu2 %v164_v14  ;;  %314 = vmatpush.msra.mxu3 %v165_v15  ;;  %v157_v23 = vld [vmem:[#allocation8 + $0x158] sm:$0xff]  ;;  %v150_v24 = vld [vmem:[#allocation8 + $0x120] sm:$0xff]  ;;  %v151_v25 = vld [vmem:[#allocation8 + $0x128] sm:$0xff] }
  0x20   :  { %192 = vmatpush.msra.mxu0 %v158_v16  ;;  %233 = vmatpush.msra.mxu1 %v159_v17  ;;  %v152_v26 = vld [vmem:[#allocation8 + $0x130] sm:$0xff]  ;;  %v153_v27 = vld [vmem:[#allocation8 + $0x138] sm:$0xff]  ;;  %v146_v28 = vld [vmem:[#allocation8 + $0x100] sm:$0xff] }
  0x21   :  { %274 = vmatpush.msra.mxu2 %v160_v18  ;;  %315 = vmatpush.msra.mxu3 %v161_v19  ;;  %v147_v29 = vld [vmem:[#allocation8 + $0x108] sm:$0xff]  ;;  %v148_v30 = vld [vmem:[#allocation8 + $0x110] sm:$0xff]  ;;  %v149_v31 = vld [vmem:[#allocation8 + $0x118] sm:$0xff] }
  0x22   :  { %193 = vmatpush.msra.mxu0 %v154_v20  ;;  %234 = vmatpush.msra.mxu1 %v155_v21  ;;  %v142_v32 = vld [vmem:[#allocation8 + $0xe0] sm:$0xff]  ;;  %v143_v33 = vld [vmem:[#allocation8 + $0xe8] sm:$0xff]  ;;  %v144_v34 = vld [vmem:[#allocation8 + $0xf0] sm:$0xff] }
  0x23   :  { %275 = vmatpush.msra.mxu2 %v156_v22  ;;  %316 = vmatpush.msra.mxu3 %v157_v23  ;;  %v145_v35 = vld [vmem:[#allocation8 + $0xf8] sm:$0xff]  ;;  %v138_v36 = vld [vmem:[#allocation8 + $0xc0] sm:$0xff]  ;;  %v139_v37 = vld [vmem:[#allocation8 + $0xc8] sm:$0xff] }
  0x24   :  { %194 = vmatpush.msra.mxu0 %v150_v24  ;;  %235 = vmatpush.msra.mxu1 %v151_v25  ;;  %v140_v38 = vld [vmem:[#allocation8 + $0xd0] sm:$0xff]  ;;  %v141_v39 = vld [vmem:[#allocation8 + $0xd8] sm:$0xff]  ;;  %v134_v40 = vld [vmem:[#allocation8 + $0xa0] sm:$0xff] }
  0x25   :  { %276 = vmatpush.msra.mxu2 %v152_v26  ;;  %317 = vmatpush.msra.mxu3 %v153_v27  ;;  %v135_v41 = vld [vmem:[#allocation8 + $0xa8] sm:$0xff]  ;;  %v136_v42 = vld [vmem:[#allocation8 + $0xb0] sm:$0xff]  ;;  %v137_v43 = vld [vmem:[#allocation8 + $0xb8] sm:$0xff] }
  0x26   :  { %195 = vmatpush.msra.mxu0 %v146_v28  ;;  %236 = vmatpush.msra.mxu1 %v147_v29  ;;  %v130_v44 = vld [vmem:[#allocation8 + $0x80] sm:$0xff]  ;;  %v131_v45 = vld [vmem:[#allocation8 + $0x88] sm:$0xff]  ;;  %v132_v46 = vld [vmem:[#allocation8 + $0x90] sm:$0xff] }
  0x27   :  { %277 = vmatpush.msra.mxu2 %v148_v30  ;;  %318 = vmatpush.msra.mxu3 %v149_v31  ;;  %v133_v47 = vld [vmem:[#allocation8 + $0x98] sm:$0xff]  ;;  %v126_v48 = vld [vmem:[#allocation8 + $0x60] sm:$0xff]  ;;  %v127_v49 = vld [vmem:[#allocation8 + $0x68] sm:$0xff] }
  0x28   :  { %196 = vmatpush.msra.mxu0 %v142_v32  ;;  %237 = vmatpush.msra.mxu1 %v143_v33  ;;  %v128_v50 = vld [vmem:[#allocation8 + $0x70] sm:$0xff]  ;;  %v129_v51 = vld [vmem:[#allocation8 + $0x78] sm:$0xff]  ;;  %v122_v52 = vld [vmem:[#allocation8 + $0x40] sm:$0xff] }
  0x29   :  { %278 = vmatpush.msra.mxu2 %v144_v34  ;;  %319 = vmatpush.msra.mxu3 %v145_v35  ;;  %v123_v53 = vld [vmem:[#allocation8 + $0x48] sm:$0xff]  ;;  %v124_v54 = vld [vmem:[#allocation8 + $0x50] sm:$0xff]  ;;  %v125_v55 = vld [vmem:[#allocation8 + $0x58] sm:$0xff] }
  0x2a   :  { %197 = vmatpush.msra.mxu0 %v138_v36  ;;  %238 = vmatpush.msra.mxu1 %v139_v37  ;;  %v118_v56 = vld [vmem:[#allocation8 + $0x20] sm:$0xff]  ;;  %v119_v57 = vld [vmem:[#allocation8 + $0x28] sm:$0xff]  ;;  %v120_v58 = vld [vmem:[#allocation8 + $0x30] sm:$0xff] }
  0x2b   :  { %279 = vmatpush.msra.mxu2 %v140_v38  ;;  %320 = vmatpush.msra.mxu3 %v141_v39  ;;  %v121_v59 = vld [vmem:[#allocation8 + $0x38] sm:$0xff]  ;;  %v114_v60 = vld [vmem:[#allocation8] sm:$0xff]  ;;  %v115_v61 = vld [vmem:[#allocation8 + $0x8] sm:$0xff] }
  0x2c   :  { %198 = vmatpush.msra.mxu0 %v134_v40  ;;  %239 = vmatpush.msra.mxu1 %v135_v41  ;;  %v116_v62 = vld [vmem:[#allocation8 + $0x10] sm:$0xff]  ;;  %v117_v63 = vld [vmem:[#allocation8 + $0x18] sm:$0xff]  ;;  %v106_v0 = vld [vmem:[#allocation5] sm:$0xff] }
  0x2d   :  { %280 = vmatpush.msra.mxu2 %v136_v42  ;;  %321 = vmatpush.msra.mxu3 %v137_v43  ;;  %v2171_v1 = vld [vmem:[#allocation10 + $0x1e0] sm:$0xff]  ;;  %v2173_v2 = vld [vmem:[#allocation10 + $0x1e8] sm:$0xff]  ;;  %v2175_v3 = vld [vmem:[#allocation10 + $0x1f8] sm:$0xff] }
  0x2e   :  { %199 = vmatpush.msra.mxu0 %v130_v44  ;;  %240 = vmatpush.msra.mxu1 %v131_v45  ;;  %v2177_v4 = vld [vmem:[#allocation10 + $0x1f0] sm:$0xff]  ;;  %v2179_v5 = vld [vmem:[#allocation10 + $0x1c0] sm:$0xff]  ;;  %v2181_v6 = vld [vmem:[#allocation10 + $0x1c8] sm:$0xff] }
  0x2f   :  { %281 = vmatpush.msra.mxu2 %v132_v46  ;;  %322 = vmatpush.msra.mxu3 %v133_v47  ;;  %v2185_v7 = vld [vmem:[#allocation10 + $0x1d8] sm:$0xff]  ;;  %v2187_v8 = vld [vmem:[#allocation10 + $0x1d0] sm:$0xff]  ;;  %v2190_v9 = vld [vmem:[#allocation10 + $0x1a0] sm:$0xff] }
  0x30   :  { %200 = vmatpush.msra.mxu0 %v126_v48  ;;  %241 = vmatpush.msra.mxu1 %v127_v49  ;;  %v2192_v10 = vld [vmem:[#allocation10 + $0x1a8] sm:$0xff]  ;;  %v2197_v11 = vld [vmem:[#allocation10 + $0x1b8] sm:$0xff]  ;;  %v2199_v12 = vld [vmem:[#allocation10 + $0x1b0] sm:$0xff] }
  0x31   :  { %282 = vmatpush.msra.mxu2 %v128_v50  ;;  %323 = vmatpush.msra.mxu3 %v129_v51  ;;  %v107_v13 = vld [vmem:[#allocation5 + $0x8] sm:$0xff]  ;;  %v2205_v14 = vld [vmem:[#allocation10 + $0x180] sm:$0xff]  ;;  %v2211_v16 = vld [vmem:[#allocation10 + $0x198] sm:$0xff] }
  0x32   :  { %201 = vmatpush.msra.mxu0 %v122_v52  ;;  %242 = vmatpush.msra.mxu1 %v123_v53  ;;  %v2207_v15 = vld [vmem:[#allocation10 + $0x188] sm:$0xff]  ;;  %v2213_v17 = vld [vmem:[#allocation10 + $0x190] sm:$0xff]  ;;  %v2215_v18 = vld [vmem:[#allocation10 + $0x160] sm:$0xff] }
  0x33   :  { %283 = vmatpush.msra.mxu2 %v124_v54  ;;  %324 = vmatpush.msra.mxu3 %v125_v55  ;;  %v2217_v19 = vld [vmem:[#allocation10 + $0x168] sm:$0xff]  ;;  %v2221_v20 = vld [vmem:[#allocation10 + $0x178] sm:$0xff]  ;;  %v2223_v21 = vld [vmem:[#allocation10 + $0x170] sm:$0xff] }
  0x34   :  { %202 = vmatpush.msra.mxu0 %v118_v56  ;;  %243 = vmatpush.msra.mxu1 %v119_v57  ;;  %v2226_v22 = vld [vmem:[#allocation10 + $0x140] sm:$0xff]  ;;  %v2228_v23 = vld [vmem:[#allocation10 + $0x148] sm:$0xff]  ;;  %v2233_v24 = vld [vmem:[#allocation10 + $0x158] sm:$0xff] }
  0x35   :  { %284 = vmatpush.msra.mxu2 %v120_v58  ;;  %325 = vmatpush.msra.mxu3 %v121_v59  ;;  %v2235_v25 = vld [vmem:[#allocation10 + $0x150] sm:$0xff]  ;;  %v2241_v27 = vld [vmem:[#allocation10 + $0x120] sm:$0xff]  ;;  %v2243_v28 = vld [vmem:[#allocation10 + $0x128] sm:$0xff] }
  0x36   :  { %203 = vmatpush.msra.mxu0 %v114_v60  ;;  %244 = vmatpush.msra.mxu1 %v115_v61  ;;  %v108_v26 = vld [vmem:[#allocation5 + $0x10] sm:$0xff]  ;;  %v2247_v29 = vld [vmem:[#allocation10 + $0x138] sm:$0xff]  ;;  %v2251_v31 = vld [vmem:[#allocation10 + $0x100] sm:$0xff] }
  0x37   :  { %285 = vmatpush.msra.mxu2 %v116_v62  ;;  %326 = vmatpush.msra.mxu3 %v117_v63  ;;  %v2249_v30 = vld [vmem:[#allocation10 + $0x130] sm:$0xff]  ;;  %v2253_v32 = vld [vmem:[#allocation10 + $0x108] sm:$0xff]  ;;  %v2257_v33 = vld [vmem:[#allocation10 + $0x118] sm:$0xff] }
  0x38   :  { %204 = vmatmul.f32.vlgmr.msra.gmra.mxu0 %v106_v0  ;;  %245 = vmatmul.f32.vlgmr.msra.gmra.mxu1 %v106_v0  ;;  %v2259_v34 = vld [vmem:[#allocation10 + $0x110] sm:$0xff]  ;;  %v2262_v35 = vld [vmem:[#allocation10 + $0xe0] sm:$0xff]  ;;  %v2264_v36 = vld [vmem:[#allocation10 + $0xe8] sm:$0xff] }
  0x39   :  { %286 = vmatmul.f32.vlgmr.msra.gmra.mxu2 %v106_v0  ;;  %327 = vmatmul.f32.vlgmr.msra.gmra.mxu3 %v106_v0  ;;  %v2269_v37 = vld [vmem:[#allocation10 + $0xf8] sm:$0xff]  ;;  %v2271_v38 = vld [vmem:[#allocation10 + $0xf0] sm:$0xff]  ;;  %v2277_v40 = vld [vmem:[#allocation10 + $0xc0] sm:$0xff] }
  0x3a   :  { %454 = vmatpush.msrb.mxu0 %v2171_v1  ;;  %474 = vmatpush.msrb.mxu1 %v2173_v2  ;;  %v109_v39 = vld [vmem:[#allocation5 + $0x18] sm:$0xff]  ;;  %v2279_v41 = vld [vmem:[#allocation10 + $0xc8] sm:$0xff]  ;;  %v2285_v43 = vld [vmem:[#allocation10 + $0xd0] sm:$0xff] }
  0x3b   :  { %514 = vmatpush.msrb.mxu3 %v2175_v3  ;;  %494 = vmatpush.msrb.mxu2 %v2177_v4  ;;  %v2283_v42 = vld [vmem:[#allocation10 + $0xd8] sm:$0xff]  ;;  %3168 = vst [vmem:[#allocation20_spill] sm:$0xff] %v2285_v43  ;;  %v2287_v44 = vld [vmem:[#allocation10 + $0xa0] sm:$0xff]  ;;  %v2289_v45 = vld [vmem:[#allocation10 + $0xa8] sm:$0xff] }
  0x3c   :  { %455 = vmatpush.msrb.mxu0 %v2179_v5  ;;  %475 = vmatpush.msrb.mxu1 %v2181_v6  ;;  %3167 = vst [vmem:[#allocation19_spill] sm:$0xff] %v2283_v42  ;;  %v2293_v46 = vld [vmem:[#allocation10 + $0xb8] sm:$0xff]  ;;  %v2295_v47 = vld [vmem:[#allocation10 + $0xb0] sm:$0xff]  ;;  %v2298_v48 = vld [vmem:[#allocation10 + $0x80] sm:$0xff] }
  0x3d   :  { %515 = vmatpush.msrb.mxu3 %v2185_v7  ;;  %495 = vmatpush.msrb.mxu2 %v2187_v8  ;;  %3169 = vst [vmem:[#allocation21_spill] sm:$0xff] %v2287_v44  ;;  %v2300_v49 = vld [vmem:[#allocation10 + $0x88] sm:$0xff]  ;;  %v2305_v50 = vld [vmem:[#allocation10 + $0x98] sm:$0xff]  ;;  %v2307_v51 = vld [vmem:[#allocation10 + $0x90] sm:$0xff] }
  0x3e   :  { %456 = vmatpush.msrb.mxu0 %v2190_v9  ;;  %476 = vmatpush.msrb.mxu1 %v2192_v10  ;;  %3170 = vst [vmem:[#allocation22_spill] sm:$0xff] %v2289_v45  ;;  %v110_v52 = vld [vmem:[#allocation5 + $0x20] sm:$0xff]  ;;  %v2315_v54 = vld [vmem:[#allocation10 + $0x68] sm:$0xff]  ;;  %v2319_v55 = vld [vmem:[#allocation10 + $0x78] sm:$0xff] }
  0x3f   :  { %516 = vmatpush.msrb.mxu3 %v2197_v11  ;;  %496 = vmatpush.msrb.mxu2 %v2199_v12  ;;  %3171 = vst [vmem:[#allocation23_spill] sm:$0xff] %v2293_v46  ;;  %v2313_v53 = vld [vmem:[#allocation10 + $0x60] sm:$0xff]  ;;  %v2321_v56 = vld [vmem:[#allocation10 + $0x70] sm:$0xff]  ;;  %v2325_v58 = vld [vmem:[#allocation10 + $0x48] sm:$0xff] }
  0x40   :  { %207 = vmatmul.f32.gmra.mxu0 %v107_v13  ;;  %248 = vmatmul.f32.gmra.mxu1 %v107_v13  ;;  %3172 = vst [vmem:[#allocation24_spill] sm:$0xff] %v2295_v47  ;;  %v2323_v57 = vld [vmem:[#allocation10 + $0x40] sm:$0xff]  ;;  %v2329_v59 = vld [vmem:[#allocation10 + $0x58] sm:$0xff]  ;;  %v2331_v60 = vld [vmem:[#allocation10 + $0x50] sm:$0xff] }
  0x41   :  { %289 = vmatmul.f32.gmra.mxu2 %v107_v13  ;;  %330 = vmatmul.f32.gmra.mxu3 %v107_v13  ;;  %3173 = vst [vmem:[#allocation25_spill] sm:$0xff] %v2298_v48  ;;  %v2334_v61 = vld [vmem:[#allocation10 + $0x20] sm:$0xff]  ;;  %v2336_v62 = vld [vmem:[#allocation10 + $0x28] sm:$0xff]  ;;  %v2341_v63 = vld [vmem:[#allocation10 + $0x30] sm:$0xff] }
  0x42   :  { %457 = vmatpush.msrb.mxu0 %v2205_v14  ;;  %477 = vmatpush.msrb.mxu1 %v2207_v15  ;;  %3174 = vst [vmem:[#allocation26_spill] sm:$0xff] %v2300_v49  ;;  %v2343_v0 = vld [vmem:[#allocation10 + $0x38] sm:$0xff]  ;;  %v111_v13 = vld [vmem:[#allocation5 + $0x28] sm:$0xff] }
  0x43   :  { %517 = vmatpush.msrb.mxu3 %v2211_v16  ;;  %497 = vmatpush.msrb.mxu2 %v2213_v17  ;;  %3175 = vst [vmem:[#allocation27_spill] sm:$0xff] %v2305_v50 }
  0x44   :  { %458 = vmatpush.msrb.mxu0 %v2215_v18  ;;  %478 = vmatpush.msrb.mxu1 %v2217_v19  ;;  %3176 = vst [vmem:[#allocation28_spill] sm:$0xff] %v2307_v51 }
  0x45   :  { %518 = vmatpush.msrb.mxu3 %v2221_v20  ;;  %498 = vmatpush.msrb.mxu2 %v2223_v21  ;;  %3177 = vst [vmem:[#allocation29_spill] sm:$0xff] %v2313_v53 }
  0x46   :  { %459 = vmatpush.msrb.mxu0 %v2226_v22  ;;  %479 = vmatpush.msrb.mxu1 %v2228_v23  ;;  %3178 = vst [vmem:[#allocation30_spill] sm:$0xff] %v2315_v54 }
  0x47   :  { %519 = vmatpush.msrb.mxu3 %v2233_v24  ;;  %499 = vmatpush.msrb.mxu2 %v2235_v25  ;;  %3179 = vst [vmem:[#allocation31_spill] sm:$0xff] %v2319_v55 }
  0x48   :  { %210 = vmatmul.f32.gmra.mxu0 %v108_v26  ;;  %251 = vmatmul.f32.gmra.mxu1 %v108_v26  ;;  %3180 = vst [vmem:[#allocation32_spill] sm:$0xff] %v2321_v56 }
  0x49   :  { %292 = vmatmul.f32.gmra.mxu2 %v108_v26  ;;  %333 = vmatmul.f32.gmra.mxu3 %v108_v26  ;;  %3181 = vst [vmem:[#allocation33_spill] sm:$0xff] %v2323_v57  ;;  %v2349_v26 = vld [vmem:[#allocation10] sm:$0xff] }
  0x4a   :  { %460 = vmatpush.msrb.mxu0 %v2241_v27  ;;  %480 = vmatpush.msrb.mxu1 %v2243_v28  ;;  %3182 = vst [vmem:[#allocation34_spill] sm:$0xff] %v2325_v58 }
  0x4b   :  { %520 = vmatpush.msrb.mxu3 %v2247_v29  ;;  %500 = vmatpush.msrb.mxu2 %v2249_v30  ;;  %3183 = vst [vmem:[#allocation35_spill] sm:$0xff] %v2329_v59 }
  0x4c   :  { %461 = vmatpush.msrb.mxu0 %v2251_v31  ;;  %481 = vmatpush.msrb.mxu1 %v2253_v32  ;;  %3184 = vst [vmem:[#allocation36_spill] sm:$0xff] %v2331_v60 }
  0x4d   :  { %521 = vmatpush.msrb.mxu3 %v2257_v33  ;;  %501 = vmatpush.msrb.mxu2 %v2259_v34  ;;  %3185 = vst [vmem:[#allocation37_spill] sm:$0xff] %v2334_v61 }
  0x4e   :  { %462 = vmatpush.msrb.mxu0 %v2262_v35  ;;  %482 = vmatpush.msrb.mxu1 %v2264_v36  ;;  %3186 = vst [vmem:[#allocation38_spill] sm:$0xff] %v2336_v62 }
  0x4f   :  { %522 = vmatpush.msrb.mxu3 %v2269_v37  ;;  %502 = vmatpush.msrb.mxu2 %v2271_v38  ;;  %3187 = vst [vmem:[#allocation39_spill] sm:$0xff] %v2341_v63 }
  0x50   :  { %213 = vmatmul.f32.gmra.mxu0 %v109_v39  ;;  %254 = vmatmul.f32.gmra.mxu1 %v109_v39  ;;  %3188 = vst [vmem:[#allocation40_spill] sm:$0xff] %v2343_v0 }
  0x51   :  { %295 = vmatmul.f32.gmra.mxu2 %v109_v39  ;;  %336 = vmatmul.f32.gmra.mxu3 %v109_v39  ;;  %3189 = vst [vmem:[#allocation41_spill] sm:$0xff] %v2349_v26  ;;  %v2351_v39 = vld [vmem:[#allocation10 + $0x8] sm:$0xff] }
  0x52   :  { %463 = vmatpush.msrb.mxu0 %v2277_v40  ;;  %483 = vmatpush.msrb.mxu1 %v2279_v41  ;;  %3190 = vst [vmem:[#allocation42_spill] sm:$0xff] %v2351_v39 }
  0x53   :  { %523 = vmatpush.msrb.mxu3 %v2283_v42  ;;  %503 = vmatpush.msrb.mxu2 %v2285_v43 }
  0x54   :  { %464 = vmatpush.msrb.mxu0 %v2287_v44  ;;  %484 = vmatpush.msrb.mxu1 %v2289_v45 }
  0x55   :  { %524 = vmatpush.msrb.mxu3 %v2293_v46  ;;  %504 = vmatpush.msrb.mxu2 %v2295_v47 }
  0x56   :  { %465 = vmatpush.msrb.mxu0 %v2298_v48  ;;  %485 = vmatpush.msrb.mxu1 %v2300_v49 }
  0x57   :  { %525 = vmatpush.msrb.mxu3 %v2305_v50  ;;  %505 = vmatpush.msrb.mxu2 %v2307_v51 }
  0x58   :  { %216 = vmatmul.f32.gmra.mxu0 %v110_v52  ;;  %257 = vmatmul.f32.gmra.mxu1 %v110_v52 }
  0x59   :  { %298 = vmatmul.f32.gmra.mxu2 %v110_v52  ;;  %339 = vmatmul.f32.gmra.mxu3 %v110_v52  ;;  %v2355_v52 = vld [vmem:[#allocation10 + $0x10] sm:$0xff] }
  0x5a   :  { %466 = vmatpush.msrb.mxu0 %v2313_v53  ;;  %486 = vmatpush.msrb.mxu1 %v2315_v54  ;;  %3191 = vst [vmem:[#allocation43_spill] sm:$0xff] %v2355_v52 }
  0x5b   :  { %526 = vmatpush.msrb.mxu3 %v2319_v55  ;;  %506 = vmatpush.msrb.mxu2 %v2321_v56 }
  0x5c   :  { %467 = vmatpush.msrb.mxu0 %v2323_v57  ;;  %487 = vmatpush.msrb.mxu1 %v2325_v58  ;;  %v2357_v58 = vld [vmem:[#allocation10 + $0x18] sm:$0xff] }
  0x5d   :  { %527 = vmatpush.msrb.mxu3 %v2329_v59  ;;  %507 = vmatpush.msrb.mxu2 %v2331_v60  ;;  %3192 = vst [vmem:[#allocation44_spill] sm:$0xff] %v2357_v58 }
  0x5e   :  { %468 = vmatpush.msrb.mxu0 %v2334_v61  ;;  %488 = vmatpush.msrb.mxu1 %v2336_v62 }
  0x5f   :  { %508 = vmatpush.msrb.mxu2 %v2341_v63  ;;  %528 = vmatpush.msrb.mxu3 %v2343_v0  ;;  %v112_v0 = vld [vmem:[#allocation5 + $0x30] sm:$0xff] }
  0x60   :  { %219 = vmatmul.f32.gmra.mxu0 %v111_v13  ;;  %260 = vmatmul.f32.gmra.mxu1 %v111_v13 }
  0x61   :  { %301 = vmatmul.f32.gmra.mxu2 %v111_v13  ;;  %342 = vmatmul.f32.gmra.mxu3 %v111_v13  ;;  %v113_v13 = vld [vmem:[#allocation5 + $0x38] sm:$0xff] }
  0x62   :  { %469 = vmatpush.msrb.mxu0 %v2349_v26  ;;  %489 = vmatpush.msrb.mxu1 %v2351_v39 }
  0x63   :  { %509 = vmatpush.msrb.mxu2 %v2355_v52  ;;  %529 = vmatpush.msrb.mxu3 %v2357_v58 }
  0x64   :  { %606 = vmatpush.msra.mxu0 %v2171_v1  ;;  %626 = vmatpush.msra.mxu1 %v2173_v2 }
  0x65   :  { %646 = vmatpush.msra.mxu2 %v2177_v4  ;;  %666 = vmatpush.msra.mxu3 %v2175_v3 }
  0x66   :  { %607 = vmatpush.msra.mxu0 %v2179_v5  ;;  %627 = vmatpush.msra.mxu1 %v2181_v6 }
  0x67   :  { %647 = vmatpush.msra.mxu2 %v2187_v8  ;;  %667 = vmatpush.msra.mxu3 %v2185_v7 }
  0x68   :  { %222 = vmatmul.f32.gmra.mxu0 %v112_v0  ;;  %263 = vmatmul.f32.gmra.mxu1 %v112_v0 }
  0x69   :  { %304 = vmatmul.f32.gmra.mxu2 %v112_v0  ;;  %345 = vmatmul.f32.gmra.mxu3 %v112_v0  ;;  %v2119_v0 = vmov 0.0  }
  0x6a   :  { %608 = vmatpush.msra.mxu0 %v2190_v9  ;;  %628 = vmatpush.msra.mxu1 %v2192_v10 }
  0x6b   :  { %648 = vmatpush.msra.mxu2 %v2199_v12  ;;  %668 = vmatpush.msra.mxu3 %v2197_v11 }
  0x6c   :  { %609 = vmatpush.msra.mxu0 %v2205_v14  ;;  %629 = vmatpush.msra.mxu1 %v2207_v15 }
  0x6d   :  { %649 = vmatpush.msra.mxu2 %v2213_v17  ;;  %669 = vmatpush.msra.mxu3 %v2211_v16 }
  0x6e   :  { %610 = vmatpush.msra.mxu0 %v2215_v18  ;;  %630 = vmatpush.msra.mxu1 %v2217_v19 }
  0x6f   :  { %650 = vmatpush.msra.mxu2 %v2223_v21  ;;  %670 = vmatpush.msra.mxu3 %v2221_v20 }
  0x70   :  { %225 = vmatmul.f32.gmra.mxu0 %v113_v13  ;;  %266 = vmatmul.f32.gmra.mxu1 %v113_v13 }
  0x71   :  { %307 = vmatmul.f32.gmra.mxu2 %v113_v13  ;;  %348 = vmatmul.f32.gmra.mxu3 %v113_v13  ;;  %v3193_v13 = vld [vmem:[#allocation34_spill] sm:$0xff] }
  0x72   :  { %611 = vmatpush.msra.mxu0 %v2226_v22  ;;  %631 = vmatpush.msra.mxu1 %v2228_v23 }
  0x73   :  { %651 = vmatpush.msra.mxu2 %v2235_v25  ;;  %671 = vmatpush.msra.mxu3 %v2233_v24 }
  0x74   :  { %612 = vmatpush.msra.mxu0 %v2241_v27  ;;  %632 = vmatpush.msra.mxu1 %v2243_v28 }
  0x75   :  { %652 = vmatpush.msra.mxu2 %v2249_v30  ;;  %672 = vmatpush.msra.mxu3 %v2247_v29 }
  0x76   :  { %613 = vmatpush.msra.mxu0 %v2251_v31  ;;  %633 = vmatpush.msra.mxu1 %v2253_v32 }
  0x77   :  { %653 = vmatpush.msra.mxu2 %v2259_v34  ;;  %673 = vmatpush.msra.mxu3 %v2257_v33 }
  0x78   :  { %470 = vmatmul.f32.vlgmr.msrb.gmra.mxu0 %v2119_v0  ;;  %490 = vmatmul.f32.vlgmr.msrb.gmra.mxu1 %v2119_v0 }
  0x79   :  { %510 = vmatmul.f32.vlgmr.msrb.gmra.mxu2 %v2119_v0  ;;  %530 = vmatmul.f32.vlgmr.msrb.gmra.mxu3 %v2119_v0  ;;  %v3194_v0 = vld [vmem:[#allocation40_spill] sm:$0xff] }
  0x7a   :  { %614 = vmatpush.msra.mxu0 %v2262_v35  ;;  %634 = vmatpush.msra.mxu1 %v2264_v36 }
  0x7b   :  { %654 = vmatpush.msra.mxu2 %v2271_v38  ;;  %674 = vmatpush.msra.mxu3 %v2269_v37 }
  0x7c   :  { %615 = vmatpush.msra.mxu0 %v2277_v40  ;;  %635 = vmatpush.msra.mxu1 %v2279_v41 }
  0x7d   :  { %655 = vmatpush.msra.mxu2 %v2285_v43  ;;  %675 = vmatpush.msra.mxu3 %v2283_v42 }
  0x7e   :  { %616 = vmatpush.msra.mxu0 %v2287_v44  ;;  %636 = vmatpush.msra.mxu1 %v2289_v45 }
  0x7f   :  { %656 = vmatpush.msra.mxu2 %v2295_v47  ;;  %676 = vmatpush.msra.mxu3 %v2293_v46 }
  0x80   :  { %617 = vmatpush.msra.mxu0 %v2298_v48  ;;  %637 = vmatpush.msra.mxu1 %v2300_v49 }
  0x81   :  { %657 = vmatpush.msra.mxu2 %v2307_v51  ;;  %677 = vmatpush.msra.mxu3 %v2305_v50 }
  0x82   :  { %618 = vmatpush.msra.mxu0 %v2313_v53  ;;  %638 = vmatpush.msra.mxu1 %v2315_v54 }
  0x83   :  { %658 = vmatpush.msra.mxu2 %v2321_v56  ;;  %678 = vmatpush.msra.mxu3 %v2319_v55 }
  0x84   :  { %619 = vmatpush.msra.mxu0 %v2323_v57  ;;  %639 = vmatpush.msra.mxu1 %v3193_v13 }
  0x85   :  { %659 = vmatpush.msra.mxu2 %v2331_v60  ;;  %679 = vmatpush.msra.mxu3 %v2329_v59 }
  0x86   :  { %620 = vmatpush.msra.mxu0 %v2334_v61  ;;  %640 = vmatpush.msra.mxu1 %v2336_v62 }
  0x87   :  { %660 = vmatpush.msra.mxu2 %v2341_v63  ;;  %680 = vmatpush.msra.mxu3 %v3194_v0 }
  0x88   :  { %621 = vmatpush.msra.mxu0 %v2349_v26  ;;  %641 = vmatpush.msra.mxu1 %v2351_v39 }
  0x89   :  { %661 = vmatpush.msra.mxu2 %v2355_v52  ;;  %681 = vmatpush.msra.mxu3 %v2357_v58 }
  0x8a   :  { %758 = vmatpush.msrb.mxu0 %v2171_v1  ;;  %778 = vmatpush.msrb.mxu1 %v2173_v2 }
  0x8b   :  { %798 = vmatpush.msrb.mxu2 %v2177_v4  ;;  %818 = vmatpush.msrb.mxu3 %v2175_v3 }
  0x8c   :  { %759 = vmatpush.msrb.mxu0 %v2179_v5  ;;  %779 = vmatpush.msrb.mxu1 %v2181_v6 }
  0x8d   :  { %799 = vmatpush.msrb.mxu2 %v2187_v8  ;;  %819 = vmatpush.msrb.mxu3 %v2185_v7 }
  0x8e   :  { %760 = vmatpush.msrb.mxu0 %v2190_v9  ;;  %780 = vmatpush.msrb.mxu1 %v2192_v10 }
  0x8f   :  { %800 = vmatpush.msrb.mxu2 %v2199_v12  ;;  %820 = vmatpush.msrb.mxu3 %v2197_v11 }
  0x90   :  { %761 = vmatpush.msrb.mxu0 %v2205_v14  ;;  %781 = vmatpush.msrb.mxu1 %v2207_v15 }
  0x91   :  { %801 = vmatpush.msrb.mxu2 %v2213_v17  ;;  %821 = vmatpush.msrb.mxu3 %v2211_v16 }
  0x92   :  { %762 = vmatpush.msrb.mxu0 %v2215_v18  ;;  %782 = vmatpush.msrb.mxu1 %v2217_v19 }
  0x93   :  { %802 = vmatpush.msrb.mxu2 %v2223_v21  ;;  %822 = vmatpush.msrb.mxu3 %v2221_v20 }
  0x94   :  { %763 = vmatpush.msrb.mxu0 %v2226_v22  ;;  %783 = vmatpush.msrb.mxu1 %v2228_v23 }
  0x95   :  { %803 = vmatpush.msrb.mxu2 %v2235_v25  ;;  %823 = vmatpush.msrb.mxu3 %v2233_v24 }
  0x96   :  { %764 = vmatpush.msrb.mxu0 %v2241_v27  ;;  %784 = vmatpush.msrb.mxu1 %v2243_v28 }
  0x97   :  { %804 = vmatpush.msrb.mxu2 %v2249_v30  ;;  %824 = vmatpush.msrb.mxu3 %v2247_v29 }
  0x98   :  { %765 = vmatpush.msrb.mxu0 %v2251_v31  ;;  %785 = vmatpush.msrb.mxu1 %v2253_v32 }
  0x99   :  { %805 = vmatpush.msrb.mxu2 %v2259_v34  ;;  %825 = vmatpush.msrb.mxu3 %v2257_v33 }
  0x9a   :  { %766 = vmatpush.msrb.mxu0 %v2262_v35  ;;  %786 = vmatpush.msrb.mxu1 %v2264_v36 }
  0x9b   :  { %806 = vmatpush.msrb.mxu2 %v2271_v38  ;;  %826 = vmatpush.msrb.mxu3 %v2269_v37 }
  0x9c   :  { %767 = vmatpush.msrb.mxu0 %v2277_v40  ;;  %787 = vmatpush.msrb.mxu1 %v2279_v41 }
  0x9d   :  { %807 = vmatpush.msrb.mxu2 %v2285_v43  ;;  %827 = vmatpush.msrb.mxu3 %v2283_v42 }
  0x9e   :  { %768 = vmatpush.msrb.mxu0 %v2287_v44  ;;  %788 = vmatpush.msrb.mxu1 %v2289_v45 }
  0x9f   :  { %808 = vmatpush.msrb.mxu2 %v2295_v47  ;;  %828 = vmatpush.msrb.mxu3 %v2293_v46 }
  0xa0   :  { %769 = vmatpush.msrb.mxu0 %v2298_v48  ;;  %789 = vmatpush.msrb.mxu1 %v2300_v49 }
  0xa1   :  { %809 = vmatpush.msrb.mxu2 %v2307_v51  ;;  %829 = vmatpush.msrb.mxu3 %v2305_v50 }
  0xa2   :  { %770 = vmatpush.msrb.mxu0 %v2313_v53  ;;  %790 = vmatpush.msrb.mxu1 %v2315_v54 }
  0xa3   :  { %810 = vmatpush.msrb.mxu2 %v2321_v56  ;;  %830 = vmatpush.msrb.mxu3 %v2319_v55 }
  0xa4   :  { %771 = vmatpush.msrb.mxu0 %v2323_v57  ;;  %791 = vmatpush.msrb.mxu1 %v3193_v13  ;;  %v178_v57 = vld [vmem:[#allocation11] sm:$0xf] }
  0xa5   :  { %811 = vmatpush.msrb.mxu2 %v2331_v60  ;;  %831 = vmatpush.msrb.mxu3 %v2329_v59  ;;  %v180_v59 = vperm.slane %v178_v57, 0  ;;  %v181_v55 = vperm.slane %v178_v57, 1 }
  0xa6   :  { %772 = vmatpush.msrb.mxu0 %v2334_v61  ;;  %792 = vmatpush.msrb.mxu1 %v2336_v62 }
  0xa7   :  { %812 = vmatpush.msrb.mxu2 %v2341_v63  ;;  %832 = vmatpush.msrb.mxu3 %v3194_v0 }
  0xa8   :  { %773 = vmatpush.msrb.mxu0 %v2349_v26  ;;  %793 = vmatpush.msrb.mxu1 %v2351_v39  ;;  %v2499_v39 = vperm.slane %v178_v57, 2 }
  0xa9   :  { %813 = vmatpush.msrb.mxu2 %v2355_v52  ;;  %833 = vmatpush.msrb.mxu3 %v2357_v58  ;;  %v183_v52 = vperm.slane %v178_v57, 3 }
  0xb5   :  { %v205_v13 = vpop.f32.mrf.mxu0  ;;  %v246_v60 = vpop.f32.mrf.mxu1 }
  0xbc   :  { %v2491_v61 = vpop.f32.mrf.mxu2  ;;  %v2493_v62 = vpop.f32.mrf.mxu3 }
  0xbd   :  { %v208_v63 = vpop.f32.mrf.mxu0  ;;  %v249_v56 = vpop.f32.mrf.mxu1 }
  0xbe   :  { %v2495_v0 = vadd.f32 %v208_v63, %v180_v59  ;;  %v2497_v26 = vadd.f32 %v249_v56, %v181_v55 }
  0xc0   :  { %3195 = vst [vmem:[#allocation45_spill] sm:$0xff] %v2495_v0 }
  0xc1   :  { %3196 = vst [vmem:[#allocation46_spill] sm:$0xff] %v2497_v26 }
  0xc4   :  { %v290_v54 = vpop.f32.mrf.mxu2  ;;  %v331_v58 = vpop.f32.mrf.mxu3 }
  0xc5   :  { %v2502_v53 = vadd.f32 %v290_v54, %v2499_v39  ;;  %v2504_v50 = vadd.f32 %v331_v58, %v183_v52  ;;  %v211_v51 = vpop.f32.mrf.mxu0  ;;  %v252_v49 = vpop.f32.mrf.mxu1 }
  0xc6   :  { %v2506_v48 = vadd.f32 %v211_v51, %v180_v59  ;;  %v2508_v46 = vadd.f32 %v252_v49, %v181_v55 }
  0xc7   :  { %3197 = vst [vmem:[#allocation47_spill] sm:$0xff] %v2502_v53 }
  0xc8   :  { %3198 = vst [vmem:[#allocation48_spill] sm:$0xff] %v2504_v50 }
  0xc9   :  { %3199 = vst [vmem:[#allocation49_spill] sm:$0xff] %v2506_v48 }
  0xca   :  { %3200 = vst [vmem:[#allocation50_spill] sm:$0xff] %v2508_v46 }
  0xcc   :  { %v293_v63 = vpop.f32.mrf.mxu2  ;;  %v334_v0 = vpop.f32.mrf.mxu3 }
  0xcd   :  { %v2511_v56 = vadd.f32 %v293_v63, %v2499_v39  ;;  %v2513_v26 = vadd.f32 %v334_v0, %v183_v52  ;;  %v214_v57 = vpop.f32.mrf.mxu0  ;;  %v255_v47 = vpop.f32.mrf.mxu1 }
  0xce   :  { %v2515_v45 = vadd.f32 %v214_v57, %v180_v59  ;;  %v2517_v54 = vadd.f32 %v255_v47, %v181_v55 }
  0xcf   :  { %3201 = vst [vmem:[#allocation51_spill] sm:$0xff] %v2511_v56 }
  0xd0   :  { %3202 = vst [vmem:[#allocation52_spill] sm:$0xff] %v2513_v26 }
  0xd1   :  { %3203 = vst [vmem:[#allocation53_spill] sm:$0xff] %v2515_v45 }
  0xd2   :  { %3204 = vst [vmem:[#allocation54_spill] sm:$0xff] %v2517_v54 }
  0xd4   :  { %v296_v58 = vpop.f32.mrf.mxu2  ;;  %v337_v53 = vpop.f32.mrf.mxu3 }
  0xd5   :  { %v2520_v51 = vadd.f32 %v296_v58, %v2499_v39  ;;  %v2522_v49 = vadd.f32 %v337_v53, %v183_v52  ;;  %v217_v46 = vpop.f32.mrf.mxu0  ;;  %v258_v48 = vpop.f32.mrf.mxu1 }
  0xd6   :  { %v2524_v50 = vadd.f32 %v217_v46, %v180_v59  ;;  %v2526_v63 = vadd.f32 %v258_v48, %v181_v55 }
  0xd7   :  { %3205 = vst [vmem:[#allocation55_spill] sm:$0xff] %v2520_v51 }
  0xd8   :  { %3206 = vst [vmem:[#allocation56_spill] sm:$0xff] %v2522_v49 }
  0xd9   :  { %3207 = vst [vmem:[#allocation57_spill] sm:$0xff] %v2524_v50 }
  0xda   :  { %3208 = vst [vmem:[#allocation58_spill] sm:$0xff] %v2526_v63 }
  0xdc   :  { %v299_v0 = vpop.f32.mrf.mxu2  ;;  %v340_v56 = vpop.f32.mrf.mxu3 }
  0xdd   :  { %v2529_v57 = vadd.f32 %v299_v0, %v2499_v39  ;;  %v2531_v47 = vadd.f32 %v340_v56, %v183_v52  ;;  %v220_v54 = vpop.f32.mrf.mxu0  ;;  %v261_v45 = vpop.f32.mrf.mxu1 }
  0xde   :  { %v2533_v26 = vadd.f32 %v220_v54, %v180_v59  ;;  %v2535_v58 = vadd.f32 %v261_v45, %v181_v55 }
  0xdf   :  { %3209 = vst [vmem:[#allocation59_spill] sm:$0xff] %v2529_v57 }
  0xe0   :  { %3210 = vst [vmem:[#allocation60_spill] sm:$0xff] %v2531_v47 }
  0xe1   :  { %3211 = vst [vmem:[#allocation61_spill] sm:$0xff] %v2533_v26 }
  0xe2   :  { %3212 = vst [vmem:[#allocation62_spill] sm:$0xff] %v2535_v58 }
  0xe4   :  { %v302_v53 = vpop.f32.mrf.mxu2  ;;  %v343_v51 = vpop.f32.mrf.mxu3 }
  0xe5   :  { %v2538_v46 = vadd.f32 %v302_v53, %v2499_v39  ;;  %v2540_v48 = vadd.f32 %v343_v51, %v183_v52  ;;  %v223_v63 = vpop.f32.mrf.mxu0  ;;  %v264_v50 = vpop.f32.mrf.mxu1  ;;  %v206_v51 = vadd.f32 %v205_v13, %v180_v59 }
  0xe6   :  { %v2542_v49 = vadd.f32 %v223_v63, %v180_v59  ;;  %v2544_v0 = vadd.f32 %v264_v50, %v181_v55 }
  0xe7   :  { %3213 = vst [vmem:[#allocation63_spill] sm:$0xff] %v2538_v46  ;;  %v247_v46 = vadd.f32 %v246_v60, %v181_v55 }
  0xe8   :  { %3214 = vst [vmem:[#allocation64_spill] sm:$0xff] %v2540_v48 }
  0xe9   :  { %3215 = vst [vmem:[#allocation65_spill] sm:$0xff] %v2542_v49 }
  0xea   :  { %3216 = vst [vmem:[#allocation66_spill] sm:$0xff] %v2544_v0 }
  0xec   :  { %v305_v56 = vpop.f32.mrf.mxu2  ;;  %v346_v57 = vpop.f32.mrf.mxu3 }
  0xed   :  { %v2547_v54 = vadd.f32 %v305_v56, %v2499_v39  ;;  %v2549_v45 = vadd.f32 %v346_v57, %v183_v52  ;;  %v226_v58 = vpop.f32.mrf.mxu0  ;;  %v267_v26 = vpop.f32.mrf.mxu1 }
  0xee   :  { %v2551_v47 = vadd.f32 %v226_v58, %v180_v59  ;;  %v2553_v53 = vadd.f32 %v267_v26, %v181_v55  ;;  %v329_v58 = vadd.f32 %v2493_v62, %v183_v52 }
  0xef   :  { %3217 = vst [vmem:[#allocation67_spill] sm:$0xff] %v2547_v54 }
  0xf0   :  { %3218 = vst [vmem:[#allocation68_spill] sm:$0xff] %v2549_v45 }
  0xf1   :  { %3219 = vst [vmem:[#allocation69_spill] sm:$0xff] %v2551_v47 }
  0xf2   :  { %3220 = vst [vmem:[#allocation70_spill] sm:$0xff] %v2553_v53 }
  0xf4   :  { %v308_v48 = vpop.f32.mrf.mxu2  ;;  %v349_v63 = vpop.f32.mrf.mxu3 }
  0xf5   :  { %v2556_v50 = vadd.f32 %v308_v48, %v2499_v39  ;;  %v2558_v0 = vadd.f32 %v349_v63, %v183_v52  ;;  %v471_v49 = vpop.f32.mrf.mxu0  ;;  %v491_v56 = vpop.f32.mrf.mxu1 }
  0xf6   :  { %v534_v54 = vadd.f32 %v471_v49, %v206_v51  ;;  %v535_v57 = vadd.f32 %v491_v56, %v247_v46  ;;  %v288_v49 = vadd.f32 %v2491_v61, %v2499_v39 }
  0xf7   :  { %3221 = vst [vmem:[#allocation71_spill] sm:$0xff] %v2556_v50 }
  0xf8   :  { %3222 = vst [vmem:[#allocation72_spill] sm:$0xff] %v2558_v0  ;;  %v1730_v45 = vmul.f32 -1.442695, %v534_v54  ;;  %v1731_v44 = vmul.f32 -1.442695, %v535_v57 }
  0xfa   :  { %1766 = vpow2.f32 %v1730_v45 }
  0xfb   :  { %1768 = vpow2.f32 %v1731_v44 }
  0xfc   :  { %v531_v26 = vpop.f32.mrf.mxu3  ;;  %v511_v63 = vpop.f32.mrf.mxu2 }
  0xfd   :  { %v537_v59 = vadd.f32 %v531_v26, %v329_v58  ;;  %v536_v45 = vadd.f32 %v511_v63, %v288_v49 }
  0xff   :  { %v1732_v55 = vmul.f32 -1.442695, %v537_v59 }
 0x100   :  { %v1767_v60 = vpop.eup %1766 }
 0x101   :  { %v1769_v13 = vpop.eup %1768  ;;  %v541_v53 = vadd.f32 1.0, %v1767_v60  ;;  %1770 = vpow2.f32 %v1732_v55 }
 0x102   :  { %v560_v48 = vadd.f32 1.0, %v1769_v13 }
 0x103   :  { %1772 = vrcp.f32 %v541_v53  ;;  %v553_v57 = vand.u32 2147483648, %v541_v53  ;;  %v551_v59 = vand.u32 2147483647, %v541_v53  ;;  %vm547_vm2 = vweird.f32 %v541_v53 }
 0x104   :  { %1774 = vrcp.f32 %v560_v48  ;;  %v572_v58 = vand.u32 2147483648, %v560_v48  ;;  %v570_v60 = vand.u32 2147483647, %v560_v48  ;;  %vm566_vm3 = vweird.f32 %v560_v48 }
 0x105   :  { %v554_v39 = vor.u32 1.1754944e-38, %v553_v57  ;;  %vm552_vm5 = vcmp.eq.f32.partialorder %v551_v59, 8.507059e+37 }
 0x106   :  { %v573_v49 = vor.u32 1.1754944e-38, %v572_v58  ;;  %vm571_vm7 = vcmp.eq.f32.partialorder %v570_v60, 8.507059e+37 }
 0x107   :  { %v1771_v50 = vpop.eup %1770 }
 0x108   :  { %v580_v46 = vadd.f32 1.0, %v1771_v50 }
 0x109   :  { %v1773_v54 = vpop.eup %1772 }
 0x10a   :  { %v1775_v62 = vpop.eup %1774  ;;  %v543_v44 = vmul.f32 %v1773_v54, %v541_v53  ;;  %1776 = vrcp.f32 %v580_v46  ;;  %vm548_vm0 = vweird.f32 %v1773_v54  ;;  %vm586_vm9 = vweird.f32 %v580_v46 }
 0x10b   :  { %v562_v52 = vmul.f32 %v1775_v62, %v560_v48  ;;  %1778 = vtanh.f32 %v536_v45  ;;  %vm567_vm1 = vweird.f32 %v1775_v62  ;;  %vm549_vm4 = vmor %vm547_vm2, %vm548_vm0  ;;  %v592_v48 = vand.u32 2147483648, %v580_v46 }
 0x10c   :  { %v544_v51 = vsub.f32 1.0, %v543_v44  ;;  %vm568_vm6 = vmor %vm566_vm3, %vm567_vm1 }
 0x10d   :  { %v563_v56 = vsub.f32 1.0, %v562_v52  ;;  %v593_v58 = vor.u32 1.1754944e-38, %v592_v48 }
 0x10e   :  { %v545_v26 = vmul.f32 %v1773_v54, %v544_v51 }
 0x10f   :  { %v564_v55 = vmul.f32 %v1775_v62, %v563_v56 }
 0x110   :  { %v1777_v13 = vpop.eup %1776  ;;  %v546_v61 = vadd.f32 %v1773_v54, %v545_v26 }
 0x111   :  { %v565_v50 = vadd.f32 %v1775_v62, %v564_v55  ;;  %v582_v63 = vmul.f32 %v1777_v13, %v580_v46  ;;  %v1779_v45 = vpop.eup %1778  ;;  %vm587_vm8 = vweird.f32 %v1777_v13 }
 0x112   :  { %v550_v44 = vsel %vm549_vm4, %v1773_v54, %v546_v61  ;;  %v590_v54 = vand.u32 2147483647, %v580_v46  ;;  %vm588_vm10 = vmor %vm586_vm9, %vm587_vm8 }
 0x113   :  { %v555_v52 = vsel %vm552_vm5, %v554_v39, %v550_v44  ;;  %v569_v51 = vsel %vm568_vm6, %v1775_v62, %v565_v50  ;;  %v583_v0 = vsub.f32 1.0, %v582_v63  ;;  %v3252_v39 = vld [vmem:[#allocation47_spill] sm:$0xff] }
 0x114   :  { %v574_v56 = vsel %vm571_vm7, %v573_v49, %v569_v51  ;;  %v597_v47 = vmul.f32 %v1779_v45, %v555_v52  ;;  %vm591_vm11 = vcmp.eq.f32.partialorder %v590_v54, 8.507059e+37 }
 0x115   :  { %v596_v42 = vmul.f32 0.0, %v574_v56  ;;  %v584_v43 = vmul.f32 %v1777_v13, %v583_v0 }
 0x117   :  { %v2563_v26 = vadd.f32 %v597_v47, %v596_v42  ;;  %v585_v53 = vadd.f32 %v1777_v13, %v584_v43 }
 0x119   :  { %1780 = vtanh.f32 %v2563_v26  ;;  %v589_v57 = vsel %vm588_vm10, %v1777_v13, %v585_v53 }
 0x11a   :  { %v594_v59 = vsel %vm591_vm11, %v593_v58, %v589_v57 }
 0x11f   :  { %v1781_v62 = vpop.eup %1780 }
 0x120   :  { %v600_v55 = vmul.f32 %v1781_v62, %v594_v59 }
 0x122   :  { %622 = vmatmul.f32.vlgmr.msra.gmra.mxu0 %v600_v55  ;;  %642 = vmatmul.f32.vlgmr.msra.gmra.mxu1 %v600_v55 }
 0x123   :  { %662 = vmatmul.f32.vlgmr.msra.gmra.mxu2 %v600_v55  ;;  %682 = vmatmul.f32.vlgmr.msra.gmra.mxu3 %v600_v55 }
 0x124   :  { %910 = vmatpush.msra.mxu0 %v2171_v1  ;;  %930 = vmatpush.msra.mxu1 %v2173_v2  ;;  %v3223_v1 = vld [vmem:[#allocation20_spill] sm:$0xff]  ;;  %v3224_v2 = vld [vmem:[#allocation19_spill] sm:$0xff] }
 0x125   :  { %950 = vmatpush.msra.mxu2 %v2177_v4  ;;  %970 = vmatpush.msra.mxu3 %v2175_v3  ;;  %v3225_v3 = vld [vmem:[#allocation21_spill] sm:$0xff]  ;;  %v3226_v4 = vld [vmem:[#allocation22_spill] sm:$0xff] }
 0x126   :  { %911 = vmatpush.msra.mxu0 %v2179_v5  ;;  %931 = vmatpush.msra.mxu1 %v2181_v6  ;;  %v3227_v5 = vld [vmem:[#allocation24_spill] sm:$0xff]  ;;  %v3228_v6 = vld [vmem:[#allocation23_spill] sm:$0xff] }
 0x127   :  { %951 = vmatpush.msra.mxu2 %v2187_v8  ;;  %971 = vmatpush.msra.mxu3 %v2185_v7  ;;  %v3229_v7 = vld [vmem:[#allocation25_spill] sm:$0xff]  ;;  %v3230_v8 = vld [vmem:[#allocation26_spill] sm:$0xff] }
 0x128   :  { %912 = vmatpush.msra.mxu0 %v2190_v9  ;;  %932 = vmatpush.msra.mxu1 %v2192_v10  ;;  %v3231_v9 = vld [vmem:[#allocation28_spill] sm:$0xff]  ;;  %v3232_v10 = vld [vmem:[#allocation27_spill] sm:$0xff] }
 0x129   :  { %952 = vmatpush.msra.mxu2 %v2199_v12  ;;  %972 = vmatpush.msra.mxu3 %v2197_v11  ;;  %v3233_v11 = vld [vmem:[#allocation29_spill] sm:$0xff]  ;;  %v3234_v12 = vld [vmem:[#allocation30_spill] sm:$0xff] }
 0x12a   :  { %913 = vmatpush.msra.mxu0 %v2205_v14  ;;  %933 = vmatpush.msra.mxu1 %v2207_v15  ;;  %v3235_v14 = vld [vmem:[#allocation32_spill] sm:$0xff]  ;;  %v3236_v15 = vld [vmem:[#allocation31_spill] sm:$0xff] }
 0x12b   :  { %953 = vmatpush.msra.mxu2 %v2213_v17  ;;  %973 = vmatpush.msra.mxu3 %v2211_v16  ;;  %v3237_v16 = vld [vmem:[#allocation33_spill] sm:$0xff]  ;;  %v3238_v17 = vld [vmem:[#allocation34_spill] sm:$0xff] }
 0x12c   :  { %914 = vmatpush.msra.mxu0 %v2215_v18  ;;  %934 = vmatpush.msra.mxu1 %v2217_v19  ;;  %v3239_v18 = vld [vmem:[#allocation36_spill] sm:$0xff]  ;;  %v3240_v19 = vld [vmem:[#allocation35_spill] sm:$0xff] }
 0x12d   :  { %954 = vmatpush.msra.mxu2 %v2223_v21  ;;  %974 = vmatpush.msra.mxu3 %v2221_v20  ;;  %v3241_v20 = vld [vmem:[#allocation37_spill] sm:$0xff]  ;;  %v3242_v21 = vld [vmem:[#allocation38_spill] sm:$0xff] }
 0x12e   :  { %915 = vmatpush.msra.mxu0 %v2226_v22  ;;  %935 = vmatpush.msra.mxu1 %v2228_v23  ;;  %v3243_v22 = vld [vmem:[#allocation39_spill] sm:$0xff]  ;;  %v3244_v23 = vld [vmem:[#allocation40_spill] sm:$0xff] }
 0x12f   :  { %955 = vmatpush.msra.mxu2 %v2235_v25  ;;  %975 = vmatpush.msra.mxu3 %v2233_v24  ;;  %v3245_v24 = vld [vmem:[#allocation41_spill] sm:$0xff]  ;;  %v3246_v25 = vld [vmem:[#allocation42_spill] sm:$0xff] }
 0x130   :  { %916 = vmatpush.msra.mxu0 %v2241_v27  ;;  %936 = vmatpush.msra.mxu1 %v2243_v28  ;;  %v3247_v27 = vld [vmem:[#allocation43_spill] sm:$0xff]  ;;  %v3248_v28 = vld [vmem:[#allocation44_spill] sm:$0xff] }
 0x131   :  { %956 = vmatpush.msra.mxu2 %v2249_v30  ;;  %976 = vmatpush.msra.mxu3 %v2247_v29 }
 0x132   :  { %917 = vmatpush.msra.mxu0 %v2251_v31  ;;  %937 = vmatpush.msra.mxu1 %v2253_v32  ;;  %v3249_v31 = vld [vmem:[#allocation45_spill] sm:$0xff] }
 0x133   :  { %957 = vmatpush.msra.mxu2 %v2259_v34  ;;  %977 = vmatpush.msra.mxu3 %v2257_v33  ;;  %v3250_v33 = vld [vmem:[#allocation46_spill] sm:$0xff] }
 0x134   :  { %918 = vmatpush.msra.mxu0 %v2262_v35  ;;  %938 = vmatpush.msra.mxu1 %v2264_v36 }
 0x135   :  { %958 = vmatpush.msra.mxu2 %v2271_v38  ;;  %978 = vmatpush.msra.mxu3 %v2269_v37  ;;  %v3251_v38 = vld [vmem:[#allocation48_spill] sm:$0xff] }
 0x136   :  { %919 = vmatpush.msra.mxu0 %v2277_v40  ;;  %939 = vmatpush.msra.mxu1 %v2279_v41 }
 0x137   :  { %959 = vmatpush.msra.mxu2 %v3223_v1  ;;  %979 = vmatpush.msra.mxu3 %v3224_v2 }
 0x138   :  { %920 = vmatpush.msra.mxu0 %v3225_v3  ;;  %940 = vmatpush.msra.mxu1 %v3226_v4 }
 0x139   :  { %960 = vmatpush.msra.mxu2 %v3227_v5  ;;  %980 = vmatpush.msra.mxu3 %v3228_v6 }
 0x13a   :  { %921 = vmatpush.msra.mxu0 %v3229_v7  ;;  %941 = vmatpush.msra.mxu1 %v3230_v8 }
 0x13b   :  { %961 = vmatpush.msra.mxu2 %v3231_v9  ;;  %981 = vmatpush.msra.mxu3 %v3232_v10 }
 0x13c   :  { %922 = vmatpush.msra.mxu0 %v3233_v11  ;;  %942 = vmatpush.msra.mxu1 %v3234_v12 }
 0x13d   :  { %962 = vmatpush.msra.mxu2 %v3235_v14  ;;  %982 = vmatpush.msra.mxu3 %v3236_v15 }
 0x13e   :  { %923 = vmatpush.msra.mxu0 %v3237_v16  ;;  %943 = vmatpush.msra.mxu1 %v3238_v17 }
 0x13f   :  { %963 = vmatpush.msra.mxu2 %v3239_v18  ;;  %983 = vmatpush.msra.mxu3 %v3240_v19 }
 0x140   :  { %924 = vmatpush.msra.mxu0 %v3241_v20  ;;  %944 = vmatpush.msra.mxu1 %v3242_v21 }
 0x141   :  { %964 = vmatpush.msra.mxu2 %v3243_v22  ;;  %984 = vmatpush.msra.mxu3 %v3244_v23 }
 0x142   :  { %925 = vmatpush.msra.mxu0 %v3245_v24  ;;  %945 = vmatpush.msra.mxu1 %v3246_v25 }
 0x143   :  { %965 = vmatpush.msra.mxu2 %v3247_v27  ;;  %985 = vmatpush.msra.mxu3 %v3248_v28 }
 0x19f   :  { %v623_v29 = vpop.f32.mrf.mxu0  ;;  %v643_v30 = vpop.f32.mrf.mxu1 }
 0x1a0   :  { %v686_v32 = vadd.f32 %v623_v29, %v3249_v31  ;;  %v687_v34 = vadd.f32 %v643_v30, %v3250_v33  ;;  %v2641_v29 = vld [vmem:[#allocation10 + $0x1e8] sm:$0xff]  ;;  %v2644_v30 = vld [vmem:[#allocation10 + $0x1f0] sm:$0xff]  ;;  %v2647_v31 = vld [vmem:[#allocation10 + $0x1f8] sm:$0xff] }
 0x1a1   :  { %v2653_v33 = vld [vmem:[#allocation10 + $0x1c8] sm:$0xff] }
 0x1a2   :  { %v1733_v35 = vmul.f32 -1.442695, %v686_v32  ;;  %v1734_v36 = vmul.f32 -1.442695, %v687_v34  ;;  %v2650_v32 = vld [vmem:[#allocation10 + $0x1c0] sm:$0xff]  ;;  %v2656_v34 = vld [vmem:[#allocation10 + $0x1d0] sm:$0xff] }
 0x1a4   :  { %1782 = vpow2.f32 %v1733_v35  ;;  %v2659_v35 = vld [vmem:[#allocation10 + $0x1d8] sm:$0xff] }
 0x1a5   :  { %1784 = vpow2.f32 %v1734_v36  ;;  %v2662_v36 = vld [vmem:[#allocation10 + $0x1a0] sm:$0xff] }
 0x1a6   :  { %v683_v37 = vpop.f32.mrf.mxu3  ;;  %v663_v46 = vpop.f32.mrf.mxu2 }
 0x1a7   :  { %v689_v40 = vadd.f32 %v683_v37, %v3251_v38  ;;  %v688_v50 = vadd.f32 %v663_v46, %v3252_v39  ;;  %v2665_v37 = vld [vmem:[#allocation10 + $0x1a8] sm:$0xff]  ;;  %v2668_v38 = vld [vmem:[#allocation10 + $0x1b0] sm:$0xff] }
 0x1a8   :  { %v2689_v46 = vld [vmem:[#allocation10 + $0x168] sm:$0xff] }
 0x1a9   :  { %v1735_v41 = vmul.f32 -1.442695, %v689_v40  ;;  %v2671_v40 = vld [vmem:[#allocation10 + $0x1b8] sm:$0xff]  ;;  %v2701_v39 = vld [vmem:[#allocation10 + $0x148] sm:$0xff] }
 0x1aa   :  { %v1783_v42 = vpop.eup %1782 }
 0x1ab   :  { %v1785_v43 = vpop.eup %1784  ;;  %v693_v47 = vadd.f32 1.0, %v1783_v42  ;;  %1786 = vpow2.f32 %v1735_v41  ;;  %v2674_v41 = vld [vmem:[#allocation10 + $0x180] sm:$0xff]  ;;  %v2677_v42 = vld [vmem:[#allocation10 + $0x188] sm:$0xff] }
 0x1ac   :  { %v712_v0 = vadd.f32 1.0, %v1785_v43  ;;  %v2680_v43 = vld [vmem:[#allocation10 + $0x190] sm:$0xff] }
 0x1ad   :  { %1788 = vrcp.f32 %v693_v47  ;;  %v705_v51 = vand.u32 2147483648, %v693_v47  ;;  %v703_v48 = vand.u32 2147483647, %v693_v47  ;;  %vm699_vm14 = vweird.f32 %v693_v47 }
 0x1ae   :  { %1790 = vrcp.f32 %v712_v0  ;;  %v724_v56 = vand.u32 2147483648, %v712_v0  ;;  %v722_v57 = vand.u32 2147483647, %v712_v0  ;;  %vm718_vm15 = vweird.f32 %v712_v0 }
 0x1af   :  { %v706_v59 = vor.u32 1.1754944e-38, %v705_v51  ;;  %vm704_vm2 = vcmp.eq.f32.partialorder %v703_v48, 8.507059e+37  ;;  %v2722_v51 = vld [vmem:[#allocation10 + $0x100] sm:$0xff]  ;;  %v2731_v48 = vld [vmem:[#allocation10 + $0x118] sm:$0xff] }
 0x1b0   :  { %v725_v2 = vor.u32 1.1754944e-38, %v724_v56  ;;  %vm723_vm3 = vcmp.eq.f32.partialorder %v722_v57, 8.507059e+37  ;;  %v2725_v56 = vld [vmem:[#allocation10 + $0x108] sm:$0xff] }
 0x1b1   :  { %v1787_v60 = vpop.eup %1786  ;;  %v2737_v57 = vld [vmem:[#allocation10 + $0xe8] sm:$0xff] }
 0x1b2   :  { %v732_v13 = vadd.f32 1.0, %v1787_v60  ;;  %v2692_v60 = vld [vmem:[#allocation10 + $0x170] sm:$0xff] }
 0x1b3   :  { %v1789_v61 = vpop.eup %1788 }
 0x1b4   :  { %v1791_v63 = vpop.eup %1790  ;;  %v695_v49 = vmul.f32 %v1789_v61, %v693_v47  ;;  %1792 = vrcp.f32 %v732_v13  ;;  %vm700_vm12 = vweird.f32 %v1789_v61  ;;  %v744_v15 = vand.u32 2147483648, %v732_v13  ;;  %v2683_v47 = vld [vmem:[#allocation10 + $0x198] sm:$0xff] }
 0x1b5   :  { %v714_v44 = vmul.f32 %v1791_v63, %v712_v0  ;;  %1794 = vtanh.f32 %v688_v50  ;;  %vm719_vm13 = vweird.f32 %v1791_v63  ;;  %vm701_vm0 = vmor %vm699_vm14, %vm700_vm12  ;;  %vm738_vm5 = vweird.f32 %v732_v13  ;;  %v2686_v0 = vld [vmem:[#allocation10 + $0x160] sm:$0xff]  ;;  %v2704_v50 = vld [vmem:[#allocation10 + $0x150] sm:$0xff] }
 0x1b6   :  { %v696_v45 = vsub.f32 1.0, %v695_v49  ;;  %vm720_vm1 = vmor %vm718_vm15, %vm719_vm13  ;;  %v742_v16 = vand.u32 2147483647, %v732_v13  ;;  %v745_v18 = vor.u32 1.1754944e-38, %v744_v15  ;;  %v2710_v49 = vld [vmem:[#allocation10 + $0x120] sm:$0xff]  ;;  %v2788_v15 = vld [vmem:[#allocation10 + $0x70] sm:$0xff] }
 0x1b7   :  { %v715_v52 = vsub.f32 1.0, %v714_v44  ;;  %v2713_v44 = vld [vmem:[#allocation10 + $0x128] sm:$0xff]  ;;  %3265 = vst [vmem:[#allocation32_spill] sm:$0xff] %v2788_v15 }
 0x1b8   :  { %v697_v53 = vmul.f32 %v1789_v61, %v696_v45  ;;  %vm743_vm7 = vcmp.eq.f32.partialorder %v742_v16, 8.507059e+37  ;;  %v2716_v45 = vld [vmem:[#allocation10 + $0x130] sm:$0xff]  ;;  %v2791_v16 = vld [vmem:[#allocation10 + $0x78] sm:$0xff] }
 0x1b9   :  { %v716_v54 = vmul.f32 %v1791_v63, %v715_v52  ;;  %v2719_v52 = vld [vmem:[#allocation10 + $0x138] sm:$0xff]  ;;  %3266 = vst [vmem:[#allocation31_spill] sm:$0xff] %v2791_v16 }
 0x1ba   :  { %v1793_v58 = vpop.eup %1792  ;;  %v698_v62 = vadd.f32 %v1789_v61, %v697_v53  ;;  %v2728_v53 = vld [vmem:[#allocation10 + $0x110] sm:$0xff] }
 0x1bb   :  { %v717_v55 = vadd.f32 %v1791_v63, %v716_v54  ;;  %v734_v1 = vmul.f32 %v1793_v58, %v732_v13  ;;  %v1795_v4 = vpop.eup %1794  ;;  %vm739_vm4 = vweird.f32 %v1793_v58  ;;  %v2695_v13 = vld [vmem:[#allocation10 + $0x178] sm:$0xff]  ;;  %v2734_v54 = vld [vmem:[#allocation10 + $0xe0] sm:$0xff] }
 0x1bc   :  { %v702_v3 = vsel %vm701_vm0, %v1789_v61, %v698_v62  ;;  %vm740_vm6 = vmor %vm738_vm5, %vm739_vm4  ;;  %v2698_v61 = vld [vmem:[#allocation10 + $0x140] sm:$0xff]  ;;  %v2743_v62 = vld [vmem:[#allocation10 + $0xf8] sm:$0xff] }
 0x1bd   :  { %v707_v5 = vsel %vm704_vm2, %v706_v59, %v702_v3  ;;  %v721_v6 = vsel %vm720_vm1, %v1791_v63, %v717_v55  ;;  %v735_v7 = vsub.f32 1.0, %v734_v1  ;;  %v2707_v63 = vld [vmem:[#allocation10 + $0x158] sm:$0xff]  ;;  %v2746_v59 = vld [vmem:[#allocation10 + $0xc0] sm:$0xff]  ;;  %v2749_v55 = vld [vmem:[#allocation10 + $0xc8] sm:$0xff] }
 0x1be   :  { %v726_v8 = vsel %vm723_vm3, %v725_v2, %v721_v6  ;;  %v749_v9 = vmul.f32 %v1795_v4, %v707_v5  ;;  %v2752_v1 = vld [vmem:[#allocation10 + $0xd0] sm:$0xff]  ;;  %v2755_v2 = vld [vmem:[#allocation10 + $0xd8] sm:$0xff]  ;;  %v2758_v3 = vld [vmem:[#allocation10 + $0xa0] sm:$0xff] }
 0x1bf   :  { %v748_v10 = vmul.f32 %v726_v8, %v2563_v26  ;;  %v736_v11 = vmul.f32 %v1793_v58, %v735_v7  ;;  %v2638_v26 = vld [vmem:[#allocation10 + $0x1e0] sm:$0xff]  ;;  %3253 = vst [vmem:[#allocation20_spill] sm:$0xff] %v2752_v1  ;;  %v2761_v4 = vld [vmem:[#allocation10 + $0xa8] sm:$0xff]  ;;  %v2764_v5 = vld [vmem:[#allocation10 + $0xb0] sm:$0xff] }
 0x1c0   :  { %3254 = vst [vmem:[#allocation19_spill] sm:$0xff] %v2755_v2  ;;  %v2767_v6 = vld [vmem:[#allocation10 + $0xb8] sm:$0xff]  ;;  %v2770_v7 = vld [vmem:[#allocation10 + $0x80] sm:$0xff]  ;;  %v2773_v8 = vld [vmem:[#allocation10 + $0x88] sm:$0xff] }
 0x1c1   :  { %v2635_v12 = vadd.f32 %v749_v9, %v748_v10  ;;  %v737_v14 = vadd.f32 %v1793_v58, %v736_v11  ;;  %3255 = vst [vmem:[#allocation21_spill] sm:$0xff] %v2758_v3  ;;  %v2776_v9 = vld [vmem:[#allocation10 + $0x90] sm:$0xff]  ;;  %v2779_v10 = vld [vmem:[#allocation10 + $0x98] sm:$0xff]  ;;  %v2782_v11 = vld [vmem:[#allocation10 + $0x60] sm:$0xff] }
 0x1c2   :  { %3256 = vst [vmem:[#allocation22_spill] sm:$0xff] %v2761_v4 }
 0x1c3   :  { %1796 = vtanh.f32 %v2635_v12  ;;  %v741_v17 = vsel %vm740_vm6, %v1793_v58, %v737_v14  ;;  %v2740_v58 = vld [vmem:[#allocation10 + $0xf0] sm:$0xff]  ;;  %3257 = vst [vmem:[#allocation24_spill] sm:$0xff] %v2764_v5  ;;  %v2785_v14 = vld [vmem:[#allocation10 + $0x68] sm:$0xff] }
 0x1c4   :  { %v746_v20 = vsel %vm743_vm7, %v745_v18, %v741_v17  ;;  %3258 = vst [vmem:[#allocation23_spill] sm:$0xff] %v2767_v6  ;;  %v2794_v17 = vld [vmem:[#allocation10 + $0x40] sm:$0xff]  ;;  %v2797_v18 = vld [vmem:[#allocation10 + $0x48] sm:$0xff] }
 0x1c5   :  { %3259 = vst [vmem:[#allocation25_spill] sm:$0xff] %v2770_v7 }
 0x1c6   :  { %3260 = vst [vmem:[#allocation26_spill] sm:$0xff] %v2773_v8 }
 0x1c7   :  { %3261 = vst [vmem:[#allocation28_spill] sm:$0xff] %v2776_v9 }
 0x1c8   :  { %3262 = vst [vmem:[#allocation27_spill] sm:$0xff] %v2779_v10 }
 0x1c9   :  { %v1797_v19 = vpop.eup %1796  ;;  %3263 = vst [vmem:[#allocation29_spill] sm:$0xff] %v2782_v11 }
 0x1ca   :  { %v752_v21 = vmul.f32 %v1797_v19, %v746_v20  ;;  %3264 = vst [vmem:[#allocation30_spill] sm:$0xff] %v2785_v14  ;;  %v2800_v19 = vld [vmem:[#allocation10 + $0x50] sm:$0xff]  ;;  %v2803_v20 = vld [vmem:[#allocation10 + $0x58] sm:$0xff] }
 0x1cb   :  { %3267 = vst [vmem:[#allocation33_spill] sm:$0xff] %v2794_v17 }
 0x1cc   :  { %774 = vmatmul.f32.vlgmr.msrb.gmra.mxu0 %v752_v21  ;;  %794 = vmatmul.f32.vlgmr.msrb.gmra.mxu1 %v752_v21  ;;  %3268 = vst [vmem:[#allocation34_spill] sm:$0xff] %v2797_v18 }
 0x1cd   :  { %814 = vmatmul.f32.vlgmr.msrb.gmra.mxu2 %v752_v21  ;;  %834 = vmatmul.f32.vlgmr.msrb.gmra.mxu3 %v752_v21  ;;  %3269 = vst [vmem:[#allocation36_spill] sm:$0xff] %v2800_v19  ;;  %v2806_v21 = vld [vmem:[#allocation10 + $0x20] sm:$0xff] }
 0x1ce   :  { %1062 = vmatpush.msrb.mxu0 %v2638_v26  ;;  %1082 = vmatpush.msrb.mxu1 %v2641_v29  ;;  %3270 = vst [vmem:[#allocation35_spill] sm:$0xff] %v2803_v20 }
 0x1cf   :  { %1102 = vmatpush.msrb.mxu2 %v2644_v30  ;;  %1122 = vmatpush.msrb.mxu3 %v2647_v31  ;;  %3271 = vst [vmem:[#allocation37_spill] sm:$0xff] %v2806_v21 }
 0x1d0   :  { %1063 = vmatpush.msrb.mxu0 %v2650_v32  ;;  %1083 = vmatpush.msrb.mxu1 %v2653_v33 }
 0x1d1   :  { %1103 = vmatpush.msrb.mxu2 %v2656_v34  ;;  %1123 = vmatpush.msrb.mxu3 %v2659_v35 }
 0x1d2   :  { %1064 = vmatpush.msrb.mxu0 %v2662_v36  ;;  %1084 = vmatpush.msrb.mxu1 %v2665_v37 }
 0x1d3   :  { %1104 = vmatpush.msrb.mxu2 %v2668_v38  ;;  %1124 = vmatpush.msrb.mxu3 %v2671_v40 }
 0x1d4   :  { %1065 = vmatpush.msrb.mxu0 %v2674_v41  ;;  %1085 = vmatpush.msrb.mxu1 %v2677_v42 }
 0x1d5   :  { %1105 = vmatpush.msrb.mxu2 %v2680_v43  ;;  %1125 = vmatpush.msrb.mxu3 %v2683_v47 }
 0x1d6   :  { %1066 = vmatpush.msrb.mxu0 %v2686_v0  ;;  %1086 = vmatpush.msrb.mxu1 %v2689_v46 }
 0x1d7   :  { %1106 = vmatpush.msrb.mxu2 %v2692_v60  ;;  %1126 = vmatpush.msrb.mxu3 %v2695_v13 }
 0x1d8   :  { %1067 = vmatpush.msrb.mxu0 %v2698_v61  ;;  %1087 = vmatpush.msrb.mxu1 %v2701_v39 }
 0x1d9   :  { %1107 = vmatpush.msrb.mxu2 %v2704_v50  ;;  %1127 = vmatpush.msrb.mxu3 %v2707_v63 }
 0x1da   :  { %1068 = vmatpush.msrb.mxu0 %v2710_v49  ;;  %1088 = vmatpush.msrb.mxu1 %v2713_v44 }
 0x1db   :  { %1108 = vmatpush.msrb.mxu2 %v2716_v45  ;;  %1128 = vmatpush.msrb.mxu3 %v2719_v52 }
 0x1dc   :  { %1069 = vmatpush.msrb.mxu0 %v2722_v51  ;;  %1089 = vmatpush.msrb.mxu1 %v2725_v56 }
 0x1dd   :  { %1109 = vmatpush.msrb.mxu2 %v2728_v53  ;;  %1129 = vmatpush.msrb.mxu3 %v2731_v48 }
 0x1de   :  { %1070 = vmatpush.msrb.mxu0 %v2734_v54  ;;  %1090 = vmatpush.msrb.mxu1 %v2737_v57 }
 0x1df   :  { %1110 = vmatpush.msrb.mxu2 %v2740_v58  ;;  %1130 = vmatpush.msrb.mxu3 %v2743_v62 }
 0x1e0   :  { %1071 = vmatpush.msrb.mxu0 %v2746_v59  ;;  %1091 = vmatpush.msrb.mxu1 %v2749_v55 }
 0x1e1   :  { %1111 = vmatpush.msrb.mxu2 %v2752_v1  ;;  %1131 = vmatpush.msrb.mxu3 %v2755_v2 }
 0x1e2   :  { %1072 = vmatpush.msrb.mxu0 %v2758_v3  ;;  %1092 = vmatpush.msrb.mxu1 %v2761_v4 }
 0x1e3   :  { %1112 = vmatpush.msrb.mxu2 %v2764_v5  ;;  %1132 = vmatpush.msrb.mxu3 %v2767_v6 }
 0x1e4   :  { %1073 = vmatpush.msrb.mxu0 %v2770_v7  ;;  %1093 = vmatpush.msrb.mxu1 %v2773_v8 }
 0x1e5   :  { %1113 = vmatpush.msrb.mxu2 %v2776_v9  ;;  %1133 = vmatpush.msrb.mxu3 %v2779_v10 }
 0x1e6   :  { %1074 = vmatpush.msrb.mxu0 %v2782_v11  ;;  %1094 = vmatpush.msrb.mxu1 %v2785_v14 }
 0x1e7   :  { %1114 = vmatpush.msrb.mxu2 %v2788_v15  ;;  %1134 = vmatpush.msrb.mxu3 %v2791_v16  ;;  %v2809_v16 = vld [vmem:[#allocation10 + $0x28] sm:$0xff] }
 0x1e8   :  { %1075 = vmatpush.msrb.mxu0 %v2794_v17  ;;  %1095 = vmatpush.msrb.mxu1 %v2797_v18  ;;  %3272 = vst [vmem:[#allocation38_spill] sm:$0xff] %v2809_v16  ;;  %v3273_v18 = vld [vmem:[#allocation49_spill] sm:$0xff]  ;;  %v3274_v17 = vld [vmem:[#allocation50_spill] sm:$0xff] }
 0x1e9   :  { %1115 = vmatpush.msrb.mxu2 %v2800_v19  ;;  %1135 = vmatpush.msrb.mxu3 %v2803_v20 }
 0x1ea   :  { %1076 = vmatpush.msrb.mxu0 %v2806_v21  ;;  %1096 = vmatpush.msrb.mxu1 %v2809_v16 }
 0x1eb   :  { %1116 = vmatpush.msrb.mxu2 %v3243_v22  ;;  %1136 = vmatpush.msrb.mxu3 %v3244_v23  ;;  %v3275_v23 = vld [vmem:[#allocation52_spill] sm:$0xff] }
 0x1ec   :  { %1077 = vmatpush.msrb.mxu0 %v3245_v24  ;;  %1097 = vmatpush.msrb.mxu1 %v3246_v25 }
 0x1ed   :  { %1117 = vmatpush.msrb.mxu2 %v3247_v27  ;;  %1137 = vmatpush.msrb.mxu3 %v3248_v28 }
 0x249   :  { %v775_v20 = vpop.f32.mrf.mxu0  ;;  %v795_v19 = vpop.f32.mrf.mxu1 }
 0x24a   :  { %v838_v21 = vadd.f32 %v775_v20, %v3273_v18  ;;  %v839_v15 = vadd.f32 %v795_v19, %v3274_v17  ;;  %v3276_v17 = vld [vmem:[#allocation51_spill] sm:$0xff] }
 0x24c   :  { %v1736_v14 = vmul.f32 -1.442695, %v838_v21  ;;  %v1737_v16 = vmul.f32 -1.442695, %v839_v15 }
 0x24e   :  { %1798 = vpow2.f32 %v1736_v14 }
 0x24f   :  { %1800 = vpow2.f32 %v1737_v16 }
 0x250   :  { %v835_v22 = vpop.f32.mrf.mxu3  ;;  %v815_v28 = vpop.f32.mrf.mxu2 }
 0x251   :  { %v841_v11 = vadd.f32 %v835_v22, %v3275_v23  ;;  %v840_v19 = vadd.f32 %v815_v28, %v3276_v17 }
 0x253   :  { %v1738_v24 = vmul.f32 -1.442695, %v841_v11 }
 0x254   :  { %v1799_v10 = vpop.eup %1798 }
 0x255   :  { %v1801_v25 = vpop.eup %1800  ;;  %v845_v9 = vadd.f32 1.0, %v1799_v10  ;;  %1802 = vpow2.f32 %v1738_v24 }
 0x256   :  { %v864_v27 = vadd.f32 1.0, %v1801_v25 }
 0x257   :  { %1804 = vrcp.f32 %v845_v9  ;;  %v857_v11 = vand.u32 2147483648, %v845_v9  ;;  %v855_v24 = vand.u32 2147483647, %v845_v9  ;;  %vm851_vm10 = vweird.f32 %v845_v9 }
 0x258   :  { %1806 = vrcp.f32 %v864_v27  ;;  %v876_v23 = vand.u32 2147483648, %v864_v27  ;;  %v874_v7 = vand.u32 2147483647, %v864_v27  ;;  %vm870_vm11 = vweird.f32 %v864_v27 }
 0x259   :  { %v858_v28 = vor.u32 1.1754944e-38, %v857_v11  ;;  %vm856_vm14 = vcmp.eq.f32.partialorder %v855_v24, 8.507059e+37 }
 0x25a   :  { %vm875_vm15 = vcmp.eq.f32.partialorder %v874_v7, 8.507059e+37 }
 0x25b   :  { %v1803_v8 = vpop.eup %1802 }
 0x25c   :  { %v884_v18 = vadd.f32 1.0, %v1803_v8 }
 0x25d   :  { %v1805_v20 = vpop.eup %1804 }
 0x25e   :  { %v1807_v15 = vpop.eup %1806  ;;  %v847_v14 = vmul.f32 %v1805_v20, %v845_v9  ;;  %1808 = vrcp.f32 %v884_v18  ;;  %vm852_vm8 = vweird.f32 %v1805_v20  ;;  %v896_v11 = vand.u32 2147483648, %v884_v18 }
 0x25f   :  { %v866_v16 = vmul.f32 %v1807_v15, %v864_v27  ;;  %1810 = vtanh.f32 %v840_v19  ;;  %vm871_vm9 = vweird.f32 %v1807_v15  ;;  %vm853_vm12 = vmor %vm851_vm10, %vm852_vm8  ;;  %vm890_vm1 = vweird.f32 %v884_v18 }
 0x260   :  { %v848_v21 = vsub.f32 1.0, %v847_v14  ;;  %vm872_vm13 = vmor %vm870_vm11, %vm871_vm9  ;;  %v877_v14 = vor.u32 1.1754944e-38, %v876_v23  ;;  %v897_v24 = vor.u32 1.1754944e-38, %v896_v11  ;;  %v3295_v11 = vld [vmem:[#allocation37_spill] sm:$0xff] }
 0x261   :  { %v867_v22 = vsub.f32 1.0, %v866_v16 }
 0x262   :  { %v849_v10 = vmul.f32 %v1805_v20, %v848_v21 }
 0x263   :  { %v868_v25 = vmul.f32 %v1807_v15, %v867_v22 }
 0x264   :  { %v1809_v6 = vpop.eup %1808  ;;  %v850_v8 = vadd.f32 %v1805_v20, %v849_v10 }
 0x265   :  { %v869_v17 = vadd.f32 %v1807_v15, %v868_v25  ;;  %v886_v5 = vmul.f32 %v1809_v6, %v884_v18  ;;  %v1811_v19 = vpop.eup %1810  ;;  %vm891_vm0 = vweird.f32 %v1809_v6  ;;  %v3284_v25 = vld [vmem:[#allocation26_spill] sm:$0xff] }
 0x266   :  { %v854_v16 = vsel %vm853_vm12, %v1805_v20, %v850_v8  ;;  %v894_v20 = vand.u32 2147483647, %v884_v18  ;;  %vm892_vm2 = vmor %vm890_vm1, %vm891_vm0  ;;  %v3283_v18 = vld [vmem:[#allocation25_spill] sm:$0xff]  ;;  %v3285_v8 = vld [vmem:[#allocation28_spill] sm:$0xff] }
 0x267   :  { %v859_v4 = vsel %vm856_vm14, %v858_v28, %v854_v16  ;;  %v873_v21 = vsel %vm872_vm13, %v1807_v15, %v869_v17  ;;  %v887_v3 = vsub.f32 1.0, %v886_v5  ;;  %v3286_v28 = vld [vmem:[#allocation27_spill] sm:$0xff]  ;;  %v3287_v17 = vld [vmem:[#allocation29_spill] sm:$0xff]  ;;  %v3289_v16 = vld [vmem:[#allocation32_spill] sm:$0xff] }
 0x268   :  { %v878_v22 = vsel %vm875_vm15, %v877_v14, %v873_v21  ;;  %v901_v2 = vmul.f32 %v1811_v19, %v859_v4  ;;  %vm895_vm3 = vcmp.eq.f32.partialorder %v894_v20, 8.507059e+37  ;;  %v3281_v4 = vld [vmem:[#allocation24_spill] sm:$0xff]  ;;  %v3288_v14 = vld [vmem:[#allocation30_spill] sm:$0xff]  ;;  %v3290_v19 = vld [vmem:[#allocation31_spill] sm:$0xff] }
 0x269   :  { %v900_v1 = vmul.f32 %v878_v22, %v2635_v12  ;;  %v888_v10 = vmul.f32 %v1809_v6, %v887_v3  ;;  %v3277_v12 = vld [vmem:[#allocation20_spill] sm:$0xff]  ;;  %v3280_v3 = vld [vmem:[#allocation22_spill] sm:$0xff]  ;;  %v3291_v21 = vld [vmem:[#allocation33_spill] sm:$0xff] }
 0x26a   :  { %v3292_v22 = vld [vmem:[#allocation34_spill] sm:$0xff] }
 0x26b   :  { %v2823_v9 = vadd.f32 %v901_v2, %v900_v1  ;;  %v889_v27 = vadd.f32 %v1809_v6, %v888_v10  ;;  %v3278_v1 = vld [vmem:[#allocation19_spill] sm:$0xff]  ;;  %v3279_v2 = vld [vmem:[#allocation21_spill] sm:$0xff]  ;;  %v3293_v10 = vld [vmem:[#allocation36_spill] sm:$0xff] }
 0x26c   :  { %v3296_v20 = vld [vmem:[#allocation38_spill] sm:$0xff] }
 0x26d   :  { %1812 = vtanh.f32 %v2823_v9  ;;  %v893_v23 = vsel %vm892_vm2, %v1809_v6, %v889_v27  ;;  %v3282_v6 = vld [vmem:[#allocation23_spill] sm:$0xff] }
 0x26e   :  { %v898_v5 = vsel %vm895_vm3, %v897_v24, %v893_v23  ;;  %v3294_v27 = vld [vmem:[#allocation35_spill] sm:$0xff]  ;;  %v2887_v24 = vld [vmem:[#allocation10 + $0x38] sm:$0xff] }
 0x26f   :  { %v2884_v23 = vld [vmem:[#allocation10 + $0x30] sm:$0xff]  ;;  %3298 = vst [vmem:[#allocation40_spill] sm:$0xff] %v2887_v24 }
 0x270   :  { %3297 = vst [vmem:[#allocation39_spill] sm:$0xff] %v2884_v23 }
 0x273   :  { %v1813_v7 = vpop.eup %1812 }
 0x274   :  { %v904_v15 = vmul.f32 %v1813_v7, %v898_v5  ;;  %v2890_v7 = vld [vmem:[#allocation10] sm:$0xff]  ;;  %v2893_v5 = vld [vmem:[#allocation10 + $0x8] sm:$0xff] }
 0x275   :  { %3299 = vst [vmem:[#allocation41_spill] sm:$0xff] %v2890_v7 }
 0x276   :  { %926 = vmatmul.f32.vlgmr.msra.gmra.mxu0 %v904_v15  ;;  %946 = vmatmul.f32.vlgmr.msra.gmra.mxu1 %v904_v15  ;;  %3300 = vst [vmem:[#allocation42_spill] sm:$0xff] %v2893_v5 }
 0x277   :  { %966 = vmatmul.f32.vlgmr.msra.gmra.mxu2 %v904_v15  ;;  %986 = vmatmul.f32.vlgmr.msra.gmra.mxu3 %v904_v15  ;;  %v2896_v15 = vld [vmem:[#allocation10 + $0x10] sm:$0xff] }
 0x278   :  { %1214 = vmatpush.msra.mxu0 %v2638_v26  ;;  %1234 = vmatpush.msra.mxu1 %v2641_v29  ;;  %3301 = vst [vmem:[#allocation43_spill] sm:$0xff] %v2896_v15 }
 0x279   :  { %1254 = vmatpush.msra.mxu2 %v2644_v30  ;;  %1274 = vmatpush.msra.mxu3 %v2647_v31 }
 0x27a   :  { %1215 = vmatpush.msra.mxu0 %v2650_v32  ;;  %1235 = vmatpush.msra.mxu1 %v2653_v33 }
 0x27b   :  { %1255 = vmatpush.msra.mxu2 %v2656_v34  ;;  %1275 = vmatpush.msra.mxu3 %v2659_v35 }
 0x27c   :  { %1216 = vmatpush.msra.mxu0 %v2662_v36  ;;  %1236 = vmatpush.msra.mxu1 %v2665_v37 }
 0x27d   :  { %1256 = vmatpush.msra.mxu2 %v2668_v38  ;;  %1276 = vmatpush.msra.mxu3 %v2671_v40 }
 0x27e   :  { %1217 = vmatpush.msra.mxu0 %v2674_v41  ;;  %1237 = vmatpush.msra.mxu1 %v2677_v42 }
 0x27f   :  { %1257 = vmatpush.msra.mxu2 %v2680_v43  ;;  %1277 = vmatpush.msra.mxu3 %v2683_v47 }
 0x280   :  { %1218 = vmatpush.msra.mxu0 %v2686_v0  ;;  %1238 = vmatpush.msra.mxu1 %v2689_v46 }
 0x281   :  { %1258 = vmatpush.msra.mxu2 %v2692_v60  ;;  %1278 = vmatpush.msra.mxu3 %v2695_v13 }
 0x282   :  { %1219 = vmatpush.msra.mxu0 %v2698_v61  ;;  %1239 = vmatpush.msra.mxu1 %v2701_v39 }
 0x283   :  { %1259 = vmatpush.msra.mxu2 %v2704_v50  ;;  %1279 = vmatpush.msra.mxu3 %v2707_v63 }
 0x284   :  { %1220 = vmatpush.msra.mxu0 %v2710_v49  ;;  %1240 = vmatpush.msra.mxu1 %v2713_v44 }
 0x285   :  { %1260 = vmatpush.msra.mxu2 %v2716_v45  ;;  %1280 = vmatpush.msra.mxu3 %v2719_v52 }
 0x286   :  { %1221 = vmatpush.msra.mxu0 %v2722_v51  ;;  %1241 = vmatpush.msra.mxu1 %v2725_v56 }
 0x287   :  { %1261 = vmatpush.msra.mxu2 %v2728_v53  ;;  %1281 = vmatpush.msra.mxu3 %v2731_v48 }
 0x288   :  { %1222 = vmatpush.msra.mxu0 %v2734_v54  ;;  %1242 = vmatpush.msra.mxu1 %v2737_v57 }
 0x289   :  { %1262 = vmatpush.msra.mxu2 %v2740_v58  ;;  %1282 = vmatpush.msra.mxu3 %v2743_v62 }
 0x28a   :  { %1223 = vmatpush.msra.mxu0 %v2746_v59  ;;  %1243 = vmatpush.msra.mxu1 %v2749_v55 }
 0x28b   :  { %1263 = vmatpush.msra.mxu2 %v3277_v12  ;;  %1283 = vmatpush.msra.mxu3 %v3278_v1 }
 0x28c   :  { %1224 = vmatpush.msra.mxu0 %v3279_v2  ;;  %1244 = vmatpush.msra.mxu1 %v3280_v3 }
 0x28d   :  { %1264 = vmatpush.msra.mxu2 %v3281_v4  ;;  %1284 = vmatpush.msra.mxu3 %v3282_v6 }
 0x28e   :  { %1225 = vmatpush.msra.mxu0 %v3283_v18  ;;  %1245 = vmatpush.msra.mxu1 %v3284_v25 }
 0x28f   :  { %1265 = vmatpush.msra.mxu2 %v3285_v8  ;;  %1285 = vmatpush.msra.mxu3 %v3286_v28 }
 0x290   :  { %1226 = vmatpush.msra.mxu0 %v3287_v17  ;;  %1246 = vmatpush.msra.mxu1 %v3288_v14 }
 0x291   :  { %1266 = vmatpush.msra.mxu2 %v3289_v16  ;;  %1286 = vmatpush.msra.mxu3 %v3290_v19 }
 0x292   :  { %1227 = vmatpush.msra.mxu0 %v3291_v21  ;;  %1247 = vmatpush.msra.mxu1 %v3292_v22 }
 0x293   :  { %1267 = vmatpush.msra.mxu2 %v3293_v10  ;;  %1287 = vmatpush.msra.mxu3 %v3294_v27  ;;  %v3303_v27 = vld [vmem:[#allocation53_spill] sm:$0xff]  ;;  %v3304_v10 = vld [vmem:[#allocation54_spill] sm:$0xff] }
 0x294   :  { %1228 = vmatpush.msra.mxu0 %v3295_v11  ;;  %1248 = vmatpush.msra.mxu1 %v3296_v20  ;;  %v2899_v20 = vld [vmem:[#allocation10 + $0x18] sm:$0xff] }
 0x295   :  { %1268 = vmatpush.msra.mxu2 %v2884_v23  ;;  %1288 = vmatpush.msra.mxu3 %v2887_v24  ;;  %3302 = vst [vmem:[#allocation44_spill] sm:$0xff] %v2899_v20 }
 0x296   :  { %1229 = vmatpush.msra.mxu0 %v2890_v7  ;;  %1249 = vmatpush.msra.mxu1 %v2893_v5  ;;  %v3305_v5 = vld [vmem:[#allocation56_spill] sm:$0xff] }
 0x297   :  { %1269 = vmatpush.msra.mxu2 %v2896_v15  ;;  %1289 = vmatpush.msra.mxu3 %v2899_v20 }
 0x2f3   :  { %v927_v23 = vpop.f32.mrf.mxu0  ;;  %v947_v11 = vpop.f32.mrf.mxu1 }
 0x2f4   :  { %v990_v24 = vadd.f32 %v927_v23, %v3303_v27  ;;  %v991_v22 = vadd.f32 %v947_v11, %v3304_v10  ;;  %v3306_v10 = vld [vmem:[#allocation55_spill] sm:$0xff] }
 0x2f6   :  { %v1739_v21 = vmul.f32 -1.442695, %v990_v24  ;;  %v1740_v7 = vmul.f32 -1.442695, %v991_v22 }
 0x2f8   :  { %1814 = vpow2.f32 %v1739_v21 }
 0x2f9   :  { %1816 = vpow2.f32 %v1740_v7 }
 0x2fa   :  { %v987_v19 = vpop.f32.mrf.mxu3  ;;  %v967_v20 = vpop.f32.mrf.mxu2 }
 0x2fb   :  { %v993_v16 = vadd.f32 %v987_v19, %v3305_v5  ;;  %v992_v11 = vadd.f32 %v967_v20, %v3306_v10 }
 0x2fd   :  { %v1741_v14 = vmul.f32 -1.442695, %v993_v16 }
 0x2fe   :  { %v1815_v17 = vpop.eup %1814 }
 0x2ff   :  { %v1817_v15 = vpop.eup %1816  ;;  %v997_v28 = vadd.f32 1.0, %v1815_v17  ;;  %1818 = vpow2.f32 %v1741_v14 }
 0x300   :  { %v1016_v8 = vadd.f32 1.0, %v1817_v15 }
 0x301   :  { %1820 = vrcp.f32 %v997_v28  ;;  %v1009_v16 = vand.u32 2147483648, %v997_v28  ;;  %v1007_v14 = vand.u32 2147483647, %v997_v28  ;;  %vm1003_vm6 = vweird.f32 %v997_v28 }
 0x302   :  { %1822 = vrcp.f32 %v1016_v8  ;;  %v1028_v5 = vand.u32 2147483648, %v1016_v8  ;;  %v1026_v18 = vand.u32 2147483647, %v1016_v8  ;;  %vm1022_vm7 = vweird.f32 %v1016_v8 }
 0x303   :  { %v1010_v20 = vor.u32 1.1754944e-38, %v1009_v16  ;;  %vm1008_vm10 = vcmp.eq.f32.partialorder %v1007_v14, 8.507059e+37 }
 0x304   :  { %vm1027_vm11 = vcmp.eq.f32.partialorder %v1026_v18, 8.507059e+37 }
 0x305   :  { %v1819_v25 = vpop.eup %1818 }
 0x306   :  { %v1036_v27 = vadd.f32 1.0, %v1819_v25 }
 0x307   :  { %v1821_v23 = vpop.eup %1820 }
 0x308   :  { %v1823_v22 = vpop.eup %1822  ;;  %v999_v21 = vmul.f32 %v1821_v23, %v997_v28  ;;  %1824 = vrcp.f32 %v1036_v27  ;;  %vm1004_vm4 = vweird.f32 %v1821_v23  ;;  %v1048_v16 = vand.u32 2147483648, %v1036_v27 }
 0x309   :  { %v1018_v24 = vmul.f32 %v1823_v22, %v1016_v8  ;;  %1826 = vtanh.f32 %v992_v11  ;;  %vm1023_vm5 = vweird.f32 %v1823_v22  ;;  %vm1005_vm8 = vmor %vm1003_vm6, %vm1004_vm4  ;;  %vm1042_vm13 = vweird.f32 %v1036_v27 }
 0x30a   :  { %v1000_v7 = vsub.f32 1.0, %v999_v21  ;;  %vm1024_vm9 = vmor %vm1022_vm7, %vm1023_vm5  ;;  %v1029_v21 = vor.u32 1.1754944e-38, %v1028_v5  ;;  %v1049_v14 = vor.u32 1.1754944e-38, %v1048_v16  ;;  %v3325_v16 = vld [vmem:[#allocation37_spill] sm:$0xff] }
 0x30b   :  { %v1019_v19 = vsub.f32 1.0, %v1018_v24 }
 0x30c   :  { %v1001_v17 = vmul.f32 %v1821_v23, %v1000_v7 }
 0x30d   :  { %v1020_v15 = vmul.f32 %v1823_v22, %v1019_v19 }
 0x30e   :  { %v1825_v6 = vpop.eup %1824  ;;  %v1002_v25 = vadd.f32 %v1821_v23, %v1001_v17 }
 0x30f   :  { %v1021_v10 = vadd.f32 %v1823_v22, %v1020_v15  ;;  %v1038_v4 = vmul.f32 %v1825_v6, %v1036_v27  ;;  %v1827_v11 = vpop.eup %1826  ;;  %vm1043_vm12 = vweird.f32 %v1825_v6  ;;  %v3314_v15 = vld [vmem:[#allocation26_spill] sm:$0xff] }
 0x310   :  { %v1006_v24 = vsel %vm1005_vm8, %v1821_v23, %v1002_v25  ;;  %v1046_v23 = vand.u32 2147483647, %v1036_v27  ;;  %vm1044_vm14 = vmor %vm1042_vm13, %vm1043_vm12  ;;  %v3313_v27 = vld [vmem:[#allocation25_spill] sm:$0xff]  ;;  %v3315_v25 = vld [vmem:[#allocation28_spill] sm:$0xff] }
 0x311   :  { %v1011_v3 = vsel %vm1008_vm10, %v1010_v20, %v1006_v24  ;;  %v1025_v7 = vsel %vm1024_vm9, %v1823_v22, %v1021_v10  ;;  %v1039_v2 = vsub.f32 1.0, %v1038_v4  ;;  %v3316_v20 = vld [vmem:[#allocation27_spill] sm:$0xff]  ;;  %v3317_v10 = vld [vmem:[#allocation29_spill] sm:$0xff]  ;;  %v3319_v24 = vld [vmem:[#allocation32_spill] sm:$0xff] }
 0x312   :  { %v1030_v19 = vsel %vm1027_vm11, %v1029_v21, %v1025_v7  ;;  %v1053_v1 = vmul.f32 %v1827_v11, %v1011_v3  ;;  %vm1047_vm15 = vcmp.eq.f32.partialorder %v1046_v23, 8.507059e+37  ;;  %v3311_v3 = vld [vmem:[#allocation24_spill] sm:$0xff]  ;;  %v3318_v21 = vld [vmem:[#allocation30_spill] sm:$0xff]  ;;  %v3320_v11 = vld [vmem:[#allocation31_spill] sm:$0xff] }
 0x313   :  { %v1052_v12 = vmul.f32 %v1030_v19, %v2823_v9  ;;  %v1040_v17 = vmul.f32 %v1825_v6, %v1039_v2  ;;  %v3307_v9 = vld [vmem:[#allocation20_spill] sm:$0xff]  ;;  %v3310_v2 = vld [vmem:[#allocation22_spill] sm:$0xff]  ;;  %v3321_v7 = vld [vmem:[#allocation33_spill] sm:$0xff] }
 0x314   :  { %v3322_v19 = vld [vmem:[#allocation34_spill] sm:$0xff] }
 0x315   :  { %v2907_v28 = vadd.f32 %v1053_v1, %v1052_v12  ;;  %v1041_v8 = vadd.f32 %v1825_v6, %v1040_v17  ;;  %v3308_v12 = vld [vmem:[#allocation19_spill] sm:$0xff]  ;;  %v3309_v1 = vld [vmem:[#allocation21_spill] sm:$0xff]  ;;  %v3323_v17 = vld [vmem:[#allocation36_spill] sm:$0xff] }
 0x316   :  { %v3326_v23 = vld [vmem:[#allocation38_spill] sm:$0xff] }
 0x317   :  { %1828 = vtanh.f32 %v2907_v28  ;;  %v1045_v5 = vsel %vm1044_vm14, %v1825_v6, %v1041_v8  ;;  %v3312_v6 = vld [vmem:[#allocation23_spill] sm:$0xff] }
 0x318   :  { %v1050_v4 = vsel %vm1047_vm15, %v1049_v14, %v1045_v5  ;;  %v3324_v8 = vld [vmem:[#allocation35_spill] sm:$0xff]  ;;  %v3328_v14 = vld [vmem:[#allocation40_spill] sm:$0xff] }
 0x319   :  { %v3327_v5 = vld [vmem:[#allocation39_spill] sm:$0xff] }
 0x31d   :  { %v1829_v18 = vpop.eup %1828 }
 0x31e   :  { %v1056_v22 = vmul.f32 %v1829_v18, %v1050_v4  ;;  %v3329_v18 = vld [vmem:[#allocation41_spill] sm:$0xff]  ;;  %v3330_v4 = vld [vmem:[#allocation42_spill] sm:$0xff] }
 0x320   :  { %1078 = vmatmul.f32.vlgmr.msrb.gmra.mxu0 %v1056_v22  ;;  %1098 = vmatmul.f32.vlgmr.msrb.gmra.mxu1 %v1056_v22 }
 0x321   :  { %1118 = vmatmul.f32.vlgmr.msrb.gmra.mxu2 %v1056_v22  ;;  %1138 = vmatmul.f32.vlgmr.msrb.gmra.mxu3 %v1056_v22  ;;  %v3331_v22 = vld [vmem:[#allocation43_spill] sm:$0xff] }
 0x322   :  { %1366 = vmatpush.msrb.mxu0 %v2638_v26  ;;  %1386 = vmatpush.msrb.mxu1 %v2641_v29 }
 0x323   :  { %1406 = vmatpush.msrb.mxu2 %v2644_v30  ;;  %1426 = vmatpush.msrb.mxu3 %v2647_v31 }
 0x324   :  { %1367 = vmatpush.msrb.mxu0 %v2650_v32  ;;  %1387 = vmatpush.msrb.mxu1 %v2653_v33 }
 0x325   :  { %1407 = vmatpush.msrb.mxu2 %v2656_v34  ;;  %1427 = vmatpush.msrb.mxu3 %v2659_v35 }
 0x326   :  { %1368 = vmatpush.msrb.mxu0 %v2662_v36  ;;  %1388 = vmatpush.msrb.mxu1 %v2665_v37 }
 0x327   :  { %1408 = vmatpush.msrb.mxu2 %v2668_v38  ;;  %1428 = vmatpush.msrb.mxu3 %v2671_v40 }
 0x328   :  { %1369 = vmatpush.msrb.mxu0 %v2674_v41  ;;  %1389 = vmatpush.msrb.mxu1 %v2677_v42 }
 0x329   :  { %1409 = vmatpush.msrb.mxu2 %v2680_v43  ;;  %1429 = vmatpush.msrb.mxu3 %v2683_v47 }
 0x32a   :  { %1370 = vmatpush.msrb.mxu0 %v2686_v0  ;;  %1390 = vmatpush.msrb.mxu1 %v2689_v46 }
 0x32b   :  { %1410 = vmatpush.msrb.mxu2 %v2692_v60  ;;  %1430 = vmatpush.msrb.mxu3 %v2695_v13 }
 0x32c   :  { %1371 = vmatpush.msrb.mxu0 %v2698_v61  ;;  %1391 = vmatpush.msrb.mxu1 %v2701_v39 }
 0x32d   :  { %1411 = vmatpush.msrb.mxu2 %v2704_v50  ;;  %1431 = vmatpush.msrb.mxu3 %v2707_v63 }
 0x32e   :  { %1372 = vmatpush.msrb.mxu0 %v2710_v49  ;;  %1392 = vmatpush.msrb.mxu1 %v2713_v44 }
 0x32f   :  { %1412 = vmatpush.msrb.mxu2 %v2716_v45  ;;  %1432 = vmatpush.msrb.mxu3 %v2719_v52 }
 0x330   :  { %1373 = vmatpush.msrb.mxu0 %v2722_v51  ;;  %1393 = vmatpush.msrb.mxu1 %v2725_v56 }
 0x331   :  { %1413 = vmatpush.msrb.mxu2 %v2728_v53  ;;  %1433 = vmatpush.msrb.mxu3 %v2731_v48 }
 0x332   :  { %1374 = vmatpush.msrb.mxu0 %v2734_v54  ;;  %1394 = vmatpush.msrb.mxu1 %v2737_v57 }
 0x333   :  { %1414 = vmatpush.msrb.mxu2 %v2740_v58  ;;  %1434 = vmatpush.msrb.mxu3 %v2743_v62 }
 0x334   :  { %1375 = vmatpush.msrb.mxu0 %v2746_v59  ;;  %1395 = vmatpush.msrb.mxu1 %v2749_v55 }
 0x335   :  { %1415 = vmatpush.msrb.mxu2 %v3307_v9  ;;  %1435 = vmatpush.msrb.mxu3 %v3308_v12 }
 0x336   :  { %1376 = vmatpush.msrb.mxu0 %v3309_v1  ;;  %1396 = vmatpush.msrb.mxu1 %v3310_v2 }
 0x337   :  { %1416 = vmatpush.msrb.mxu2 %v3311_v3  ;;  %1436 = vmatpush.msrb.mxu3 %v3312_v6 }
 0x338   :  { %1377 = vmatpush.msrb.mxu0 %v3313_v27  ;;  %1397 = vmatpush.msrb.mxu1 %v3314_v15 }
 0x339   :  { %1417 = vmatpush.msrb.mxu2 %v3315_v25  ;;  %1437 = vmatpush.msrb.mxu3 %v3316_v20 }
 0x33a   :  { %1378 = vmatpush.msrb.mxu0 %v3317_v10  ;;  %1398 = vmatpush.msrb.mxu1 %v3318_v21 }
 0x33b   :  { %1418 = vmatpush.msrb.mxu2 %v3319_v24  ;;  %1438 = vmatpush.msrb.mxu3 %v3320_v11  ;;  %v3333_v11 = vld [vmem:[#allocation57_spill] sm:$0xff]  ;;  %v3334_v24 = vld [vmem:[#allocation58_spill] sm:$0xff] }
 0x33c   :  { %1379 = vmatpush.msrb.mxu0 %v3321_v7  ;;  %1399 = vmatpush.msrb.mxu1 %v3322_v19  ;;  %v3332_v7 = vld [vmem:[#allocation44_spill] sm:$0xff] }
 0x33d   :  { %1419 = vmatpush.msrb.mxu2 %v3323_v17  ;;  %1439 = vmatpush.msrb.mxu3 %v3324_v8 }
 0x33e   :  { %1380 = vmatpush.msrb.mxu0 %v3325_v16  ;;  %1400 = vmatpush.msrb.mxu1 %v3326_v23 }
 0x33f   :  { %1420 = vmatpush.msrb.mxu2 %v3327_v5  ;;  %1440 = vmatpush.msrb.mxu3 %v3328_v14  ;;  %v3335_v14 = vld [vmem:[#allocation60_spill] sm:$0xff] }
 0x340   :  { %1381 = vmatpush.msrb.mxu0 %v3329_v18  ;;  %1401 = vmatpush.msrb.mxu1 %v3330_v4 }
 0x341   :  { %1421 = vmatpush.msrb.mxu2 %v3331_v22  ;;  %1441 = vmatpush.msrb.mxu3 %v3332_v7 }
 0x39d   :  { %v1079_v19 = vpop.f32.mrf.mxu0  ;;  %v1099_v17 = vpop.f32.mrf.mxu1 }
 0x39e   :  { %v1142_v8 = vadd.f32 %v1079_v19, %v3333_v11  ;;  %v1143_v16 = vadd.f32 %v1099_v17, %v3334_v24  ;;  %v3336_v24 = vld [vmem:[#allocation59_spill] sm:$0xff] }
 0x3a0   :  { %v1742_v21 = vmul.f32 -1.442695, %v1142_v8  ;;  %v1743_v23 = vmul.f32 -1.442695, %v1143_v16 }
 0x3a2   :  { %1830 = vpow2.f32 %v1742_v21 }
 0x3a3   :  { %1832 = vpow2.f32 %v1743_v23 }
 0x3a4   :  { %v1139_v5 = vpop.f32.mrf.mxu3  ;;  %v1119_v7 = vpop.f32.mrf.mxu2 }
 0x3a5   :  { %v1145_v10 = vadd.f32 %v1139_v5, %v3335_v14  ;;  %v1144_v17 = vadd.f32 %v1119_v7, %v3336_v24 }
 0x3a7   :  { %v1744_v18 = vmul.f32 -1.442695, %v1145_v10 }
 0x3a8   :  { %v1831_v20 = vpop.eup %1830 }
 0x3a9   :  { %v1833_v4 = vpop.eup %1832  ;;  %v1149_v25 = vadd.f32 1.0, %v1831_v20  ;;  %1834 = vpow2.f32 %v1744_v18 }
 0x3aa   :  { %v1168_v22 = vadd.f32 1.0, %v1833_v4 }
 0x3ab   :  { %1836 = vrcp.f32 %v1149_v25  ;;  %v1161_v10 = vand.u32 2147483648, %v1149_v25  ;;  %v1159_v18 = vand.u32 2147483647, %v1149_v25  ;;  %vm1155_vm2 = vweird.f32 %v1149_v25 }
 0x3ac   :  { %1838 = vrcp.f32 %v1168_v22  ;;  %v1180_v14 = vand.u32 2147483648, %v1168_v22  ;;  %v1178_v27 = vand.u32 2147483647, %v1168_v22  ;;  %vm1174_vm3 = vweird.f32 %v1168_v22 }
 0x3ad   :  { %v1162_v7 = vor.u32 1.1754944e-38, %v1161_v10  ;;  %vm1160_vm6 = vcmp.eq.f32.partialorder %v1159_v18, 8.507059e+37 }
 0x3ae   :  { %vm1179_vm7 = vcmp.eq.f32.partialorder %v1178_v27, 8.507059e+37 }
 0x3af   :  { %v1835_v15 = vpop.eup %1834 }
 0x3b0   :  { %v1188_v11 = vadd.f32 1.0, %v1835_v15 }
 0x3b1   :  { %v1837_v19 = vpop.eup %1836 }
 0x3b2   :  { %v1839_v8 = vpop.eup %1838  ;;  %v1151_v21 = vmul.f32 %v1837_v19, %v1149_v25  ;;  %1840 = vrcp.f32 %v1188_v11  ;;  %vm1156_vm0 = vweird.f32 %v1837_v19  ;;  %v1200_v10 = vand.u32 2147483648, %v1188_v11 }
 0x3b3   :  { %v1170_v16 = vmul.f32 %v1839_v8, %v1168_v22  ;;  %1842 = vtanh.f32 %v1144_v17  ;;  %vm1175_vm1 = vweird.f32 %v1839_v8  ;;  %vm1157_vm4 = vmor %vm1155_vm2, %vm1156_vm0  ;;  %vm1194_vm9 = vweird.f32 %v1188_v11 }
 0x3b4   :  { %v1152_v23 = vsub.f32 1.0, %v1151_v21  ;;  %vm1176_vm5 = vmor %vm1174_vm3, %vm1175_vm1  ;;  %v1181_v21 = vor.u32 1.1754944e-38, %v1180_v14  ;;  %v1201_v18 = vor.u32 1.1754944e-38, %v1200_v10 }
 0x3b5   :  { %v1171_v5 = vsub.f32 1.0, %v1170_v16 }
 0x3b6   :  { %v1153_v20 = vmul.f32 %v1837_v19, %v1152_v23 }
 0x3b7   :  { %v1172_v4 = vmul.f32 %v1839_v8, %v1171_v5 }
 0x3b8   :  { %v1841_v6 = vpop.eup %1840  ;;  %v1154_v15 = vadd.f32 %v1837_v19, %v1153_v20 }
 0x3b9   :  { %v1173_v24 = vadd.f32 %v1839_v8, %v1172_v4  ;;  %v1190_v3 = vmul.f32 %v1841_v6, %v1188_v11  ;;  %v1843_v17 = vpop.eup %1842  ;;  %vm1195_vm8 = vweird.f32 %v1841_v6 }
 0x3ba   :  { %v1158_v16 = vsel %vm1157_vm4, %v1837_v19, %v1154_v15  ;;  %v1198_v19 = vand.u32 2147483647, %v1188_v11  ;;  %vm1196_vm10 = vmor %vm1194_vm9, %vm1195_vm8  ;;  %v3366_v15 = vld [vmem:[#allocation63_spill] sm:$0xff] }
 0x3bb   :  { %v1163_v2 = vsel %vm1160_vm6, %v1162_v7, %v1158_v16  ;;  %v1177_v23 = vsel %vm1176_vm5, %v1839_v8, %v1173_v24  ;;  %v1191_v1 = vsub.f32 1.0, %v1190_v3 }
 0x3bc   :  { %v1182_v5 = vsel %vm1179_vm7, %v1181_v21, %v1177_v23  ;;  %v1205_v12 = vmul.f32 %v1843_v17, %v1163_v2  ;;  %vm1199_vm11 = vcmp.eq.f32.partialorder %v1198_v19, 8.507059e+37 }
 0x3bd   :  { %v1204_v9 = vmul.f32 %v1182_v5, %v2907_v28  ;;  %v1192_v20 = vmul.f32 %v1841_v6, %v1191_v1 }
 0x3bf   :  { %v2979_v25 = vadd.f32 %v1205_v12, %v1204_v9  ;;  %v1193_v22 = vadd.f32 %v1841_v6, %v1192_v20 }
 0x3c1   :  { %1844 = vtanh.f32 %v2979_v25  ;;  %v1197_v14 = vsel %vm1196_vm10, %v1841_v6, %v1193_v22 }
 0x3c2   :  { %v1202_v3 = vsel %vm1199_vm11, %v1201_v18, %v1197_v14 }
 0x3c7   :  { %v1845_v27 = vpop.eup %1844 }
 0x3c8   :  { %v1208_v8 = vmul.f32 %v1845_v27, %v1202_v3 }
 0x3ca   :  { %1230 = vmatmul.f32.vlgmr.msra.gmra.mxu0 %v1208_v8  ;;  %1250 = vmatmul.f32.vlgmr.msra.gmra.mxu1 %v1208_v8 }
 0x3cb   :  { %1270 = vmatmul.f32.vlgmr.msra.gmra.mxu2 %v1208_v8  ;;  %1290 = vmatmul.f32.vlgmr.msra.gmra.mxu3 %v1208_v8 }
 0x3cc   :  { %1518 = vmatpush.msra.mxu0 %v2638_v26  ;;  %1538 = vmatpush.msra.mxu1 %v2641_v29  ;;  %v3337_v26 = vld [vmem:[#allocation20_spill] sm:$0xff]  ;;  %v3338_v29 = vld [vmem:[#allocation19_spill] sm:$0xff] }
 0x3cd   :  { %1558 = vmatpush.msra.mxu2 %v2644_v30  ;;  %1578 = vmatpush.msra.mxu3 %v2647_v31  ;;  %v3339_v30 = vld [vmem:[#allocation21_spill] sm:$0xff]  ;;  %v3340_v31 = vld [vmem:[#allocation22_spill] sm:$0xff] }
 0x3ce   :  { %1519 = vmatpush.msra.mxu0 %v2650_v32  ;;  %1539 = vmatpush.msra.mxu1 %v2653_v33  ;;  %v3341_v32 = vld [vmem:[#allocation24_spill] sm:$0xff]  ;;  %v3342_v33 = vld [vmem:[#allocation23_spill] sm:$0xff] }
 0x3cf   :  { %1559 = vmatpush.msra.mxu2 %v2656_v34  ;;  %1579 = vmatpush.msra.mxu3 %v2659_v35  ;;  %v3343_v34 = vld [vmem:[#allocation25_spill] sm:$0xff]  ;;  %v3344_v35 = vld [vmem:[#allocation26_spill] sm:$0xff] }
 0x3d0   :  { %1520 = vmatpush.msra.mxu0 %v2662_v36  ;;  %1540 = vmatpush.msra.mxu1 %v2665_v37  ;;  %v3345_v36 = vld [vmem:[#allocation28_spill] sm:$0xff]  ;;  %v3346_v37 = vld [vmem:[#allocation27_spill] sm:$0xff] }
 0x3d1   :  { %1560 = vmatpush.msra.mxu2 %v2668_v38  ;;  %1580 = vmatpush.msra.mxu3 %v2671_v40  ;;  %v3347_v38 = vld [vmem:[#allocation29_spill] sm:$0xff]  ;;  %v3348_v40 = vld [vmem:[#allocation30_spill] sm:$0xff] }
 0x3d2   :  { %1521 = vmatpush.msra.mxu0 %v2674_v41  ;;  %1541 = vmatpush.msra.mxu1 %v2677_v42  ;;  %v3349_v41 = vld [vmem:[#allocation32_spill] sm:$0xff]  ;;  %v3350_v42 = vld [vmem:[#allocation31_spill] sm:$0xff] }
 0x3d3   :  { %1561 = vmatpush.msra.mxu2 %v2680_v43  ;;  %1581 = vmatpush.msra.mxu3 %v2683_v47  ;;  %v3351_v43 = vld [vmem:[#allocation33_spill] sm:$0xff]  ;;  %v3352_v47 = vld [vmem:[#allocation34_spill] sm:$0xff] }
 0x3d4   :  { %1522 = vmatpush.msra.mxu0 %v2686_v0  ;;  %1542 = vmatpush.msra.mxu1 %v2689_v46  ;;  %v3353_v0 = vld [vmem:[#allocation36_spill] sm:$0xff]  ;;  %v3354_v46 = vld [vmem:[#allocation35_spill] sm:$0xff] }
 0x3d5   :  { %1562 = vmatpush.msra.mxu2 %v2692_v60  ;;  %1582 = vmatpush.msra.mxu3 %v2695_v13  ;;  %v3355_v60 = vld [vmem:[#allocation37_spill] sm:$0xff]  ;;  %v3356_v13 = vld [vmem:[#allocation38_spill] sm:$0xff] }
 0x3d6   :  { %1523 = vmatpush.msra.mxu0 %v2698_v61  ;;  %1543 = vmatpush.msra.mxu1 %v2701_v39  ;;  %v3357_v61 = vld [vmem:[#allocation39_spill] sm:$0xff]  ;;  %v3358_v39 = vld [vmem:[#allocation40_spill] sm:$0xff] }
 0x3d7   :  { %1563 = vmatpush.msra.mxu2 %v2704_v50  ;;  %1583 = vmatpush.msra.mxu3 %v2707_v63  ;;  %v3359_v50 = vld [vmem:[#allocation41_spill] sm:$0xff]  ;;  %v3360_v63 = vld [vmem:[#allocation42_spill] sm:$0xff] }
 0x3d8   :  { %1524 = vmatpush.msra.mxu0 %v2710_v49  ;;  %1544 = vmatpush.msra.mxu1 %v2713_v44  ;;  %v3361_v49 = vld [vmem:[#allocation43_spill] sm:$0xff]  ;;  %v3362_v44 = vld [vmem:[#allocation44_spill] sm:$0xff] }
 0x3d9   :  { %1564 = vmatpush.msra.mxu2 %v2716_v45  ;;  %1584 = vmatpush.msra.mxu3 %v2719_v52 }
 0x3da   :  { %1525 = vmatpush.msra.mxu0 %v2722_v51  ;;  %1545 = vmatpush.msra.mxu1 %v2725_v56  ;;  %v3363_v51 = vld [vmem:[#allocation61_spill] sm:$0xff] }
 0x3db   :  { %1565 = vmatpush.msra.mxu2 %v2728_v53  ;;  %1585 = vmatpush.msra.mxu3 %v2731_v48  ;;  %v3364_v53 = vld [vmem:[#allocation62_spill] sm:$0xff] }
 0x3dc   :  { %1526 = vmatpush.msra.mxu0 %v2734_v54  ;;  %1546 = vmatpush.msra.mxu1 %v2737_v57 }
 0x3dd   :  { %1566 = vmatpush.msra.mxu2 %v2740_v58  ;;  %1586 = vmatpush.msra.mxu3 %v2743_v62  ;;  %v3365_v62 = vld [vmem:[#allocation64_spill] sm:$0xff] }
 0x3de   :  { %1527 = vmatpush.msra.mxu0 %v2746_v59  ;;  %1547 = vmatpush.msra.mxu1 %v2749_v55 }
 0x3df   :  { %1567 = vmatpush.msra.mxu2 %v3337_v26  ;;  %1587 = vmatpush.msra.mxu3 %v3338_v29 }
 0x3e0   :  { %1528 = vmatpush.msra.mxu0 %v3339_v30  ;;  %1548 = vmatpush.msra.mxu1 %v3340_v31 }
 0x3e1   :  { %1568 = vmatpush.msra.mxu2 %v3341_v32  ;;  %1588 = vmatpush.msra.mxu3 %v3342_v33 }
 0x3e2   :  { %1529 = vmatpush.msra.mxu0 %v3343_v34  ;;  %1549 = vmatpush.msra.mxu1 %v3344_v35 }
 0x3e3   :  { %1569 = vmatpush.msra.mxu2 %v3345_v36  ;;  %1589 = vmatpush.msra.mxu3 %v3346_v37 }
 0x3e4   :  { %1530 = vmatpush.msra.mxu0 %v3347_v38  ;;  %1550 = vmatpush.msra.mxu1 %v3348_v40 }
 0x3e5   :  { %1570 = vmatpush.msra.mxu2 %v3349_v41  ;;  %1590 = vmatpush.msra.mxu3 %v3350_v42 }
 0x3e6   :  { %1531 = vmatpush.msra.mxu0 %v3351_v43  ;;  %1551 = vmatpush.msra.mxu1 %v3352_v47 }
 0x3e7   :  { %1571 = vmatpush.msra.mxu2 %v3353_v0  ;;  %1591 = vmatpush.msra.mxu3 %v3354_v46 }
 0x3e8   :  { %1532 = vmatpush.msra.mxu0 %v3355_v60  ;;  %1552 = vmatpush.msra.mxu1 %v3356_v13 }
 0x3e9   :  { %1572 = vmatpush.msra.mxu2 %v3357_v61  ;;  %1592 = vmatpush.msra.mxu3 %v3358_v39  ;;  %v3367_v39 = vld [vmem:[#allocation65_spill] sm:$0xff] }
 0x3ea   :  { %1533 = vmatpush.msra.mxu0 %v3359_v50  ;;  %1553 = vmatpush.msra.mxu1 %v3360_v63  ;;  %v3368_v63 = vld [vmem:[#allocation66_spill] sm:$0xff] }
 0x3eb   :  { %1573 = vmatpush.msra.mxu2 %v3361_v49  ;;  %1593 = vmatpush.msra.mxu3 %v3362_v44 }
 0x447   :  { %v1231_v45 = vpop.f32.mrf.mxu0  ;;  %v1251_v52 = vpop.f32.mrf.mxu1 }
 0x448   :  { %v1294_v56 = vadd.f32 %v1231_v45, %v3363_v51  ;;  %v1295_v48 = vadd.f32 %v1251_v52, %v3364_v53  ;;  %v3369_v51 = vld [vmem:[#allocation68_spill] sm:$0xff] }
 0x44a   :  { %v1745_v54 = vmul.f32 -1.442695, %v1294_v56  ;;  %v1746_v57 = vmul.f32 -1.442695, %v1295_v48 }
 0x44c   :  { %1846 = vpow2.f32 %v1745_v54 }
 0x44d   :  { %1848 = vpow2.f32 %v1746_v57 }
 0x44e   :  { %v1291_v58 = vpop.f32.mrf.mxu3  ;;  %v1271_v2 = vpop.f32.mrf.mxu2 }
 0x44f   :  { %v1297_v59 = vadd.f32 %v1291_v58, %v3365_v62  ;;  %v1296_v7 = vadd.f32 %v1271_v2, %v3366_v15 }
 0x451   :  { %v1747_v55 = vmul.f32 -1.442695, %v1297_v59 }
 0x452   :  { %v1847_v28 = vpop.eup %1846 }
 0x453   :  { %v1849_v9 = vpop.eup %1848  ;;  %v1301_v12 = vadd.f32 1.0, %v1847_v28  ;;  %1850 = vpow2.f32 %v1747_v55 }
 0x454   :  { %v1320_v1 = vadd.f32 1.0, %v1849_v9  ;;  %v3370_v9 = vld [vmem:[#allocation67_spill] sm:$0xff] }
 0x455   :  { %1852 = vrcp.f32 %v1301_v12  ;;  %v1313_v5 = vand.u32 2147483648, %v1301_v12  ;;  %v1311_v10 = vand.u32 2147483647, %v1301_v12  ;;  %vm1307_vm14 = vweird.f32 %v1301_v12 }
 0x456   :  { %1854 = vrcp.f32 %v1320_v1  ;;  %v1332_v20 = vand.u32 2147483648, %v1320_v1  ;;  %v1330_v14 = vand.u32 2147483647, %v1320_v1  ;;  %vm1326_vm15 = vweird.f32 %v1320_v1 }
 0x457   :  { %v1314_v3 = vor.u32 1.1754944e-38, %v1313_v5  ;;  %vm1312_vm2 = vcmp.eq.f32.partialorder %v1311_v10, 8.507059e+37 }
 0x458   :  { %v1333_v29 = vor.u32 1.1754944e-38, %v1332_v20  ;;  %vm1331_vm3 = vcmp.eq.f32.partialorder %v1330_v14, 8.507059e+37 }
 0x459   :  { %v1851_v6 = vpop.eup %1850 }
 0x45a   :  { %v1340_v11 = vadd.f32 1.0, %v1851_v6 }
 0x45b   :  { %v1853_v4 = vpop.eup %1852 }
 0x45c   :  { %v1855_v24 = vpop.eup %1854  ;;  %v1303_v21 = vmul.f32 %v1853_v4, %v1301_v12  ;;  %1856 = vrcp.f32 %v1340_v11  ;;  %vm1308_vm12 = vweird.f32 %v1853_v4  ;;  %v1352_v42 = vand.u32 2147483648, %v1340_v11 }
 0x45d   :  { %v1322_v16 = vmul.f32 %v1855_v24, %v1320_v1  ;;  %1858 = vtanh.f32 %v1296_v7  ;;  %vm1327_vm13 = vweird.f32 %v1855_v24  ;;  %vm1309_vm0 = vmor %vm1307_vm14, %vm1308_vm12  ;;  %vm1346_vm5 = vweird.f32 %v1340_v11 }
 0x45e   :  { %v1304_v17 = vsub.f32 1.0, %v1303_v21  ;;  %vm1328_vm1 = vmor %vm1326_vm15, %vm1327_vm13  ;;  %v1350_v43 = vand.u32 2147483647, %v1340_v11  ;;  %v1353_v0 = vor.u32 1.1754944e-38, %v1352_v42 }
 0x45f   :  { %v1323_v23 = vsub.f32 1.0, %v1322_v16 }
 0x460   :  { %v1305_v22 = vmul.f32 %v1853_v4, %v1304_v17  ;;  %vm1351_vm7 = vcmp.eq.f32.partialorder %v1350_v43, 8.507059e+37  ;;  %v1684_v43 = vld [vmem:[#allocation13 + $0x70] sm:$0xff] }
 0x461   :  { %v1324_v19 = vmul.f32 %v1855_v24, %v1323_v23 }
 0x462   :  { %v1857_v18 = vpop.eup %1856  ;;  %v1306_v27 = vadd.f32 %v1853_v4, %v1305_v22 }
 0x463   :  { %v1325_v8 = vadd.f32 %v1855_v24, %v1324_v19  ;;  %v1342_v26 = vmul.f32 %v1857_v18, %v1340_v11  ;;  %v1859_v31 = vpop.eup %1858  ;;  %vm1347_vm4 = vweird.f32 %v1857_v18 }
 0x464   :  { %v1310_v30 = vsel %vm1309_vm0, %v1853_v4, %v1306_v27  ;;  %vm1348_vm6 = vmor %vm1346_vm5, %vm1347_vm4 }
 0x465   :  { %v1315_v32 = vsel %vm1312_vm2, %v1314_v3, %v1310_v30  ;;  %v1329_v33 = vsel %vm1328_vm1, %v1855_v24, %v1325_v8  ;;  %v1343_v34 = vsub.f32 1.0, %v1342_v26 }
 0x466   :  { %v1334_v35 = vsel %vm1331_vm3, %v1333_v29, %v1329_v33  ;;  %v1357_v36 = vmul.f32 %v1859_v31, %v1315_v32 }
 0x467   :  { %v1356_v37 = vmul.f32 %v1334_v35, %v2979_v25  ;;  %v1344_v38 = vmul.f32 %v1857_v18, %v1343_v34 }
 0x469   :  { %v3051_v40 = vadd.f32 %v1357_v36, %v1356_v37  ;;  %v1345_v41 = vadd.f32 %v1857_v18, %v1344_v38 }
 0x46b   :  { %1860 = vtanh.f32 %v3051_v40  ;;  %v1349_v47 = vsel %vm1348_vm6, %v1857_v18, %v1345_v41 }
 0x46c   :  { %v1354_v60 = vsel %vm1351_vm7, %v1353_v0, %v1349_v47  ;;  %v1683_v47 = vld [vmem:[#allocation13 + $0x68] sm:$0xff]  ;;  %v1682_v0 = vld [vmem:[#allocation13 + $0x60] sm:$0xff] }
 0x471   :  { %v1861_v46 = vpop.eup %1860 }
 0x472   :  { %v1360_v13 = vmul.f32 %v1861_v46, %v1354_v60  ;;  %v1681_v46 = vld [vmem:[#allocation13 + $0x58] sm:$0xff]  ;;  %v1680_v60 = vld [vmem:[#allocation13 + $0x50] sm:$0xff] }
 0x474   :  { %1382 = vmatmul.f32.vlgmr.msrb.gmra.mxu0 %v1360_v13  ;;  %1402 = vmatmul.f32.vlgmr.msrb.gmra.mxu1 %v1360_v13 }
 0x475   :  { %1422 = vmatmul.f32.vlgmr.msrb.gmra.mxu2 %v1360_v13  ;;  %1442 = vmatmul.f32.vlgmr.msrb.gmra.mxu3 %v1360_v13  ;;  %v1679_v13 = vld [vmem:[#allocation13 + $0x48] sm:$0xff] }
 0x4f1   :  { %v1383_v25 = vpop.f32.mrf.mxu0  ;;  %v1403_v61 = vpop.f32.mrf.mxu1 }
 0x4f2   :  { %v1446_v50 = vadd.f32 %v1383_v25, %v3367_v39  ;;  %v1447_v49 = vadd.f32 %v1403_v61, %v3368_v63  ;;  %v1678_v25 = vld [vmem:[#allocation13 + $0x40] sm:$0xff]  ;;  %v1677_v61 = vld [vmem:[#allocation13 + $0x38] sm:$0xff]  ;;  %v1676_v39 = vld [vmem:[#allocation13 + $0x30] sm:$0xff] }
 0x4f4   :  { %v1748_v44 = vmul.f32 -1.442695, %v1446_v50  ;;  %v1749_v45 = vmul.f32 -1.442695, %v1447_v49  ;;  %v3371_v49 = vld [vmem:[#allocation69_spill] sm:$0xff] }
 0x4f6   :  { %1862 = vpow2.f32 %v1748_v44 }
 0x4f7   :  { %1864 = vpow2.f32 %v1749_v45  ;;  %v3372_v45 = vld [vmem:[#allocation70_spill] sm:$0xff] }
 0x4f8   :  { %v1443_v52 = vpop.f32.mrf.mxu3  ;;  %v1423_v62 = vpop.f32.mrf.mxu2 }
 0x4f9   :  { %v1449_v56 = vadd.f32 %v1443_v52, %v3369_v51  ;;  %v1448_v12 = vadd.f32 %v1423_v62, %v3370_v9  ;;  %v1675_v51 = vld [vmem:[#allocation13 + $0x28] sm:$0xff] }
 0x4fa   :  { %v1671_v62 = vld [vmem:[#allocation13 + $0x8] sm:$0xff] }
 0x4fb   :  { %v1750_v53 = vmul.f32 -1.442695, %v1449_v56 }
 0x4fc   :  { %v1863_v48 = vpop.eup %1862 }
 0x4fd   :  { %v1865_v54 = vpop.eup %1864  ;;  %v1453_v57 = vadd.f32 1.0, %v1863_v48  ;;  %1866 = vpow2.f32 %v1750_v53  ;;  %v1674_v48 = vld [vmem:[#allocation13 + $0x20] sm:$0xff] }
 0x4fe   :  { %v1472_v58 = vadd.f32 1.0, %v1865_v54  ;;  %v1673_v54 = vld [vmem:[#allocation13 + $0x18] sm:$0xff] }
 0x4ff   :  { %1868 = vrcp.f32 %v1453_v57  ;;  %v1465_v15 = vand.u32 2147483648, %v1453_v57  ;;  %v1463_v21 = vand.u32 2147483647, %v1453_v57  ;;  %vm1459_vm10 = vweird.f32 %v1453_v57 }
 0x500   :  { %1870 = vrcp.f32 %v1472_v58  ;;  %v1484_v7 = vand.u32 2147483648, %v1472_v58  ;;  %v1482_v17 = vand.u32 2147483647, %v1472_v58  ;;  %vm1478_vm11 = vweird.f32 %v1472_v58 }
 0x501   :  { %v1466_v20 = vor.u32 1.1754944e-38, %v1465_v15  ;;  %vm1464_vm14 = vcmp.eq.f32.partialorder %v1463_v21, 8.507059e+37 }
 0x502   :  { %v1485_v19 = vor.u32 1.1754944e-38, %v1484_v7  ;;  %vm1483_vm15 = vcmp.eq.f32.partialorder %v1482_v17, 8.507059e+37 }
 0x503   :  { %v1867_v59 = vpop.eup %1866 }
 0x504   :  { %v1492_v55 = vadd.f32 1.0, %v1867_v59  ;;  %v3373_v59 = vld [vmem:[#allocation72_spill] sm:$0xff] }
 0x505   :  { %v1869_v28 = vpop.eup %1868 }
 0x506   :  { %v1871_v1 = vpop.eup %1870  ;;  %v1455_v2 = vmul.f32 %v1869_v28, %v1453_v57  ;;  %1872 = vrcp.f32 %v1492_v55  ;;  %vm1460_vm8 = vweird.f32 %v1869_v28  ;;  %v1504_v34 = vand.u32 2147483648, %v1492_v55  ;;  %v1672_v57 = vld [vmem:[#allocation13 + $0x10] sm:$0xff] }
 0x507   :  { %v1474_v6 = vmul.f32 %v1871_v1, %v1472_v58  ;;  %1874 = vtanh.f32 %v1448_v12  ;;  %vm1479_vm9 = vweird.f32 %v1871_v1  ;;  %vm1461_vm12 = vmor %vm1459_vm10, %vm1460_vm8  ;;  %vm1498_vm1 = vweird.f32 %v1492_v55 }
 0x508   :  { %v1456_v11 = vsub.f32 1.0, %v1455_v2  ;;  %vm1480_vm13 = vmor %vm1478_vm11, %vm1479_vm9  ;;  %v1502_v35 = vand.u32 2147483647, %v1492_v55  ;;  %v1505_v37 = vor.u32 1.1754944e-38, %v1504_v34 }
 0x509   :  { %v1475_v4 = vsub.f32 1.0, %v1474_v6 }
 0x50a   :  { %v1457_v24 = vmul.f32 %v1869_v28, %v1456_v11  ;;  %vm1503_vm3 = vcmp.eq.f32.partialorder %v1502_v35, 8.507059e+37 }
 0x50b   :  { %v1476_v16 = vmul.f32 %v1871_v1, %v1475_v4 }
 0x50c   :  { %v1873_v23 = vpop.eup %1872  ;;  %v1458_v5 = vadd.f32 %v1869_v28, %v1457_v24  ;;  %v3374_v24 = vld [vmem:[#allocation71_spill] sm:$0xff] }
 0x50d   :  { %v1477_v22 = vadd.f32 %v1871_v1, %v1476_v16  ;;  %v1494_v10 = vmul.f32 %v1873_v23, %v1492_v55  ;;  %v1875_v18 = vpop.eup %1874  ;;  %vm1499_vm0 = vweird.f32 %v1873_v23 }
 0x50e   :  { %v1462_v14 = vsel %vm1461_vm12, %v1869_v28, %v1458_v5  ;;  %vm1500_vm2 = vmor %vm1498_vm1, %vm1499_vm0  ;;  %v1670_v28 = vld [vmem:[#allocation13] sm:$0xff] }
 0x50f   :  { %v1467_v27 = vsel %vm1464_vm14, %v1466_v20, %v1462_v14  ;;  %v1481_v3 = vsel %vm1480_vm13, %v1871_v1, %v1477_v22  ;;  %v1495_v8 = vsub.f32 1.0, %v1494_v10 }
 0x510   :  { %v1486_v26 = vsel %vm1483_vm15, %v1485_v19, %v1481_v3  ;;  %v1509_v29 = vmul.f32 %v1875_v18, %v1467_v27 }
 0x511   :  { %v1508_v30 = vmul.f32 %v1486_v26, %v3051_v40  ;;  %v1496_v31 = vmul.f32 %v1873_v23, %v1495_v8  ;;  %v1685_v40 = vld [vmem:[#allocation13 + $0x78] sm:$0xff] }
 0x512   :  { %1690 = vmatpush.msrb.mxu0 %v1685_v40 }
 0x513   :  { %v3059_v32 = vadd.f32 %v1509_v29, %v1508_v30  ;;  %v1497_v33 = vadd.f32 %v1873_v23, %v1496_v31 }
 0x514   :  { %1691 = vmatpush.msrb.mxu0 %v1684_v43 }
 0x515   :  { %1876 = vtanh.f32 %v3059_v32  ;;  %v1501_v36 = vsel %vm1500_vm2, %v1873_v23, %v1497_v33 }
 0x516   :  { %v1506_v41 = vsel %vm1503_vm3, %v1505_v37, %v1501_v36  ;;  %1692 = vmatpush.msrb.mxu0 %v1683_v47 }
 0x518   :  { %1693 = vmatpush.msrb.mxu0 %v1682_v0 }
 0x51a   :  { %1694 = vmatpush.msrb.mxu0 %v1681_v46 }
 0x51b   :  { %v1877_v38 = vpop.eup %1876 }
 0x51c   :  { %v1512_v42 = vmul.f32 %v1877_v38, %v1506_v41  ;;  %1695 = vmatpush.msrb.mxu0 %v1680_v60 }
 0x51e   :  { %1534 = vmatmul.f32.vlgmr.msra.gmra.mxu0 %v1512_v42  ;;  %1554 = vmatmul.f32.vlgmr.msra.gmra.mxu1 %v1512_v42 }
 0x51f   :  { %1574 = vmatmul.f32.vlgmr.msra.gmra.mxu2 %v1512_v42  ;;  %1594 = vmatmul.f32.vlgmr.msra.gmra.mxu3 %v1512_v42 }
 0x520   :  { %1696 = vmatpush.msrb.mxu0 %v1679_v13 }
 0x522   :  { %1697 = vmatpush.msrb.mxu0 %v1678_v25 }
 0x524   :  { %1698 = vmatpush.msrb.mxu0 %v1677_v61 }
 0x526   :  { %1699 = vmatpush.msrb.mxu0 %v1676_v39 }
 0x528   :  { %1700 = vmatpush.msrb.mxu0 %v1675_v51 }
 0x52a   :  { %1701 = vmatpush.msrb.mxu0 %v1674_v48 }
 0x52c   :  { %1702 = vmatpush.msrb.mxu0 %v1673_v54 }
 0x52e   :  { %1703 = vmatpush.msrb.mxu0 %v1672_v57 }
 0x530   :  { %1704 = vmatpush.msrb.mxu0 %v1671_v62 }
 0x532   :  { %1705 = vmatpush.msrb.mxu0 %v1670_v28 }
 0x59b   :  { %v1535_v50 = vpop.f32.mrf.mxu0  ;;  %v1555_v63 = vpop.f32.mrf.mxu1 }
 0x59c   :  { %v1598_v44 = vadd.f32 %v1535_v50, %v3371_v49  ;;  %v1599_v52 = vadd.f32 %v1555_v63, %v3372_v45 }
 0x59e   :  { %v1751_v56 = vmul.f32 -1.442695, %v1598_v44  ;;  %v1752_v53 = vmul.f32 -1.442695, %v1599_v52 }
 0x5a0   :  { %1878 = vpow2.f32 %v1751_v56 }
 0x5a1   :  { %1880 = vpow2.f32 %v1752_v53 }
 0x5a2   :  { %v1595_v58 = vpop.f32.mrf.mxu3  ;;  %v1575_v11 = vpop.f32.mrf.mxu2 }
 0x5a3   :  { %v1601_v55 = vadd.f32 %v1595_v58, %v3373_v59  ;;  %v1600_v21 = vadd.f32 %v1575_v11, %v3374_v24 }
 0x5a5   :  { %v1753_v9 = vmul.f32 -1.442695, %v1601_v55 }
 0x5a6   :  { %v1879_v12 = vpop.eup %1878 }
 0x5a7   :  { %v1881_v1 = vpop.eup %1880  ;;  %v1605_v2 = vadd.f32 1.0, %v1879_v12  ;;  %1882 = vpow2.f32 %v1753_v9 }
 0x5a8   :  { %v1624_v6 = vadd.f32 1.0, %v1881_v1 }
 0x5a9   :  { %1884 = vrcp.f32 %v1605_v2  ;;  %v1617_v22 = vand.u32 2147483648, %v1605_v2  ;;  %v1615_v14 = vand.u32 2147483647, %v1605_v2  ;;  %vm1611_vm6 = vweird.f32 %v1605_v2 }
 0x5aa   :  { %1886 = vrcp.f32 %v1624_v6  ;;  %v1636_v10 = vand.u32 2147483648, %v1624_v6  ;;  %v1634_v27 = vand.u32 2147483647, %v1624_v6  ;;  %vm1630_vm7 = vweird.f32 %v1624_v6 }
 0x5ab   :  { %v1618_v26 = vor.u32 1.1754944e-38, %v1617_v22  ;;  %vm1616_vm10 = vcmp.eq.f32.partialorder %v1615_v14, 8.507059e+37 }
 0x5ac   :  { %v1637_v31 = vor.u32 1.1754944e-38, %v1636_v10  ;;  %vm1635_vm11 = vcmp.eq.f32.partialorder %v1634_v27, 8.507059e+37 }
 0x5ad   :  { %v1883_v4 = vpop.eup %1882 }
 0x5ae   :  { %v1644_v15 = vadd.f32 1.0, %v1883_v4 }
 0x5af   :  { %v1885_v7 = vpop.eup %1884 }
 0x5b0   :  { %v1887_v16 = vpop.eup %1886  ;;  %v1607_v17 = vmul.f32 %v1885_v7, %v1605_v2  ;;  %1888 = vrcp.f32 %v1644_v15  ;;  %vm1612_vm4 = vweird.f32 %v1885_v7  ;;  %v1656_v0 = vand.u32 2147483648, %v1644_v15 }
 0x5b1   :  { %v1626_v23 = vmul.f32 %v1887_v16, %v1624_v6  ;;  %1890 = vtanh.f32 %v1600_v21  ;;  %vm1631_vm5 = vweird.f32 %v1887_v16  ;;  %vm1613_vm8 = vmor %vm1611_vm6, %vm1612_vm4  ;;  %vm1650_vm13 = vweird.f32 %v1644_v15 }
 0x5b2   :  { %v1608_v5 = vsub.f32 1.0, %v1607_v17  ;;  %vm1632_vm9 = vmor %vm1630_vm7, %vm1631_vm5  ;;  %v1654_v46 = vand.u32 2147483647, %v1644_v15  ;;  %v1657_v13 = vor.u32 1.1754944e-38, %v1656_v0 }
 0x5b3   :  { %v1627_v20 = vsub.f32 1.0, %v1626_v23 }
 0x5b4   :  { %v1609_v19 = vmul.f32 %v1885_v7, %v1608_v5  ;;  %vm1655_vm15 = vcmp.eq.f32.partialorder %v1654_v46, 8.507059e+37 }
 0x5b5   :  { %v1628_v18 = vmul.f32 %v1887_v16, %v1627_v20 }
 0x5b6   :  { %v1889_v3 = vpop.eup %1888  ;;  %v1610_v8 = vadd.f32 %v1885_v7, %v1609_v19 }
 0x5b7   :  { %v1629_v29 = vadd.f32 %v1887_v16, %v1628_v18  ;;  %v1646_v30 = vmul.f32 %v1889_v3, %v1644_v15  ;;  %v1891_v34 = vpop.eup %1890  ;;  %vm1651_vm12 = vweird.f32 %v1889_v3 }
 0x5b8   :  { %v1614_v33 = vsel %vm1613_vm8, %v1885_v7, %v1610_v8  ;;  %vm1652_vm14 = vmor %vm1650_vm13, %vm1651_vm12 }
 0x5b9   :  { %v1619_v35 = vsel %vm1616_vm10, %v1618_v26, %v1614_v33  ;;  %v1633_v36 = vsel %vm1632_vm9, %v1887_v16, %v1629_v29  ;;  %v1647_v37 = vsub.f32 1.0, %v1646_v30 }
 0x5ba   :  { %v1638_v38 = vsel %vm1635_vm11, %v1637_v31, %v1633_v36  ;;  %v1661_v41 = vmul.f32 %v1891_v34, %v1619_v35 }
 0x5bb   :  { %v1660_v42 = vmul.f32 %v1638_v38, %v3059_v32  ;;  %v1648_v40 = vmul.f32 %v1889_v3, %v1647_v37  ;;  %v1765_v32 = vld [vmem:[%s3078_s5] ss:$0 sm:$0xff] }
 0x5bd   :  { %v1662_v43 = vadd.f32 %v1661_v41, %v1660_v42  ;;  %v1649_v47 = vadd.f32 %v1889_v3, %v1648_v40 }
 0x5bf   :  { %1892 = vtanh.f32 %v1662_v43  ;;  %v1653_v60 = vsel %vm1652_vm14, %v1889_v3, %v1649_v47 }
 0x5c0   :  { %v1658_v61 = vsel %vm1655_vm15, %v1657_v13, %v1653_v60 }
 0x5c5   :  { %v1893_v25 = vpop.eup %1892 }
 0x5c6   :  { %v1664_v39 = vmul.f32 %v1893_v25, %v1658_v61 }
 0x5c8   :  { %1706 = vmatmul.f32.vlgmr.msrb.gmra.mxu0 %v1664_v39 }
 0x645   :  { %v1707_v50 = vpop.f32.mrf.mxu0 }
 0x646   :  { %v1708_v63 = vadd.f32 %v1765_v32, %v1707_v50 }
 0x648   :  { %1710 = vst [vmem:[#allocation14] sm:$0xff] %v1708_v63 }
 0x649   :  { %1721 = dma.vmem_to_hbm [thread:$0]  %s1717_s24, 128, %s1719_s27, [#allocation7]  }
 0x64a   :  { %2108 = dma.done.wait [#allocation7], 128  }
 0x64b   :  { %2109 = vsyncadd [#allocation7], 4294967168 }
 0x64c   :  { %1726 = vsyncpa [#allocation6], 1 }
 0x64d   :  { %1727 = vsyncpa [#allocation9], 1 }
 0x64e   :  { %1728 = vsyncpa [#allocation12], 1 }
 0x64f   :  { %1729 = vsyncpa [#allocation7], 1 }

// kernel: tpu_custom_call.1
= control target key start
LH: loop header
LB: loop body
LE: loop exit
PB: predicated region body
PF: predicated region fallthrough
CT: control target
= control target key end

     0   :  { %11 = vsyncpa [#allocation6], 0  ;;  %s3073_s0 = inlined_call_operand.hbm [shape: f32[8,8,128], index: 0, kind: input, shape index: {}]   ;;  %s3074_s1 = inlined_call_operand.hbm [shape: f32[128,512], index: 1, kind: input, shape index: {}]   ;;  %s3075_s2 = inlined_call_operand.hbm [shape: f32[128,512], index: 2, kind: input, shape index: {}]   ;;  %s3076_s3 = inlined_call_operand.hbm [shape: f32[1,512], index: 3, kind: input, shape index: {}]   ;;  %s3077_s4 = inlined_call_operand.hbm [shape: f32[128,128], index: 4, kind: input, shape index: {}]   ;;  %s3078_s5 = inlined_call_operand.vmem [shape: f32[1,128], index: 5, kind: input, shape index: {}]   ;;  %s3079_s6 = inlined_call_operand.hbm [shape: f32[8,128], index: 6, kind: output, shape index: {}]  }
   0x1   :  { %12 = vsyncpa [#allocation9], 0 }
   0x2   :  { %13 = vsyncpa [#allocation12], 0  ;;  %s32_s23 = sshll.u32 %s3074_s1, 4  ;;  %s33_s23 = int_to_ptr.hbm [resolvable:$true] %s32_s23 }
   0x3   :  { %14 = vsyncpa [#allocation7], 0  ;;  %s2110_s24 = smov [#allocation8]   ;;  %s59_s28 = sshll.u32 %s3076_s3, 4  ;;  %s60_s28 = int_to_ptr.hbm [resolvable:$true] %s59_s28 }
   0x4   :  { %s34_s25 = sshll.u32 %s2110_s24, 4  ;;  %s2111_s29 = smov 512   ;;  %s35_s25 = int_to_ptr.vmem [resolvable:$true] %s34_s25 }
   0x5   :  { %s2112_s30 = smov 32   ;;  %s2113_s7 = smov [#allocation11]  }
   0x6   :  { %40 = dma.hbm_to_vmem [thread:$0]  %s33_s23, 8192, %s35_s25, [#allocation9], %s2111_s29, %s2111_s29, %s2112_s30  }
   0x7   :  { %s61_s8 = sshll.u32 %s2113_s7, 4  ;;  %s19_s11 = sshll.u32 %s3073_s0, 4  ;;  %s62_s8 = int_to_ptr.vmem [resolvable:$true] %s61_s8  ;;  %s20_s11 = int_to_ptr.hbm [resolvable:$true] %s19_s11 }
   0x8   :  { %64 = dma.hbm_to_vmem [thread:$0]  %s60_s28, 64, %s62_s8, [#allocation12]  }
   0x9   :  { %s2114_s1 = smov [#allocation5]   ;;  %s45_s3 = sshll.u32 %s3075_s2, 4  ;;  %s46_s3 = int_to_ptr.hbm [resolvable:$true] %s45_s3 }
   0xa   :  { %s21_s12 = sshll.u32 %s2114_s1, 4  ;;  %s2115_s15 = smov 128   ;;  %s22_s12 = int_to_ptr.vmem [resolvable:$true] %s21_s12 }
   0xb   :  { %s2116_s16 = smov 8   ;;  %s2117_s17 = smov [#allocation10]  }
   0xc   :  { %27 = dma.hbm_to_vmem [thread:$0]  %s20_s11, 1024, %s22_s12, [#allocation6], %s2115_s15, %s2115_s15, %s2116_s16  }
   0xd   :  { %s47_s18 = sshll.u32 %s2117_s17, 4  ;;  %s69_s0 = sshll.u32 %s3077_s4, 4  ;;  %s48_s18 = int_to_ptr.vmem [resolvable:$true] %s47_s18  ;;  %s70_s0 = int_to_ptr.hbm [resolvable:$true] %s69_s0 }
   0xe   :  { %53 = dma.hbm_to_vmem [thread:$0]  %s46_s3, 8192, %s48_s18, [#allocation9], %s2111_s29, %s2111_s29, %s2112_s30  }
   0xf   :  { %s2118_s21 = smov [#allocation13]  }
  0x10   :  { %s71_s22 = sshll.u32 %s2118_s21, 4  ;;  %s72_s22 = int_to_ptr.vmem [resolvable:$true] %s71_s22 }
  0x11   :  { %77 = dma.hbm_to_vmem [thread:$0]  %s70_s0, 2048, %s72_s22, [#allocation12], %s2115_s15, %s2115_s15, %s2116_s16  }
  0x12   :  { %2102 = dma.done.wait [#allocation6], 1024  }
  0x13   :  { %2103 = vsyncadd [#allocation6], 4294966272 }
  0x14   :  { %2104 = dma.done.wait [#allocation9], 16384  }
  0x15   :  { %2105 = vsyncadd [#allocation9], 4294950912 }
  0x16   :  { %2106 = dma.done.wait [#allocation12], 2112  }
  0x17   :  { %2107 = vsyncadd [#allocation12], 4294965184  ;;  %v174_v0 = vld [vmem:[#allocation8 + $0x1e0] sm:$0xff]  ;;  %v175_v1 = vld [vmem:[#allocation8 + $0x1e8] sm:$0xff]  ;;  %s2120_s23 = smov [#allocation14]   ;;  %s1718_s27 = sshll.u32 %s3079_s6, 4  ;;  %s1719_s27 = int_to_ptr.hbm [resolvable:$true] %s1718_s27 }
  0x18   :  { %v176_v2 = vld [vmem:[#allocation8 + $0x1f0] sm:$0xff]  ;;  %188 = vmatpush.msra.mxu0 %v174_v0  ;;  %229 = vmatpush.msra.mxu1 %v175_v1  ;;  %v177_v3 = vld [vmem:[#allocation8 + $0x1f8] sm:$0xff]  ;;  %v170_v4 = vld [vmem:[#allocation8 + $0x1c0] sm:$0xff]  ;;  %s1716_s24 = sshll.u32 %s2120_s23, 4  ;;  %s1717_s24 = int_to_ptr.vmem [resolvable:$true] %s1716_s24 }
  0x19   :  { %v171_v5 = vld [vmem:[#allocation8 + $0x1c8] sm:$0xff]  ;;  %270 = vmatpush.msra.mxu2 %v176_v2  ;;  %311 = vmatpush.msra.mxu3 %v177_v3  ;;  %v172_v6 = vld [vmem:[#allocation8 + $0x1d0] sm:$0xff]  ;;  %v173_v7 = vld [vmem:[#allocation8 + $0x1d8] sm:$0xff] }
  0x1a   :  { %v166_v8 = vld [vmem:[#allocation8 + $0x1a0] sm:$0xff]  ;;  %189 = vmatpush.msra.mxu0 %v170_v4  ;;  %230 = vmatpush.msra.mxu1 %v171_v5  ;;  %v167_v9 = vld [vmem:[#allocation8 + $0x1a8] sm:$0xff]  ;;  %v168_v10 = vld [vmem:[#allocation8 + $0x1b0] sm:$0xff] }
  0x1b   :  { %v169_v11 = vld [vmem:[#allocation8 + $0x1b8] sm:$0xff]  ;;  %271 = vmatpush.msra.mxu2 %v172_v6  ;;  %312 = vmatpush.msra.mxu3 %v173_v7  ;;  %v162_v12 = vld [vmem:[#allocation8 + $0x180] sm:$0xff]  ;;  %v163_v13 = vld [vmem:[#allocation8 + $0x188] sm:$0xff] }
  0x1c   :  { %190 = vmatpush.msra.mxu0 %v166_v8  ;;  %231 = vmatpush.msra.mxu1 %v167_v9  ;;  %v164_v14 = vld [vmem:[#allocation8 + $0x190] sm:$0xff]  ;;  %v165_v15 = vld [vmem:[#allocation8 + $0x198] sm:$0xff]  ;;  %v158_v16 = vld [vmem:[#allocation8 + $0x160] sm:$0xff] }
  0x1d   :  { %272 = vmatpush.msra.mxu2 %v168_v10  ;;  %313 = vmatpush.msra.mxu3 %v169_v11  ;;  %v159_v17 = vld [vmem:[#allocation8 + $0x168] sm:$0xff]  ;;  %v160_v18 = vld [vmem:[#allocation8 + $0x170] sm:$0xff]  ;;  %v161_v19 = vld [vmem:[#allocation8 + $0x178] sm:$0xff] }
  0x1e   :  { %191 = vmatpush.msra.mxu0 %v162_v12  ;;  %232 = vmatpush.msra.mxu1 %v163_v13  ;;  %v154_v20 = vld [vmem:[#allocation8 + $0x140] sm:$0xff]  ;;  %v155_v21 = vld [vmem:[#allocation8 + $0x148] sm:$0xff]  ;;  %v156_v22 = vld [vmem:[#allocation8 + $0x150] sm:$0xff] }
  0x1f   :  { %273 = vmatpush.msra.mxu2 %v164_v14  ;;  %314 = vmatpush.msra.mxu3 %v165_v15  ;;  %v157_v23 = vld [vmem:[#allocation8 + $0x158] sm:$0xff]  ;;  %v150_v24 = vld [vmem:[#allocation8 + $0x120] sm:$0xff]  ;;  %v151_v25 = vld [vmem:[#allocation8 + $0x128] sm:$0xff] }
  0x20   :  { %192 = vmatpush.msra.mxu0 %v158_v16  ;;  %233 = vmatpush.msra.mxu1 %v159_v17  ;;  %v152_v26 = vld [vmem:[#allocation8 + $0x130] sm:$0xff]  ;;  %v153_v27 = vld [vmem:[#allocation8 + $0x138] sm:$0xff]  ;;  %v146_v28 = vld [vmem:[#allocation8 + $0x100] sm:$0xff] }
  0x21   :  { %274 = vmatpush.msra.mxu2 %v160_v18  ;;  %315 = vmatpush.msra.mxu3 %v161_v19  ;;  %v147_v29 = vld [vmem:[#allocation8 + $0x108] sm:$0xff]  ;;  %v148_v30 = vld [vmem:[#allocation8 + $0x110] sm:$0xff]  ;;  %v149_v31 = vld [vmem:[#allocation8 + $0x118] sm:$0xff] }
  0x22   :  { %193 = vmatpush.msra.mxu0 %v154_v20  ;;  %234 = vmatpush.msra.mxu1 %v155_v21  ;;  %v142_v32 = vld [vmem:[#allocation8 + $0xe0] sm:$0xff]  ;;  %v143_v33 = vld [vmem:[#allocation8 + $0xe8] sm:$0xff]  ;;  %v144_v34 = vld [vmem:[#allocation8 + $0xf0] sm:$0xff] }
  0x23   :  { %275 = vmatpush.msra.mxu2 %v156_v22  ;;  %316 = vmatpush.msra.mxu3 %v157_v23  ;;  %v145_v35 = vld [vmem:[#allocation8 + $0xf8] sm:$0xff]  ;;  %v138_v36 = vld [vmem:[#allocation8 + $0xc0] sm:$0xff]  ;;  %v139_v37 = vld [vmem:[#allocation8 + $0xc8] sm:$0xff] }
  0x24   :  { %194 = vmatpush.msra.mxu0 %v150_v24  ;;  %235 = vmatpush.msra.mxu1 %v151_v25  ;;  %v140_v38 = vld [vmem:[#allocation8 + $0xd0] sm:$0xff]  ;;  %v141_v39 = vld [vmem:[#allocation8 + $0xd8] sm:$0xff]  ;;  %v134_v40 = vld [vmem:[#allocation8 + $0xa0] sm:$0xff] }
  0x25   :  { %276 = vmatpush.msra.mxu2 %v152_v26  ;;  %317 = vmatpush.msra.mxu3 %v153_v27  ;;  %v135_v41 = vld [vmem:[#allocation8 + $0xa8] sm:$0xff]  ;;  %v136_v42 = vld [vmem:[#allocation8 + $0xb0] sm:$0xff]  ;;  %v137_v43 = vld [vmem:[#allocation8 + $0xb8] sm:$0xff] }
  0x26   :  { %195 = vmatpush.msra.mxu0 %v146_v28  ;;  %236 = vmatpush.msra.mxu1 %v147_v29  ;;  %v130_v44 = vld [vmem:[#allocation8 + $0x80] sm:$0xff]  ;;  %v131_v45 = vld [vmem:[#allocation8 + $0x88] sm:$0xff]  ;;  %v132_v46 = vld [vmem:[#allocation8 + $0x90] sm:$0xff] }
  0x27   :  { %277 = vmatpush.msra.mxu2 %v148_v30  ;;  %318 = vmatpush.msra.mxu3 %v149_v31  ;;  %v133_v47 = vld [vmem:[#allocation8 + $0x98] sm:$0xff]  ;;  %v126_v48 = vld [vmem:[#allocation8 + $0x60] sm:$0xff]  ;;  %v127_v49 = vld [vmem:[#allocation8 + $0x68] sm:$0xff] }
  0x28   :  { %196 = vmatpush.msra.mxu0 %v142_v32  ;;  %237 = vmatpush.msra.mxu1 %v143_v33  ;;  %v128_v50 = vld [vmem:[#allocation8 + $0x70] sm:$0xff]  ;;  %v129_v51 = vld [vmem:[#allocation8 + $0x78] sm:$0xff]  ;;  %v122_v52 = vld [vmem:[#allocation8 + $0x40] sm:$0xff] }
  0x29   :  { %278 = vmatpush.msra.mxu2 %v144_v34  ;;  %319 = vmatpush.msra.mxu3 %v145_v35  ;;  %v123_v53 = vld [vmem:[#allocation8 + $0x48] sm:$0xff]  ;;  %v124_v54 = vld [vmem:[#allocation8 + $0x50] sm:$0xff]  ;;  %v125_v55 = vld [vmem:[#allocation8 + $0x58] sm:$0xff] }
  0x2a   :  { %197 = vmatpush.msra.mxu0 %v138_v36  ;;  %238 = vmatpush.msra.mxu1 %v139_v37  ;;  %v118_v56 = vld [vmem:[#allocation8 + $0x20] sm:$0xff]  ;;  %v119_v57 = vld [vmem:[#allocation8 + $0x28] sm:$0xff]  ;;  %v120_v58 = vld [vmem:[#allocation8 + $0x30] sm:$0xff] }
  0x2b   :  { %279 = vmatpush.msra.mxu2 %v140_v38  ;;  %320 = vmatpush.msra.mxu3 %v141_v39  ;;  %v121_v59 = vld [vmem:[#allocation8 + $0x38] sm:$0xff]  ;;  %v114_v60 = vld [vmem:[#allocation8] sm:$0xff]  ;;  %v115_v61 = vld [vmem:[#allocation8 + $0x8] sm:$0xff] }
  0x2c   :  { %198 = vmatpush.msra.mxu0 %v134_v40  ;;  %239 = vmatpush.msra.mxu1 %v135_v41  ;;  %v116_v62 = vld [vmem:[#allocation8 + $0x10] sm:$0xff]  ;;  %v117_v63 = vld [vmem:[#allocation8 + $0x18] sm:$0xff]  ;;  %v106_v0 = vld [vmem:[#allocation5] sm:$0xff] }
  0x2d   :  { %280 = vmatpush.msra.mxu2 %v136_v42  ;;  %321 = vmatpush.msra.mxu3 %v137_v43  ;;  %v2171_v1 = vld [vmem:[#allocation10 + $0x1e0] sm:$0xff]  ;;  %v2173_v2 = vld [vmem:[#allocation10 + $0x1e8] sm:$0xff]  ;;  %v2175_v3 = vld [vmem:[#allocation10 + $0x1f8] sm:$0xff] }
  0x2e   :  { %199 = vmatpush.msra.mxu0 %v130_v44  ;;  %240 = vmatpush.msra.mxu1 %v131_v45  ;;  %v2177_v4 = vld [vmem:[#allocation10 + $0x1f0] sm:$0xff]  ;;  %v2179_v5 = vld [vmem:[#allocation10 + $0x1c0] sm:$0xff]  ;;  %v2181_v6 = vld [vmem:[#allocation10 + $0x1c8] sm:$0xff] }
  0x2f   :  { %281 = vmatpush.msra.mxu2 %v132_v46  ;;  %322 = vmatpush.msra.mxu3 %v133_v47  ;;  %v2185_v7 = vld [vmem:[#allocation10 + $0x1d8] sm:$0xff]  ;;  %v2187_v8 = vld [vmem:[#allocation10 + $0x1d0] sm:$0xff]  ;;  %v2190_v9 = vld [vmem:[#allocation10 + $0x1a0] sm:$0xff] }
  0x30   :  { %200 = vmatpush.msra.mxu0 %v126_v48  ;;  %241 = vmatpush.msra.mxu1 %v127_v49  ;;  %v2192_v10 = vld [vmem:[#allocation10 + $0x1a8] sm:$0xff]  ;;  %v2197_v11 = vld [vmem:[#allocation10 + $0x1b8] sm:$0xff]  ;;  %v2199_v12 = vld [vmem:[#allocation10 + $0x1b0] sm:$0xff] }
  0x31   :  { %282 = vmatpush.msra.mxu2 %v128_v50  ;;  %323 = vmatpush.msra.mxu3 %v129_v51  ;;  %v107_v13 = vld [vmem:[#allocation5 + $0x8] sm:$0xff]  ;;  %v2205_v14 = vld [vmem:[#allocation10 + $0x180] sm:$0xff]  ;;  %v2211_v16 = vld [vmem:[#allocation10 + $0x198] sm:$0xff] }
  0x32   :  { %201 = vmatpush.msra.mxu0 %v122_v52  ;;  %242 = vmatpush.msra.mxu1 %v123_v53  ;;  %v2207_v15 = vld [vmem:[#allocation10 + $0x188] sm:$0xff]  ;;  %v2213_v17 = vld [vmem:[#allocation10 + $0x190] sm:$0xff]  ;;  %v2215_v18 = vld [vmem:[#allocation10 + $0x160] sm:$0xff] }
  0x33   :  { %283 = vmatpush.msra.mxu2 %v124_v54  ;;  %324 = vmatpush.msra.mxu3 %v125_v55  ;;  %v2217_v19 = vld [vmem:[#allocation10 + $0x168] sm:$0xff]  ;;  %v2221_v20 = vld [vmem:[#allocation10 + $0x178] sm:$0xff]  ;;  %v2223_v21 = vld [vmem:[#allocation10 + $0x170] sm:$0xff] }
  0x34   :  { %202 = vmatpush.msra.mxu0 %v118_v56  ;;  %243 = vmatpush.msra.mxu1 %v119_v57  ;;  %v2226_v22 = vld [vmem:[#allocation10 + $0x140] sm:$0xff]  ;;  %v2228_v23 = vld [vmem:[#allocation10 + $0x148] sm:$0xff]  ;;  %v2233_v24 = vld [vmem:[#allocation10 + $0x158] sm:$0xff] }
  0x35   :  { %284 = vmatpush.msra.mxu2 %v120_v58  ;;  %325 = vmatpush.msra.mxu3 %v121_v59  ;;  %v2235_v25 = vld [vmem:[#allocation10 + $0x150] sm:$0xff]  ;;  %v2241_v27 = vld [vmem:[#allocation10 + $0x120] sm:$0xff]  ;;  %v2243_v28 = vld [vmem:[#allocation10 + $0x128] sm:$0xff] }
  0x36   :  { %203 = vmatpush.msra.mxu0 %v114_v60  ;;  %244 = vmatpush.msra.mxu1 %v115_v61  ;;  %v108_v26 = vld [vmem:[#allocation5 + $0x10] sm:$0xff]  ;;  %v2247_v29 = vld [vmem:[#allocation10 + $0x138] sm:$0xff]  ;;  %v2251_v31 = vld [vmem:[#allocation10 + $0x100] sm:$0xff] }
  0x37   :  { %285 = vmatpush.msra.mxu2 %v116_v62  ;;  %326 = vmatpush.msra.mxu3 %v117_v63  ;;  %v2249_v30 = vld [vmem:[#allocation10 + $0x130] sm:$0xff]  ;;  %v2253_v32 = vld [vmem:[#allocation10 + $0x108] sm:$0xff]  ;;  %v2257_v33 = vld [vmem:[#allocation10 + $0x118] sm:$0xff] }
  0x38   :  { %204 = vmatmul.f32.vlgmr.msra.gmra.mxu0 %v106_v0  ;;  %245 = vmatmul.f32.vlgmr.msra.gmra.mxu1 %v106_v0  ;;  %v2259_v34 = vld [vmem:[#allocation10 + $0x110] sm:$0xff]  ;;  %v2262_v35 = vld [vmem:[#allocation10 + $0xe0] sm:$0xff]  ;;  %v2264_v36 = vld [vmem:[#allocation10 + $0xe8] sm:$0xff] }
  0x39   :  { %286 = vmatmul.f32.vlgmr.msra.gmra.mxu2 %v106_v0  ;;  %327 = vmatmul.f32.vlgmr.msra.gmra.mxu3 %v106_v0  ;;  %v2269_v37 = vld [vmem:[#allocation10 + $0xf8] sm:$0xff]  ;;  %v2271_v38 = vld [vmem:[#allocation10 + $0xf0] sm:$0xff]  ;;  %v2277_v40 = vld [vmem:[#allocation10 + $0xc0] sm:$0xff] }
  0x3a   :  { %454 = vmatpush.msrb.mxu0 %v2171_v1  ;;  %474 = vmatpush.msrb.mxu1 %v2173_v2  ;;  %v109_v39 = vld [vmem:[#allocation5 + $0x18] sm:$0xff]  ;;  %v2279_v41 = vld [vmem:[#allocation10 + $0xc8] sm:$0xff]  ;;  %v2285_v43 = vld [vmem:[#allocation10 + $0xd0] sm:$0xff] }
  0x3b   :  { %514 = vmatpush.msrb.mxu3 %v2175_v3  ;;  %494 = vmatpush.msrb.mxu2 %v2177_v4  ;;  %v2283_v42 = vld [vmem:[#allocation10 + $0xd8] sm:$0xff]  ;;  %3168 = vst [vmem:[#allocation20_spill] sm:$0xff] %v2285_v43  ;;  %v2287_v44 = vld [vmem:[#allocation10 + $0xa0] sm:$0xff]  ;;  %v2289_v45 = vld [vmem:[#allocation10 + $0xa8] sm:$0xff] }
  0x3c   :  { %455 = vmatpush.msrb.mxu0 %v2179_v5  ;;  %475 = vmatpush.msrb.mxu1 %v2181_v6  ;;  %3167 = vst [vmem:[#allocation19_spill] sm:$0xff] %v2283_v42  ;;  %v2293_v46 = vld [vmem:[#allocation10 + $0xb8] sm:$0xff]  ;;  %v2295_v47 = vld [vmem:[#allocation10 + $0xb0] sm:$0xff]  ;;  %v2298_v48 = vld [vmem:[#allocation10 + $0x80] sm:$0xff] }
  0x3d   :  { %515 = vmatpush.msrb.mxu3 %v2185_v7  ;;  %495 = vmatpush.msrb.mxu2 %v2187_v8  ;;  %3169 = vst [vmem:[#allocation21_spill] sm:$0xff] %v2287_v44  ;;  %v2300_v49 = vld [vmem:[#allocation10 + $0x88] sm:$0xff]  ;;  %v2305_v50 = vld [vmem:[#allocation10 + $0x98] sm:$0xff]  ;;  %v2307_v51 = vld [vmem:[#allocation10 + $0x90] sm:$0xff] }
  0x3e   :  { %456 = vmatpush.msrb.mxu0 %v2190_v9  ;;  %476 = vmatpush.msrb.mxu1 %v2192_v10  ;;  %3170 = vst [vmem:[#allocation22_spill] sm:$0xff] %v2289_v45  ;;  %v110_v52 = vld [vmem:[#allocation5 + $0x20] sm:$0xff]  ;;  %v2315_v54 = vld [vmem:[#allocation10 + $0x68] sm:$0xff]  ;;  %v2319_v55 = vld [vmem:[#allocation10 + $0x78] sm:$0xff] }
  0x3f   :  { %516 = vmatpush.msrb.mxu3 %v2197_v11  ;;  %496 = vmatpush.msrb.mxu2 %v2199_v12  ;;  %3171 = vst [vmem:[#allocation23_spill] sm:$0xff] %v2293_v46  ;;  %v2313_v53 = vld [vmem:[#allocation10 + $0x60] sm:$0xff]  ;;  %v2321_v56 = vld [vmem:[#allocation10 + $0x70] sm:$0xff]  ;;  %v2325_v58 = vld [vmem:[#allocation10 + $0x48] sm:$0xff] }
  0x40   :  { %207 = vmatmul.f32.gmra.mxu0 %v107_v13  ;;  %248 = vmatmul.f32.gmra.mxu1 %v107_v13  ;;  %3172 = vst [vmem:[#allocation24_spill] sm:$0xff] %v2295_v47  ;;  %v2323_v57 = vld [vmem:[#allocation10 + $0x40] sm:$0xff]  ;;  %v2329_v59 = vld [vmem:[#allocation10 + $0x58] sm:$0xff]  ;;  %v2331_v60 = vld [vmem:[#allocation10 + $0x50] sm:$0xff] }
  0x41   :  { %289 = vmatmul.f32.gmra.mxu2 %v107_v13  ;;  %330 = vmatmul.f32.gmra.mxu3 %v107_v13  ;;  %3173 = vst [vmem:[#allocation25_spill] sm:$0xff] %v2298_v48  ;;  %v2334_v61 = vld [vmem:[#allocation10 + $0x20] sm:$0xff]  ;;  %v2336_v62 = vld [vmem:[#allocation10 + $0x28] sm:$0xff]  ;;  %v2341_v63 = vld [vmem:[#allocation10 + $0x30] sm:$0xff] }
  0x42   :  { %457 = vmatpush.msrb.mxu0 %v2205_v14  ;;  %477 = vmatpush.msrb.mxu1 %v2207_v15  ;;  %3174 = vst [vmem:[#allocation26_spill] sm:$0xff] %v2300_v49  ;;  %v2343_v0 = vld [vmem:[#allocation10 + $0x38] sm:$0xff]  ;;  %v111_v13 = vld [vmem:[#allocation5 + $0x28] sm:$0xff] }
  0x43   :  { %517 = vmatpush.msrb.mxu3 %v2211_v16  ;;  %497 = vmatpush.msrb.mxu2 %v2213_v17  ;;  %3175 = vst [vmem:[#allocation27_spill] sm:$0xff] %v2305_v50 }
  0x44   :  { %458 = vmatpush.msrb.mxu0 %v2215_v18  ;;  %478 = vmatpush.msrb.mxu1 %v2217_v19  ;;  %3176 = vst [vmem:[#allocation28_spill] sm:$0xff] %v2307_v51 }
  0x45   :  { %518 = vmatpush.msrb.mxu3 %v2221_v20  ;;  %498 = vmatpush.msrb.mxu2 %v2223_v21  ;;  %3177 = vst [vmem:[#allocation29_spill] sm:$0xff] %v2313_v53 }
  0x46   :  { %459 = vmatpush.msrb.mxu0 %v2226_v22  ;;  %479 = vmatpush.msrb.mxu1 %v2228_v23  ;;  %3178 = vst [vmem:[#allocation30_spill] sm:$0xff] %v2315_v54 }
  0x47   :  { %519 = vmatpush.msrb.mxu3 %v2233_v24  ;;  %499 = vmatpush.msrb.mxu2 %v2235_v25  ;;  %3179 = vst [vmem:[#allocation31_spill] sm:$0xff] %v2319_v55 }
  0x48   :  { %210 = vmatmul.f32.gmra.mxu0 %v108_v26  ;;  %251 = vmatmul.f32.gmra.mxu1 %v108_v26  ;;  %3180 = vst [vmem:[#allocation32_spill] sm:$0xff] %v2321_v56 }
  0x49   :  { %292 = vmatmul.f32.gmra.mxu2 %v108_v26  ;;  %333 = vmatmul.f32.gmra.mxu3 %v108_v26  ;;  %3181 = vst [vmem:[#allocation33_spill] sm:$0xff] %v2323_v57  ;;  %v2349_v26 = vld [vmem:[#allocation10] sm:$0xff] }
  0x4a   :  { %460 = vmatpush.msrb.mxu0 %v2241_v27  ;;  %480 = vmatpush.msrb.mxu1 %v2243_v28  ;;  %3182 = vst [vmem:[#allocation34_spill] sm:$0xff] %v2325_v58 }
  0x4b   :  { %520 = vmatpush.msrb.mxu3 %v2247_v29  ;;  %500 = vmatpush.msrb.mxu2 %v2249_v30  ;;  %3183 = vst [vmem:[#allocation35_spill] sm:$0xff] %v2329_v59 }
  0x4c   :  { %461 = vmatpush.msrb.mxu0 %v2251_v31  ;;  %481 = vmatpush.msrb.mxu1 %v2253_v32  ;;  %3184 = vst [vmem:[#allocation36_spill] sm:$0xff] %v2331_v60 }
  0x4d   :  { %521 = vmatpush.msrb.mxu3 %v2257_v33  ;;  %501 = vmatpush.msrb.mxu2 %v2259_v34  ;;  %3185 = vst [vmem:[#allocation37_spill] sm:$0xff] %v2334_v61 }
  0x4e   :  { %462 = vmatpush.msrb.mxu0 %v2262_v35  ;;  %482 = vmatpush.msrb.mxu1 %v2264_v36  ;;  %3186 = vst [vmem:[#allocation38_spill] sm:$0xff] %v2336_v62 }
  0x4f   :  { %522 = vmatpush.msrb.mxu3 %v2269_v37  ;;  %502 = vmatpush.msrb.mxu2 %v2271_v38  ;;  %3187 = vst [vmem:[#allocation39_spill] sm:$0xff] %v2341_v63 }
  0x50   :  { %213 = vmatmul.f32.gmra.mxu0 %v109_v39  ;;  %254 = vmatmul.f32.gmra.mxu1 %v109_v39  ;;  %3188 = vst [vmem:[#allocation40_spill] sm:$0xff] %v2343_v0 }
  0x51   :  { %295 = vmatmul.f32.gmra.mxu2 %v109_v39  ;;  %336 = vmatmul.f32.gmra.mxu3 %v109_v39  ;;  %3189 = vst [vmem:[#allocation41_spill] sm:$0xff] %v2349_v26  ;;  %v2351_v39 = vld [vmem:[#allocation10 + $0x8] sm:$0xff] }
  0x52   :  { %463 = vmatpush.msrb.mxu0 %v2277_v40  ;;  %483 = vmatpush.msrb.mxu1 %v2279_v41  ;;  %3190 = vst [vmem:[#allocation42_spill] sm:$0xff] %v2351_v39 }
  0x53   :  { %523 = vmatpush.msrb.mxu3 %v2283_v42  ;;  %503 = vmatpush.msrb.mxu2 %v2285_v43 }
  0x54   :  { %464 = vmatpush.msrb.mxu0 %v2287_v44  ;;  %484 = vmatpush.msrb.mxu1 %v2289_v45 }
  0x55   :  { %524 = vmatpush.msrb.mxu3 %v2293_v46  ;;  %504 = vmatpush.msrb.mxu2 %v2295_v47 }
  0x56   :  { %465 = vmatpush.msrb.mxu0 %v2298_v48  ;;  %485 = vmatpush.msrb.mxu1 %v2300_v49 }
  0x57   :  { %525 = vmatpush.msrb.mxu3 %v2305_v50  ;;  %505 = vmatpush.msrb.mxu2 %v2307_v51 }
  0x58   :  { %216 = vmatmul.f32.gmra.mxu0 %v110_v52  ;;  %257 = vmatmul.f32.gmra.mxu1 %v110_v52 }
  0x59   :  { %298 = vmatmul.f32.gmra.mxu2 %v110_v52  ;;  %339 = vmatmul.f32.gmra.mxu3 %v110_v52  ;;  %v2355_v52 = vld [vmem:[#allocation10 + $0x10] sm:$0xff] }
  0x5a   :  { %466 = vmatpush.msrb.mxu0 %v2313_v53  ;;  %486 = vmatpush.msrb.mxu1 %v2315_v54  ;;  %3191 = vst [vmem:[#allocation43_spill] sm:$0xff] %v2355_v52 }
  0x5b   :  { %526 = vmatpush.msrb.mxu3 %v2319_v55  ;;  %506 = vmatpush.msrb.mxu2 %v2321_v56 }
  0x5c   :  { %467 = vmatpush.msrb.mxu0 %v2323_v57  ;;  %487 = vmatpush.msrb.mxu1 %v2325_v58  ;;  %v2357_v58 = vld [vmem:[#allocation10 + $0x18] sm:$0xff] }
  0x5d   :  { %527 = vmatpush.msrb.mxu3 %v2329_v59  ;;  %507 = vmatpush.msrb.mxu2 %v2331_v60  ;;  %3192 = vst [vmem:[#allocation44_spill] sm:$0xff] %v2357_v58 }
  0x5e   :  { %468 = vmatpush.msrb.mxu0 %v2334_v61  ;;  %488 = vmatpush.msrb.mxu1 %v2336_v62 }
  0x5f   :  { %508 = vmatpush.msrb.mxu2 %v2341_v63  ;;  %528 = vmatpush.msrb.mxu3 %v2343_v0  ;;  %v112_v0 = vld [vmem:[#allocation5 + $0x30] sm:$0xff] }
  0x60   :  { %219 = vmatmul.f32.gmra.mxu0 %v111_v13  ;;  %260 = vmatmul.f32.gmra.mxu1 %v111_v13 }
  0x61   :  { %301 = vmatmul.f32.gmra.mxu2 %v111_v13  ;;  %342 = vmatmul.f32.gmra.mxu3 %v111_v13  ;;  %v113_v13 = vld [vmem:[#allocation5 + $0x38] sm:$0xff] }
  0x62   :  { %469 = vmatpush.msrb.mxu0 %v2349_v26  ;;  %489 = vmatpush.msrb.mxu1 %v2351_v39 }
  0x63   :  { %509 = vmatpush.msrb.mxu2 %v2355_v52  ;;  %529 = vmatpush.msrb.mxu3 %v2357_v58 }
  0x64   :  { %606 = vmatpush.msra.mxu0 %v2171_v1  ;;  %626 = vmatpush.msra.mxu1 %v2173_v2 }
  0x65   :  { %646 = vmatpush.msra.mxu2 %v2177_v4  ;;  %666 = vmatpush.msra.mxu3 %v2175_v3 }
  0x66   :  { %607 = vmatpush.msra.mxu0 %v2179_v5  ;;  %627 = vmatpush.msra.mxu1 %v2181_v6 }
  0x67   :  { %647 = vmatpush.msra.mxu2 %v2187_v8  ;;  %667 = vmatpush.msra.mxu3 %v2185_v7 }
  0x68   :  { %222 = vmatmul.f32.gmra.mxu0 %v112_v0  ;;  %263 = vmatmul.f32.gmra.mxu1 %v112_v0 }
  0x69   :  { %304 = vmatmul.f32.gmra.mxu2 %v112_v0  ;;  %345 = vmatmul.f32.gmra.mxu3 %v112_v0  ;;  %v2119_v0 = vmov 0.0  }
  0x6a   :  { %608 = vmatpush.msra.mxu0 %v2190_v9  ;;  %628 = vmatpush.msra.mxu1 %v2192_v10 }
  0x6b   :  { %648 = vmatpush.msra.mxu2 %v2199_v12  ;;  %668 = vmatpush.msra.mxu3 %v2197_v11 }
  0x6c   :  { %609 = vmatpush.msra.mxu0 %v2205_v14  ;;  %629 = vmatpush.msra.mxu1 %v2207_v15 }
  0x6d   :  { %649 = vmatpush.msra.mxu2 %v2213_v17  ;;  %669 = vmatpush.msra.mxu3 %v2211_v16 }
  0x6e   :  { %610 = vmatpush.msra.mxu0 %v2215_v18  ;;  %630 = vmatpush.msra.mxu1 %v2217_v19 }
  0x6f   :  { %650 = vmatpush.msra.mxu2 %v2223_v21  ;;  %670 = vmatpush.msra.mxu3 %v2221_v20 }
  0x70   :  { %225 = vmatmul.f32.gmra.mxu0 %v113_v13  ;;  %266 = vmatmul.f32.gmra.mxu1 %v113_v13 }
  0x71   :  { %307 = vmatmul.f32.gmra.mxu2 %v113_v13  ;;  %348 = vmatmul.f32.gmra.mxu3 %v113_v13  ;;  %v3193_v13 = vld [vmem:[#allocation34_spill] sm:$0xff] }
  0x72   :  { %611 = vmatpush.msra.mxu0 %v2226_v22  ;;  %631 = vmatpush.msra.mxu1 %v2228_v23 }
  0x73   :  { %651 = vmatpush.msra.mxu2 %v2235_v25  ;;  %671 = vmatpush.msra.mxu3 %v2233_v24 }
  0x74   :  { %612 = vmatpush.msra.mxu0 %v2241_v27  ;;  %632 = vmatpush.msra.mxu1 %v2243_v28 }
  0x75   :  { %652 = vmatpush.msra.mxu2 %v2249_v30  ;;  %672 = vmatpush.msra.mxu3 %v2247_v29 }
  0x76   :  { %613 = vmatpush.msra.mxu0 %v2251_v31  ;;  %633 = vmatpush.msra.mxu1 %v2253_v32 }
  0x77   :  { %653 = vmatpush.msra.mxu2 %v2259_v34  ;;  %673 = vmatpush.msra.mxu3 %v2257_v33 }
  0x78   :  { %470 = vmatmul.f32.vlgmr.msrb.gmra.mxu0 %v2119_v0  ;;  %490 = vmatmul.f32.vlgmr.msrb.gmra.mxu1 %v2119_v0 }
  0x79   :  { %510 = vmatmul.f32.vlgmr.msrb.gmra.mxu2 %v2119_v0  ;;  %530 = vmatmul.f32.vlgmr.msrb.gmra.mxu3 %v2119_v0  ;;  %v3194_v0 = vld [vmem:[#allocation40_spill] sm:$0xff] }
  0x7a   :  { %614 = vmatpush.msra.mxu0 %v2262_v35  ;;  %634 = vmatpush.msra.mxu1 %v2264_v36 }
  0x7b   :  { %654 = vmatpush.msra.mxu2 %v2271_v38  ;;  %674 = vmatpush.msra.mxu3 %v2269_v37 }
  0x7c   :  { %615 = vmatpush.msra.mxu0 %v2277_v40  ;;  %635 = vmatpush.msra.mxu1 %v2279_v41 }
  0x7d   :  { %655 = vmatpush.msra.mxu2 %v2285_v43  ;;  %675 = vmatpush.msra.mxu3 %v2283_v42 }
  0x7e   :  { %616 = vmatpush.msra.mxu0 %v2287_v44  ;;  %636 = vmatpush.msra.mxu1 %v2289_v45 }
  0x7f   :  { %656 = vmatpush.msra.mxu2 %v2295_v47  ;;  %676 = vmatpush.msra.mxu3 %v2293_v46 }
  0x80   :  { %617 = vmatpush.msra.mxu0 %v2298_v48  ;;  %637 = vmatpush.msra.mxu1 %v2300_v49 }
  0x81   :  { %657 = vmatpush.msra.mxu2 %v2307_v51  ;;  %677 = vmatpush.msra.mxu3 %v2305_v50 }
  0x82   :  { %618 = vmatpush.msra.mxu0 %v2313_v53  ;;  %638 = vmatpush.msra.mxu1 %v2315_v54 }
  0x83   :  { %658 = vmatpush.msra.mxu2 %v2321_v56  ;;  %678 = vmatpush.msra.mxu3 %v2319_v55 }
  0x84   :  { %619 = vmatpush.msra.mxu0 %v2323_v57  ;;  %639 = vmatpush.msra.mxu1 %v3193_v13 }
  0x85   :  { %659 = vmatpush.msra.mxu2 %v2331_v60  ;;  %679 = vmatpush.msra.mxu3 %v2329_v59 }
  0x86   :  { %620 = vmatpush.msra.mxu0 %v2334_v61  ;;  %640 = vmatpush.msra.mxu1 %v2336_v62 }
  0x87   :  { %660 = vmatpush.msra.mxu2 %v2341_v63  ;;  %680 = vmatpush.msra.mxu3 %v3194_v0 }
  0x88   :  { %621 = vmatpush.msra.mxu0 %v2349_v26  ;;  %641 = vmatpush.msra.mxu1 %v2351_v39 }
  0x89   :  { %661 = vmatpush.msra.mxu2 %v2355_v52  ;;  %681 = vmatpush.msra.mxu3 %v2357_v58 }
  0x8a   :  { %758 = vmatpush.msrb.mxu0 %v2171_v1  ;;  %778 = vmatpush.msrb.mxu1 %v2173_v2 }
  0x8b   :  { %798 = vmatpush.msrb.mxu2 %v2177_v4  ;;  %818 = vmatpush.msrb.mxu3 %v2175_v3 }
  0x8c   :  { %759 = vmatpush.msrb.mxu0 %v2179_v5  ;;  %779 = vmatpush.msrb.mxu1 %v2181_v6 }
  0x8d   :  { %799 = vmatpush.msrb.mxu2 %v2187_v8  ;;  %819 = vmatpush.msrb.mxu3 %v2185_v7 }
  0x8e   :  { %760 = vmatpush.msrb.mxu0 %v2190_v9  ;;  %780 = vmatpush.msrb.mxu1 %v2192_v10 }
  0x8f   :  { %800 = vmatpush.msrb.mxu2 %v2199_v12  ;;  %820 = vmatpush.msrb.mxu3 %v2197_v11 }
  0x90   :  { %761 = vmatpush.msrb.mxu0 %v2205_v14  ;;  %781 = vmatpush.msrb.mxu1 %v2207_v15 }
  0x91   :  { %801 = vmatpush.msrb.mxu2 %v2213_v17  ;;  %821 = vmatpush.msrb.mxu3 %v2211_v16 }
  0x92   :  { %762 = vmatpush.msrb.mxu0 %v2215_v18  ;;  %782 = vmatpush.msrb.mxu1 %v2217_v19 }
  0x93   :  { %802 = vmatpush.msrb.mxu2 %v2223_v21  ;;  %822 = vmatpush.msrb.mxu3 %v2221_v20 }
  0x94   :  { %763 = vmatpush.msrb.mxu0 %v2226_v22  ;;  %783 = vmatpush.msrb.mxu1 %v2228_v23 }
  0x95   :  { %803 = vmatpush.msrb.mxu2 %v2235_v25  ;;  %823 = vmatpush.msrb.mxu3 %v2233_v24 }
  0x96   :  { %764 = vmatpush.msrb.mxu0 %v2241_v27  ;;  %784 = vmatpush.msrb.mxu1 %v2243_v28 }
  0x97   :  { %804 = vmatpush.msrb.mxu2 %v2249_v30  ;;  %824 = vmatpush.msrb.mxu3 %v2247_v29 }
  0x98   :  { %765 = vmatpush.msrb.mxu0 %v2251_v31  ;;  %785 = vmatpush.msrb.mxu1 %v2253_v32 }
  0x99   :  { %805 = vmatpush.msrb.mxu2 %v2259_v34  ;;  %825 = vmatpush.msrb.mxu3 %v2257_v33 }
  0x9a   :  { %766 = vmatpush.msrb.mxu0 %v2262_v35  ;;  %786 = vmatpush.msrb.mxu1 %v2264_v36 }
  0x9b   :  { %806 = vmatpush.msrb.mxu2 %v2271_v38  ;;  %826 = vmatpush.msrb.mxu3 %v2269_v37 }
  0x9c   :  { %767 = vmatpush.msrb.mxu0 %v2277_v40  ;;  %787 = vmatpush.msrb.mxu1 %v2279_v41 }
  0x9d   :  { %807 = vmatpush.msrb.mxu2 %v2285_v43  ;;  %827 = vmatpush.msrb.mxu3 %v2283_v42 }
  0x9e   :  { %768 = vmatpush.msrb.mxu0 %v2287_v44  ;;  %788 = vmatpush.msrb.mxu1 %v2289_v45 }
  0x9f   :  { %808 = vmatpush.msrb.mxu2 %v2295_v47  ;;  %828 = vmatpush.msrb.mxu3 %v2293_v46 }
  0xa0   :  { %769 = vmatpush.msrb.mxu0 %v2298_v48  ;;  %789 = vmatpush.msrb.mxu1 %v2300_v49 }
  0xa1   :  { %809 = vmatpush.msrb.mxu2 %v2307_v51  ;;  %829 = vmatpush.msrb.mxu3 %v2305_v50 }
  0xa2   :  { %770 = vmatpush.msrb.mxu0 %v2313_v53  ;;  %790 = vmatpush.msrb.mxu1 %v2315_v54 }
  0xa3   :  { %810 = vmatpush.msrb.mxu2 %v2321_v56  ;;  %830 = vmatpush.msrb.mxu3 %v2319_v55 }
  0xa4   :  { %771 = vmatpush.msrb.mxu0 %v2323_v57  ;;  %791 = vmatpush.msrb.mxu1 %v3193_v13  ;;  %v178_v57 = vld [vmem:[#allocation11] sm:$0xf] }
  0xa5   :  { %811 = vmatpush.msrb.mxu2 %v2331_v60  ;;  %831 = vmatpush.msrb.mxu3 %v2329_v59  ;;  %v180_v59 = vperm.slane %v178_v57, 0  ;;  %v181_v55 = vperm.slane %v178_v57, 1 }
  0xa6   :  { %772 = vmatpush.msrb.mxu0 %v2334_v61  ;;  %792 = vmatpush.msrb.mxu1 %v2336_v62 }
  0xa7   :  { %812 = vmatpush.msrb.mxu2 %v2341_v63  ;;  %832 = vmatpush.msrb.mxu3 %v3194_v0 }
  0xa8   :  { %773 = vmatpush.msrb.mxu0 %v2349_v26  ;;  %793 = vmatpush.msrb.mxu1 %v2351_v39  ;;  %v2499_v39 = vperm.slane %v178_v57, 2 }
  0xa9   :  { %813 = vmatpush.msrb.mxu2 %v2355_v52  ;;  %833 = vmatpush.msrb.mxu3 %v2357_v58  ;;  %v183_v52 = vperm.slane %v178_v57, 3 }
  0xb5   :  { %v205_v13 = vpop.f32.mrf.mxu0  ;;  %v246_v60 = vpop.f32.mrf.mxu1 }
  0xbc   :  { %v2491_v61 = vpop.f32.mrf.mxu2  ;;  %v2493_v62 = vpop.f32.mrf.mxu3 }
  0xbd   :  { %v208_v63 = vpop.f32.mrf.mxu0  ;;  %v249_v56 = vpop.f32.mrf.mxu1 }
  0xbe   :  { %v2495_v0 = vadd.f32 %v208_v63, %v180_v59  ;;  %v2497_v26 = vadd.f32 %v249_v56, %v181_v55 }
  0xc0   :  { %3195 = vst [vmem:[#allocation45_spill] sm:$0xff] %v2495_v0 }
  0xc1   :  { %3196 = vst [vmem:[#allocation46_spill] sm:$0xff] %v2497_v26 }
  0xc4   :  { %v290_v54 = vpop.f32.mrf.mxu2  ;;  %v331_v58 = vpop.f32.mrf.mxu3 }
  0xc5   :  { %v2502_v53 = vadd.f32 %v290_v54, %v2499_v39  ;;  %v2504_v50 = vadd.f32 %v331_v58, %v183_v52  ;;  %v211_v51 = vpop.f32.mrf.mxu0  ;;  %v252_v49 = vpop.f32.mrf.mxu1 }
  0xc6   :  { %v2506_v48 = vadd.f32 %v211_v51, %v180_v59  ;;  %v2508_v46 = vadd.f32 %v252_v49, %v181_v55 }
  0xc7   :  { %3197 = vst [vmem:[#allocation47_spill] sm:$0xff] %v2502_v53 }
  0xc8   :  { %3198 = vst [vmem:[#allocation48_spill] sm:$0xff] %v2504_v50 }
  0xc9   :  { %3199 = vst [vmem:[#allocation49_spill] sm:$0xff] %v2506_v48 }
  0xca   :  { %3200 = vst [vmem:[#allocation50_spill] sm:$0xff] %v2508_v46 }
  0xcc   :  { %v293_v63 = vpop.f32.mrf.mxu2  ;;  %v334_v0 = vpop.f32.mrf.mxu3 }
  0xcd   :  { %v2511_v56 = vadd.f32 %v293_v63, %v2499_v39  ;;  %v2513_v26 = vadd.f32 %v334_v0, %v183_v52  ;;  %v214_v57 = vpop.f32.mrf.mxu0  ;;  %v255_v47 = vpop.f32.mrf.mxu1 }
  0xce   :  { %v2515_v45 = vadd.f32 %v214_v57, %v180_v59  ;;  %v2517_v54 = vadd.f32 %v255_v47, %v181_v55 }
  0xcf   :  { %3201 = vst [vmem:[#allocation51_spill] sm:$0xff] %v2511_v56 }
  0xd0   :  { %3202 = vst [vmem:[#allocation52_spill] sm:$0xff] %v2513_v26 }
  0xd1   :  { %3203 = vst [vmem:[#allocation53_spill] sm:$0xff] %v2515_v45 }
  0xd2   :  { %3204 = vst [vmem:[#allocation54_spill] sm:$0xff] %v2517_v54 }
  0xd4   :  { %v296_v58 = vpop.f32.mrf.mxu2  ;;  %v337_v53 = vpop.f32.mrf.mxu3 }
  0xd5   :  { %v2520_v51 = vadd.f32 %v296_v58, %v2499_v39  ;;  %v2522_v49 = vadd.f32 %v337_v53, %v183_v52  ;;  %v217_v46 = vpop.f32.mrf.mxu0  ;;  %v258_v48 = vpop.f32.mrf.mxu1 }
  0xd6   :  { %v2524_v50 = vadd.f32 %v217_v46, %v180_v59  ;;  %v2526_v63 = vadd.f32 %v258_v48, %v181_v55 }
  0xd7   :  { %3205 = vst [vmem:[#allocation55_spill] sm:$0xff] %v2520_v51 }
  0xd8   :  { %3206 = vst [vmem:[#allocation56_spill] sm:$0xff] %v2522_v49 }
  0xd9   :  { %3207 = vst [vmem:[#allocation57_spill] sm:$0xff] %v2524_v50 }
  0xda   :  { %3208 = vst [vmem:[#allocation58_spill] sm:$0xff] %v2526_v63 }
  0xdc   :  { %v299_v0 = vpop.f32.mrf.mxu2  ;;  %v340_v56 = vpop.f32.mrf.mxu3 }
  0xdd   :  { %v2529_v57 = vadd.f32 %v299_v0, %v2499_v39  ;;  %v2531_v47 = vadd.f32 %v340_v56, %v183_v52  ;;  %v220_v54 = vpop.f32.mrf.mxu0  ;;  %v261_v45 = vpop.f32.mrf.mxu1 }
  0xde   :  { %v2533_v26 = vadd.f32 %v220_v54, %v180_v59  ;;  %v2535_v58 = vadd.f32 %v261_v45, %v181_v55 }
  0xdf   :  { %3209 = vst [vmem:[#allocation59_spill] sm:$0xff] %v2529_v57 }
  0xe0   :  { %3210 = vst [vmem:[#allocation60_spill] sm:$0xff] %v2531_v47 }
  0xe1   :  { %3211 = vst [vmem:[#allocation61_spill] sm:$0xff] %v2533_v26 }
  0xe2   :  { %3212 = vst [vmem:[#allocation62_spill] sm:$0xff] %v2535_v58 }
  0xe4   :  { %v302_v53 = vpop.f32.mrf.mxu2  ;;  %v343_v51 = vpop.f32.mrf.mxu3 }
  0xe5   :  { %v2538_v46 = vadd.f32 %v302_v53, %v2499_v39  ;;  %v2540_v48 = vadd.f32 %v343_v51, %v183_v52  ;;  %v223_v63 = vpop.f32.mrf.mxu0  ;;  %v264_v50 = vpop.f32.mrf.mxu1  ;;  %v206_v51 = vadd.f32 %v205_v13, %v180_v59 }
  0xe6   :  { %v2542_v49 = vadd.f32 %v223_v63, %v180_v59  ;;  %v2544_v0 = vadd.f32 %v264_v50, %v181_v55 }
  0xe7   :  { %3213 = vst [vmem:[#allocation63_spill] sm:$0xff] %v2538_v46  ;;  %v247_v46 = vadd.f32 %v246_v60, %v181_v55 }
  0xe8   :  { %3214 = vst [vmem:[#allocation64_spill] sm:$0xff] %v2540_v48 }
  0xe9   :  { %3215 = vst [vmem:[#allocation65_spill] sm:$0xff] %v2542_v49 }
  0xea   :  { %3216 = vst [vmem:[#allocation66_spill] sm:$0xff] %v2544_v0 }
  0xec   :  { %v305_v56 = vpop.f32.mrf.mxu2  ;;  %v346_v57 = vpop.f32.mrf.mxu3 }
  0xed   :  { %v2547_v54 = vadd.f32 %v305_v56, %v2499_v39  ;;  %v2549_v45 = vadd.f32 %v346_v57, %v183_v52  ;;  %v226_v58 = vpop.f32.mrf.mxu0  ;;  %v267_v26 = vpop.f32.mrf.mxu1 }
  0xee   :  { %v2551_v47 = vadd.f32 %v226_v58, %v180_v59  ;;  %v2553_v53 = vadd.f32 %v267_v26, %v181_v55  ;;  %v329_v58 = vadd.f32 %v2493_v62, %v183_v52 }
  0xef   :  { %3217 = vst [vmem:[#allocation67_spill] sm:$0xff] %v2547_v54 }
  0xf0   :  { %3218 = vst [vmem:[#allocation68_spill] sm:$0xff] %v2549_v45 }
  0xf1   :  { %3219 = vst [vmem:[#allocation69_spill] sm:$0xff] %v2551_v47 }
  0xf2   :  { %3220 = vst [vmem:[#allocation70_spill] sm:$0xff] %v2553_v53 }
  0xf4   :  { %v308_v48 = vpop.f32.mrf.mxu2  ;;  %v349_v63 = vpop.f32.mrf.mxu3 }
  0xf5   :  { %v2556_v50 = vadd.f32 %v308_v48, %v2499_v39  ;;  %v2558_v0 = vadd.f32 %v349_v63, %v183_v52  ;;  %v471_v49 = vpop.f32.mrf.mxu0  ;;  %v491_v56 = vpop.f32.mrf.mxu1 }
  0xf6   :  { %v534_v54 = vadd.f32 %v471_v49, %v206_v51  ;;  %v535_v57 = vadd.f32 %v491_v56, %v247_v46  ;;  %v288_v49 = vadd.f32 %v2491_v61, %v2499_v39 }
  0xf7   :  { %3221 = vst [vmem:[#allocation71_spill] sm:$0xff] %v2556_v50 }
  0xf8   :  { %3222 = vst [vmem:[#allocation72_spill] sm:$0xff] %v2558_v0  ;;  %v1730_v45 = vmul.f32 -1.442695, %v534_v54  ;;  %v1731_v44 = vmul.f32 -1.442695, %v535_v57 }
  0xfa   :  { %1766 = vpow2.f32 %v1730_v45 }
  0xfb   :  { %1768 = vpow2.f32 %v1731_v44 }
  0xfc   :  { %v531_v26 = vpop.f32.mrf.mxu3  ;;  %v511_v63 = vpop.f32.mrf.mxu2 }
  0xfd   :  { %v537_v59 = vadd.f32 %v531_v26, %v329_v58  ;;  %v536_v45 = vadd.f32 %v511_v63, %v288_v49 }
  0xff   :  { %v1732_v55 = vmul.f32 -1.442695, %v537_v59 }
 0x100   :  { %v1767_v60 = vpop.eup %1766 }
 0x101   :  { %v1769_v13 = vpop.eup %1768  ;;  %v541_v53 = vadd.f32 1.0, %v1767_v60  ;;  %1770 = vpow2.f32 %v1732_v55 }
 0x102   :  { %v560_v48 = vadd.f32 1.0, %v1769_v13 }
 0x103   :  { %1772 = vrcp.f32 %v541_v53  ;;  %v553_v57 = vand.u32 2147483648, %v541_v53  ;;  %v551_v59 = vand.u32 2147483647, %v541_v53  ;;  %vm547_vm2 = vweird.f32 %v541_v53 }
 0x104   :  { %1774 = vrcp.f32 %v560_v48  ;;  %v572_v58 = vand.u32 2147483648, %v560_v48  ;;  %v570_v60 = vand.u32 2147483647, %v560_v48  ;;  %vm566_vm3 = vweird.f32 %v560_v48 }
 0x105   :  { %v554_v39 = vor.u32 1.1754944e-38, %v553_v57  ;;  %vm552_vm5 = vcmp.eq.f32.partialorder %v551_v59, 8.507059e+37 }
 0x106   :  { %v573_v49 = vor.u32 1.1754944e-38, %v572_v58  ;;  %vm571_vm7 = vcmp.eq.f32.partialorder %v570_v60, 8.507059e+37 }
 0x107   :  { %v1771_v50 = vpop.eup %1770 }
 0x108   :  { %v580_v46 = vadd.f32 1.0, %v1771_v50 }
 0x109   :  { %v1773_v54 = vpop.eup %1772 }
 0x10a   :  { %v1775_v62 = vpop.eup %1774  ;;  %v543_v44 = vmul.f32 %v1773_v54, %v541_v53  ;;  %1776 = vrcp.f32 %v580_v46  ;;  %vm548_vm0 = vweird.f32 %v1773_v54  ;;  %vm586_vm9 = vweird.f32 %v580_v46 }
 0x10b   :  { %v562_v52 = vmul.f32 %v1775_v62, %v560_v48  ;;  %1778 = vtanh.f32 %v536_v45  ;;  %vm567_vm1 = vweird.f32 %v1775_v62  ;;  %vm549_vm4 = vmor %vm547_vm2, %vm548_vm0  ;;  %v592_v48 = vand.u32 2147483648, %v580_v46 }
 0x10c   :  { %v544_v51 = vsub.f32 1.0, %v543_v44  ;;  %vm568_vm6 = vmor %vm566_vm3, %vm567_vm1 }
 0x10d   :  { %v563_v56 = vsub.f32 1.0, %v562_v52  ;;  %v593_v58 = vor.u32 1.1754944e-38, %v592_v48 }
 0x10e   :  { %v545_v26 = vmul.f32 %v1773_v54, %v544_v51 }
 0x10f   :  { %v564_v55 = vmul.f32 %v1775_v62, %v563_v56 }
 0x110   :  { %v1777_v13 = vpop.eup %1776  ;;  %v546_v61 = vadd.f32 %v1773_v54, %v545_v26 }
 0x111   :  { %v565_v50 = vadd.f32 %v1775_v62, %v564_v55  ;;  %v582_v63 = vmul.f32 %v1777_v13, %v580_v46  ;;  %v1779_v45 = vpop.eup %1778  ;;  %vm587_vm8 = vweird.f32 %v1777_v13 }
 0x112   :  { %v550_v44 = vsel %vm549_vm4, %v1773_v54, %v546_v61  ;;  %v590_v54 = vand.u32 2147483647, %v580_v46  ;;  %vm588_vm10 = vmor %vm586_vm9, %vm587_vm8 }
 0x113   :  { %v555_v52 = vsel %vm552_vm5, %v554_v39, %v550_v44  ;;  %v569_v51 = vsel %vm568_vm6, %v1775_v62, %v565_v50  ;;  %v583_v0 = vsub.f32 1.0, %v582_v63  ;;  %v3252_v39 = vld [vmem:[#allocation47_spill] sm:$0xff] }
 0x114   :  { %v574_v56 = vsel %vm571_vm7, %v573_v49, %v569_v51  ;;  %v597_v47 = vmul.f32 %v1779_v45, %v555_v52  ;;  %vm591_vm11 = vcmp.eq.f32.partialorder %v590_v54, 8.507059e+37 }
 0x115   :  { %v596_v42 = vmul.f32 0.0, %v574_v56  ;;  %v584_v43 = vmul.f32 %v1777_v13, %v583_v0 }
 0x117   :  { %v2563_v26 = vadd.f32 %v597_v47, %v596_v42  ;;  %v585_v53 = vadd.f32 %v1777_v13, %v584_v43 }
 0x119   :  { %1780 = vtanh.f32 %v2563_v26  ;;  %v589_v57 = vsel %vm588_vm10, %v1777_v13, %v585_v53 }
 0x11a   :  { %v594_v59 = vsel %vm591_vm11, %v593_v58, %v589_v57 }
 0x11f   :  { %v1781_v62 = vpop.eup %1780 }
 0x120   :  { %v600_v55 = vmul.f32 %v1781_v62, %v594_v59 }
 0x122   :  { %622 = vmatmul.f32.vlgmr.msra.gmra.mxu0 %v600_v55  ;;  %642 = vmatmul.f32.vlgmr.msra.gmra.mxu1 %v600_v55 }
 0x123   :  { %662 = vmatmul.f32.vlgmr.msra.gmra.mxu2 %v600_v55  ;;  %682 = vmatmul.f32.vlgmr.msra.gmra.mxu3 %v600_v55 }
 0x124   :  { %910 = vmatpush.msra.mxu0 %v2171_v1  ;;  %930 = vmatpush.msra.mxu1 %v2173_v2  ;;  %v3223_v1 = vld [vmem:[#allocation20_spill] sm:$0xff]  ;;  %v3224_v2 = vld [vmem:[#allocation19_spill] sm:$0xff] }
 0x125   :  { %950 = vmatpush.msra.mxu2 %v2177_v4  ;;  %970 = vmatpush.msra.mxu3 %v2175_v3  ;;  %v3225_v3 = vld [vmem:[#allocation21_spill] sm:$0xff]  ;;  %v3226_v4 = vld [vmem:[#allocation22_spill] sm:$0xff] }
 0x126   :  { %911 = vmatpush.msra.mxu0 %v2179_v5  ;;  %931 = vmatpush.msra.mxu1 %v2181_v6  ;;  %v3227_v5 = vld [vmem:[#allocation24_spill] sm:$0xff]  ;;  %v3228_v6 = vld [vmem:[#allocation23_spill] sm:$0xff] }
 0x127   :  { %951 = vmatpush.msra.mxu2 %v2187_v8  ;;  %971 = vmatpush.msra.mxu3 %v2185_v7  ;;  %v3229_v7 = vld [vmem:[#allocation25_spill] sm:$0xff]  ;;  %v3230_v8 = vld [vmem:[#allocation26_spill] sm:$0xff] }
 0x128   :  { %912 = vmatpush.msra.mxu0 %v2190_v9  ;;  %932 = vmatpush.msra.mxu1 %v2192_v10  ;;  %v3231_v9 = vld [vmem:[#allocation28_spill] sm:$0xff]  ;;  %v3232_v10 = vld [vmem:[#allocation27_spill] sm:$0xff] }
 0x129   :  { %952 = vmatpush.msra.mxu2 %v2199_v12  ;;  %972 = vmatpush.msra.mxu3 %v2197_v11  ;;  %v3233_v11 = vld [vmem:[#allocation29_spill] sm:$0xff]  ;;  %v3234_v12 = vld [vmem:[#allocation30_spill] sm:$0xff] }
 0x12a   :  { %913 = vmatpush.msra.mxu0 %v2205_v14  ;;  %933 = vmatpush.msra.mxu1 %v2207_v15  ;;  %v3235_v14 = vld [vmem:[#allocation32_spill] sm:$0xff]  ;;  %v3236_v15 = vld [vmem:[#allocation31_spill] sm:$0xff] }
 0x12b   :  { %953 = vmatpush.msra.mxu2 %v2213_v17  ;;  %973 = vmatpush.msra.mxu3 %v2211_v16  ;;  %v3237_v16 = vld [vmem:[#allocation33_spill] sm:$0xff]  ;;  %v3238_v17 = vld [vmem:[#allocation34_spill] sm:$0xff] }
 0x12c   :  { %914 = vmatpush.msra.mxu0 %v2215_v18  ;;  %934 = vmatpush.msra.mxu1 %v2217_v19  ;;  %v3239_v18 = vld [vmem:[#allocation36_spill] sm:$0xff]  ;;  %v3240_v19 = vld [vmem:[#allocation35_spill] sm:$0xff] }
 0x12d   :  { %954 = vmatpush.msra.mxu2 %v2223_v21  ;;  %974 = vmatpush.msra.mxu3 %v2221_v20  ;;  %v3241_v20 = vld [vmem:[#allocation37_spill] sm:$0xff]  ;;  %v3242_v21 = vld [vmem:[#allocation38_spill] sm:$0xff] }
 0x12e   :  { %915 = vmatpush.msra.mxu0 %v2226_v22  ;;  %935 = vmatpush.msra.mxu1 %v2228_v23  ;;  %v3243_v22 = vld [vmem:[#allocation39_spill] sm:$0xff]  ;;  %v3244_v23 = vld [vmem:[#allocation40_spill] sm:$0xff] }
 0x12f   :  { %955 = vmatpush.msra.mxu2 %v2235_v25  ;;  %975 = vmatpush.msra.mxu3 %v2233_v24  ;;  %v3245_v24 = vld [vmem:[#allocation41_spill] sm:$0xff]  ;;  %v3246_v25 = vld [vmem:[#allocation42_spill] sm:$0xff] }
 0x130   :  { %916 = vmatpush.msra.mxu0 %v2241_v27  ;;  %936 = vmatpush.msra.mxu1 %v2243_v28  ;;  %v3247_v27 = vld [vmem:[#allocation43_spill] sm:$0xff]  ;;  %v3248_v28 = vld [vmem:[#allocation44_spill] sm:$0xff] }
 0x131   :  { %956 = vmatpush.msra.mxu2 %v2249_v30  ;;  %976 = vmatpush.msra.mxu3 %v2247_v29 }
 0x132   :  { %917 = vmatpush.msra.mxu0 %v2251_v31  ;;  %937 = vmatpush.msra.mxu1 %v2253_v32  ;;  %v3249_v31 = vld [vmem:[#allocation45_spill] sm:$0xff] }
 0x133   :  { %957 = vmatpush.msra.mxu2 %v2259_v34  ;;  %977 = vmatpush.msra.mxu3 %v2257_v33  ;;  %v3250_v33 = vld [vmem:[#allocation46_spill] sm:$0xff] }
 0x134   :  { %918 = vmatpush.msra.mxu0 %v2262_v35  ;;  %938 = vmatpush.msra.mxu1 %v2264_v36 }
 0x135   :  { %958 = vmatpush.msra.mxu2 %v2271_v38  ;;  %978 = vmatpush.msra.mxu3 %v2269_v37  ;;  %v3251_v38 = vld [vmem:[#allocation48_spill] sm:$0xff] }
 0x136   :  { %919 = vmatpush.msra.mxu0 %v2277_v40  ;;  %939 = vmatpush.msra.mxu1 %v2279_v41 }
 0x137   :  { %959 = vmatpush.msra.mxu2 %v3223_v1  ;;  %979 = vmatpush.msra.mxu3 %v3224_v2 }
 0x138   :  { %920 = vmatpush.msra.mxu0 %v3225_v3  ;;  %940 = vmatpush.msra.mxu1 %v3226_v4 }
 0x139   :  { %960 = vmatpush.msra.mxu2 %v3227_v5  ;;  %980 = vmatpush.msra.mxu3 %v3228_v6 }
 0x13a   :  { %921 = vmatpush.msra.mxu0 %v3229_v7  ;;  %941 = vmatpush.msra.mxu1 %v3230_v8 }
 0x13b   :  { %961 = vmatpush.msra.mxu2 %v3231_v9  ;;  %981 = vmatpush.msra.mxu3 %v3232_v10 }
 0x13c   :  { %922 = vmatpush.msra.mxu0 %v3233_v11  ;;  %942 = vmatpush.msra.mxu1 %v3234_v12 }
 0x13d   :  { %962 = vmatpush.msra.mxu2 %v3235_v14  ;;  %982 = vmatpush.msra.mxu3 %v3236_v15 }
 0x13e   :  { %923 = vmatpush.msra.mxu0 %v3237_v16  ;;  %943 = vmatpush.msra.mxu1 %v3238_v17 }
 0x13f   :  { %963 = vmatpush.msra.mxu2 %v3239_v18  ;;  %983 = vmatpush.msra.mxu3 %v3240_v19 }
 0x140   :  { %924 = vmatpush.msra.mxu0 %v3241_v20  ;;  %944 = vmatpush.msra.mxu1 %v3242_v21 }
 0x141   :  { %964 = vmatpush.msra.mxu2 %v3243_v22  ;;  %984 = vmatpush.msra.mxu3 %v3244_v23 }
 0x142   :  { %925 = vmatpush.msra.mxu0 %v3245_v24  ;;  %945 = vmatpush.msra.mxu1 %v3246_v25 }
 0x143   :  { %965 = vmatpush.msra.mxu2 %v3247_v27  ;;  %985 = vmatpush.msra.mxu3 %v3248_v28 }
 0x19f   :  { %v623_v29 = vpop.f32.mrf.mxu0  ;;  %v643_v30 = vpop.f32.mrf.mxu1 }
 0x1a0   :  { %v686_v32 = vadd.f32 %v623_v29, %v3249_v31  ;;  %v687_v34 = vadd.f32 %v643_v30, %v3250_v33  ;;  %v2641_v29 = vld [vmem:[#allocation10 + $0x1e8] sm:$0xff]  ;;  %v2644_v30 = vld [vmem:[#allocation10 + $0x1f0] sm:$0xff]  ;;  %v2647_v31 = vld [vmem:[#allocation10 + $0x1f8] sm:$0xff] }
 0x1a1   :  { %v2653_v33 = vld [vmem:[#allocation10 + $0x1c8] sm:$0xff] }
 0x1a2   :  { %v1733_v35 = vmul.f32 -1.442695, %v686_v32  ;;  %v1734_v36 = vmul.f32 -1.442695, %v687_v34  ;;  %v2650_v32 = vld [vmem:[#allocation10 + $0x1c0] sm:$0xff]  ;;  %v2656_v34 = vld [vmem:[#allocation10 + $0x1d0] sm:$0xff] }
 0x1a4   :  { %1782 = vpow2.f32 %v1733_v35  ;;  %v2659_v35 = vld [vmem:[#allocation10 + $0x1d8] sm:$0xff] }
 0x1a5   :  { %1784 = vpow2.f32 %v1734_v36  ;;  %v2662_v36 = vld [vmem:[#allocation10 + $0x1a0] sm:$0xff] }
 0x1a6   :  { %v683_v37 = vpop.f32.mrf.mxu3  ;;  %v663_v46 = vpop.f32.mrf.mxu2 }
 0x1a7   :  { %v689_v40 = vadd.f32 %v683_v37, %v3251_v38  ;;  %v688_v50 = vadd.f32 %v663_v46, %v3252_v39  ;;  %v2665_v37 = vld [vmem:[#allocation10 + $0x1a8] sm:$0xff]  ;;  %v2668_v38 = vld [vmem:[#allocation10 + $0x1b0] sm:$0xff] }
 0x1a8   :  { %v2689_v46 = vld [vmem:[#allocation10 + $0x168] sm:$0xff] }
 0x1a9   :  { %v1735_v41 = vmul.f32 -1.442695, %v689_v40  ;;  %v2671_v40 = vld [vmem:[#allocation10 + $0x1b8] sm:$0xff]  ;;  %v2701_v39 = vld [vmem:[#allocation10 + $0x148] sm:$0xff] }
 0x1aa   :  { %v1783_v42 = vpop.eup %1782 }
 0x1ab   :  { %v1785_v43 = vpop.eup %1784  ;;  %v693_v47 = vadd.f32 1.0, %v1783_v42  ;;  %1786 = vpow2.f32 %v1735_v41  ;;  %v2674_v41 = vld [vmem:[#allocation10 + $0x180] sm:$0xff]  ;;  %v2677_v42 = vld [vmem:[#allocation10 + $0x188] sm:$0xff] }
 0x1ac   :  { %v712_v0 = vadd.f32 1.0, %v1785_v43  ;;  %v2680_v43 = vld [vmem:[#allocation10 + $0x190] sm:$0xff] }
 0x1ad   :  { %1788 = vrcp.f32 %v693_v47  ;;  %v705_v51 = vand.u32 2147483648, %v693_v47  ;;  %v703_v48 = vand.u32 2147483647, %v693_v47  ;;  %vm699_vm14 = vweird.f32 %v693_v47 }
 0x1ae   :  { %1790 = vrcp.f32 %v712_v0  ;;  %v724_v56 = vand.u32 2147483648, %v712_v0  ;;  %v722_v57 = vand.u32 2147483647, %v712_v0  ;;  %vm718_vm15 = vweird.f32 %v712_v0 }
 0x1af   :  { %v706_v59 = vor.u32 1.1754944e-38, %v705_v51  ;;  %vm704_vm2 = vcmp.eq.f32.partialorder %v703_v48, 8.507059e+37  ;;  %v2722_v51 = vld [vmem:[#allocation10 + $0x100] sm:$0xff]  ;;  %v2731_v48 = vld [vmem:[#allocation10 + $0x118] sm:$0xff] }
 0x1b0   :  { %v725_v2 = vor.u32 1.1754944e-38, %v724_v56  ;;  %vm723_vm3 = vcmp.eq.f32.partialorder %v722_v57, 8.507059e+37  ;;  %v2725_v56 = vld [vmem:[#allocation10 + $0x108] sm:$0xff] }
 0x1b1   :  { %v1787_v60 = vpop.eup %1786  ;;  %v2737_v57 = vld [vmem:[#allocation10 + $0xe8] sm:$0xff] }
 0x1b2   :  { %v732_v13 = vadd.f32 1.0, %v1787_v60  ;;  %v2692_v60 = vld [vmem:[#allocation10 + $0x170] sm:$0xff] }
 0x1b3   :  { %v1789_v61 = vpop.eup %1788 }
 0x1b4   :  { %v1791_v63 = vpop.eup %1790  ;;  %v695_v49 = vmul.f32 %v1789_v61, %v693_v47  ;;  %1792 = vrcp.f32 %v732_v13  ;;  %vm700_vm12 = vweird.f32 %v1789_v61  ;;  %v744_v15 = vand.u32 2147483648, %v732_v13  ;;  %v2683_v47 = vld [vmem:[#allocation10 + $0x198] sm:$0xff] }
 0x1b5   :  { %v714_v44 = vmul.f32 %v1791_v63, %v712_v0  ;;  %1794 = vtanh.f32 %v688_v50  ;;  %vm719_vm13 = vweird.f32 %v1791_v63  ;;  %vm701_vm0 = vmor %vm699_vm14, %vm700_vm12  ;;  %vm738_vm5 = vweird.f32 %v732_v13  ;;  %v2686_v0 = vld [vmem:[#allocation10 + $0x160] sm:$0xff]  ;;  %v2704_v50 = vld [vmem:[#allocation10 + $0x150] sm:$0xff] }
 0x1b6   :  { %v696_v45 = vsub.f32 1.0, %v695_v49  ;;  %vm720_vm1 = vmor %vm718_vm15, %vm719_vm13  ;;  %v742_v16 = vand.u32 2147483647, %v732_v13  ;;  %v745_v18 = vor.u32 1.1754944e-38, %v744_v15  ;;  %v2710_v49 = vld [vmem:[#allocation10 + $0x120] sm:$0xff]  ;;  %v2788_v15 = vld [vmem:[#allocation10 + $0x70] sm:$0xff] }
 0x1b7   :  { %v715_v52 = vsub.f32 1.0, %v714_v44  ;;  %v2713_v44 = vld [vmem:[#allocation10 + $0x128] sm:$0xff]  ;;  %3265 = vst [vmem:[#allocation32_spill] sm:$0xff] %v2788_v15 }
 0x1b8   :  { %v697_v53 = vmul.f32 %v1789_v61, %v696_v45  ;;  %vm743_vm7 = vcmp.eq.f32.partialorder %v742_v16, 8.507059e+37  ;;  %v2716_v45 = vld [vmem:[#allocation10 + $0x130] sm:$0xff]  ;;  %v2791_v16 = vld [vmem:[#allocation10 + $0x78] sm:$0xff] }
 0x1b9   :  { %v716_v54 = vmul.f32 %v1791_v63, %v715_v52  ;;  %v2719_v52 = vld [vmem:[#allocation10 + $0x138] sm:$0xff]  ;;  %3266 = vst [vmem:[#allocation31_spill] sm:$0xff] %v2791_v16 }
 0x1ba   :  { %v1793_v58 = vpop.eup %1792  ;;  %v698_v62 = vadd.f32 %v1789_v61, %v697_v53  ;;  %v2728_v53 = vld [vmem:[#allocation10 + $0x110] sm:$0xff] }
 0x1bb   :  { %v717_v55 = vadd.f32 %v1791_v63, %v716_v54  ;;  %v734_v1 = vmul.f32 %v1793_v58, %v732_v13  ;;  %v1795_v4 = vpop.eup %1794  ;;  %vm739_vm4 = vweird.f32 %v1793_v58  ;;  %v2695_v13 = vld [vmem:[#allocation10 + $0x178] sm:$0xff]  ;;  %v2734_v54 = vld [vmem:[#allocation10 + $0xe0] sm:$0xff] }
 0x1bc   :  { %v702_v3 = vsel %vm701_vm0, %v1789_v61, %v698_v62  ;;  %vm740_vm6 = vmor %vm738_vm5, %vm739_vm4  ;;  %v2698_v61 = vld [vmem:[#allocation10 + $0x140] sm:$0xff]  ;;  %v2743_v62 = vld [vmem:[#allocation10 + $0xf8] sm:$0xff] }
 0x1bd   :  { %v707_v5 = vsel %vm704_vm2, %v706_v59, %v702_v3  ;;  %v721_v6 = vsel %vm720_vm1, %v1791_v63, %v717_v55  ;;  %v735_v7 = vsub.f32 1.0, %v734_v1  ;;  %v2707_v63 = vld [vmem:[#allocation10 + $0x158] sm:$0xff]  ;;  %v2746_v59 = vld [vmem:[#allocation10 + $0xc0] sm:$0xff]  ;;  %v2749_v55 = vld [vmem:[#allocation10 + $0xc8] sm:$0xff] }
 0x1be   :  { %v726_v8 = vsel %vm723_vm3, %v725_v2, %v721_v6  ;;  %v749_v9 = vmul.f32 %v1795_v4, %v707_v5  ;;  %v2752_v1 = vld [vmem:[#allocation10 + $0xd0] sm:$0xff]  ;;  %v2755_v2 = vld [vmem:[#allocation10 + $0xd8] sm:$0xff]  ;;  %v2758_v3 = vld [vmem:[#allocation10 + $0xa0] sm:$0xff] }
 0x1bf   :  { %v748_v10 = vmul.f32 %v726_v8, %v2563_v26  ;;  %v736_v11 = vmul.f32 %v1793_v58, %v735_v7  ;;  %v2638_v26 = vld [vmem:[#allocation10 + $0x1e0] sm:$0xff]  ;;  %3253 = vst [vmem:[#allocation20_spill] sm:$0xff] %v2752_v1  ;;  %v2761_v4 = vld [vmem:[#allocation10 + $0xa8] sm:$0xff]  ;;  %v2764_v5 = vld [vmem:[#allocation10 + $0xb0] sm:$0xff] }
 0x1c0   :  { %3254 = vst [vmem:[#allocation19_spill] sm:$0xff] %v2755_v2  ;;  %v2767_v6 = vld [vmem:[#allocation10 + $0xb8] sm:$0xff]  ;;  %v2770_v7 = vld [vmem:[#allocation10 + $0x80] sm:$0xff]  ;;  %v2773_v8 = vld [vmem:[#allocation10 + $0x88] sm:$0xff] }
 0x1c1   :  { %v2635_v12 = vadd.f32 %v749_v9, %v748_v10  ;;  %v737_v14 = vadd.f32 %v1793_v58, %v736_v11  ;;  %3255 = vst [vmem:[#allocation21_spill] sm:$0xff] %v2758_v3  ;;  %v2776_v9 = vld [vmem:[#allocation10 + $0x90] sm:$0xff]  ;;  %v2779_v10 = vld [vmem:[#allocation10 + $0x98] sm:$0xff]  ;;  %v2782_v11 = vld [vmem:[#allocation10 + $0x60] sm:$0xff] }
 0x1c2   :  { %3256 = vst [vmem:[#allocation22_spill] sm:$0xff] %v2761_v4 }
 0x1c3   :  { %1796 = vtanh.f32 %v2635_v12  ;;  %v741_v17 = vsel %vm740_vm6, %v1793_v58, %v737_v14  ;;  %v2740_v58 = vld [vmem:[#allocation10 + $0xf0] sm:$0xff]  ;;  %3257 = vst [vmem:[#allocation24_spill] sm:$0xff] %v2764_v5  ;;  %v2785_v14 = vld [vmem:[#allocation10 + $0x68] sm:$0xff] }
 0x1c4   :  { %v746_v20 = vsel %vm743_vm7, %v745_v18, %v741_v17  ;;  %3258 = vst [vmem:[#allocation23_spill] sm:$0xff] %v2767_v6  ;;  %v2794_v17 = vld [vmem:[#allocation10 + $0x40] sm:$0xff]  ;;  %v2797_v18 = vld [vmem:[#allocation10 + $0x48] sm:$0xff] }
 0x1c5   :  { %3259 = vst [vmem:[#allocation25_spill] sm:$0xff] %v2770_v7 }
 0x1c6   :  { %3260 = vst [vmem:[#allocation26_spill] sm:$0xff] %v2773_v8 }
 0x1c7   :  { %3261 = vst [vmem:[#allocation28_spill] sm:$0xff] %v2776_v9 }
 0x1c8   :  { %3262 = vst [vmem:[#allocation27_spill] sm:$0xff] %v2779_v10 }
 0x1c9   :  { %v1797_v19 = vpop.eup %1796  ;;  %3263 = vst [vmem:[#allocation29_spill] sm:$0xff] %v2782_v11 }
 0x1ca   :  { %v752_v21 = vmul.f32 %v1797_v19, %v746_v20  ;;  %3264 = vst [vmem:[#allocation30_spill] sm:$0xff] %v2785_v14  ;;  %v2800_v19 = vld [vmem:[#allocation10 + $0x50] sm:$0xff]  ;;  %v2803_v20 = vld [vmem:[#allocation10 + $0x58] sm:$0xff] }
 0x1cb   :  { %3267 = vst [vmem:[#allocation33_spill] sm:$0xff] %v2794_v17 }
 0x1cc   :  { %774 = vmatmul.f32.vlgmr.msrb.gmra.mxu0 %v752_v21  ;;  %794 = vmatmul.f32.vlgmr.msrb.gmra.mxu1 %v752_v21  ;;  %3268 = vst [vmem:[#allocation34_spill] sm:$0xff] %v2797_v18 }
 0x1cd   :  { %814 = vmatmul.f32.vlgmr.msrb.gmra.mxu2 %v752_v21  ;;  %834 = vmatmul.f32.vlgmr.msrb.gmra.mxu3 %v752_v21  ;;  %3269 = vst [vmem:[#allocation36_spill] sm:$0xff] %v2800_v19  ;;  %v2806_v21 = vld [vmem:[#allocation10 + $0x20] sm:$0xff] }
 0x1ce   :  { %1062 = vmatpush.msrb.mxu0 %v2638_v26  ;;  %1082 = vmatpush.msrb.mxu1 %v2641_v29  ;;  %3270 = vst [vmem:[#allocation35_spill] sm:$0xff] %v2803_v20 }
 0x1cf   :  { %1102 = vmatpush.msrb.mxu2 %v2644_v30  ;;  %1122 = vmatpush.msrb.mxu3 %v2647_v31  ;;  %3271 = vst [vmem:[#allocation37_spill] sm:$0xff] %v2806_v21 }
 0x1d0   :  { %1063 = vmatpush.msrb.mxu0 %v2650_v32  ;;  %1083 = vmatpush.msrb.mxu1 %v2653_v33 }
 0x1d1   :  { %1103 = vmatpush.msrb.mxu2 %v2656_v34  ;;  %1123 = vmatpush.msrb.mxu3 %v2659_v35 }
 0x1d2   :  { %1064 = vmatpush.msrb.mxu0 %v2662_v36  ;;  %1084 = vmatpush.msrb.mxu1 %v2665_v37 }
 0x1d3   :  { %1104 = vmatpush.msrb.mxu2 %v2668_v38  ;;  %1124 = vmatpush.msrb.mxu3 %v2671_v40 }
 0x1d4   :  { %1065 = vmatpush.msrb.mxu0 %v2674_v41  ;;  %1085 = vmatpush.msrb.mxu1 %v2677_v42 }
 0x1d5   :  { %1105 = vmatpush.msrb.mxu2 %v2680_v43  ;;  %1125 = vmatpush.msrb.mxu3 %v2683_v47 }
 0x1d6   :  { %1066 = vmatpush.msrb.mxu0 %v2686_v0  ;;  %1086 = vmatpush.msrb.mxu1 %v2689_v46 }
 0x1d7   :  { %1106 = vmatpush.msrb.mxu2 %v2692_v60  ;;  %1126 = vmatpush.msrb.mxu3 %v2695_v13 }
 0x1d8   :  { %1067 = vmatpush.msrb.mxu0 %v2698_v61  ;;  %1087 = vmatpush.msrb.mxu1 %v2701_v39 }
 0x1d9   :  { %1107 = vmatpush.msrb.mxu2 %v2704_v50  ;;  %1127 = vmatpush.msrb.mxu3 %v2707_v63 }
 0x1da   :  { %1068 = vmatpush.msrb.mxu0 %v2710_v49  ;;  %1088 = vmatpush.msrb.mxu1 %v2713_v44 }
 0x1db   :  { %1108 = vmatpush.msrb.mxu2 %v2716_v45  ;;  %1128 = vmatpush.msrb.mxu3 %v2719_v52 }
 0x1dc   :  { %1069 = vmatpush.msrb.mxu0 %v2722_v51  ;;  %1089 = vmatpush.msrb.mxu1 %v2725_v56 }
 0x1dd   :  { %1109 = vmatpush.msrb.mxu2 %v2728_v53  ;;  %1129 = vmatpush.msrb.mxu3 %v2731_v48 }
 0x1de   :  { %1070 = vmatpush.msrb.mxu0 %v2734_v54  ;;  %1090 = vmatpush.msrb.mxu1 %v2737_v57 }
 0x1df   :  { %1110 = vmatpush.msrb.mxu2 %v2740_v58  ;;  %1130 = vmatpush.msrb.mxu3 %v2743_v62 }
 0x1e0   :  { %1071 = vmatpush.msrb.mxu0 %v2746_v59  ;;  %1091 = vmatpush.msrb.mxu1 %v2749_v55 }
 0x1e1   :  { %1111 = vmatpush.msrb.mxu2 %v2752_v1  ;;  %1131 = vmatpush.msrb.mxu3 %v2755_v2 }
 0x1e2   :  { %1072 = vmatpush.msrb.mxu0 %v2758_v3  ;;  %1092 = vmatpush.msrb.mxu1 %v2761_v4 }
 0x1e3   :  { %1112 = vmatpush.msrb.mxu2 %v2764_v5  ;;  %1132 = vmatpush.msrb.mxu3 %v2767_v6 }
 0x1e4   :  { %1073 = vmatpush.msrb.mxu0 %v2770_v7  ;;  %1093 = vmatpush.msrb.mxu1 %v2773_v8 }
 0x1e5   :  { %1113 = vmatpush.msrb.mxu2 %v2776_v9  ;;  %1133 = vmatpush.msrb.mxu3 %v2779_v10 }
 0x1e6   :  { %1074 = vmatpush.msrb.mxu0 %v2782_v11  ;;  %1094 = vmatpush.msrb.mxu1 %v2785_v14 }
 0x1e7   :  { %1114 = vmatpush.msrb.mxu2 %v2788_v15  ;;  %1134 = vmatpush.msrb.mxu3 %v2791_v16  ;;  %v2809_v16 = vld [vmem:[#allocation10 + $0x28] sm:$0xff] }
 0x1e8   :  { %1075 = vmatpush.msrb.mxu0 %v2794_v17  ;;  %1095 = vmatpush.msrb.mxu1 %v2797_v18  ;;  %3272 = vst [vmem:[#allocation38_spill] sm:$0xff] %v2809_v16  ;;  %v3273_v18 = vld [vmem:[#allocation49_spill] sm:$0xff]  ;;  %v3274_v17 = vld [vmem:[#allocation50_spill] sm:$0xff] }
 0x1e9   :  { %1115 = vmatpush.msrb.mxu2 %v2800_v19  ;;  %1135 = vmatpush.msrb.mxu3 %v2803_v20 }
 0x1ea   :  { %1076 = vmatpush.msrb.mxu0 %v2806_v21  ;;  %1096 = vmatpush.msrb.mxu1 %v2809_v16 }
 0x1eb   :  { %1116 = vmatpush.msrb.mxu2 %v3243_v22  ;;  %1136 = vmatpush.msrb.mxu3 %v3244_v23  ;;  %v3275_v23 = vld [vmem:[#allocation52_spill] sm:$0xff] }
 0x1ec   :  { %1077 = vmatpush.msrb.mxu0 %v3245_v24  ;;  %1097 = vmatpush.msrb.mxu1 %v3246_v25 }
 0x1ed   :  { %1117 = vmatpush.msrb.mxu2 %v3247_v27  ;;  %1137 = vmatpush.msrb.mxu3 %v3248_v28 }
 0x249   :  { %v775_v20 = vpop.f32.mrf.mxu0  ;;  %v795_v19 = vpop.f32.mrf.mxu1 }
 0x24a   :  { %v838_v21 = vadd.f32 %v775_v20, %v3273_v18  ;;  %v839_v15 = vadd.f32 %v795_v19, %v3274_v17  ;;  %v3276_v17 = vld [vmem:[#allocation51_spill] sm:$0xff] }
 0x24c   :  { %v1736_v14 = vmul.f32 -1.442695, %v838_v21  ;;  %v1737_v16 = vmul.f32 -1.442695, %v839_v15 }
 0x24e   :  { %1798 = vpow2.f32 %v1736_v14 }
 0x24f   :  { %1800 = vpow2.f32 %v1737_v16 }
 0x250   :  { %v835_v22 = vpop.f32.mrf.mxu3  ;;  %v815_v28 = vpop.f32.mrf.mxu2 }
 0x251   :  { %v841_v11 = vadd.f32 %v835_v22, %v3275_v23  ;;  %v840_v19 = vadd.f32 %v815_v28, %v3276_v17 }
 0x253   :  { %v1738_v24 = vmul.f32 -1.442695, %v841_v11 }
 0x254   :  { %v1799_v10 = vpop.eup %1798 }
 0x255   :  { %v1801_v25 = vpop.eup %1800  ;;  %v845_v9 = vadd.f32 1.0, %v1799_v10  ;;  %1802 = vpow2.f32 %v1738_v24 }
 0x256   :  { %v864_v27 = vadd.f32 1.0, %v1801_v25 }
 0x257   :  { %1804 = vrcp.f32 %v845_v9  ;;  %v857_v11 = vand.u32 2147483648, %v845_v9  ;;  %v855_v24 = vand.u32 2147483647, %v845_v9  ;;  %vm851_vm10 = vweird.f32 %v845_v9 }
 0x258   :  { %1806 = vrcp.f32 %v864_v27  ;;  %v876_v23 = vand.u32 2147483648, %v864_v27  ;;  %v874_v7 = vand.u32 2147483647, %v864_v27  ;;  %vm870_vm11 = vweird.f32 %v864_v27 }
 0x259   :  { %v858_v28 = vor.u32 1.1754944e-38, %v857_v11  ;;  %vm856_vm14 = vcmp.eq.f32.partialorder %v855_v24, 8.507059e+37 }
 0x25a   :  { %vm875_vm15 = vcmp.eq.f32.partialorder %v874_v7, 8.507059e+37 }
 0x25b   :  { %v1803_v8 = vpop.eup %1802 }
 0x25c   :  { %v884_v18 = vadd.f32 1.0, %v1803_v8 }
 0x25d   :  { %v1805_v20 = vpop.eup %1804 }
 0x25e   :  { %v1807_v15 = vpop.eup %1806  ;;  %v847_v14 = vmul.f32 %v1805_v20, %v845_v9  ;;  %1808 = vrcp.f32 %v884_v18  ;;  %vm852_vm8 = vweird.f32 %v1805_v20  ;;  %v896_v11 = vand.u32 2147483648, %v884_v18 }
 0x25f   :  { %v866_v16 = vmul.f32 %v1807_v15, %v864_v27  ;;  %1810 = vtanh.f32 %v840_v19  ;;  %vm871_vm9 = vweird.f32 %v1807_v15  ;;  %vm853_vm12 = vmor %vm851_vm10, %vm852_vm8  ;;  %vm890_vm1 = vweird.f32 %v884_v18 }
 0x260   :  { %v848_v21 = vsub.f32 1.0, %v847_v14  ;;  %vm872_vm13 = vmor %vm870_vm11, %vm871_vm9  ;;  %v877_v14 = vor.u32 1.1754944e-38, %v876_v23  ;;  %v897_v24 = vor.u32 1.1754944e-38, %v896_v11  ;;  %v3295_v11 = vld [vmem:[#allocation37_spill] sm:$0xff] }
 0x261   :  { %v867_v22 = vsub.f32 1.0, %v866_v16 }
 0x262   :  { %v849_v10 = vmul.f32 %v1805_v20, %v848_v21 }
 0x263   :  { %v868_v25 = vmul.f32 %v1807_v15, %v867_v22 }
 0x264   :  { %v1809_v6 = vpop.eup %1808  ;;  %v850_v8 = vadd.f32 %v1805_v20, %v849_v10 }
 0x265   :  { %v869_v17 = vadd.f32 %v1807_v15, %v868_v25  ;;  %v886_v5 = vmul.f32 %v1809_v6, %v884_v18  ;;  %v1811_v19 = vpop.eup %1810  ;;  %vm891_vm0 = vweird.f32 %v1809_v6  ;;  %v3284_v25 = vld [vmem:[#allocation26_spill] sm:$0xff] }
 0x266   :  { %v854_v16 = vsel %vm853_vm12, %v1805_v20, %v850_v8  ;;  %v894_v20 = vand.u32 2147483647, %v884_v18  ;;  %vm892_vm2 = vmor %vm890_vm1, %vm891_vm0  ;;  %v3283_v18 = vld [vmem:[#allocation25_spill] sm:$0xff]  ;;  %v3285_v8 = vld [vmem:[#allocation28_spill] sm:$0xff] }
 0x267   :  { %v859_v4 = vsel %vm856_vm14, %v858_v28, %v854_v16  ;;  %v873_v21 = vsel %vm872_vm13, %v1807_v15, %v869_v17  ;;  %v887_v3 = vsub.f32 1.0, %v886_v5  ;;  %v3286_v28 = vld [vmem:[#allocation27_spill] sm:$0xff]  ;;  %v3287_v17 = vld [vmem:[#allocation29_spill] sm:$0xff]  ;;  %v3289_v16 = vld [vmem:[#allocation32_spill] sm:$0xff] }
 0x268   :  { %v878_v22 = vsel %vm875_vm15, %v877_v14, %v873_v21  ;;  %v901_v2 = vmul.f32 %v1811_v19, %v859_v4  ;;  %vm895_vm3 = vcmp.eq.f32.partialorder %v894_v20, 8.507059e+37  ;;  %v3281_v4 = vld [vmem:[#allocation24_spill] sm:$0xff]  ;;  %v3288_v14 = vld [vmem:[#allocation30_spill] sm:$0xff]  ;;  %v3290_v19 = vld [vmem:[#allocation31_spill] sm:$0xff] }
 0x269   :  { %v900_v1 = vmul.f32 %v878_v22, %v2635_v12  ;;  %v888_v10 = vmul.f32 %v1809_v6, %v887_v3  ;;  %v3277_v12 = vld [vmem:[#allocation20_spill] sm:$0xff]  ;;  %v3280_v3 = vld [vmem:[#allocation22_spill] sm:$0xff]  ;;  %v3291_v21 = vld [vmem:[#allocation33_spill] sm:$0xff] }
 0x26a   :  { %v3292_v22 = vld [vmem:[#allocation34_spill] sm:$0xff] }
 0x26b   :  { %v2823_v9 = vadd.f32 %v901_v2, %v900_v1  ;;  %v889_v27 = vadd.f32 %v1809_v6, %v888_v10  ;;  %v3278_v1 = vld [vmem:[#allocation19_spill] sm:$0xff]  ;;  %v3279_v2 = vld [vmem:[#allocation21_spill] sm:$0xff]  ;;  %v3293_v10 = vld [vmem:[#allocation36_spill] sm:$0xff] }
 0x26c   :  { %v3296_v20 = vld [vmem:[#allocation38_spill] sm:$0xff] }
 0x26d   :  { %1812 = vtanh.f32 %v2823_v9  ;;  %v893_v23 = vsel %vm892_vm2, %v1809_v6, %v889_v27  ;;  %v3282_v6 = vld [vmem:[#allocation23_spill] sm:$0xff] }
 0x26e   :  { %v898_v5 = vsel %vm895_vm3, %v897_v24, %v893_v23  ;;  %v3294_v27 = vld [vmem:[#allocation35_spill] sm:$0xff]  ;;  %v2887_v24 = vld [vmem:[#allocation10 + $0x38] sm:$0xff] }
 0x26f   :  { %v2884_v23 = vld [vmem:[#allocation10 + $0x30] sm:$0xff]  ;;  %3298 = vst [vmem:[#allocation40_spill] sm:$0xff] %v2887_v24 }
 0x270   :  { %3297 = vst [vmem:[#allocation39_spill] sm:$0xff] %v2884_v23 }
 0x273   :  { %v1813_v7 = vpop.eup %1812 }
 0x274   :  { %v904_v15 = vmul.f32 %v1813_v7, %v898_v5  ;;  %v2890_v7 = vld [vmem:[#allocation10] sm:$0xff]  ;;  %v2893_v5 = vld [vmem:[#allocation10 + $0x8] sm:$0xff] }
 0x275   :  { %3299 = vst [vmem:[#allocation41_spill] sm:$0xff] %v2890_v7 }
 0x276   :  { %926 = vmatmul.f32.vlgmr.msra.gmra.mxu0 %v904_v15  ;;  %946 = vmatmul.f32.vlgmr.msra.gmra.mxu1 %v904_v15  ;;  %3300 = vst [vmem:[#allocation42_spill] sm:$0xff] %v2893_v5 }
 0x277   :  { %966 = vmatmul.f32.vlgmr.msra.gmra.mxu2 %v904_v15  ;;  %986 = vmatmul.f32.vlgmr.msra.gmra.mxu3 %v904_v15  ;;  %v2896_v15 = vld [vmem:[#allocation10 + $0x10] sm:$0xff] }
 0x278   :  { %1214 = vmatpush.msra.mxu0 %v2638_v26  ;;  %1234 = vmatpush.msra.mxu1 %v2641_v29  ;;  %3301 = vst [vmem:[#allocation43_spill] sm:$0xff] %v2896_v15 }
 0x279   :  { %1254 = vmatpush.msra.mxu2 %v2644_v30  ;;  %1274 = vmatpush.msra.mxu3 %v2647_v31 }
 0x27a   :  { %1215 = vmatpush.msra.mxu0 %v2650_v32  ;;  %1235 = vmatpush.msra.mxu1 %v2653_v33 }
 0x27b   :  { %1255 = vmatpush.msra.mxu2 %v2656_v34  ;;  %1275 = vmatpush.msra.mxu3 %v2659_v35 }
 0x27c   :  { %1216 = vmatpush.msra.mxu0 %v2662_v36  ;;  %1236 = vmatpush.msra.mxu1 %v2665_v37 }
 0x27d   :  { %1256 = vmatpush.msra.mxu2 %v2668_v38  ;;  %1276 = vmatpush.msra.mxu3 %v2671_v40 }
 0x27e   :  { %1217 = vmatpush.msra.mxu0 %v2674_v41  ;;  %1237 = vmatpush.msra.mxu1 %v2677_v42 }
 0x27f   :  { %1257 = vmatpush.msra.mxu2 %v2680_v43  ;;  %1277 = vmatpush.msra.mxu3 %v2683_v47 }
 0x280   :  { %1218 = vmatpush.msra.mxu0 %v2686_v0  ;;  %1238 = vmatpush.msra.mxu1 %v2689_v46 }
 0x281   :  { %1258 = vmatpush.msra.mxu2 %v2692_v60  ;;  %1278 = vmatpush.msra.mxu3 %v2695_v13 }
 0x282   :  { %1219 = vmatpush.msra.mxu0 %v2698_v61  ;;  %1239 = vmatpush.msra.mxu1 %v2701_v39 }
 0x283   :  { %1259 = vmatpush.msra.mxu2 %v2704_v50  ;;  %1279 = vmatpush.msra.mxu3 %v2707_v63 }
 0x284   :  { %1220 = vmatpush.msra.mxu0 %v2710_v49  ;;  %1240 = vmatpush.msra.mxu1 %v2713_v44 }
 0x285   :  { %1260 = vmatpush.msra.mxu2 %v2716_v45  ;;  %1280 = vmatpush.msra.mxu3 %v2719_v52 }
 0x286   :  { %1221 = vmatpush.msra.mxu0 %v2722_v51  ;;  %1241 = vmatpush.msra.mxu1 %v2725_v56 }
 0x287   :  { %1261 = vmatpush.msra.mxu2 %v2728_v53  ;;  %1281 = vmatpush.msra.mxu3 %v2731_v48 }
 0x288   :  { %1222 = vmatpush.msra.mxu0 %v2734_v54  ;;  %1242 = vmatpush.msra.mxu1 %v2737_v57 }
 0x289   :  { %1262 = vmatpush.msra.mxu2 %v2740_v58  ;;  %1282 = vmatpush.msra.mxu3 %v2743_v62 }
 0x28a   :  { %1223 = vmatpush.msra.mxu0 %v2746_v59  ;;  %1243 = vmatpush.msra.mxu1 %v2749_v55 }
 0x28b   :  { %1263 = vmatpush.msra.mxu2 %v3277_v12  ;;  %1283 = vmatpush.msra.mxu3 %v3278_v1 }
 0x28c   :  { %1224 = vmatpush.msra.mxu0 %v3279_v2  ;;  %1244 = vmatpush.msra.mxu1 %v3280_v3 }
 0x28d   :  { %1264 = vmatpush.msra.mxu2 %v3281_v4  ;;  %1284 = vmatpush.msra.mxu3 %v3282_v6 }
 0x28e   :  { %1225 = vmatpush.msra.mxu0 %v3283_v18  ;;  %1245 = vmatpush.msra.mxu1 %v3284_v25 }
 0x28f   :  { %1265 = vmatpush.msra.mxu2 %v3285_v8  ;;  %1285 = vmatpush.msra.mxu3 %v3286_v28 }
 0x290   :  { %1226 = vmatpush.msra.mxu0 %v3287_v17  ;;  %1246 = vmatpush.msra.mxu1 %v3288_v14 }
 0x291   :  { %1266 = vmatpush.msra.mxu2 %v3289_v16  ;;  %1286 = vmatpush.msra.mxu3 %v3290_v19 }
 0x292   :  { %1227 = vmatpush.msra.mxu0 %v3291_v21  ;;  %1247 = vmatpush.msra.mxu1 %v3292_v22 }
 0x293   :  { %1267 = vmatpush.msra.mxu2 %v3293_v10  ;;  %1287 = vmatpush.msra.mxu3 %v3294_v27  ;;  %v3303_v27 = vld [vmem:[#allocation53_spill] sm:$0xff]  ;;  %v3304_v10 = vld [vmem:[#allocation54_spill] sm:$0xff] }
 0x294   :  { %1228 = vmatpush.msra.mxu0 %v3295_v11  ;;  %1248 = vmatpush.msra.mxu1 %v3296_v20  ;;  %v2899_v20 = vld [vmem:[#allocation10 + $0x18] sm:$0xff] }
 0x295   :  { %1268 = vmatpush.msra.mxu2 %v2884_v23  ;;  %1288 = vmatpush.msra.mxu3 %v2887_v24  ;;  %3302 = vst [vmem:[#allocation44_spill] sm:$0xff] %v2899_v20 }
 0x296   :  { %1229 = vmatpush.msra.mxu0 %v2890_v7  ;;  %1249 = vmatpush.msra.mxu1 %v2893_v5  ;;  %v3305_v5 = vld [vmem:[#allocation56_spill] sm:$0xff] }
 0x297   :  { %1269 = vmatpush.msra.mxu2 %v2896_v15  ;;  %1289 = vmatpush.msra.mxu3 %v2899_v20 }
 0x2f3   :  { %v927_v23 = vpop.f32.mrf.mxu0  ;;  %v947_v11 = vpop.f32.mrf.mxu1 }
 0x2f4   :  { %v990_v24 = vadd.f32 %v927_v23, %v3303_v27  ;;  %v991_v22 = vadd.f32 %v947_v11, %v3304_v10  ;;  %v3306_v10 = vld [vmem:[#allocation55_spill] sm:$0xff] }
 0x2f6   :  { %v1739_v21 = vmul.f32 -1.442695, %v990_v24  ;;  %v1740_v7 = vmul.f32 -1.442695, %v991_v22 }
 0x2f8   :  { %1814 = vpow2.f32 %v1739_v21 }
 0x2f9   :  { %1816 = vpow2.f32 %v1740_v7 }
 0x2fa   :  { %v987_v19 = vpop.f32.mrf.mxu3  ;;  %v967_v20 = vpop.f32.mrf.mxu2 }
 0x2fb   :  { %v993_v16 = vadd.f32 %v987_v19, %v3305_v5  ;;  %v992_v11 = vadd.f32 %v967_v20, %v3306_v10 }
 0x2fd   :  { %v1741_v14 = vmul.f32 -1.442695, %v993_v16 }
 0x2fe   :  { %v1815_v17 = vpop.eup %1814 }
 0x2ff   :  { %v1817_v15 = vpop.eup %1816  ;;  %v997_v28 = vadd.f32 1.0, %v1815_v17  ;;  %1818 = vpow2.f32 %v1741_v14 }
 0x300   :  { %v1016_v8 = vadd.f32 1.0, %v1817_v15 }
 0x301   :  { %1820 = vrcp.f32 %v997_v28  ;;  %v1009_v16 = vand.u32 2147483648, %v997_v28  ;;  %v1007_v14 = vand.u32 2147483647, %v997_v28  ;;  %vm1003_vm6 = vweird.f32 %v997_v28 }
 0x302   :  { %1822 = vrcp.f32 %v1016_v8  ;;  %v1028_v5 = vand.u32 2147483648, %v1016_v8  ;;  %v1026_v18 = vand.u32 2147483647, %v1016_v8  ;;  %vm1022_vm7 = vweird.f32 %v1016_v8 }
 0x303   :  { %v1010_v20 = vor.u32 1.1754944e-38, %v1009_v16  ;;  %vm1008_vm10 = vcmp.eq.f32.partialorder %v1007_v14, 8.507059e+37 }
 0x304   :  { %vm1027_vm11 = vcmp.eq.f32.partialorder %v1026_v18, 8.507059e+37 }
 0x305   :  { %v1819_v25 = vpop.eup %1818 }
 0x306   :  { %v1036_v27 = vadd.f32 1.0, %v1819_v25 }
 0x307   :  { %v1821_v23 = vpop.eup %1820 }
 0x308   :  { %v1823_v22 = vpop.eup %1822  ;;  %v999_v21 = vmul.f32 %v1821_v23, %v997_v28  ;;  %1824 = vrcp.f32 %v1036_v27  ;;  %vm1004_vm4 = vweird.f32 %v1821_v23  ;;  %v1048_v16 = vand.u32 2147483648, %v1036_v27 }
 0x309   :  { %v1018_v24 = vmul.f32 %v1823_v22, %v1016_v8  ;;  %1826 = vtanh.f32 %v992_v11  ;;  %vm1023_vm5 = vweird.f32 %v1823_v22  ;;  %vm1005_vm8 = vmor %vm1003_vm6, %vm1004_vm4  ;;  %vm1042_vm13 = vweird.f32 %v1036_v27 }
 0x30a   :  { %v1000_v7 = vsub.f32 1.0, %v999_v21  ;;  %vm1024_vm9 = vmor %vm1022_vm7, %vm1023_vm5  ;;  %v1029_v21 = vor.u32 1.1754944e-38, %v1028_v5  ;;  %v1049_v14 = vor.u32 1.1754944e-38, %v1048_v16  ;;  %v3325_v16 = vld [vmem:[#allocation37_spill] sm:$0xff] }
 0x30b   :  { %v1019_v19 = vsub.f32 1.0, %v1018_v24 }
 0x30c   :  { %v1001_v17 = vmul.f32 %v1821_v23, %v1000_v7 }
 0x30d   :  { %v1020_v15 = vmul.f32 %v1823_v22, %v1019_v19 }
 0x30e   :  { %v1825_v6 = vpop.eup %1824  ;;  %v1002_v25 = vadd.f32 %v1821_v23, %v1001_v17 }
 0x30f   :  { %v1021_v10 = vadd.f32 %v1823_v22, %v1020_v15  ;;  %v1038_v4 = vmul.f32 %v1825_v6, %v1036_v27  ;;  %v1827_v11 = vpop.eup %1826  ;;  %vm1043_vm12 = vweird.f32 %v1825_v6  ;;  %v3314_v15 = vld [vmem:[#allocation26_spill] sm:$0xff] }
 0x310   :  { %v1006_v24 = vsel %vm1005_vm8, %v1821_v23, %v1002_v25  ;;  %v1046_v23 = vand.u32 2147483647, %v1036_v27  ;;  %vm1044_vm14 = vmor %vm1042_vm13, %vm1043_vm12  ;;  %v3313_v27 = vld [vmem:[#allocation25_spill] sm:$0xff]  ;;  %v3315_v25 = vld [vmem:[#allocation28_spill] sm:$0xff] }
 0x311   :  { %v1011_v3 = vsel %vm1008_vm10, %v1010_v20, %v1006_v24  ;;  %v1025_v7 = vsel %vm1024_vm9, %v1823_v22, %v1021_v10  ;;  %v1039_v2 = vsub.f32 1.0, %v1038_v4  ;;  %v3316_v20 = vld [vmem:[#allocation27_spill] sm:$0xff]  ;;  %v3317_v10 = vld [vmem:[#allocation29_spill] sm:$0xff]  ;;  %v3319_v24 = vld [vmem:[#allocation32_spill] sm:$0xff] }
 0x312   :  { %v1030_v19 = vsel %vm1027_vm11, %v1029_v21, %v1025_v7  ;;  %v1053_v1 = vmul.f32 %v1827_v11, %v1011_v3  ;;  %vm1047_vm15 = vcmp.eq.f32.partialorder %v1046_v23, 8.507059e+37  ;;  %v3311_v3 = vld [vmem:[#allocation24_spill] sm:$0xff]  ;;  %v3318_v21 = vld [vmem:[#allocation30_spill] sm:$0xff]  ;;  %v3320_v11 = vld [vmem:[#allocation31_spill] sm:$0xff] }
 0x313   :  { %v1052_v12 = vmul.f32 %v1030_v19, %v2823_v9  ;;  %v1040_v17 = vmul.f32 %v1825_v6, %v1039_v2  ;;  %v3307_v9 = vld [vmem:[#allocation20_spill] sm:$0xff]  ;;  %v3310_v2 = vld [vmem:[#allocation22_spill] sm:$0xff]  ;;  %v3321_v7 = vld [vmem:[#allocation33_spill] sm:$0xff] }
 0x314   :  { %v3322_v19 = vld [vmem:[#allocation34_spill] sm:$0xff] }
 0x315   :  { %v2907_v28 = vadd.f32 %v1053_v1, %v1052_v12  ;;  %v1041_v8 = vadd.f32 %v1825_v6, %v1040_v17  ;;  %v3308_v12 = vld [vmem:[#allocation19_spill] sm:$0xff]  ;;  %v3309_v1 = vld [vmem:[#allocation21_spill] sm:$0xff]  ;;  %v3323_v17 = vld [vmem:[#allocation36_spill] sm:$0xff] }
 0x316   :  { %v3326_v23 = vld [vmem:[#allocation38_spill] sm:$0xff] }
 0x317   :  { %1828 = vtanh.f32 %v2907_v28  ;;  %v1045_v5 = vsel %vm1044_vm14, %v1825_v6, %v1041_v8  ;;  %v3312_v6 = vld [vmem:[#allocation23_spill] sm:$0xff] }
 0x318   :  { %v1050_v4 = vsel %vm1047_vm15, %v1049_v14, %v1045_v5  ;;  %v3324_v8 = vld [vmem:[#allocation35_spill] sm:$0xff]  ;;  %v3328_v14 = vld [vmem:[#allocation40_spill] sm:$0xff] }
 0x319   :  { %v3327_v5 = vld [vmem:[#allocation39_spill] sm:$0xff] }
 0x31d   :  { %v1829_v18 = vpop.eup %1828 }
 0x31e   :  { %v1056_v22 = vmul.f32 %v1829_v18, %v1050_v4  ;;  %v3329_v18 = vld [vmem:[#allocation41_spill] sm:$0xff]  ;;  %v3330_v4 = vld [vmem:[#allocation42_spill] sm:$0xff] }
 0x320   :  { %1078 = vmatmul.f32.vlgmr.msrb.gmra.mxu0 %v1056_v22  ;;  %1098 = vmatmul.f32.vlgmr.msrb.gmra.mxu1 %v1056_v22 }
 0x321   :  { %1118 = vmatmul.f32.vlgmr.msrb.gmra.mxu2 %v1056_v22  ;;  %1138 = vmatmul.f32.vlgmr.msrb.gmra.mxu3 %v1056_v22  ;;  %v3331_v22 = vld [vmem:[#allocation43_spill] sm:$0xff] }
 0x322   :  { %1366 = vmatpush.msrb.mxu0 %v2638_v26  ;;  %1386 = vmatpush.msrb.mxu1 %v2641_v29 }
 0x323   :  { %1406 = vmatpush.msrb.mxu2 %v2644_v30  ;;  %1426 = vmatpush.msrb.mxu3 %v2647_v31 }
 0x324   :  { %1367 = vmatpush.msrb.mxu0 %v2650_v32  ;;  %1387 = vmatpush.msrb.mxu1 %v2653_v33 }
 0x325   :  { %1407 = vmatpush.msrb.mxu2 %v2656_v34  ;;  %1427 = vmatpush.msrb.mxu3 %v2659_v35 }
 0x326   :  { %1368 = vmatpush.msrb.mxu0 %v2662_v36  ;;  %1388 = vmatpush.msrb.mxu1 %v2665_v37 }
 0x327   :  { %1408 = vmatpush.msrb.mxu2 %v2668_v38  ;;  %1428 = vmatpush.msrb.mxu3 %v2671_v40 }
 0x328   :  { %1369 = vmatpush.msrb.mxu0 %v2674_v41  ;;  %1389 = vmatpush.msrb.mxu1 %v2677_v42 }
 0x329   :  { %1409 = vmatpush.msrb.mxu2 %v2680_v43  ;;  %1429 = vmatpush.msrb.mxu3 %v2683_v47 }
 0x32a   :  { %1370 = vmatpush.msrb.mxu0 %v2686_v0  ;;  %1390 = vmatpush.msrb.mxu1 %v2689_v46 }
 0x32b   :  { %1410 = vmatpush.msrb.mxu2 %v2692_v60  ;;  %1430 = vmatpush.msrb.mxu3 %v2695_v13 }
 0x32c   :  { %1371 = vmatpush.msrb.mxu0 %v2698_v61  ;;  %1391 = vmatpush.msrb.mxu1 %v2701_v39 }
 0x32d   :  { %1411 = vmatpush.msrb.mxu2 %v2704_v50  ;;  %1431 = vmatpush.msrb.mxu3 %v2707_v63 }
 0x32e   :  { %1372 = vmatpush.msrb.mxu0 %v2710_v49  ;;  %1392 = vmatpush.msrb.mxu1 %v2713_v44 }
 0x32f   :  { %1412 = vmatpush.msrb.mxu2 %v2716_v45  ;;  %1432 = vmatpush.msrb.mxu3 %v2719_v52 }
 0x330   :  { %1373 = vmatpush.msrb.mxu0 %v2722_v51  ;;  %1393 = vmatpush.msrb.mxu1 %v2725_v56 }
 0x331   :  { %1413 = vmatpush.msrb.mxu2 %v2728_v53  ;;  %1433 = vmatpush.msrb.mxu3 %v2731_v48 }
 0x332   :  { %1374 = vmatpush.msrb.mxu0 %v2734_v54  ;;  %1394 = vmatpush.msrb.mxu1 %v2737_v57 }
 0x333   :  { %1414 = vmatpush.msrb.mxu2 %v2740_v58  ;;  %1434 = vmatpush.msrb.mxu3 %v2743_v62 }
 0x334   :  { %1375 = vmatpush.msrb.mxu0 %v2746_v59  ;;  %1395 = vmatpush.msrb.mxu1 %v2749_v55 }
 0x335   :  { %1415 = vmatpush.msrb.mxu2 %v3307_v9  ;;  %1435 = vmatpush.msrb.mxu3 %v3308_v12 }
 0x336   :  { %1376 = vmatpush.msrb.mxu0 %v3309_v1  ;;  %1396 = vmatpush.msrb.mxu1 %v3310_v2 }
 0x337   :  { %1416 = vmatpush.msrb.mxu2 %v3311_v3  ;;  %1436 = vmatpush.msrb.mxu3 %v3312_v6 }
 0x338   :  { %1377 = vmatpush.msrb.mxu0 %v3313_v27  ;;  %1397 = vmatpush.msrb.mxu1 %v3314_v15 }
 0x339   :  { %1417 = vmatpush.msrb.mxu2 %v3315_v25  ;;  %1437 = vmatpush.msrb.mxu3 %v3316_v20 }
 0x33a   :  { %1378 = vmatpush.msrb.mxu0 %v3317_v10  ;;  %1398 = vmatpush.msrb.mxu1 %v3318_v21 }
 0x33b   :  { %1418 = vmatpush.msrb.mxu2 %v3319_v24  ;;  %1438 = vmatpush.msrb.mxu3 %v3320_v11  ;;  %v3333_v11 = vld [vmem:[#allocation57_spill] sm:$0xff]  ;;  %v3334_v24 = vld [vmem:[#allocation58_spill] sm:$0xff] }
 0x33c   :  { %1379 = vmatpush.msrb.mxu0 %v3321_v7  ;;  %1399 = vmatpush.msrb.mxu1 %v3322_v19  ;;  %v3332_v7 = vld [vmem:[#allocation44_spill] sm:$0xff] }
 0x33d   :  { %1419 = vmatpush.msrb.mxu2 %v3323_v17  ;;  %1439 = vmatpush.msrb.mxu3 %v3324_v8 }
 0x33e   :  { %1380 = vmatpush.msrb.mxu0 %v3325_v16  ;;  %1400 = vmatpush.msrb.mxu1 %v3326_v23 }
 0x33f   :  { %1420 = vmatpush.msrb.mxu2 %v3327_v5  ;;  %1440 = vmatpush.msrb.mxu3 %v3328_v14  ;;  %v3335_v14 = vld [vmem:[#allocation60_spill] sm:$0xff] }
 0x340   :  { %1381 = vmatpush.msrb.mxu0 %v3329_v18  ;;  %1401 = vmatpush.msrb.mxu1 %v3330_v4 }
 0x341   :  { %1421 = vmatpush.msrb.mxu2 %v3331_v22  ;;  %1441 = vmatpush.msrb.mxu3 %v3332_v7 }
 0x39d   :  { %v1079_v19 = vpop.f32.mrf.mxu0  ;;  %v1099_v17 = vpop.f32.mrf.mxu1 }
 0x39e   :  { %v1142_v8 = vadd.f32 %v1079_v19, %v3333_v11  ;;  %v1143_v16 = vadd.f32 %v1099_v17, %v3334_v24  ;;  %v3336_v24 = vld [vmem:[#allocation59_spill] sm:$0xff] }
 0x3a0   :  { %v1742_v21 = vmul.f32 -1.442695, %v1142_v8  ;;  %v1743_v23 = vmul.f32 -1.442695, %v1143_v16 }
 0x3a2   :  { %1830 = vpow2.f32 %v1742_v21 }
 0x3a3   :  { %1832 = vpow2.f32 %v1743_v23 }
 0x3a4   :  { %v1139_v5 = vpop.f32.mrf.mxu3  ;;  %v1119_v7 = vpop.f32.mrf.mxu2 }
 0x3a5   :  { %v1145_v10 = vadd.f32 %v1139_v5, %v3335_v14  ;;  %v1144_v17 = vadd.f32 %v1119_v7, %v3336_v24 }
 0x3a7   :  { %v1744_v18 = vmul.f32 -1.442695, %v1145_v10 }
 0x3a8   :  { %v1831_v20 = vpop.eup %1830 }
 0x3a9   :  { %v1833_v4 = vpop.eup %1832  ;;  %v1149_v25 = vadd.f32 1.0, %v1831_v20  ;;  %1834 = vpow2.f32 %v1744_v18 }
 0x3aa   :  { %v1168_v22 = vadd.f32 1.0, %v1833_v4 }
 0x3ab   :  { %1836 = vrcp.f32 %v1149_v25  ;;  %v1161_v10 = vand.u32 2147483648, %v1149_v25  ;;  %v1159_v18 = vand.u32 2147483647, %v1149_v25  ;;  %vm1155_vm2 = vweird.f32 %v1149_v25 }
 0x3ac   :  { %1838 = vrcp.f32 %v1168_v22  ;;  %v1180_v14 = vand.u32 2147483648, %v1168_v22  ;;  %v1178_v27 = vand.u32 2147483647, %v1168_v22  ;;  %vm1174_vm3 = vweird.f32 %v1168_v22 }
 0x3ad   :  { %v1162_v7 = vor.u32 1.1754944e-38, %v1161_v10  ;;  %vm1160_vm6 = vcmp.eq.f32.partialorder %v1159_v18, 8.507059e+37 }
 0x3ae   :  { %vm1179_vm7 = vcmp.eq.f32.partialorder %v1178_v27, 8.507059e+37 }
 0x3af   :  { %v1835_v15 = vpop.eup %1834 }
 0x3b0   :  { %v1188_v11 = vadd.f32 1.0, %v1835_v15 }
 0x3b1   :  { %v1837_v19 = vpop.eup %1836 }
 0x3b2   :  { %v1839_v8 = vpop.eup %1838  ;;  %v1151_v21 = vmul.f32 %v1837_v19, %v1149_v25  ;;  %1840 = vrcp.f32 %v1188_v11  ;;  %vm1156_vm0 = vweird.f32 %v1837_v19  ;;  %v1200_v10 = vand.u32 2147483648, %v1188_v11 }
 0x3b3   :  { %v1170_v16 = vmul.f32 %v1839_v8, %v1168_v22  ;;  %1842 = vtanh.f32 %v1144_v17  ;;  %vm1175_vm1 = vweird.f32 %v1839_v8  ;;  %vm1157_vm4 = vmor %vm1155_vm2, %vm1156_vm0  ;;  %vm1194_vm9 = vweird.f32 %v1188_v11 }
 0x3b4   :  { %v1152_v23 = vsub.f32 1.0, %v1151_v21  ;;  %vm1176_vm5 = vmor %vm1174_vm3, %vm1175_vm1  ;;  %v1181_v21 = vor.u32 1.1754944e-38, %v1180_v14  ;;  %v1201_v18 = vor.u32 1.1754944e-38, %v1200_v10 }
 0x3b5   :  { %v1171_v5 = vsub.f32 1.0, %v1170_v16 }
 0x3b6   :  { %v1153_v20 = vmul.f32 %v1837_v19, %v1152_v23 }
 0x3b7   :  { %v1172_v4 = vmul.f32 %v1839_v8, %v1171_v5 }
 0x3b8   :  { %v1841_v6 = vpop.eup %1840  ;;  %v1154_v15 = vadd.f32 %v1837_v19, %v1153_v20 }
 0x3b9   :  { %v1173_v24 = vadd.f32 %v1839_v8, %v1172_v4  ;;  %v1190_v3 = vmul.f32 %v1841_v6, %v1188_v11  ;;  %v1843_v17 = vpop.eup %1842  ;;  %vm1195_vm8 = vweird.f32 %v1841_v6 }
 0x3ba   :  { %v1158_v16 = vsel %vm1157_vm4, %v1837_v19, %v1154_v15  ;;  %v1198_v19 = vand.u32 2147483647, %v1188_v11  ;;  %vm1196_vm10 = vmor %vm1194_vm9, %vm1195_vm8  ;;  %v3366_v15 = vld [vmem:[#allocation63_spill] sm:$0xff] }
 0x3bb   :  { %v1163_v2 = vsel %vm1160_vm6, %v1162_v7, %v1158_v16  ;;  %v1177_v23 = vsel %vm1176_vm5, %v1839_v8, %v1173_v24  ;;  %v1191_v1 = vsub.f32 1.0, %v1190_v3 }
 0x3bc   :  { %v1182_v5 = vsel %vm1179_vm7, %v1181_v21, %v1177_v23  ;;  %v1205_v12 = vmul.f32 %v1843_v17, %v1163_v2  ;;  %vm1199_vm11 = vcmp.eq.f32.partialorder %v1198_v19, 8.507059e+37 }
 0x3bd   :  { %v1204_v9 = vmul.f32 %v1182_v5, %v2907_v28  ;;  %v1192_v20 = vmul.f32 %v1841_v6, %v1191_v1 }
 0x3bf   :  { %v2979_v25 = vadd.f32 %v1205_v12, %v1204_v9  ;;  %v1193_v22 = vadd.f32 %v1841_v6, %v1192_v20 }
 0x3c1   :  { %1844 = vtanh.f32 %v2979_v25  ;;  %v1197_v14 = vsel %vm1196_vm10, %v1841_v6, %v1193_v22 }
 0x3c2   :  { %v1202_v3 = vsel %vm1199_vm11, %v1201_v18, %v1197_v14 }
 0x3c7   :  { %v1845_v27 = vpop.eup %1844 }
 0x3c8   :  { %v1208_v8 = vmul.f32 %v1845_v27, %v1202_v3 }
 0x3ca   :  { %1230 = vmatmul.f32.vlgmr.msra.gmra.mxu0 %v1208_v8  ;;  %1250 = vmatmul.f32.vlgmr.msra.gmra.mxu1 %v1208_v8 }
 0x3cb   :  { %1270 = vmatmul.f32.vlgmr.msra.gmra.mxu2 %v1208_v8  ;;  %1290 = vmatmul.f32.vlgmr.msra.gmra.mxu3 %v1208_v8 }
 0x3cc   :  { %1518 = vmatpush.msra.mxu0 %v2638_v26  ;;  %1538 = vmatpush.msra.mxu1 %v2641_v29  ;;  %v3337_v26 = vld [vmem:[#allocation20_spill] sm:$0xff]  ;;  %v3338_v29 = vld [vmem:[#allocation19_spill] sm:$0xff] }
 0x3cd   :  { %1558 = vmatpush.msra.mxu2 %v2644_v30  ;;  %1578 = vmatpush.msra.mxu3 %v2647_v31  ;;  %v3339_v30 = vld [vmem:[#allocation21_spill] sm:$0xff]  ;;  %v3340_v31 = vld [vmem:[#allocation22_spill] sm:$0xff] }
 0x3ce   :  { %1519 = vmatpush.msra.mxu0 %v2650_v32  ;;  %1539 = vmatpush.msra.mxu1 %v2653_v33  ;;  %v3341_v32 = vld [vmem:[#allocation24_spill] sm:$0xff]  ;;  %v3342_v33 = vld [vmem:[#allocation23_spill] sm:$0xff] }
 0x3cf   :  { %1559 = vmatpush.msra.mxu2 %v2656_v34  ;;  %1579 = vmatpush.msra.mxu3 %v2659_v35  ;;  %v3343_v34 = vld [vmem:[#allocation25_spill] sm:$0xff]  ;;  %v3344_v35 = vld [vmem:[#allocation26_spill] sm:$0xff] }
 0x3d0   :  { %1520 = vmatpush.msra.mxu0 %v2662_v36  ;;  %1540 = vmatpush.msra.mxu1 %v2665_v37  ;;  %v3345_v36 = vld [vmem:[#allocation28_spill] sm:$0xff]  ;;  %v3346_v37 = vld [vmem:[#allocation27_spill] sm:$0xff] }
 0x3d1   :  { %1560 = vmatpush.msra.mxu2 %v2668_v38  ;;  %1580 = vmatpush.msra.mxu3 %v2671_v40  ;;  %v3347_v38 = vld [vmem:[#allocation29_spill] sm:$0xff]  ;;  %v3348_v40 = vld [vmem:[#allocation30_spill] sm:$0xff] }
 0x3d2   :  { %1521 = vmatpush.msra.mxu0 %v2674_v41  ;;  %1541 = vmatpush.msra.mxu1 %v2677_v42  ;;  %v3349_v41 = vld [vmem:[#allocation32_spill] sm:$0xff]  ;;  %v3350_v42 = vld [vmem:[#allocation31_spill] sm:$0xff] }
 0x3d3   :  { %1561 = vmatpush.msra.mxu2 %v2680_v43  ;;  %1581 = vmatpush.msra.mxu3 %v2683_v47  ;;  %v3351_v43 = vld [vmem:[#allocation33_spill] sm:$0xff]  ;;  %v3352_v47 = vld [vmem:[#allocation34_spill] sm:$0xff] }
 0x3d4   :  { %1522 = vmatpush.msra.mxu0 %v2686_v0  ;;  %1542 = vmatpush.msra.mxu1 %v2689_v46  ;;  %v3353_v0 = vld [vmem:[#allocation36_spill] sm:$0xff]  ;;  %v3354_v46 = vld [vmem:[#allocation35_spill] sm:$0xff] }
 0x3d5   :  { %1562 = vmatpush.msra.mxu2 %v2692_v60  ;;  %1582 = vmatpush.msra.mxu3 %v2695_v13  ;;  %v3355_v60 = vld [vmem:[#allocation37_spill] sm:$0xff]  ;;  %v3356_v13 = vld [vmem:[#allocation38_spill] sm:$0xff] }
 0x3d6   :  { %1523 = vmatpush.msra.mxu0 %v2698_v61  ;;  %1543 = vmatpush.msra.mxu1 %v2701_v39  ;;  %v3357_v61 = vld [vmem:[#allocation39_spill] sm:$0xff]  ;;  %v3358_v39 = vld [vmem:[#allocation40_spill] sm:$0xff] }
 0x3d7   :  { %1563 = vmatpush.msra.mxu2 %v2704_v50  ;;  %1583 = vmatpush.msra.mxu3 %v2707_v63  ;;  %v3359_v50 = vld [vmem:[#allocation41_spill] sm:$0xff]  ;;  %v3360_v63 = vld [vmem:[#allocation42_spill] sm:$0xff] }
 0x3d8   :  { %1524 = vmatpush.msra.mxu0 %v2710_v49  ;;  %1544 = vmatpush.msra.mxu1 %v2713_v44  ;;  %v3361_v49 = vld [vmem:[#allocation43_spill] sm:$0xff]  ;;  %v3362_v44 = vld [vmem:[#allocation44_spill] sm:$0xff] }
 0x3d9   :  { %1564 = vmatpush.msra.mxu2 %v2716_v45  ;;  %1584 = vmatpush.msra.mxu3 %v2719_v52 }
 0x3da   :  { %1525 = vmatpush.msra.mxu0 %v2722_v51  ;;  %1545 = vmatpush.msra.mxu1 %v2725_v56  ;;  %v3363_v51 = vld [vmem:[#allocation61_spill] sm:$0xff] }
 0x3db   :  { %1565 = vmatpush.msra.mxu2 %v2728_v53  ;;  %1585 = vmatpush.msra.mxu3 %v2731_v48  ;;  %v3364_v53 = vld [vmem:[#allocation62_spill] sm:$0xff] }
 0x3dc   :  { %1526 = vmatpush.msra.mxu0 %v2734_v54  ;;  %1546 = vmatpush.msra.mxu1 %v2737_v57 }
 0x3dd   :  { %1566 = vmatpush.msra.mxu2 %v2740_v58  ;;  %1586 = vmatpush.msra.mxu3 %v2743_v62  ;;  %v3365_v62 = vld [vmem:[#allocation64_spill] sm:$0xff] }
 0x3de   :  { %1527 = vmatpush.msra.mxu0 %v2746_v59  ;;  %1547 = vmatpush.msra.mxu1 %v2749_v55 }
 0x3df   :  { %1567 = vmatpush.msra.mxu2 %v3337_v26  ;;  %1587 = vmatpush.msra.mxu3 %v3338_v29 }
 0x3e0   :  { %1528 = vmatpush.msra.mxu0 %v3339_v30  ;;  %1548 = vmatpush.msra.mxu1 %v3340_v31 }
 0x3e1   :  { %1568 = vmatpush.msra.mxu2 %v3341_v32  ;;  %1588 = vmatpush.msra.mxu3 %v3342_v33 }
 0x3e2   :  { %1529 = vmatpush.msra.mxu0 %v3343_v34  ;;  %1549 = vmatpush.msra.mxu1 %v3344_v35 }
 0x3e3   :  { %1569 = vmatpush.msra.mxu2 %v3345_v36  ;;  %1589 = vmatpush.msra.mxu3 %v3346_v37 }
 0x3e4   :  { %1530 = vmatpush.msra.mxu0 %v3347_v38  ;;  %1550 = vmatpush.msra.mxu1 %v3348_v40 }
 0x3e5   :  { %1570 = vmatpush.msra.mxu2 %v3349_v41  ;;  %1590 = vmatpush.msra.mxu3 %v3350_v42 }
 0x3e6   :  { %1531 = vmatpush.msra.mxu0 %v3351_v43  ;;  %1551 = vmatpush.msra.mxu1 %v3352_v47 }
 0x3e7   :  { %1571 = vmatpush.msra.mxu2 %v3353_v0  ;;  %1591 = vmatpush.msra.mxu3 %v3354_v46 }
 0x3e8   :  { %1532 = vmatpush.msra.mxu0 %v3355_v60  ;;  %1552 = vmatpush.msra.mxu1 %v3356_v13 }
 0x3e9   :  { %1572 = vmatpush.msra.mxu2 %v3357_v61  ;;  %1592 = vmatpush.msra.mxu3 %v3358_v39  ;;  %v3367_v39 = vld [vmem:[#allocation65_spill] sm:$0xff] }
 0x3ea   :  { %1533 = vmatpush.msra.mxu0 %v3359_v50  ;;  %1553 = vmatpush.msra.mxu1 %v3360_v63  ;;  %v3368_v63 = vld [vmem:[#allocation66_spill] sm:$0xff] }
 0x3eb   :  { %1573 = vmatpush.msra.mxu2 %v3361_v49  ;;  %1593 = vmatpush.msra.mxu3 %v3362_v44 }
 0x447   :  { %v1231_v45 = vpop.f32.mrf.mxu0  ;;  %v1251_v52 = vpop.f32.mrf.mxu1 }
 0x448   :  { %v1294_v56 = vadd.f32 %v1231_v45, %v3363_v51  ;;  %v1295_v48 = vadd.f32 %v1251_v52, %v3364_v53  ;;  %v3369_v51 = vld [vmem:[#allocation68_spill] sm:$0xff] }
 0x44a   :  { %v1745_v54 = vmul.f32 -1.442695, %v1294_v56  ;;  %v1746_v57 = vmul.f32 -1.442695, %v1295_v48 }
 0x44c   :  { %1846 = vpow2.f32 %v1745_v54 }
 0x44d   :  { %1848 = vpow2.f32 %v1746_v57 }
 0x44e   :  { %v1291_v58 = vpop.f32.mrf.mxu3  ;;  %v1271_v2 = vpop.f32.mrf.mxu2 }
 0x44f   :  { %v1297_v59 = vadd.f32 %v1291_v58, %v3365_v62  ;;  %v1296_v7 = vadd.f32 %v1271_v2, %v3366_v15 }
 0x451   :  { %v1747_v55 = vmul.f32 -1.442695, %v1297_v59 }
 0x452   :  { %v1847_v28 = vpop.eup %1846 }
 0x453   :  { %v1849_v9 = vpop.eup %1848  ;;  %v1301_v12 = vadd.f32 1.0, %v1847_v28  ;;  %1850 = vpow2.f32 %v1747_v55 }
 0x454   :  { %v1320_v1 = vadd.f32 1.0, %v1849_v9  ;;  %v3370_v9 = vld [vmem:[#allocation67_spill] sm:$0xff] }
 0x455   :  { %1852 = vrcp.f32 %v1301_v12  ;;  %v1313_v5 = vand.u32 2147483648, %v1301_v12  ;;  %v1311_v10 = vand.u32 2147483647, %v1301_v12  ;;  %vm1307_vm14 = vweird.f32 %v1301_v12 }
 0x456   :  { %1854 = vrcp.f32 %v1320_v1  ;;  %v1332_v20 = vand.u32 2147483648, %v1320_v1  ;;  %v1330_v14 = vand.u32 2147483647, %v1320_v1  ;;  %vm1326_vm15 = vweird.f32 %v1320_v1 }
 0x457   :  { %v1314_v3 = vor.u32 1.1754944e-38, %v1313_v5  ;;  %vm1312_vm2 = vcmp.eq.f32.partialorder %v1311_v10, 8.507059e+37 }
 0x458   :  { %v1333_v29 = vor.u32 1.1754944e-38, %v1332_v20  ;;  %vm1331_vm3 = vcmp.eq.f32.partialorder %v1330_v14, 8.507059e+37 }
 0x459   :  { %v1851_v6 = vpop.eup %1850 }
 0x45a   :  { %v1340_v11 = vadd.f32 1.0, %v1851_v6 }
 0x45b   :  { %v1853_v4 = vpop.eup %1852 }
 0x45c   :  { %v1855_v24 = vpop.eup %1854  ;;  %v1303_v21 = vmul.f32 %v1853_v4, %v1301_v12  ;;  %1856 = vrcp.f32 %v1340_v11  ;;  %vm1308_vm12 = vweird.f32 %v1853_v4  ;;  %v1352_v42 = vand.u32 2147483648, %v1340_v11 }
 0x45d   :  { %v1322_v16 = vmul.f32 %v1855_v24, %v1320_v1  ;;  %1858 = vtanh.f32 %v1296_v7  ;;  %vm1327_vm13 = vweird.f32 %v1855_v24  ;;  %vm1309_vm0 = vmor %vm1307_vm14, %vm1308_vm12  ;;  %vm1346_vm5 = vweird.f32 %v1340_v11 }
 0x45e   :  { %v1304_v17 = vsub.f32 1.0, %v1303_v21  ;;  %vm1328_vm1 = vmor %vm1326_vm15, %vm1327_vm13  ;;  %v1350_v43 = vand.u32 2147483647, %v1340_v11  ;;  %v1353_v0 = vor.u32 1.1754944e-38, %v1352_v42 }
 0x45f   :  { %v1323_v23 = vsub.f32 1.0, %v1322_v16 }
 0x460   :  { %v1305_v22 = vmul.f32 %v1853_v4, %v1304_v17  ;;  %vm1351_vm7 = vcmp.eq.f32.partialorder %v1350_v43, 8.507059e+37  ;;  %v1684_v43 = vld [vmem:[#allocation13 + $0x70] sm:$0xff] }
 0x461   :  { %v1324_v19 = vmul.f32 %v1855_v24, %v1323_v23 }
 0x462   :  { %v1857_v18 = vpop.eup %1856  ;;  %v1306_v27 = vadd.f32 %v1853_v4, %v1305_v22 }
 0x463   :  { %v1325_v8 = vadd.f32 %v1855_v24, %v1324_v19  ;;  %v1342_v26 = vmul.f32 %v1857_v18, %v1340_v11  ;;  %v1859_v31 = vpop.eup %1858  ;;  %vm1347_vm4 = vweird.f32 %v1857_v18 }
 0x464   :  { %v1310_v30 = vsel %vm1309_vm0, %v1853_v4, %v1306_v27  ;;  %vm1348_vm6 = vmor %vm1346_vm5, %vm1347_vm4 }
 0x465   :  { %v1315_v32 = vsel %vm1312_vm2, %v1314_v3, %v1310_v30  ;;  %v1329_v33 = vsel %vm1328_vm1, %v1855_v24, %v1325_v8  ;;  %v1343_v34 = vsub.f32 1.0, %v1342_v26 }
 0x466   :  { %v1334_v35 = vsel %vm1331_vm3, %v1333_v29, %v1329_v33  ;;  %v1357_v36 = vmul.f32 %v1859_v31, %v1315_v32 }
 0x467   :  { %v1356_v37 = vmul.f32 %v1334_v35, %v2979_v25  ;;  %v1344_v38 = vmul.f32 %v1857_v18, %v1343_v34 }
 0x469   :  { %v3051_v40 = vadd.f32 %v1357_v36, %v1356_v37  ;;  %v1345_v41 = vadd.f32 %v1857_v18, %v1344_v38 }
 0x46b   :  { %1860 = vtanh.f32 %v3051_v40  ;;  %v1349_v47 = vsel %vm1348_vm6, %v1857_v18, %v1345_v41 }
 0x46c   :  { %v1354_v60 = vsel %vm1351_vm7, %v1353_v0, %v1349_v47  ;;  %v1683_v47 = vld [vmem:[#allocation13 + $0x68] sm:$0xff]  ;;  %v1682_v0 = vld [vmem:[#allocation13 + $0x60] sm:$0xff] }
 0x471   :  { %v1861_v46 = vpop.eup %1860 }
 0x472   :  { %v1360_v13 = vmul.f32 %v1861_v46, %v1354_v60  ;;  %v1681_v46 = vld [vmem:[#allocation13 + $0x58] sm:$0xff]  ;;  %v1680_v60 = vld [vmem:[#allocation13 + $0x50] sm:$0xff] }
 0x474   :  { %1382 = vmatmul.f32.vlgmr.msrb.gmra.mxu0 %v1360_v13  ;;  %1402 = vmatmul.f32.vlgmr.msrb.gmra.mxu1 %v1360_v13 }
 0x475   :  { %1422 = vmatmul.f32.vlgmr.msrb.gmra.mxu2 %v1360_v13  ;;  %1442 = vmatmul.f32.vlgmr.msrb.gmra.mxu3 %v1360_v13  ;;  %v1679_v13 = vld [vmem:[#allocation13 + $0x48] sm:$0xff] }
 0x4f1   :  { %v1383_v25 = vpop.f32.mrf.mxu0  ;;  %v1403_v61 = vpop.f32.mrf.mxu1 }
 0x4f2   :  { %v1446_v50 = vadd.f32 %v1383_v25, %v3367_v39  ;;  %v1447_v49 = vadd.f32 %v1403_v61, %v3368_v63  ;;  %v1678_v25 = vld [vmem:[#allocation13 + $0x40] sm:$0xff]  ;;  %v1677_v61 = vld [vmem:[#allocation13 + $0x38] sm:$0xff]  ;;  %v1676_v39 = vld [vmem:[#allocation13 + $0x30] sm:$0xff] }
 0x4f4   :  { %v1748_v44 = vmul.f32 -1.442695, %v1446_v50  ;;  %v1749_v45 = vmul.f32 -1.442695, %v1447_v49  ;;  %v3371_v49 = vld [vmem:[#allocation69_spill] sm:$0xff] }
 0x4f6   :  { %1862 = vpow2.f32 %v1748_v44 }
 0x4f7   :  { %1864 = vpow2.f32 %v1749_v45  ;;  %v3372_v45 = vld [vmem:[#allocation70_spill] sm:$0xff] }
 0x4f8   :  { %v1443_v52 = vpop.f32.mrf.mxu3  ;;  %v1423_v62 = vpop.f32.mrf.mxu2 }
 0x4f9   :  { %v1449_v56 = vadd.f32 %v1443_v52, %v3369_v51  ;;  %v1448_v12 = vadd.f32 %v1423_v62, %v3370_v9  ;;  %v1675_v51 = vld [vmem:[#allocation13 + $0x28] sm:$0xff] }
 0x4fa   :  { %v1671_v62 = vld [vmem:[#allocation13 + $0x8] sm:$0xff] }
 0x4fb   :  { %v1750_v53 = vmul.f32 -1.442695, %v1449_v56 }
 0x4fc   :  { %v1863_v48 = vpop.eup %1862 }
 0x4fd   :  { %v1865_v54 = vpop.eup %1864  ;;  %v1453_v57 = vadd.f32 1.0, %v1863_v48  ;;  %1866 = vpow2.f32 %v1750_v53  ;;  %v1674_v48 = vld [vmem:[#allocation13 + $0x20] sm:$0xff] }
 0x4fe   :  { %v1472_v58 = vadd.f32 1.0, %v1865_v54  ;;  %v1673_v54 = vld [vmem:[#allocation13 + $0x18] sm:$0xff] }
 0x4ff   :  { %1868 = vrcp.f32 %v1453_v57  ;;  %v1465_v15 = vand.u32 2147483648, %v1453_v57  ;;  %v1463_v21 = vand.u32 2147483647, %v1453_v57  ;;  %vm1459_vm10 = vweird.f32 %v1453_v57 }
 0x500   :  { %1870 = vrcp.f32 %v1472_v58  ;;  %v1484_v7 = vand.u32 2147483648, %v1472_v58  ;;  %v1482_v17 = vand.u32 2147483647, %v1472_v58  ;;  %vm1478_vm11 = vweird.f32 %v1472_v58 }
 0x501   :  { %v1466_v20 = vor.u32 1.1754944e-38, %v1465_v15  ;;  %vm1464_vm14 = vcmp.eq.f32.partialorder %v1463_v21, 8.507059e+37 }
 0x502   :  { %v1485_v19 = vor.u32 1.1754944e-38, %v1484_v7  ;;  %vm1483_vm15 = vcmp.eq.f32.partialorder %v1482_v17, 8.507059e+37 }
 0x503   :  { %v1867_v59 = vpop.eup %1866 }
 0x504   :  { %v1492_v55 = vadd.f32 1.0, %v1867_v59  ;;  %v3373_v59 = vld [vmem:[#allocation72_spill] sm:$0xff] }
 0x505   :  { %v1869_v28 = vpop.eup %1868 }
 0x506   :  { %v1871_v1 = vpop.eup %1870  ;;  %v1455_v2 = vmul.f32 %v1869_v28, %v1453_v57  ;;  %1872 = vrcp.f32 %v1492_v55  ;;  %vm1460_vm8 = vweird.f32 %v1869_v28  ;;  %v1504_v34 = vand.u32 2147483648, %v1492_v55  ;;  %v1672_v57 = vld [vmem:[#allocation13 + $0x10] sm:$0xff] }
 0x507   :  { %v1474_v6 = vmul.f32 %v1871_v1, %v1472_v58  ;;  %1874 = vtanh.f32 %v1448_v12  ;;  %vm1479_vm9 = vweird.f32 %v1871_v1  ;;  %vm1461_vm12 = vmor %vm1459_vm10, %vm1460_vm8  ;;  %vm1498_vm1 = vweird.f32 %v1492_v55 }
 0x508   :  { %v1456_v11 = vsub.f32 1.0, %v1455_v2  ;;  %vm1480_vm13 = vmor %vm1478_vm11, %vm1479_vm9  ;;  %v1502_v35 = vand.u32 2147483647, %v1492_v55  ;;  %v1505_v37 = vor.u32 1.1754944e-38, %v1504_v34 }
 0x509   :  { %v1475_v4 = vsub.f32 1.0, %v1474_v6 }
 0x50a   :  { %v1457_v24 = vmul.f32 %v1869_v28, %v1456_v11  ;;  %vm1503_vm3 = vcmp.eq.f32.partialorder %v1502_v35, 8.507059e+37 }
 0x50b   :  { %v1476_v16 = vmul.f32 %v1871_v1, %v1475_v4 }
 0x50c   :  { %v1873_v23 = vpop.eup %1872  ;;  %v1458_v5 = vadd.f32 %v1869_v28, %v1457_v24  ;;  %v3374_v24 = vld [vmem:[#allocation71_spill] sm:$0xff] }
 0x50d   :  { %v1477_v22 = vadd.f32 %v1871_v1, %v1476_v16  ;;  %v1494_v10 = vmul.f32 %v1873_v23, %v1492_v55  ;;  %v1875_v18 = vpop.eup %1874  ;;  %vm1499_vm0 = vweird.f32 %v1873_v23 }
 0x50e   :  { %v1462_v14 = vsel %vm1461_vm12, %v1869_v28, %v1458_v5  ;;  %vm1500_vm2 = vmor %vm1498_vm1, %vm1499_vm0  ;;  %v1670_v28 = vld [vmem:[#allocation13] sm:$0xff] }
 0x50f   :  { %v1467_v27 = vsel %vm1464_vm14, %v1466_v20, %v1462_v14  ;;  %v1481_v3 = vsel %vm1480_vm13, %v1871_v1, %v1477_v22  ;;  %v1495_v8 = vsub.f32 1.0, %v1494_v10 }
 0x510   :  { %v1486_v26 = vsel %vm1483_vm15, %v1485_v19, %v1481_v3  ;;  %v1509_v29 = vmul.f32 %v1875_v18, %v1467_v27 }
 0x511   :  { %v1508_v30 = vmul.f32 %v1486_v26, %v3051_v40  ;;  %v1496_v31 = vmul.f32 %v1873_v23, %v1495_v8  ;;  %v1685_v40 = vld [vmem:[#allocation13 + $0x78] sm:$0xff] }
 0x512   :  { %1690 = vmatpush.msrb.mxu0 %v1685_v40 }
 0x513   :  { %v3059_v32 = vadd.f32 %v1509_v29, %v1508_v30  ;;  %v1497_v33 = vadd.f32 %v1873_v23, %v1496_v31 }
 0x514   :  { %1691 = vmatpush.msrb.mxu0 %v1684_v43 }
 0x515   :  { %1876 = vtanh.f32 %v3059_v32  ;;  %v1501_v36 = vsel %vm1500_vm2, %v1873_v23, %v1497_v33 }
 0x516   :  { %v1506_v41 = vsel %vm1503_vm3, %v1505_v37, %v1501_v36  ;;  %1692 = vmatpush.msrb.mxu0 %v1683_v47 }
 0x518   :  { %1693 = vmatpush.msrb.mxu0 %v1682_v0 }
 0x51a   :  { %1694 = vmatpush.msrb.mxu0 %v1681_v46 }
 0x51b   :  { %v1877_v38 = vpop.eup %1876 }
 0x51c   :  { %v1512_v42 = vmul.f32 %v1877_v38, %v1506_v41  ;;  %1695 = vmatpush.msrb.mxu0 %v1680_v60 }
 0x51e   :  { %1534 = vmatmul.f32.vlgmr.msra.gmra.mxu0 %v1512_v42  ;;  %1554 = vmatmul.f32.vlgmr.msra.gmra.mxu1 %v1512_v42 }
 0x51f   :  { %1574 = vmatmul.f32.vlgmr.msra.gmra.mxu2 %v1512_v42  ;;  %1594 = vmatmul.f32.vlgmr.msra.gmra.mxu3 %v1512_v42 }
 0x520   :  { %1696 = vmatpush.msrb.mxu0 %v1679_v13 }
 0x522   :  { %1697 = vmatpush.msrb.mxu0 %v1678_v25 }
 0x524   :  { %1698 = vmatpush.msrb.mxu0 %v1677_v61 }
 0x526   :  { %1699 = vmatpush.msrb.mxu0 %v1676_v39 }
 0x528   :  { %1700 = vmatpush.msrb.mxu0 %v1675_v51 }
 0x52a   :  { %1701 = vmatpush.msrb.mxu0 %v1674_v48 }
 0x52c   :  { %1702 = vmatpush.msrb.mxu0 %v1673_v54 }
 0x52e   :  { %1703 = vmatpush.msrb.mxu0 %v1672_v57 }
 0x530   :  { %1704 = vmatpush.msrb.mxu0 %v1671_v62 }
 0x532   :  { %1705 = vmatpush.msrb.mxu0 %v1670_v28 }
 0x59b   :  { %v1535_v50 = vpop.f32.mrf.mxu0  ;;  %v1555_v63 = vpop.f32.mrf.mxu1 }
 0x59c   :  { %v1598_v44 = vadd.f32 %v1535_v50, %v3371_v49  ;;  %v1599_v52 = vadd.f32 %v1555_v63, %v3372_v45 }
 0x59e   :  { %v1751_v56 = vmul.f32 -1.442695, %v1598_v44  ;;  %v1752_v53 = vmul.f32 -1.442695, %v1599_v52 }
 0x5a0   :  { %1878 = vpow2.f32 %v1751_v56 }
 0x5a1   :  { %1880 = vpow2.f32 %v1752_v53 }
 0x5a2   :  { %v1595_v58 = vpop.f32.mrf.mxu3  ;;  %v1575_v11 = vpop.f32.mrf.mxu2 }
 0x5a3   :  { %v1601_v55 = vadd.f32 %v1595_v58, %v3373_v59  ;;  %v1600_v21 = vadd.f32 %v1575_v11, %v3374_v24 }
 0x5a5   :  { %v1753_v9 = vmul.f32 -1.442695, %v1601_v55 }
 0x5a6   :  { %v1879_v12 = vpop.eup %1878 }
 0x5a7   :  { %v1881_v1 = vpop.eup %1880  ;;  %v1605_v2 = vadd.f32 1.0, %v1879_v12  ;;  %1882 = vpow2.f32 %v1753_v9 }
 0x5a8   :  { %v1624_v6 = vadd.f32 1.0, %v1881_v1 }
 0x5a9   :  { %1884 = vrcp.f32 %v1605_v2  ;;  %v1617_v22 = vand.u32 2147483648, %v1605_v2  ;;  %v1615_v14 = vand.u32 2147483647, %v1605_v2  ;;  %vm1611_vm6 = vweird.f32 %v1605_v2 }
 0x5aa   :  { %1886 = vrcp.f32 %v1624_v6  ;;  %v1636_v10 = vand.u32 2147483648, %v1624_v6  ;;  %v1634_v27 = vand.u32 2147483647, %v1624_v6  ;;  %vm1630_vm7 = vweird.f32 %v1624_v6 }
 0x5ab   :  { %v1618_v26 = vor.u32 1.1754944e-38, %v1617_v22  ;;  %vm1616_vm10 = vcmp.eq.f32.partialorder %v1615_v14, 8.507059e+37 }
 0x5ac   :  { %v1637_v31 = vor.u32 1.1754944e-38, %v1636_v10  ;;  %vm1635_vm11 = vcmp.eq.f32.partialorder %v1634_v27, 8.507059e+37 }
 0x5ad   :  { %v1883_v4 = vpop.eup %1882 }
 0x5ae   :  { %v1644_v15 = vadd.f32 1.0, %v1883_v4 }
 0x5af   :  { %v1885_v7 = vpop.eup %1884 }
 0x5b0   :  { %v1887_v16 = vpop.eup %1886  ;;  %v1607_v17 = vmul.f32 %v1885_v7, %v1605_v2  ;;  %1888 = vrcp.f32 %v1644_v15  ;;  %vm1612_vm4 = vweird.f32 %v1885_v7  ;;  %v1656_v0 = vand.u32 2147483648, %v1644_v15 }
 0x5b1   :  { %v1626_v23 = vmul.f32 %v1887_v16, %v1624_v6  ;;  %1890 = vtanh.f32 %v1600_v21  ;;  %vm1631_vm5 = vweird.f32 %v1887_v16  ;;  %vm1613_vm8 = vmor %vm1611_vm6, %vm1612_vm4  ;;  %vm1650_vm13 = vweird.f32 %v1644_v15 }
 0x5b2   :  { %v1608_v5 = vsub.f32 1.0, %v1607_v17  ;;  %vm1632_vm9 = vmor %vm1630_vm7, %vm1631_vm5  ;;  %v1654_v46 = vand.u32 2147483647, %v1644_v15  ;;  %v1657_v13 = vor.u32 1.1754944e-38, %v1656_v0 }
 0x5b3   :  { %v1627_v20 = vsub.f32 1.0, %v1626_v23 }
 0x5b4   :  { %v1609_v19 = vmul.f32 %v1885_v7, %v1608_v5  ;;  %vm1655_vm15 = vcmp.eq.f32.partialorder %v1654_v46, 8.507059e+37 }
 0x5b5   :  { %v1628_v18 = vmul.f32 %v1887_v16, %v1627_v20 }
 0x5b6   :  { %v1889_v3 = vpop.eup %1888  ;;  %v1610_v8 = vadd.f32 %v1885_v7, %v1609_v19 }
 0x5b7   :  { %v1629_v29 = vadd.f32 %v1887_v16, %v1628_v18  ;;  %v1646_v30 = vmul.f32 %v1889_v3, %v1644_v15  ;;  %v1891_v34 = vpop.eup %1890  ;;  %vm1651_vm12 = vweird.f32 %v1889_v3 }
 0x5b8   :  { %v1614_v33 = vsel %vm1613_vm8, %v1885_v7, %v1610_v8  ;;  %vm1652_vm14 = vmor %vm1650_vm13, %vm1651_vm12 }
 0x5b9   :  { %v1619_v35 = vsel %vm1616_vm10, %v1618_v26, %v1614_v33  ;;  %v1633_v36 = vsel %vm1632_vm9, %v1887_v16, %v1629_v29  ;;  %v1647_v37 = vsub.f32 1.0, %v1646_v30 }
 0x5ba   :  { %v1638_v38 = vsel %vm1635_vm11, %v1637_v31, %v1633_v36  ;;  %v1661_v41 = vmul.f32 %v1891_v34, %v1619_v35 }
 0x5bb   :  { %v1660_v42 = vmul.f32 %v1638_v38, %v3059_v32  ;;  %v1648_v40 = vmul.f32 %v1889_v3, %v1647_v37  ;;  %v1765_v32 = vld [vmem:[%s3078_s5] ss:$0 sm:$0xff] }
 0x5bd   :  { %v1662_v43 = vadd.f32 %v1661_v41, %v1660_v42  ;;  %v1649_v47 = vadd.f32 %v1889_v3, %v1648_v40 }
 0x5bf   :  { %1892 = vtanh.f32 %v1662_v43  ;;  %v1653_v60 = vsel %vm1652_vm14, %v1889_v3, %v1649_v47 }
 0x5c0   :  { %v1658_v61 = vsel %vm1655_vm15, %v1657_v13, %v1653_v60 }
 0x5c5   :  { %v1893_v25 = vpop.eup %1892 }
 0x5c6   :  { %v1664_v39 = vmul.f32 %v1893_v25, %v1658_v61 }
 0x5c8   :  { %1706 = vmatmul.f32.vlgmr.msrb.gmra.mxu0 %v1664_v39 }
 0x645   :  { %v1707_v50 = vpop.f32.mrf.mxu0 }
 0x646   :  { %v1708_v63 = vadd.f32 %v1765_v32, %v1707_v50 }
 0x648   :  { %1710 = vst [vmem:[#allocation14] sm:$0xff] %v1708_v63 }
 0x649   :  { %1721 = dma.vmem_to_hbm [thread:$0]  %s1717_s24, 128, %s1719_s27, [#allocation7]  }
 0x64a   :  { %2108 = dma.done.wait [#allocation7], 128  }
 0x64b   :  { %2109 = vsyncadd [#allocation7], 4294967168 }
 0x64c   :  { %1726 = vsyncpa [#allocation6], 1 }
 0x64d   :  { %1727 = vsyncpa [#allocation9], 1 }
 0x64e   :  { %1728 = vsyncpa [#allocation12], 1 }
 0x64f   :  { %1729 = vsyncpa [#allocation7], 1 }

</bundles_post_ra>
